<compile_context>
chip_gen: v6e
topology: v6e:2x2x1
jax: 0.10.0
libtpu: 0.0.40
codegen_flags: <defaults>
</compile_context>

<pallas_src>
from functools import partial

import jax
import jax.numpy as jnp
from jax import lax
from jax.experimental import pallas as pl
from jax.experimental.pallas import tpu as pltpu


def _fullspec(shape):
    nd = len(shape)
    return pl.BlockSpec(shape, lambda *_: (0,) * nd)


# ----------------------------------------------------------------------------
# Kernel A: Conv3d (patch matmul) -> trans_ch -> trans_sp, fully fused.
#   p_ref  : (C*k^3, S*Lp) f32  patchified input, seq blocks stacked on lanes
#   output : (S*C, Lp)     f32  trans_sp output, seq blocks stacked on rows
# ----------------------------------------------------------------------------
def _conv_trans_kernel(
        p_ref, wc_ref, bc_ref,
        # trans_ch params (transposed (E, tokens) layout, E = C)
        wqkv_c_ref, bqkv_c_ref, indT_c_ref, ind_c_ref, wo_c_ref, bo_c_ref,
        ln1w_c_ref, ln1b_c_ref, w1_c_ref, b1_c_ref, w2_c_ref, b2_c_ref,
        ln2w_c_ref, ln2b_c_ref,
        # trans_sp params (standard (tokens, E) layout, E padded 378 -> 384)
        wqkv_s_ref, bqkv_s_ref, ind_s_ref, indT_s_ref, wo_s_ref, bo_s_ref,
        ln1w_s_ref, ln1b_s_ref, w1_s_ref, b1_s_ref, w2_s_ref, b2_s_ref,
        ln2w_s_ref, ln2b_s_ref,
        o_ref,
        *, S, C, L, Lp, eps):

    f32 = jnp.float32
    bf = jnp.bfloat16

    def bdot(a, b):  # bf16 MXU operands, f32 accumulation
        return jnp.dot(a.astype(bf), b.astype(bf), preferred_element_type=f32)

    # ---------------- Conv3d: one stacked (C, C*k^3) @ (C*k^3, S*Lp) ---------
    x = bdot(wc_ref[...], p_ref[...]) + bc_ref[...]              # (C, S*Lp) f32

    # ---------------- trans_ch (post-norm), transposed layout ----------------
    # Tokens are lane columns; attention mixes the S seq blocks column-wise.
    qkv = bdot(wqkv_c_ref[...], x) + bqkv_c_ref[...]             # (3C, S*Lp)
    qs = [qkv[0 * C:1 * C, s * Lp:(s + 1) * Lp] for s in range(S)]  # pre-scaled
    ks = [qkv[1 * C:2 * C, s * Lp:(s + 1) * Lp] for s in range(S)]
    vs = [qkv[2 * C:3 * C, s * Lp:(s + 1) * Lp] for s in range(S)]

    indT_c = indT_c_ref[...]                                     # (nhead, C)
    ind_c = ind_c_ref[...]                                       # (C, nhead)
    attn_blk = []
    for s in range(S):
        sc = [bdot(indT_c, qs[s] * ks[t]) for t in range(S)]     # (nhead, Lp)
        m = sc[0]
        for t in range(1, S):
            m = jnp.maximum(m, sc[t])
        ex = [jnp.exp(c - m) for c in sc]
        den = ex[0]
        for t in range(1, S):
            den = den + ex[t]
        inv = pl.reciprocal(den, approx=True)
        acc = bdot(ind_c, ex[0] * inv) * vs[0]
        for t in range(1, S):
            acc = acc + bdot(ind_c, ex[t] * inv) * vs[t]
        attn_blk.append(acc)                                     # (C, Lp)
    attn = jnp.concatenate(attn_blk, axis=1)                     # (C, S*Lp)

    h = x + bdot(wo_c_ref[...], attn) + bo_c_ref[...]
    mu = jnp.mean(h, axis=0, keepdims=True)
    var = jnp.mean((h - mu) * (h - mu), axis=0, keepdims=True)
    h = (h - mu) * lax.rsqrt(var + eps) * ln1w_c_ref[...] + ln1b_c_ref[...]

    f = jnp.maximum(bdot(w1_c_ref[...], h) + b1_c_ref[...], 0.0)
    h2 = h + bdot(w2_c_ref[...], f) + b2_c_ref[...]
    mu2 = jnp.mean(h2, axis=0, keepdims=True)
    var2 = jnp.mean((h2 - mu2) * (h2 - mu2), axis=0, keepdims=True)
    y = (h2 - mu2) * lax.rsqrt(var2 + eps) * ln2w_c_ref[...] + ln2b_c_ref[...]
    # y (C, S*Lp): already in the (tokens=C, embed=Lp) layout trans_sp wants.

    # ---------------- trans_sp (post-norm), standard layout ------------------
    mask = (lax.broadcasted_iota(jnp.int32, (1, Lp), 1) < L).astype(f32)
    Y = jnp.concatenate([y[:, s * Lp:(s + 1) * Lp] for s in range(S)],
                        axis=0) * mask                           # (S*C, Lp)

    qkv2 = bdot(Y, wqkv_s_ref[...]) + bqkv_s_ref[...]            # (S*C, 3*Lp)
    q2 = [qkv2[s * C:(s + 1) * C, 0 * Lp:1 * Lp] for s in range(S)]  # pre-scaled
    k2 = [qkv2[s * C:(s + 1) * C, 1 * Lp:2 * Lp] for s in range(S)]
    v2 = [qkv2[s * C:(s + 1) * C, 2 * Lp:3 * Lp] for s in range(S)]

    ind_s = ind_s_ref[...]                                       # (Lp, nhead)
    indT_s = indT_s_ref[...]                                     # (nhead, Lp)
    attn_blk2 = []
    for s in range(S):
        sc = [bdot(q2[s] * k2[t], ind_s) for t in range(S)]      # (C, nhead)
        m = sc[0]
        for t in range(1, S):
            m = jnp.maximum(m, sc[t])
        ex = [jnp.exp(c - m) for c in sc]
        den = ex[0]
        for t in range(1, S):
            den = den + ex[t]
        inv = pl.reciprocal(den, approx=True)
        acc = bdot(ex[0] * inv, indT_s) * v2[0]
        for t in range(1, S):
            acc = acc + bdot(ex[t] * inv, indT_s) * v2[t]
        attn_blk2.append(acc)                                    # (C, Lp)
    A = jnp.concatenate(attn_blk2, axis=0)                       # (S*C, Lp)

    inv_L = 1.0 / L

    def ln_lanes(hh, w, b):  # LayerNorm over the (padded) lane axis, true len L
        mu_ = jnp.sum(hh, axis=-1, keepdims=True) * inv_L
        d = (hh - mu_) * mask
        var_ = jnp.sum(d * d, axis=-1, keepdims=True) * inv_L
        return d * lax.rsqrt(var_ + eps) * w + b   # pad lanes -> 0 (w,b pad = 0)

    g = Y + bdot(A, wo_s_ref[...]) + bo_s_ref[...]
    g = ln_lanes(g, ln1w_s_ref[...], ln1b_s_ref[...])
    f2 = jnp.maximum(bdot(g, w1_s_ref[...]) + b1_s_ref[...], 0.0)
    g2 = g + bdot(f2, w2_s_ref[...]) + b2_s_ref[...]
    o_ref[...] = ln_lanes(g2, ln2w_s_ref[...], ln2b_s_ref[...])  # (S*C, Lp)


# ----------------------------------------------------------------------------
# Kernel B: ConvTranspose3d (patch matmul) + sigmoid gate, in patch layout.
#   xr_ref : (1, C, Lp)      reinterpreted trans_sp output for this batch n
#   p_ref  : (C*k^3, Lp)     identity patch columns for this batch n
#   output : (1, C*k^3, Lp)  identity + identity * sigmoid(re_conv(x))
# ----------------------------------------------------------------------------
def _reconv_gate_kernel(xr_ref, p_ref, wrc_ref, brc_ref, o_ref):
    rec = jnp.dot(wrc_ref[...], xr_ref[0].astype(jnp.bfloat16),
                  preferred_element_type=jnp.float32) + brc_ref[...]
    idn = p_ref[...]                                 # exact f32 identity
    sig = pl.reciprocal(1.0 + jnp.exp(-rec), approx=True)   # EUP exp + recip
    o_ref[0] = idn + idn * sig


# ----------------------------------------------------------------------------
# Parameter preparation: PyTorch-shaped params -> kernel-ready packed arrays
# ----------------------------------------------------------------------------
def _head_indicator(E, nhead):
    dh = E // nhead
    return (jnp.arange(E)[:, None] // dh
            == jnp.arange(nhead)[None, :]).astype(jnp.float32)   # (E, nhead)


def prepare_params(p, C, nhead_ch=8, nhead_sp=9):
    f32, bf = jnp.float32, jnp.bfloat16
    ds = p['conv_w'].shape[-1]
    K3 = ds ** 3

    # Conv3d, transposed orientation: y^T = Wc (C_out, C_in*k^3) @ patches^T
    wc = p['conv_w'].reshape(C, C * K3).astype(bf)
    bc = p['conv_b'].reshape(C, 1).astype(f32)

    # ConvTranspose3d, transposed orientation: rec = Wrc (C_out*k^3, C_in) @ x^T
    wrc = p['reconv_w'].reshape(C, C * K3).T.astype(bf)
    brc = jnp.repeat(p['reconv_b'], K3).reshape(C * K3, 1).astype(f32)

    # trans_ch (E = C), transposed (E, tokens) layout: y^T = W_pt @ x^T + b_col
    tc = p['tch']
    E = C
    scale = (E // nhead_ch) ** -0.5
    sc_vec = jnp.concatenate([jnp.full((E,), scale, f32), jnp.ones((2 * E,), f32)])
    wqkv_c = (tc['in_w'] * sc_vec[:, None]).astype(bf)               # (3E, E)
    bqkv_c = (tc['in_b'] * sc_vec).reshape(3 * E, 1).astype(f32)
    ind_c = _head_indicator(E, nhead_ch)                             # (E, nhead)
    tch_args = [
        wqkv_c, bqkv_c, ind_c.T.astype(bf), ind_c.astype(bf),
        tc['out_w'].astype(bf), tc['out_b'].reshape(E, 1).astype(f32),
        tc['ln1w'].reshape(E, 1).astype(f32), tc['ln1b'].reshape(E, 1).astype(f32),
        tc['lin1_w'].astype(bf), tc['lin1_b'].reshape(-1, 1).astype(f32),
        tc['lin2_w'].astype(bf), tc['lin2_b'].reshape(E, 1).astype(f32),
        tc['ln2w'].reshape(E, 1).astype(f32), tc['ln2b'].reshape(E, 1).astype(f32),
    ]

    # trans_sp (E = 378), standard (tokens, E) layout, lane axis padded to 384.
    # Zero-padding of contraction rows / output cols / biases / LN affine keeps
    # the pad lanes exactly zero throughout the layer.
    ts = p['tsp']
    Es = ts['ln1w'].shape[0]
    Lp = ((Es + 127) // 128) * 128
    pad = Lp - Es
    scs = (Es // nhead_sp) ** -0.5

    pad_mat = lambda w: jnp.pad(w, ((0, pad), (0, pad)))
    pad_row = lambda b: jnp.pad(b, (0, pad))

    wq = ts['in_w'][0:Es].T * scs
    wk = ts['in_w'][Es:2 * Es].T
    wv = ts['in_w'][2 * Es:3 * Es].T
    wqkv_s = jnp.concatenate([pad_mat(wq), pad_mat(wk), pad_mat(wv)],
                             axis=1).astype(bf)                      # (Lp, 3*Lp)
    bq = ts['in_b'][0:Es] * scs
    bk = ts['in_b'][Es:2 * Es]
    bv = ts['in_b'][2 * Es:3 * Es]
    bqkv_s = jnp.concatenate([pad_row(bq), pad_row(bk), pad_row(bv)]
                             ).reshape(1, 3 * Lp).astype(f32)
    ind_s = _head_indicator(Es, nhead_sp)                            # (Es, nhead)
    tsp_args = [
        wqkv_s, bqkv_s,
        jnp.pad(ind_s, ((0, pad), (0, 0))).astype(bf),               # (Lp, nhead)
        jnp.pad(ind_s.T, ((0, 0), (0, pad))).astype(bf),             # (nhead, Lp)
        pad_mat(ts['out_w'].T).astype(bf), pad_row(ts['out_b']).reshape(1, Lp).astype(f32),
        pad_row(ts['ln1w']).reshape(1, Lp).astype(f32), pad_row(ts['ln1b']).reshape(1, Lp).astype(f32),
        jnp.pad(ts['lin1_w'].T, ((0, pad), (0, 0))).astype(bf), ts['lin1_b'].reshape(1, -1).astype(f32),
        jnp.pad(ts['lin2_w'].T, ((0, 0), (0, pad))).astype(bf), pad_row(ts['lin2_b']).reshape(1, Lp).astype(f32),
        pad_row(ts['ln2w']).reshape(1, Lp).astype(f32), pad_row(ts['ln2b']).reshape(1, Lp).astype(f32),
    ]

    return dict(wc=wc, bc=bc, wrc=wrc, brc=brc, tch=tch_args, tsp=tsp_args)


# ----------------------------------------------------------------------------
# Full Trans_Att forward
# ----------------------------------------------------------------------------
def trans_att_forward(x, prep, down_scale):
    N, C, H, W, D = x.shape
    ds = down_scale
    Ho, Wo, Do = H // ds, W // ds, D // ds
    K3 = ds ** 3
    L = Ho * Wo * Do                       # 378 = trans_sp d_model
    Lp = prep['tsp'][0].shape[0]           # lane-padded length (384)
    S = N                                  # transformer seq length (batch_first=False)
    assert Lp % 128 == 0 and L <= Lp

    # Patchify once (shared by both kernels): rows (c, kh, kw, kd),
    # cols s*Lp + (ho, wo, do); pad lanes are zero.
    pf = x.astype(jnp.float32).reshape(N, C, Ho, ds, Wo, ds, Do, ds)
    pf = pf.transpose(1, 3, 5, 7, 0, 2, 4, 6).reshape(C * K3, N, L)
    p_all = jnp.pad(pf, ((0, 0), (0, 0), (0, Lp - L))).reshape(C * K3, N * Lp)

    # Kernel A: conv -> trans_ch -> trans_sp (single fused pallas_call).
    a_args = [p_all, prep['wc'], prep['bc']] + list(prep['tch']) + list(prep['tsp'])
    kern_a = partial(_conv_trans_kernel, S=S, C=C, L=L, Lp=Lp, eps=1e-5)
    t_sp = pl.pallas_call(
        kern_a,
        out_shape=jax.ShapeDtypeStruct((S * C, Lp), jnp.float32),
        grid=(1,),
        in_specs=[_fullspec(a.shape) for a in a_args],
        out_specs=_fullspec((S * C, Lp)),
        compiler_params=pltpu.CompilerParams(dimension_semantics=("arbitrary",)),
    )(*a_args)

    # PyTorch: trans_sp.permute(0,2,1).reshape(N, C, H', W', D') is a raw
    # reinterpret of the (L, C) data as (C, L); one small (~48 KB) XLA copy.
    t_sp = t_sp.reshape(S, C, Lp)[:, :, :L]                       # (N, C, L)
    xr = jnp.transpose(t_sp, (0, 2, 1)).reshape(N, C, L)
    xr = jnp.pad(xr, ((0, 0), (0, 0), (0, Lp - L)))               # (N, C, Lp)

    # Kernel B: re_conv + sigmoid gate in patch layout, parallel over batch.
    out_p = pl.pallas_call(
        _reconv_gate_kernel,
        out_shape=jax.ShapeDtypeStruct((N, C * K3, Lp), jnp.float32),
        grid=(N,),
        in_specs=[pl.BlockSpec((1, C, Lp), lambda n: (n, 0, 0)),
                  pl.BlockSpec((C * K3, Lp), lambda n: (0, n)),
                  pl.BlockSpec((C * K3, C), lambda n: (0, 0)),
                  pl.BlockSpec((C * K3, 1), lambda n: (0, 0))],
        out_specs=pl.BlockSpec((1, C * K3, Lp), lambda n: (n, 0, 0)),
        compiler_params=pltpu.CompilerParams(dimension_semantics=("parallel",)),
    )(xr, p_all, prep['wrc'], prep['brc'])

    # Un-patchify gated output back to (N, C, H, W, D).
    out = out_p[:, :, :L].reshape(N, C, ds, ds, ds, Ho, Wo, Do)
    out = out.transpose(0, 1, 5, 2, 6, 3, 7, 4).reshape(N, C, H, W, D)
    return out


# ----------------------------------------------------------------------------
# Deterministic synthetic parameters (PyTorch shapes, per the module __init__)
# ----------------------------------------------------------------------------
def init_params(key, C, ds, E_sp=378):
    counter = [0]

    def rnd(shape, scale=0.05):
        counter[0] += 1
        return scale * jax.random.normal(jax.random.fold_in(key, counter[0]),
                                         shape, dtype=jnp.float32)

    def tlayer(E, F):
        return dict(
            in_w=rnd((3 * E, E)), in_b=rnd((3 * E,)),
            out_w=rnd((E, E)), out_b=rnd((E,)),
            ln1w=jnp.ones((E,), jnp.float32), ln1b=jnp.zeros((E,), jnp.float32),
            lin1_w=rnd((F, E)), lin1_b=rnd((F,)),
            lin2_w=rnd((E, F)), lin2_b=rnd((E,)),
            ln2w=jnp.ones((E,), jnp.float32), ln2b=jnp.zeros((E,), jnp.float32),
        )

    return dict(
        conv_w=rnd((C, C, ds, ds, ds)), conv_b=rnd((C,)),
        reconv_w=rnd((C, C, ds, ds, ds)), reconv_b=rnd((C,)),
        tch=tlayer(C, C // 2),            # TransformerEncoderLayer(C, 8, C//2)
        tsp=tlayer(E_sp, E_sp // 2),      # TransformerEncoderLayer(378, 9, 189)
    )


if __name__ == "__main__":
    # in_channels=16 (divisible by nhead=8), down_scale=2.
    # Post-conv spatial dims (6, 7, 9) -> 6*7*9 = 378 = trans_sp d_model.
    C, ds = 16, 2
    N, H, W, D = 2, 12, 14, 18

    key = jax.random.PRNGKey(0)
    kx, kp = jax.random.split(key)
    x = jax.random.normal(kx, (N, C, H, W, D), dtype=jnp.float32)
    params = init_params(kp, C, ds)
    prep = prepare_params(params, C)

    fwd = jax.jit(partial(trans_att_forward, down_scale=ds))
    out = fwd(x, prep)
    jax.block_until_ready(out)

    assert out.shape == x.shape, (out.shape, x.shape)
    assert bool(jnp.all(jnp.isfinite(out)))
    print("KERNEL_OK")
</pallas_src>

<mosaic_0001>
module attributes {stable_mosaic.version = 11 : i64} {
  func.func @_conv_trans_kernel(%arg0: i32, %arg1: memref<128x768xf32, #tpu.memory_space<vmem>>, %arg2: memref<16x128xbf16, #tpu.memory_space<vmem>>, %arg3: memref<16x1xf32, #tpu.memory_space<vmem>>, %arg4: memref<48x16xbf16, #tpu.memory_space<vmem>>, %arg5: memref<48x1xf32, #tpu.memory_space<vmem>>, %arg6: memref<8x16xbf16, #tpu.memory_space<vmem>>, %arg7: memref<16x8xbf16, #tpu.memory_space<vmem>>, %arg8: memref<16x16xbf16, #tpu.memory_space<vmem>>, %arg9: memref<16x1xf32, #tpu.memory_space<vmem>>, %arg10: memref<16x1xf32, #tpu.memory_space<vmem>>, %arg11: memref<16x1xf32, #tpu.memory_space<vmem>>, %arg12: memref<8x16xbf16, #tpu.memory_space<vmem>>, %arg13: memref<8x1xf32, #tpu.memory_space<vmem>>, %arg14: memref<16x8xbf16, #tpu.memory_space<vmem>>, %arg15: memref<16x1xf32, #tpu.memory_space<vmem>>, %arg16: memref<16x1xf32, #tpu.memory_space<vmem>>, %arg17: memref<16x1xf32, #tpu.memory_space<vmem>>, %arg18: memref<384x1152xbf16, #tpu.memory_space<vmem>>, %arg19: memref<1x1152xf32, #tpu.memory_space<vmem>>, %arg20: memref<384x9xbf16, #tpu.memory_space<vmem>>, %arg21: memref<9x384xbf16, #tpu.memory_space<vmem>>, %arg22: memref<384x384xbf16, #tpu.memory_space<vmem>>, %arg23: memref<1x384xf32, #tpu.memory_space<vmem>>, %arg24: memref<1x384xf32, #tpu.memory_space<vmem>>, %arg25: memref<1x384xf32, #tpu.memory_space<vmem>>, %arg26: memref<384x189xbf16, #tpu.memory_space<vmem>>, %arg27: memref<1x189xf32, #tpu.memory_space<vmem>>, %arg28: memref<189x384xbf16, #tpu.memory_space<vmem>>, %arg29: memref<1x384xf32, #tpu.memory_space<vmem>>, %arg30: memref<1x384xf32, #tpu.memory_space<vmem>>, %arg31: memref<1x384xf32, #tpu.memory_space<vmem>>, %arg32: memref<32x384xf32, #tpu.memory_space<vmem>>) attributes {dimension_semantics = [#tpu.dimension_semantics<arbitrary>], iteration_bounds = array<i64: 1>, scalar_prefetch = 0 : i64, scratch_operands = 0 : i64, tpu.core_type = #tpu.core_type<tc>, window_params = [{pipeline_mode = #tpu.pipeline_mode<synchronous>, transform_indices = @transform_0, window_bounds = array<i64: 128, 768>}, {pipeline_mode = #tpu.pipeline_mode<synchronous>, transform_indices = @transform_1, window_bounds = array<i64: 16, 128>}, {pipeline_mode = #tpu.pipeline_mode<synchronous>, transform_indices = @transform_2, window_bounds = array<i64: 16, 1>}, {pipeline_mode = #tpu.pipeline_mode<synchronous>, transform_indices = @transform_3, window_bounds = array<i64: 48, 16>}, {pipeline_mode = #tpu.pipeline_mode<synchronous>, transform_indices = @transform_4, window_bounds = array<i64: 48, 1>}, {pipeline_mode = #tpu.pipeline_mode<synchronous>, transform_indices = @transform_5, window_bounds = array<i64: 8, 16>}, {pipeline_mode = #tpu.pipeline_mode<synchronous>, transform_indices = @transform_6, window_bounds = array<i64: 16, 8>}, {pipeline_mode = #tpu.pipeline_mode<synchronous>, transform_indices = @transform_7, window_bounds = array<i64: 16, 16>}, {pipeline_mode = #tpu.pipeline_mode<synchronous>, transform_indices = @transform_8, window_bounds = array<i64: 16, 1>}, {pipeline_mode = #tpu.pipeline_mode<synchronous>, transform_indices = @transform_9, window_bounds = array<i64: 16, 1>}, {pipeline_mode = #tpu.pipeline_mode<synchronous>, transform_indices = @transform_10, window_bounds = array<i64: 16, 1>}, {pipeline_mode = #tpu.pipeline_mode<synchronous>, transform_indices = @transform_11, window_bounds = array<i64: 8, 16>}, {pipeline_mode = #tpu.pipeline_mode<synchronous>, transform_indices = @transform_12, window_bounds = array<i64: 8, 1>}, {pipeline_mode = #tpu.pipeline_mode<synchronous>, transform_indices = @transform_13, window_bounds = array<i64: 16, 8>}, {pipeline_mode = #tpu.pipeline_mode<synchronous>, transform_indices = @transform_14, window_bounds = array<i64: 16, 1>}, {pipeline_mode = #tpu.pipeline_mode<synchronous>, transform_indices = @transform_15, window_bounds = array<i64: 16, 1>}, {pipeline_mode = #tpu.pipeline_mode<synchronous>, transform_indices = @transform_16, window_bounds = array<i64: 16, 1>}, {pipeline_mode = #tpu.pipeline_mode<synchronous>, transform_indices = @transform_17, window_bounds = array<i64: 384, 1152>}, {pipeline_mode = #tpu.pipeline_mode<synchronous>, transform_indices = @transform_18, window_bounds = array<i64: 1, 1152>}, {pipeline_mode = #tpu.pipeline_mode<synchronous>, transform_indices = @transform_19, window_bounds = array<i64: 384, 9>}, {pipeline_mode = #tpu.pipeline_mode<synchronous>, transform_indices = @transform_20, window_bounds = array<i64: 9, 384>}, {pipeline_mode = #tpu.pipeline_mode<synchronous>, transform_indices = @transform_21, window_bounds = array<i64: 384, 384>}, {pipeline_mode = #tpu.pipeline_mode<synchronous>, transform_indices = @transform_22, window_bounds = array<i64: 1, 384>}, {pipeline_mode = #tpu.pipeline_mode<synchronous>, transform_indices = @transform_23, window_bounds = array<i64: 1, 384>}, {pipeline_mode = #tpu.pipeline_mode<synchronous>, transform_indices = @transform_24, window_bounds = array<i64: 1, 384>}, {pipeline_mode = #tpu.pipeline_mode<synchronous>, transform_indices = @transform_25, window_bounds = array<i64: 384, 189>}, {pipeline_mode = #tpu.pipeline_mode<synchronous>, transform_indices = @transform_26, window_bounds = array<i64: 1, 189>}, {pipeline_mode = #tpu.pipeline_mode<synchronous>, transform_indices = @transform_27, window_bounds = array<i64: 189, 384>}, {pipeline_mode = #tpu.pipeline_mode<synchronous>, transform_indices = @transform_28, window_bounds = array<i64: 1, 384>}, {pipeline_mode = #tpu.pipeline_mode<synchronous>, transform_indices = @transform_29, window_bounds = array<i64: 1, 384>}, {pipeline_mode = #tpu.pipeline_mode<synchronous>, transform_indices = @transform_30, window_bounds = array<i64: 1, 384>}, {pipeline_mode = #tpu.pipeline_mode<synchronous>, transform_indices = @transform_31, window_bounds = array<i64: 32, 384>}]} {
    %c0 = arith.constant 0 : index
    %c0_0 = arith.constant 0 : index
    %0 = vector.load %arg2[%c0, %c0_0] : memref<16x128xbf16, #tpu.memory_space<vmem>>, vector<16x128xbf16>
    %c0_1 = arith.constant 0 : index
    %c0_2 = arith.constant 0 : index
    %1 = vector.load %arg1[%c0_1, %c0_2] : memref<128x768xf32, #tpu.memory_space<vmem>>, vector<128x768xf32>
    %2 = arith.truncf %1 : vector<128x768xf32> to vector<128x768xbf16>
    %cst = arith.constant dense<0.000000e+00> : vector<16x768xf32>
    %3 = tpu.matmul %0, %2, %cst {dimension_numbers = #tpu.dot_dimension_numbers<[1], [0], [0], [1], [0, 0, 1, 1], [], []>} : vector<16x128xbf16>, vector<128x768xbf16>, vector<16x768xf32> -> vector<16x768xf32>
    %c0_3 = arith.constant 0 : index
    %c0_4 = arith.constant 0 : index
    %4 = vector.load %arg3[%c0_3, %c0_4] : memref<16x1xf32, #tpu.memory_space<vmem>>, vector<16x1xf32>
    %5 = vector.broadcast %4 : vector<16x1xf32> to vector<16x768xf32>
    %6 = arith.addf %3, %5 : vector<16x768xf32>
    %c0_5 = arith.constant 0 : index
    %c0_6 = arith.constant 0 : index
    %7 = vector.load %arg4[%c0_5, %c0_6] : memref<48x16xbf16, #tpu.memory_space<vmem>>, vector<48x16xbf16>
    %8 = arith.truncf %6 : vector<16x768xf32> to vector<16x768xbf16>
    %cst_7 = arith.constant dense<0.000000e+00> : vector<48x768xf32>
    %9 = tpu.matmul %7, %8, %cst_7 {dimension_numbers = #tpu.dot_dimension_numbers<[1], [0], [0], [1], [0, 0, 1, 1], [], []>} : vector<48x16xbf16>, vector<16x768xbf16>, vector<48x768xf32> -> vector<48x768xf32>
    %c0_8 = arith.constant 0 : index
    %c0_9 = arith.constant 0 : index
    %10 = vector.load %arg5[%c0_8, %c0_9] : memref<48x1xf32, #tpu.memory_space<vmem>>, vector<48x1xf32>
    %11 = vector.broadcast %10 : vector<48x1xf32> to vector<48x768xf32>
    %12 = arith.addf %9, %11 : vector<48x768xf32>
    %13 = vector.extract_strided_slice %12 {offsets = [0, 0], sizes = [16, 384], strides = [1, 1]} : vector<48x768xf32> to vector<16x384xf32>
    %14 = vector.extract_strided_slice %12 {offsets = [0, 384], sizes = [16, 384], strides = [1, 1]} : vector<48x768xf32> to vector<16x384xf32>
    %15 = vector.extract_strided_slice %12 {offsets = [16, 0], sizes = [16, 384], strides = [1, 1]} : vector<48x768xf32> to vector<16x384xf32>
    %16 = vector.extract_strided_slice %12 {offsets = [16, 384], sizes = [16, 384], strides = [1, 1]} : vector<48x768xf32> to vector<16x384xf32>
    %17 = vector.extract_strided_slice %12 {offsets = [32, 0], sizes = [16, 384], strides = [1, 1]} : vector<48x768xf32> to vector<16x384xf32>
    %18 = vector.extract_strided_slice %12 {offsets = [32, 384], sizes = [16, 384], strides = [1, 1]} : vector<48x768xf32> to vector<16x384xf32>
    %c0_10 = arith.constant 0 : index
    %c0_11 = arith.constant 0 : index
    %19 = vector.load %arg6[%c0_10, %c0_11] : memref<8x16xbf16, #tpu.memory_space<vmem>>, vector<8x16xbf16>
    %c0_12 = arith.constant 0 : index
    %c0_13 = arith.constant 0 : index
    %20 = vector.load %arg7[%c0_12, %c0_13] : memref<16x8xbf16, #tpu.memory_space<vmem>>, vector<16x8xbf16>
    %21 = arith.mulf %13, %15 : vector<16x384xf32>
    %22 = arith.truncf %21 : vector<16x384xf32> to vector<16x384xbf16>
    %cst_14 = arith.constant dense<0.000000e+00> : vector<8x384xf32>
    %23 = tpu.matmul %19, %22, %cst_14 {dimension_numbers = #tpu.dot_dimension_numbers<[1], [0], [0], [1], [0, 0, 1, 1], [], []>} : vector<8x16xbf16>, vector<16x384xbf16>, vector<8x384xf32> -> vector<8x384xf32>
    %24 = arith.mulf %13, %16 : vector<16x384xf32>
    %25 = arith.truncf %24 : vector<16x384xf32> to vector<16x384xbf16>
    %cst_15 = arith.constant dense<0.000000e+00> : vector<8x384xf32>
    %26 = tpu.matmul %19, %25, %cst_15 {dimension_numbers = #tpu.dot_dimension_numbers<[1], [0], [0], [1], [0, 0, 1, 1], [], []>} : vector<8x16xbf16>, vector<16x384xbf16>, vector<8x384xf32> -> vector<8x384xf32>
    %27 = arith.maximumf %23, %26 : vector<8x384xf32>
    %28 = arith.subf %23, %27 : vector<8x384xf32>
    %29 = math.exp %28 : vector<8x384xf32>
    %30 = arith.subf %26, %27 : vector<8x384xf32>
    %31 = math.exp %30 : vector<8x384xf32>
    %32 = arith.addf %29, %31 : vector<8x384xf32>
    %33 = tpu.reciprocal %32 {approx = true} : vector<8x384xf32> -> vector<8x384xf32>
    %34 = arith.mulf %29, %33 : vector<8x384xf32>
    %35 = arith.truncf %34 : vector<8x384xf32> to vector<8x384xbf16>
    %cst_16 = arith.constant dense<0.000000e+00> : vector<16x384xf32>
    %36 = tpu.matmul %20, %35, %cst_16 {dimension_numbers = #tpu.dot_dimension_numbers<[1], [0], [0], [1], [0, 0, 1, 1], [], []>} : vector<16x8xbf16>, vector<8x384xbf16>, vector<16x384xf32> -> vector<16x384xf32>
    %37 = arith.mulf %36, %17 : vector<16x384xf32>
    %38 = arith.mulf %31, %33 : vector<8x384xf32>
    %39 = arith.truncf %38 : vector<8x384xf32> to vector<8x384xbf16>
    %cst_17 = arith.constant dense<0.000000e+00> : vector<16x384xf32>
    %40 = tpu.matmul %20, %39, %cst_17 {dimension_numbers = #tpu.dot_dimension_numbers<[1], [0], [0], [1], [0, 0, 1, 1], [], []>} : vector<16x8xbf16>, vector<8x384xbf16>, vector<16x384xf32> -> vector<16x384xf32>
    %41 = arith.mulf %40, %18 : vector<16x384xf32>
    %42 = arith.addf %37, %41 : vector<16x384xf32>
    %43 = arith.mulf %14, %15 : vector<16x384xf32>
    %44 = arith.truncf %43 : vector<16x384xf32> to vector<16x384xbf16>
    %cst_18 = arith.constant dense<0.000000e+00> : vector<8x384xf32>
    %45 = tpu.matmul %19, %44, %cst_18 {dimension_numbers = #tpu.dot_dimension_numbers<[1], [0], [0], [1], [0, 0, 1, 1], [], []>} : vector<8x16xbf16>, vector<16x384xbf16>, vector<8x384xf32> -> vector<8x384xf32>
    %46 = arith.mulf %14, %16 : vector<16x384xf32>
    %47 = arith.truncf %46 : vector<16x384xf32> to vector<16x384xbf16>
    %cst_19 = arith.constant dense<0.000000e+00> : vector<8x384xf32>
    %48 = tpu.matmul %19, %47, %cst_19 {dimension_numbers = #tpu.dot_dimension_numbers<[1], [0], [0], [1], [0, 0, 1, 1], [], []>} : vector<8x16xbf16>, vector<16x384xbf16>, vector<8x384xf32> -> vector<8x384xf32>
    %49 = arith.maximumf %45, %48 : vector<8x384xf32>
    %50 = arith.subf %45, %49 : vector<8x384xf32>
    %51 = math.exp %50 : vector<8x384xf32>
    %52 = arith.subf %48, %49 : vector<8x384xf32>
    %53 = math.exp %52 : vector<8x384xf32>
    %54 = arith.addf %51, %53 : vector<8x384xf32>
    %55 = tpu.reciprocal %54 {approx = true} : vector<8x384xf32> -> vector<8x384xf32>
    %56 = arith.mulf %51, %55 : vector<8x384xf32>
    %57 = arith.truncf %56 : vector<8x384xf32> to vector<8x384xbf16>
    %cst_20 = arith.constant dense<0.000000e+00> : vector<16x384xf32>
    %58 = tpu.matmul %20, %57, %cst_20 {dimension_numbers = #tpu.dot_dimension_numbers<[1], [0], [0], [1], [0, 0, 1, 1], [], []>} : vector<16x8xbf16>, vector<8x384xbf16>, vector<16x384xf32> -> vector<16x384xf32>
    %59 = arith.mulf %58, %17 : vector<16x384xf32>
    %60 = arith.mulf %53, %55 : vector<8x384xf32>
    %61 = arith.truncf %60 : vector<8x384xf32> to vector<8x384xbf16>
    %cst_21 = arith.constant dense<0.000000e+00> : vector<16x384xf32>
    %62 = tpu.matmul %20, %61, %cst_21 {dimension_numbers = #tpu.dot_dimension_numbers<[1], [0], [0], [1], [0, 0, 1, 1], [], []>} : vector<16x8xbf16>, vector<8x384xbf16>, vector<16x384xf32> -> vector<16x384xf32>
    %63 = arith.mulf %62, %18 : vector<16x384xf32>
    %64 = arith.addf %59, %63 : vector<16x384xf32>
    %65 = tpu.concatenate %42, %64 in 1 : vector<16x384xf32>, vector<16x384xf32> -> vector<16x768xf32>
    %c0_22 = arith.constant 0 : index
    %c0_23 = arith.constant 0 : index
    %66 = vector.load %arg8[%c0_22, %c0_23] : memref<16x16xbf16, #tpu.memory_space<vmem>>, vector<16x16xbf16>
    %67 = arith.truncf %65 : vector<16x768xf32> to vector<16x768xbf16>
    %cst_24 = arith.constant dense<0.000000e+00> : vector<16x768xf32>
    %68 = tpu.matmul %66, %67, %cst_24 {dimension_numbers = #tpu.dot_dimension_numbers<[1], [0], [0], [1], [0, 0, 1, 1], [], []>} : vector<16x16xbf16>, vector<16x768xbf16>, vector<16x768xf32> -> vector<16x768xf32>
    %69 = arith.addf %6, %68 : vector<16x768xf32>
    %c0_25 = arith.constant 0 : index
    %c0_26 = arith.constant 0 : index
    %70 = vector.load %arg9[%c0_25, %c0_26] : memref<16x1xf32, #tpu.memory_space<vmem>>, vector<16x1xf32>
    %71 = vector.broadcast %70 : vector<16x1xf32> to vector<16x768xf32>
    %72 = arith.addf %69, %71 : vector<16x768xf32>
    %cst_27 = arith.constant dense<0.000000e+00> : vector<768xf32>
    %73 = vector.multi_reduction <add>, %72, %cst_27 [0] : vector<16x768xf32> to vector<768xf32>
    %74 = vector.shape_cast %73 : vector<768xf32> to vector<1x768xf32>
    %cst_28 = arith.constant 1.600000e+01 : f32
    %75 = vector.broadcast %cst_28 : f32 to vector<1x768xf32>
    %76 = arith.divf %74, %75 : vector<1x768xf32>
    %77 = vector.broadcast %76 : vector<1x768xf32> to vector<16x768xf32>
    %78 = arith.subf %72, %77 : vector<16x768xf32>
    %79 = vector.broadcast %76 : vector<1x768xf32> to vector<16x768xf32>
    %80 = arith.subf %72, %79 : vector<16x768xf32>
    %81 = arith.mulf %78, %80 : vector<16x768xf32>
    %cst_29 = arith.constant dense<0.000000e+00> : vector<768xf32>
    %82 = vector.multi_reduction <add>, %81, %cst_29 [0] : vector<16x768xf32> to vector<768xf32>
    %83 = vector.shape_cast %82 : vector<768xf32> to vector<1x768xf32>
    %cst_30 = arith.constant 1.600000e+01 : f32
    %84 = vector.broadcast %cst_30 : f32 to vector<1x768xf32>
    %85 = arith.divf %83, %84 : vector<1x768xf32>
    %86 = vector.broadcast %76 : vector<1x768xf32> to vector<16x768xf32>
    %87 = arith.subf %72, %86 : vector<16x768xf32>
    %cst_31 = arith.constant 9.99999974E-6 : f32
    %88 = vector.broadcast %cst_31 : f32 to vector<1x768xf32>
    %89 = arith.addf %85, %88 : vector<1x768xf32>
    %90 = math.rsqrt %89 : vector<1x768xf32>
    %91 = vector.broadcast %90 : vector<1x768xf32> to vector<16x768xf32>
    %92 = arith.mulf %87, %91 : vector<16x768xf32>
    %c0_32 = arith.constant 0 : index
    %c0_33 = arith.constant 0 : index
    %93 = vector.load %arg10[%c0_32, %c0_33] : memref<16x1xf32, #tpu.memory_space<vmem>>, vector<16x1xf32>
    %94 = vector.broadcast %93 : vector<16x1xf32> to vector<16x768xf32>
    %95 = arith.mulf %92, %94 : vector<16x768xf32>
    %c0_34 = arith.constant 0 : index
    %c0_35 = arith.constant 0 : index
    %96 = vector.load %arg11[%c0_34, %c0_35] : memref<16x1xf32, #tpu.memory_space<vmem>>, vector<16x1xf32>
    %97 = vector.broadcast %96 : vector<16x1xf32> to vector<16x768xf32>
    %98 = arith.addf %95, %97 : vector<16x768xf32>
    %c0_36 = arith.constant 0 : index
    %c0_37 = arith.constant 0 : index
    %99 = vector.load %arg12[%c0_36, %c0_37] : memref<8x16xbf16, #tpu.memory_space<vmem>>, vector<8x16xbf16>
    %100 = arith.truncf %98 : vector<16x768xf32> to vector<16x768xbf16>
    %cst_38 = arith.constant dense<0.000000e+00> : vector<8x768xf32>
    %101 = tpu.matmul %99, %100, %cst_38 {dimension_numbers = #tpu.dot_dimension_numbers<[1], [0], [0], [1], [0, 0, 1, 1], [], []>} : vector<8x16xbf16>, vector<16x768xbf16>, vector<8x768xf32> -> vector<8x768xf32>
    %c0_39 = arith.constant 0 : index
    %c0_40 = arith.constant 0 : index
    %102 = vector.load %arg13[%c0_39, %c0_40] : memref<8x1xf32, #tpu.memory_space<vmem>>, vector<8x1xf32>
    %103 = vector.broadcast %102 : vector<8x1xf32> to vector<8x768xf32>
    %104 = arith.addf %101, %103 : vector<8x768xf32>
    %cst_41 = arith.constant 0.000000e+00 : f32
    %105 = vector.broadcast %cst_41 : f32 to vector<8x768xf32>
    %106 = arith.maximumf %104, %105 : vector<8x768xf32>
    %c0_42 = arith.constant 0 : index
    %c0_43 = arith.constant 0 : index
    %107 = vector.load %arg14[%c0_42, %c0_43] : memref<16x8xbf16, #tpu.memory_space<vmem>>, vector<16x8xbf16>
    %108 = arith.truncf %106 : vector<8x768xf32> to vector<8x768xbf16>
    %cst_44 = arith.constant dense<0.000000e+00> : vector<16x768xf32>
    %109 = tpu.matmul %107, %108, %cst_44 {dimension_numbers = #tpu.dot_dimension_numbers<[1], [0], [0], [1], [0, 0, 1, 1], [], []>} : vector<16x8xbf16>, vector<8x768xbf16>, vector<16x768xf32> -> vector<16x768xf32>
    %110 = arith.addf %98, %109 : vector<16x768xf32>
    %c0_45 = arith.constant 0 : index
    %c0_46 = arith.constant 0 : index
    %111 = vector.load %arg15[%c0_45, %c0_46] : memref<16x1xf32, #tpu.memory_space<vmem>>, vector<16x1xf32>
    %112 = vector.broadcast %111 : vector<16x1xf32> to vector<16x768xf32>
    %113 = arith.addf %110, %112 : vector<16x768xf32>
    %cst_47 = arith.constant dense<0.000000e+00> : vector<768xf32>
    %114 = vector.multi_reduction <add>, %113, %cst_47 [0] : vector<16x768xf32> to vector<768xf32>
    %115 = vector.shape_cast %114 : vector<768xf32> to vector<1x768xf32>
    %cst_48 = arith.constant 1.600000e+01 : f32
    %116 = vector.broadcast %cst_48 : f32 to vector<1x768xf32>
    %117 = arith.divf %115, %116 : vector<1x768xf32>
    %118 = vector.broadcast %117 : vector<1x768xf32> to vector<16x768xf32>
    %119 = arith.subf %113, %118 : vector<16x768xf32>
    %120 = vector.broadcast %117 : vector<1x768xf32> to vector<16x768xf32>
    %121 = arith.subf %113, %120 : vector<16x768xf32>
    %122 = arith.mulf %119, %121 : vector<16x768xf32>
    %cst_49 = arith.constant dense<0.000000e+00> : vector<768xf32>
    %123 = vector.multi_reduction <add>, %122, %cst_49 [0] : vector<16x768xf32> to vector<768xf32>
    %124 = vector.shape_cast %123 : vector<768xf32> to vector<1x768xf32>
    %cst_50 = arith.constant 1.600000e+01 : f32
    %125 = vector.broadcast %cst_50 : f32 to vector<1x768xf32>
    %126 = arith.divf %124, %125 : vector<1x768xf32>
    %127 = vector.broadcast %117 : vector<1x768xf32> to vector<16x768xf32>
    %128 = arith.subf %113, %127 : vector<16x768xf32>
    %cst_51 = arith.constant 9.99999974E-6 : f32
    %129 = vector.broadcast %cst_51 : f32 to vector<1x768xf32>
    %130 = arith.addf %126, %129 : vector<1x768xf32>
    %131 = math.rsqrt %130 : vector<1x768xf32>
    %132 = vector.broadcast %131 : vector<1x768xf32> to vector<16x768xf32>
    %133 = arith.mulf %128, %132 : vector<16x768xf32>
    %c0_52 = arith.constant 0 : index
    %c0_53 = arith.constant 0 : index
    %134 = vector.load %arg16[%c0_52, %c0_53] : memref<16x1xf32, #tpu.memory_space<vmem>>, vector<16x1xf32>
    %135 = vector.broadcast %134 : vector<16x1xf32> to vector<16x768xf32>
    %136 = arith.mulf %133, %135 : vector<16x768xf32>
    %c0_54 = arith.constant 0 : index
    %c0_55 = arith.constant 0 : index
    %137 = vector.load %arg17[%c0_54, %c0_55] : memref<16x1xf32, #tpu.memory_space<vmem>>, vector<16x1xf32>
    %138 = vector.broadcast %137 : vector<16x1xf32> to vector<16x768xf32>
    %139 = arith.addf %136, %138 : vector<16x768xf32>
    %140 = tpu.iota {dimensions = array<i32: 1>} : vector<1x384xi32>
    %c378_i32 = arith.constant 378 : i32
    %141 = vector.broadcast %c378_i32 : i32 to vector<1x384xi32>
    %142 = arith.cmpi slt, %140, %141 : vector<1x384xi32>
    %143 = arith.extui %142 : vector<1x384xi1> to vector<1x384xi32>
    %144 = arith.sitofp %143 : vector<1x384xi32> to vector<1x384xf32>
    %145 = vector.extract_strided_slice %139 {offsets = [0, 0], sizes = [16, 384], strides = [1, 1]} : vector<16x768xf32> to vector<16x384xf32>
    %146 = vector.extract_strided_slice %139 {offsets = [0, 384], sizes = [16, 384], strides = [1, 1]} : vector<16x768xf32> to vector<16x384xf32>
    %147 = tpu.concatenate %145, %146 in 0 : vector<16x384xf32>, vector<16x384xf32> -> vector<32x384xf32>
    %148 = vector.broadcast %144 : vector<1x384xf32> to vector<32x384xf32>
    %149 = arith.mulf %147, %148 : vector<32x384xf32>
    %c0_56 = arith.constant 0 : index
    %c0_57 = arith.constant 0 : index
    %150 = vector.load %arg18[%c0_56, %c0_57] : memref<384x1152xbf16, #tpu.memory_space<vmem>>, vector<384x1152xbf16>
    %151 = arith.truncf %149 : vector<32x384xf32> to vector<32x384xbf16>
    %cst_58 = arith.constant dense<0.000000e+00> : vector<32x1152xf32>
    %152 = tpu.matmul %151, %150, %cst_58 {dimension_numbers = #tpu.dot_dimension_numbers<[1], [0], [0], [1], [0, 0, 1, 1], [], []>} : vector<32x384xbf16>, vector<384x1152xbf16>, vector<32x1152xf32> -> vector<32x1152xf32>
    %c0_59 = arith.constant 0 : index
    %c0_60 = arith.constant 0 : index
    %153 = vector.load %arg19[%c0_59, %c0_60] : memref<1x1152xf32, #tpu.memory_space<vmem>>, vector<1x1152xf32>
    %154 = vector.broadcast %153 : vector<1x1152xf32> to vector<32x1152xf32>
    %155 = arith.addf %152, %154 : vector<32x1152xf32>
    %156 = vector.extract_strided_slice %155 {offsets = [0, 0], sizes = [16, 384], strides = [1, 1]} : vector<32x1152xf32> to vector<16x384xf32>
    %157 = vector.extract_strided_slice %155 {offsets = [16, 0], sizes = [16, 384], strides = [1, 1]} : vector<32x1152xf32> to vector<16x384xf32>
    %158 = vector.extract_strided_slice %155 {offsets = [0, 384], sizes = [16, 384], strides = [1, 1]} : vector<32x1152xf32> to vector<16x384xf32>
    %159 = vector.extract_strided_slice %155 {offsets = [16, 384], sizes = [16, 384], strides = [1, 1]} : vector<32x1152xf32> to vector<16x384xf32>
    %160 = vector.extract_strided_slice %155 {offsets = [0, 768], sizes = [16, 384], strides = [1, 1]} : vector<32x1152xf32> to vector<16x384xf32>
    %161 = vector.extract_strided_slice %155 {offsets = [16, 768], sizes = [16, 384], strides = [1, 1]} : vector<32x1152xf32> to vector<16x384xf32>
    %c0_61 = arith.constant 0 : index
    %c0_62 = arith.constant 0 : index
    %162 = vector.load %arg20[%c0_61, %c0_62] : memref<384x9xbf16, #tpu.memory_space<vmem>>, vector<384x9xbf16>
    %c0_63 = arith.constant 0 : index
    %c0_64 = arith.constant 0 : index
    %163 = vector.load %arg21[%c0_63, %c0_64] : memref<9x384xbf16, #tpu.memory_space<vmem>>, vector<9x384xbf16>
    %164 = arith.mulf %156, %158 : vector<16x384xf32>
    %165 = arith.truncf %164 : vector<16x384xf32> to vector<16x384xbf16>
    %cst_65 = arith.constant dense<0.000000e+00> : vector<16x9xf32>
    %166 = tpu.matmul %165, %162, %cst_65 {dimension_numbers = #tpu.dot_dimension_numbers<[1], [0], [0], [1], [0, 0, 1, 1], [], []>} : vector<16x384xbf16>, vector<384x9xbf16>, vector<16x9xf32> -> vector<16x9xf32>
    %167 = arith.mulf %156, %159 : vector<16x384xf32>
    %168 = arith.truncf %167 : vector<16x384xf32> to vector<16x384xbf16>
    %cst_66 = arith.constant dense<0.000000e+00> : vector<16x9xf32>
    %169 = tpu.matmul %168, %162, %cst_66 {dimension_numbers = #tpu.dot_dimension_numbers<[1], [0], [0], [1], [0, 0, 1, 1], [], []>} : vector<16x384xbf16>, vector<384x9xbf16>, vector<16x9xf32> -> vector<16x9xf32>
    %170 = arith.maximumf %166, %169 : vector<16x9xf32>
    %171 = arith.subf %166, %170 : vector<16x9xf32>
    %172 = math.exp %171 : vector<16x9xf32>
    %173 = arith.subf %169, %170 : vector<16x9xf32>
    %174 = math.exp %173 : vector<16x9xf32>
    %175 = arith.addf %172, %174 : vector<16x9xf32>
    %176 = tpu.reciprocal %175 {approx = true} : vector<16x9xf32> -> vector<16x9xf32>
    %177 = arith.mulf %172, %176 : vector<16x9xf32>
    %178 = arith.truncf %177 : vector<16x9xf32> to vector<16x9xbf16>
    %cst_67 = arith.constant dense<0.000000e+00> : vector<16x384xf32>
    %179 = tpu.matmul %178, %163, %cst_67 {dimension_numbers = #tpu.dot_dimension_numbers<[1], [0], [0], [1], [0, 0, 1, 1], [], []>} : vector<16x9xbf16>, vector<9x384xbf16>, vector<16x384xf32> -> vector<16x384xf32>
    %180 = arith.mulf %179, %160 : vector<16x384xf32>
    %181 = arith.mulf %174, %176 : vector<16x9xf32>
    %182 = arith.truncf %181 : vector<16x9xf32> to vector<16x9xbf16>
    %cst_68 = arith.constant dense<0.000000e+00> : vector<16x384xf32>
    %183 = tpu.matmul %182, %163, %cst_68 {dimension_numbers = #tpu.dot_dimension_numbers<[1], [0], [0], [1], [0, 0, 1, 1], [], []>} : vector<16x9xbf16>, vector<9x384xbf16>, vector<16x384xf32> -> vector<16x384xf32>
    %184 = arith.mulf %183, %161 : vector<16x384xf32>
    %185 = arith.addf %180, %184 : vector<16x384xf32>
    %186 = arith.mulf %157, %158 : vector<16x384xf32>
    %187 = arith.truncf %186 : vector<16x384xf32> to vector<16x384xbf16>
    %cst_69 = arith.constant dense<0.000000e+00> : vector<16x9xf32>
    %188 = tpu.matmul %187, %162, %cst_69 {dimension_numbers = #tpu.dot_dimension_numbers<[1], [0], [0], [1], [0, 0, 1, 1], [], []>} : vector<16x384xbf16>, vector<384x9xbf16>, vector<16x9xf32> -> vector<16x9xf32>
    %189 = arith.mulf %157, %159 : vector<16x384xf32>
    %190 = arith.truncf %189 : vector<16x384xf32> to vector<16x384xbf16>
    %cst_70 = arith.constant dense<0.000000e+00> : vector<16x9xf32>
    %191 = tpu.matmul %190, %162, %cst_70 {dimension_numbers = #tpu.dot_dimension_numbers<[1], [0], [0], [1], [0, 0, 1, 1], [], []>} : vector<16x384xbf16>, vector<384x9xbf16>, vector<16x9xf32> -> vector<16x9xf32>
    %192 = arith.maximumf %188, %191 : vector<16x9xf32>
    %193 = arith.subf %188, %192 : vector<16x9xf32>
    %194 = math.exp %193 : vector<16x9xf32>
    %195 = arith.subf %191, %192 : vector<16x9xf32>
    %196 = math.exp %195 : vector<16x9xf32>
    %197 = arith.addf %194, %196 : vector<16x9xf32>
    %198 = tpu.reciprocal %197 {approx = true} : vector<16x9xf32> -> vector<16x9xf32>
    %199 = arith.mulf %194, %198 : vector<16x9xf32>
    %200 = arith.truncf %199 : vector<16x9xf32> to vector<16x9xbf16>
    %cst_71 = arith.constant dense<0.000000e+00> : vector<16x384xf32>
    %201 = tpu.matmul %200, %163, %cst_71 {dimension_numbers = #tpu.dot_dimension_numbers<[1], [0], [0], [1], [0, 0, 1, 1], [], []>} : vector<16x9xbf16>, vector<9x384xbf16>, vector<16x384xf32> -> vector<16x384xf32>
    %202 = arith.mulf %201, %160 : vector<16x384xf32>
    %203 = arith.mulf %196, %198 : vector<16x9xf32>
    %204 = arith.truncf %203 : vector<16x9xf32> to vector<16x9xbf16>
    %cst_72 = arith.constant dense<0.000000e+00> : vector<16x384xf32>
    %205 = tpu.matmul %204, %163, %cst_72 {dimension_numbers = #tpu.dot_dimension_numbers<[1], [0], [0], [1], [0, 0, 1, 1], [], []>} : vector<16x9xbf16>, vector<9x384xbf16>, vector<16x384xf32> -> vector<16x384xf32>
    %206 = arith.mulf %205, %161 : vector<16x384xf32>
    %207 = arith.addf %202, %206 : vector<16x384xf32>
    %208 = tpu.concatenate %185, %207 in 0 : vector<16x384xf32>, vector<16x384xf32> -> vector<32x384xf32>
    %c0_73 = arith.constant 0 : index
    %c0_74 = arith.constant 0 : index
    %209 = vector.load %arg22[%c0_73, %c0_74] : memref<384x384xbf16, #tpu.memory_space<vmem>>, vector<384x384xbf16>
    %210 = arith.truncf %208 : vector<32x384xf32> to vector<32x384xbf16>
    %cst_75 = arith.constant dense<0.000000e+00> : vector<32x384xf32>
    %211 = tpu.matmul %210, %209, %cst_75 {dimension_numbers = #tpu.dot_dimension_numbers<[1], [0], [0], [1], [0, 0, 1, 1], [], []>} : vector<32x384xbf16>, vector<384x384xbf16>, vector<32x384xf32> -> vector<32x384xf32>
    %212 = arith.addf %149, %211 : vector<32x384xf32>
    %c0_76 = arith.constant 0 : index
    %c0_77 = arith.constant 0 : index
    %213 = vector.load %arg23[%c0_76, %c0_77] : memref<1x384xf32, #tpu.memory_space<vmem>>, vector<1x384xf32>
    %214 = vector.broadcast %213 : vector<1x384xf32> to vector<32x384xf32>
    %215 = arith.addf %212, %214 : vector<32x384xf32>
    %c0_78 = arith.constant 0 : index
    %c0_79 = arith.constant 0 : index
    %216 = vector.load %arg24[%c0_78, %c0_79] : memref<1x384xf32, #tpu.memory_space<vmem>>, vector<1x384xf32>
    %c0_80 = arith.constant 0 : index
    %c0_81 = arith.constant 0 : index
    %217 = vector.load %arg25[%c0_80, %c0_81] : memref<1x384xf32, #tpu.memory_space<vmem>>, vector<1x384xf32>
    %cst_82 = arith.constant dense<0.000000e+00> : vector<32xf32>
    %218 = vector.multi_reduction <add>, %215, %cst_82 [1] : vector<32x384xf32> to vector<32xf32>
    %219 = vector.shape_cast %218 : vector<32xf32> to vector<32x1xf32>
    %cst_83 = arith.constant 0.00264550257 : f32
    %220 = vector.broadcast %cst_83 : f32 to vector<32x1xf32>
    %221 = arith.mulf %219, %220 : vector<32x1xf32>
    %222 = vector.broadcast %221 : vector<32x1xf32> to vector<32x384xf32>
    %223 = arith.subf %215, %222 : vector<32x384xf32>
    %224 = vector.broadcast %144 : vector<1x384xf32> to vector<32x384xf32>
    %225 = arith.mulf %223, %224 : vector<32x384xf32>
    %226 = arith.mulf %225, %225 : vector<32x384xf32>
    %cst_84 = arith.constant dense<0.000000e+00> : vector<32xf32>
    %227 = vector.multi_reduction <add>, %226, %cst_84 [1] : vector<32x384xf32> to vector<32xf32>
    %228 = vector.shape_cast %227 : vector<32xf32> to vector<32x1xf32>
    %cst_85 = arith.constant 0.00264550257 : f32
    %229 = vector.broadcast %cst_85 : f32 to vector<32x1xf32>
    %230 = arith.mulf %228, %229 : vector<32x1xf32>
    %cst_86 = arith.constant 9.99999974E-6 : f32
    %231 = vector.broadcast %cst_86 : f32 to vector<32x1xf32>
    %232 = arith.addf %230, %231 : vector<32x1xf32>
    %233 = math.rsqrt %232 : vector<32x1xf32>
    %234 = vector.broadcast %233 : vector<32x1xf32> to vector<32x384xf32>
    %235 = arith.mulf %225, %234 : vector<32x384xf32>
    %236 = vector.broadcast %216 : vector<1x384xf32> to vector<32x384xf32>
    %237 = arith.mulf %235, %236 : vector<32x384xf32>
    %238 = vector.broadcast %217 : vector<1x384xf32> to vector<32x384xf32>
    %239 = arith.addf %237, %238 : vector<32x384xf32>
    %c0_87 = arith.constant 0 : index
    %c0_88 = arith.constant 0 : index
    %240 = vector.load %arg26[%c0_87, %c0_88] : memref<384x189xbf16, #tpu.memory_space<vmem>>, vector<384x189xbf16>
    %241 = arith.truncf %239 : vector<32x384xf32> to vector<32x384xbf16>
    %cst_89 = arith.constant dense<0.000000e+00> : vector<32x189xf32>
    %242 = tpu.matmul %241, %240, %cst_89 {dimension_numbers = #tpu.dot_dimension_numbers<[1], [0], [0], [1], [0, 0, 1, 1], [], []>} : vector<32x384xbf16>, vector<384x189xbf16>, vector<32x189xf32> -> vector<32x189xf32>
    %c0_90 = arith.constant 0 : index
    %c0_91 = arith.constant 0 : index
    %243 = vector.load %arg27[%c0_90, %c0_91] : memref<1x189xf32, #tpu.memory_space<vmem>>, vector<1x189xf32>
    %244 = vector.broadcast %243 : vector<1x189xf32> to vector<32x189xf32>
    %245 = arith.addf %242, %244 : vector<32x189xf32>
    %cst_92 = arith.constant 0.000000e+00 : f32
    %246 = vector.broadcast %cst_92 : f32 to vector<32x189xf32>
    %247 = arith.maximumf %245, %246 : vector<32x189xf32>
    %c0_93 = arith.constant 0 : index
    %c0_94 = arith.constant 0 : index
    %248 = vector.load %arg28[%c0_93, %c0_94] : memref<189x384xbf16, #tpu.memory_space<vmem>>, vector<189x384xbf16>
    %249 = arith.truncf %247 : vector<32x189xf32> to vector<32x189xbf16>
    %cst_95 = arith.constant dense<0.000000e+00> : vector<32x384xf32>
    %250 = tpu.matmul %249, %248, %cst_95 {dimension_numbers = #tpu.dot_dimension_numbers<[1], [0], [0], [1], [0, 0, 1, 1], [], []>} : vector<32x189xbf16>, vector<189x384xbf16>, vector<32x384xf32> -> vector<32x384xf32>
    %251 = arith.addf %239, %250 : vector<32x384xf32>
    %c0_96 = arith.constant 0 : index
    %c0_97 = arith.constant 0 : index
    %252 = vector.load %arg29[%c0_96, %c0_97] : memref<1x384xf32, #tpu.memory_space<vmem>>, vector<1x384xf32>
    %253 = vector.broadcast %252 : vector<1x384xf32> to vector<32x384xf32>
    %254 = arith.addf %251, %253 : vector<32x384xf32>
    %c0_98 = arith.constant 0 : index
    %c0_99 = arith.constant 0 : index
    %255 = vector.load %arg30[%c0_98, %c0_99] : memref<1x384xf32, #tpu.memory_space<vmem>>, vector<1x384xf32>
    %c0_100 = arith.constant 0 : index
    %c0_101 = arith.constant 0 : index
    %256 = vector.load %arg31[%c0_100, %c0_101] : memref<1x384xf32, #tpu.memory_space<vmem>>, vector<1x384xf32>
    %cst_102 = arith.constant dense<0.000000e+00> : vector<32xf32>
    %257 = vector.multi_reduction <add>, %254, %cst_102 [1] : vector<32x384xf32> to vector<32xf32>
    %258 = vector.shape_cast %257 : vector<32xf32> to vector<32x1xf32>
    %cst_103 = arith.constant 0.00264550257 : f32
    %259 = vector.broadcast %cst_103 : f32 to vector<32x1xf32>
    %260 = arith.mulf %258, %259 : vector<32x1xf32>
    %261 = vector.broadcast %260 : vector<32x1xf32> to vector<32x384xf32>
    %262 = arith.subf %254, %261 : vector<32x384xf32>
    %263 = vector.broadcast %144 : vector<1x384xf32> to vector<32x384xf32>
    %264 = arith.mulf %262, %263 : vector<32x384xf32>
    %265 = arith.mulf %264, %264 : vector<32x384xf32>
    %cst_104 = arith.constant dense<0.000000e+00> : vector<32xf32>
    %266 = vector.multi_reduction <add>, %265, %cst_104 [1] : vector<32x384xf32> to vector<32xf32>
    %267 = vector.shape_cast %266 : vector<32xf32> to vector<32x1xf32>
    %cst_105 = arith.constant 0.00264550257 : f32
    %268 = vector.broadcast %cst_105 : f32 to vector<32x1xf32>
    %269 = arith.mulf %267, %268 : vector<32x1xf32>
    %cst_106 = arith.constant 9.99999974E-6 : f32
    %270 = vector.broadcast %cst_106 : f32 to vector<32x1xf32>
    %271 = arith.addf %269, %270 : vector<32x1xf32>
    %272 = math.rsqrt %271 : vector<32x1xf32>
    %273 = vector.broadcast %272 : vector<32x1xf32> to vector<32x384xf32>
    %274 = arith.mulf %264, %273 : vector<32x384xf32>
    %275 = vector.broadcast %255 : vector<1x384xf32> to vector<32x384xf32>
    %276 = arith.mulf %274, %275 : vector<32x384xf32>
    %277 = vector.broadcast %256 : vector<1x384xf32> to vector<32x384xf32>
    %278 = arith.addf %276, %277 : vector<32x384xf32>
    %c0_107 = arith.constant 0 : index
    %c0_108 = arith.constant 0 : index
    %279 = vector.load %arg32[%c0_107, %c0_108] : memref<32x384xf32, #tpu.memory_space<vmem>>, vector<32x384xf32>
    tpu.vector_store %arg32[%c0_107, %c0_108], %278 {strides = array<i32>} : memref<32x384xf32, #tpu.memory_space<vmem>>, vector<32x384xf32>,
    return
  }
  func.func @transform_0(%arg0: i32) -> (i32, i32) {
    %c0_i32 = arith.constant 0 : i32
    %c0_i32_0 = arith.constant 0 : i32
    %c0_i32_1 = arith.constant 0 : i32
    return %c0_i32, %c0_i32_0 : i32, i32
  }
  func.func @transform_1(%arg0: i32) -> (i32, i32) {
    %c0_i32 = arith.constant 0 : i32
    %c0_i32_0 = arith.constant 0 : i32
    %c0_i32_1 = arith.constant 0 : i32
    return %c0_i32, %c0_i32_0 : i32, i32
  }
  func.func @transform_2(%arg0: i32) -> (i32, i32) {
    %c0_i32 = arith.constant 0 : i32
    %c0_i32_0 = arith.constant 0 : i32
    %c0_i32_1 = arith.constant 0 : i32
    return %c0_i32, %c0_i32_0 : i32, i32
  }
  func.func @transform_3(%arg0: i32) -> (i32, i32) {
    %c0_i32 = arith.constant 0 : i32
    %c0_i32_0 = arith.constant 0 : i32
    %c0_i32_1 = arith.constant 0 : i32
    return %c0_i32, %c0_i32_0 : i32, i32
  }
  func.func @transform_4(%arg0: i32) -> (i32, i32) {
    %c0_i32 = arith.constant 0 : i32
    %c0_i32_0 = arith.constant 0 : i32
    %c0_i32_1 = arith.constant 0 : i32
    return %c0_i32, %c0_i32_0 : i32, i32
  }
  func.func @transform_5(%arg0: i32) -> (i32, i32) {
    %c0_i32 = arith.constant 0 : i32
    %c0_i32_0 = arith.constant 0 : i32
    %c0_i32_1 = arith.constant 0 : i32
    return %c0_i32, %c0_i32_0 : i32, i32
  }
  func.func @transform_6(%arg0: i32) -> (i32, i32) {
    %c0_i32 = arith.constant 0 : i32
    %c0_i32_0 = arith.constant 0 : i32
    %c0_i32_1 = arith.constant 0 : i32
    return %c0_i32, %c0_i32_0 : i32, i32
  }
  func.func @transform_7(%arg0: i32) -> (i32, i32) {
    %c0_i32 = arith.constant 0 : i32
    %c0_i32_0 = arith.constant 0 : i32
    %c0_i32_1 = arith.constant 0 : i32
    return %c0_i32, %c0_i32_0 : i32, i32
  }
  func.func @transform_8(%arg0: i32) -> (i32, i32) {
    %c0_i32 = arith.constant 0 : i32
    %c0_i32_0 = arith.constant 0 : i32
    %c0_i32_1 = arith.constant 0 : i32
    return %c0_i32, %c0_i32_0 : i32, i32
  }
  func.func @transform_9(%arg0: i32) -> (i32, i32) {
    %c0_i32 = arith.constant 0 : i32
    %c0_i32_0 = arith.constant 0 : i32
    %c0_i32_1 = arith.constant 0 : i32
    return %c0_i32, %c0_i32_0 : i32, i32
  }
  func.func @transform_10(%arg0: i32) -> (i32, i32) {
    %c0_i32 = arith.constant 0 : i32
    %c0_i32_0 = arith.constant 0 : i32
    %c0_i32_1 = arith.constant 0 : i32
    return %c0_i32, %c0_i32_0 : i32, i32
  }
  func.func @transform_11(%arg0: i32) -> (i32, i32) {
    %c0_i32 = arith.constant 0 : i32
    %c0_i32_0 = arith.constant 0 : i32
    %c0_i32_1 = arith.constant 0 : i32
    return %c0_i32, %c0_i32_0 : i32, i32
  }
  func.func @transform_12(%arg0: i32) -> (i32, i32) {
    %c0_i32 = arith.constant 0 : i32
    %c0_i32_0 = arith.constant 0 : i32
    %c0_i32_1 = arith.constant 0 : i32
    return %c0_i32, %c0_i32_0 : i32, i32
  }
  func.func @transform_13(%arg0: i32) -> (i32, i32) {
    %c0_i32 = arith.constant 0 : i32
    %c0_i32_0 = arith.constant 0 : i32
    %c0_i32_1 = arith.constant 0 : i32
    return %c0_i32, %c0_i32_0 : i32, i32
  }
  func.func @transform_14(%arg0: i32) -> (i32, i32) {
    %c0_i32 = arith.constant 0 : i32
    %c0_i32_0 = arith.constant 0 : i32
    %c0_i32_1 = arith.constant 0 : i32
    return %c0_i32, %c0_i32_0 : i32, i32
  }
  func.func @transform_15(%arg0: i32) -> (i32, i32) {
    %c0_i32 = arith.constant 0 : i32
    %c0_i32_0 = arith.constant 0 : i32
    %c0_i32_1 = arith.constant 0 : i32
    return %c0_i32, %c0_i32_0 : i32, i32
  }
  func.func @transform_16(%arg0: i32) -> (i32, i32) {
    %c0_i32 = arith.constant 0 : i32
    %c0_i32_0 = arith.constant 0 : i32
    %c0_i32_1 = arith.constant 0 : i32
    return %c0_i32, %c0_i32_0 : i32, i32
  }
  func.func @transform_17(%arg0: i32) -> (i32, i32) {
    %c0_i32 = arith.constant 0 : i32
    %c0_i32_0 = arith.constant 0 : i32
    %c0_i32_1 = arith.constant 0 : i32
    return %c0_i32, %c0_i32_0 : i32, i32
  }
  func.func @transform_18(%arg0: i32) -> (i32, i32) {
    %c0_i32 = arith.constant 0 : i32
    %c0_i32_0 = arith.constant 0 : i32
    %c0_i32_1 = arith.constant 0 : i32
    return %c0_i32, %c0_i32_0 : i32, i32
  }
  func.func @transform_19(%arg0: i32) -> (i32, i32) {
    %c0_i32 = arith.constant 0 : i32
    %c0_i32_0 = arith.constant 0 : i32
    %c0_i32_1 = arith.constant 0 : i32
    return %c0_i32, %c0_i32_0 : i32, i32
  }
  func.func @transform_20(%arg0: i32) -> (i32, i32) {
    %c0_i32 = arith.constant 0 : i32
    %c0_i32_0 = arith.constant 0 : i32
    %c0_i32_1 = arith.constant 0 : i32
    return %c0_i32, %c0_i32_0 : i32, i32
  }
  func.func @transform_21(%arg0: i32) -> (i32, i32) {
    %c0_i32 = arith.constant 0 : i32
    %c0_i32_0 = arith.constant 0 : i32
    %c0_i32_1 = arith.constant 0 : i32
    return %c0_i32, %c0_i32_0 : i32, i32
  }
  func.func @transform_22(%arg0: i32) -> (i32, i32) {
    %c0_i32 = arith.constant 0 : i32
    %c0_i32_0 = arith.constant 0 : i32
    %c0_i32_1 = arith.constant 0 : i32
    return %c0_i32, %c0_i32_0 : i32, i32
  }
  func.func @transform_23(%arg0: i32) -> (i32, i32) {
    %c0_i32 = arith.constant 0 : i32
    %c0_i32_0 = arith.constant 0 : i32
    %c0_i32_1 = arith.constant 0 : i32
    return %c0_i32, %c0_i32_0 : i32, i32
  }
  func.func @transform_24(%arg0: i32) -> (i32, i32) {
    %c0_i32 = arith.constant 0 : i32
    %c0_i32_0 = arith.constant 0 : i32
    %c0_i32_1 = arith.constant 0 : i32
    return %c0_i32, %c0_i32_0 : i32, i32
  }
  func.func @transform_25(%arg0: i32) -> (i32, i32) {
    %c0_i32 = arith.constant 0 : i32
    %c0_i32_0 = arith.constant 0 : i32
    %c0_i32_1 = arith.constant 0 : i32
    return %c0_i32, %c0_i32_0 : i32, i32
  }
  func.func @transform_26(%arg0: i32) -> (i32, i32) {
    %c0_i32 = arith.constant 0 : i32
    %c0_i32_0 = arith.constant 0 : i32
    %c0_i32_1 = arith.constant 0 : i32
    return %c0_i32, %c0_i32_0 : i32, i32
  }
  func.func @transform_27(%arg0: i32) -> (i32, i32) {
    %c0_i32 = arith.constant 0 : i32
    %c0_i32_0 = arith.constant 0 : i32
    %c0_i32_1 = arith.constant 0 : i32
    return %c0_i32, %c0_i32_0 : i32, i32
  }
  func.func @transform_28(%arg0: i32) -> (i32, i32) {
    %c0_i32 = arith.constant 0 : i32
    %c0_i32_0 = arith.constant 0 : i32
    %c0_i32_1 = arith.constant 0 : i32
    return %c0_i32, %c0_i32_0 : i32, i32
  }
  func.func @transform_29(%arg0: i32) -> (i32, i32) {
    %c0_i32 = arith.constant 0 : i32
    %c0_i32_0 = arith.constant 0 : i32
    %c0_i32_1 = arith.constant 0 : i32
    return %c0_i32, %c0_i32_0 : i32, i32
  }
  func.func @transform_30(%arg0: i32) -> (i32, i32) {
    %c0_i32 = arith.constant 0 : i32
    %c0_i32_0 = arith.constant 0 : i32
    %c0_i32_1 = arith.constant 0 : i32
    return %c0_i32, %c0_i32_0 : i32, i32
  }
  func.func @transform_31(%arg0: i32) -> (i32, i32) {
    %c0_i32 = arith.constant 0 : i32
    %c0_i32_0 = arith.constant 0 : i32
    %c0_i32_1 = arith.constant 0 : i32
    return %c0_i32, %c0_i32_0 : i32, i32
  }
}

module attributes {stable_mosaic.version = 11 : i64} {
  func.func @_reconv_gate_kernel(%arg0: i32, %arg1: memref<1x16x384xf32, #tpu.memory_space<vmem>>, %arg2: memref<128x384xf32, #tpu.memory_space<vmem>>, %arg3: memref<128x16xbf16, #tpu.memory_space<vmem>>, %arg4: memref<128x1xf32, #tpu.memory_space<vmem>>, %arg5: memref<1x128x384xf32, #tpu.memory_space<vmem>>) attributes {dimension_semantics = [#tpu.dimension_semantics<parallel>], iteration_bounds = array<i64: 2>, scalar_prefetch = 0 : i64, scratch_operands = 0 : i64, tpu.core_type = #tpu.core_type<tc>, window_params = [{transform_indices = @transform_0, window_bounds = array<i64: 1, 16, 384>}, {transform_indices = @transform_1, window_bounds = array<i64: 128, 384>}, {pipeline_mode = #tpu.pipeline_mode<synchronous>, transform_indices = @transform_2, window_bounds = array<i64: 128, 16>}, {pipeline_mode = #tpu.pipeline_mode<synchronous>, transform_indices = @transform_3, window_bounds = array<i64: 128, 1>}, {transform_indices = @transform_4, window_bounds = array<i64: 1, 128, 384>}]} {
    %c0 = arith.constant 0 : index
    %c0_0 = arith.constant 0 : index
    %0 = vector.load %arg3[%c0, %c0_0] : memref<128x16xbf16, #tpu.memory_space<vmem>>, vector<128x16xbf16>
    %c0_1 = arith.constant 0 : index
    %c0_2 = arith.constant 0 : index
    %c0_3 = arith.constant 0 : index
    %1 = vector.load %arg1[%c0_1, %c0_2, %c0_3] : memref<1x16x384xf32, #tpu.memory_space<vmem>>, vector<1x16x384xf32>
    %2 = vector.shape_cast %1 : vector<1x16x384xf32> to vector<16x384xf32>
    %3 = arith.truncf %2 : vector<16x384xf32> to vector<16x384xbf16>
    %cst = arith.constant dense<0.000000e+00> : vector<128x384xf32>
    %4 = tpu.matmul %0, %3, %cst {dimension_numbers = #tpu.dot_dimension_numbers<[1], [0], [0], [1], [0, 0, 1, 1], [], []>} : vector<128x16xbf16>, vector<16x384xbf16>, vector<128x384xf32> -> vector<128x384xf32>
    %c0_4 = arith.constant 0 : index
    %c0_5 = arith.constant 0 : index
    %5 = vector.load %arg4[%c0_4, %c0_5] : memref<128x1xf32, #tpu.memory_space<vmem>>, vector<128x1xf32>
    %6 = vector.broadcast %5 : vector<128x1xf32> to vector<128x384xf32>
    %7 = arith.addf %4, %6 : vector<128x384xf32>
    %c0_6 = arith.constant 0 : index
    %c0_7 = arith.constant 0 : index
    %8 = vector.load %arg2[%c0_6, %c0_7] : memref<128x384xf32, #tpu.memory_space<vmem>>, vector<128x384xf32>
    %cst_8 = arith.constant 0.000000e+00 : f32
    %9 = vector.broadcast %cst_8 : f32 to vector<128x384xf32>
    %10 = arith.subf %9, %7 : vector<128x384xf32>
    %11 = math.exp %10 : vector<128x384xf32>
    %cst_9 = arith.constant 1.000000e+00 : f32
    %12 = vector.broadcast %cst_9 : f32 to vector<128x384xf32>
    %13 = arith.addf %12, %11 : vector<128x384xf32>
    %14 = tpu.reciprocal %13 {approx = true} : vector<128x384xf32> -> vector<128x384xf32>
    %15 = arith.mulf %8, %14 : vector<128x384xf32>
    %16 = arith.addf %8, %15 : vector<128x384xf32>
    %c0_10 = arith.constant 0 : index
    %c0_11 = arith.constant 0 : index
    %c0_12 = arith.constant 0 : index
    %17 = vector.load %arg5[%c0_10, %c0_11, %c0_12] : memref<1x128x384xf32, #tpu.memory_space<vmem>>, vector<1x128x384xf32>
    %18 = vector.shape_cast %17 : vector<1x128x384xf32> to vector<128x384xf32>
    %19 = vector.shape_cast %16 : vector<128x384xf32> to vector<1x128x384xf32>
    tpu.vector_store %arg5[%c0_10, %c0_11, %c0_12], %19 {strides = array<i32>} : memref<1x128x384xf32, #tpu.memory_space<vmem>>, vector<1x128x384xf32>,
    return
  }
  func.func @transform_0(%arg0: i32) -> (i32, i32, i32) {
    %c0_i32 = arith.constant 0 : i32
    %c0_i32_0 = arith.constant 0 : i32
    %c0_i32_1 = arith.constant 0 : i32
    return %arg0, %c0_i32, %c0_i32_0 : i32, i32, i32
  }
  func.func @transform_1(%arg0: i32) -> (i32, i32) {
    %c0_i32 = arith.constant 0 : i32
    %c0_i32_0 = arith.constant 0 : i32
    return %c0_i32, %arg0 : i32, i32
  }
  func.func @transform_2(%arg0: i32) -> (i32, i32) {
    %c0_i32 = arith.constant 0 : i32
    %c0_i32_0 = arith.constant 0 : i32
    %c0_i32_1 = arith.constant 0 : i32
    return %c0_i32, %c0_i32_0 : i32, i32
  }
  func.func @transform_3(%arg0: i32) -> (i32, i32) {
    %c0_i32 = arith.constant 0 : i32
    %c0_i32_0 = arith.constant 0 : i32
    %c0_i32_1 = arith.constant 0 : i32
    return %c0_i32, %c0_i32_0 : i32, i32
  }
  func.func @transform_4(%arg0: i32) -> (i32, i32, i32) {
    %c0_i32 = arith.constant 0 : i32
    %c0_i32_0 = arith.constant 0 : i32
    %c0_i32_1 = arith.constant 0 : i32
    return %arg0, %c0_i32, %c0_i32_0 : i32, i32, i32
  }
}

</mosaic_0001>

<bundles_post_ra>
// kernel: trans_att_forward.3
= control target key start
LH: loop header
LB: loop body
LE: loop exit
PB: predicated region body
PF: predicated region fallthrough
CT: control target
= control target key end

     0   :  { %s1580_s15 = smov 0   ;;  %s1582_s16 = smov 0   ;;  %s2095_s0 = inlined_call_operand.vmem [shape: f32[2,16,384], index: 0, kind: input, shape index: {}]   ;;  %s2096_s1 = inlined_call_operand.vmem [shape: f32[128,768], index: 1, kind: input, shape index: {}]   ;;  %s2097_s2 = inlined_call_operand.vmem [shape: bf16[128,16], index: 2, kind: input, shape index: {}]   ;;  %s2098_s3 = inlined_call_operand.vmem [shape: f32[128,1], index: 3, kind: input, shape index: {}]   ;;  %s2099_s4 = inlined_call_operand.vmem [shape: f32[2,128,384], index: 4, kind: output, shape index: {}]  }
   0x1   :  { %s1584_s17 = smov 0  }
   0x2 LB: > { %s1235_s18 = sadd.s32 4294967295, %s1552_s17   ;;  %s1597_s19 = sadd.s32 1, %s1552_s17   ;;  %s1552_s17 = sphi %s1584_s17, %s2102_s17   ;;  %s1548_s16 = sphi %s1582_s16, %s2101_s16   ;;  %s1544_s15 = sphi %s1580_s15, %s2100_s15  }
   0x3   : > { %s44_s20 = ssub.s32 %s1552_s17, %s1597_s19  ;;  %s47_s21 = sadd.s32 1, %s1548_s16 }
   0x4   : > { %p45_p0 = scmp.eq.s32.totalorder %s44_s20, 0  ;;  %p54_p1 = scmp.ne.s32.totalorder %s1548_s16, %s1544_s15 }
   0x5   : > { %p55_p2 = scmp.eq.s32.totalorder %s1552_s17, 0  ;;  %p1238_p4 = scmp.ge.s32.totalorder %s1552_s17, 2 }
   0x6   : > { %s1606_s22 = scalar_select %p45_p0, %s1548_s16, %s47_s21  }
   0x7   : > { %p56_p3 = por %p55_p2, %p54_p1  ;;  %154 = sbr.rel (%p1238_p4) target bundleno = 41 (0x29), region = 24 }
   0xc   : > { %165 = sbr.rel (!%p56_p3) target bundleno = 41 (0x29), region = 32  ;;  %s167_s23 = sand.u32 (%p56_p3), 1, %s1548_s16  }
   0xd   : > { %s1269_s24 = smul.u32 (%p56_p3), 24, %s1552_s17 }
   0xe   : > { %s1299_s25 = smul.u32 (%p56_p3), 384, %s167_s23 }
   0xf   : > { %s1614_s28 = scalar_lea.vmem (%p56_p3), %s2096_s1, %s1269_s24 }
  0x10   : > { %v185_v0 = vld [vmem:[%s1614_s28] sm:$0xff] (%p56_p3)  ;;  %v187_v1 = vld [vmem:[%s1614_s28 + $0x8] sm:$0xff] (%p56_p3)  ;;  %v189_v2 = vld [vmem:[%s1614_s28 + $0x10] sm:$0xff] (%p56_p3)  ;;  %s1619_s29 = scalar_lea.vmem (%p56_p3), [#allocation2], %s1299_s25 }
  0x11   : > { %186 = vst [vmem:[%s1619_s29] sm:$0xff] %v185_v0  ;;  %188 = vst [vmem:[%s1619_s29 + $0x8] sm:$0xff] %v187_v1  ;;  %v191_v3 = vld [vmem:[%s1614_s28 + $0x30] sm:$0xff]  ;;  %v193_v4 = vld [vmem:[%s1614_s28 + $0x38] sm:$0xff] }
  0x12   : > { %190 = vst [vmem:[%s1619_s29 + $0x10] sm:$0xff] %v189_v2  ;;  %v195_v5 = vld [vmem:[%s1614_s28 + $0x40] sm:$0xff]  ;;  %192 = vst [vmem:[%s1619_s29 + $0x18] sm:$0xff] %v191_v3  ;;  %v199_v7 = vld [vmem:[%s1614_s28 + $0x68] sm:$0xff] }
  0x13   : > { %194 = vst [vmem:[%s1619_s29 + $0x20] sm:$0xff] %v193_v4  ;;  %196 = vst [vmem:[%s1619_s29 + $0x28] sm:$0xff] %v195_v5  ;;  %v197_v6 = vld [vmem:[%s1614_s28 + $0x60] sm:$0xff]  ;;  %v201_v8 = vld [vmem:[%s1614_s28 + $0x70] sm:$0xff] }
  0x14   : > { %198 = vst [vmem:[%s1619_s29 + $0x30] sm:$0xff] %v197_v6  ;;  %200 = vst [vmem:[%s1619_s29 + $0x38] sm:$0xff] %v199_v7  ;;  %v203_v9 = vld [vmem:[%s1614_s28 + $0x90] sm:$0xff]  ;;  %v205_v10 = vld [vmem:[%s1614_s28 + $0x98] sm:$0xff] }
  0x15   : > { %202 = vst [vmem:[%s1619_s29 + $0x40] sm:$0xff] %v201_v8  ;;  %v207_v11 = vld [vmem:[%s1614_s28 + $0xa0] sm:$0xff]  ;;  %204 = vst [vmem:[%s1619_s29 + $0x48] sm:$0xff] %v203_v9  ;;  %v211_v13 = vld [vmem:[%s1614_s28 + $0xc8] sm:$0xff] }
  0x16   : > { %206 = vst [vmem:[%s1619_s29 + $0x50] sm:$0xff] %v205_v10  ;;  %208 = vst [vmem:[%s1619_s29 + $0x58] sm:$0xff] %v207_v11  ;;  %v209_v12 = vld [vmem:[%s1614_s28 + $0xc0] sm:$0xff]  ;;  %v213_v14 = vld [vmem:[%s1614_s28 + $0xd0] sm:$0xff] }
  0x17   : > { %210 = vst [vmem:[%s1619_s29 + $0x60] sm:$0xff] %v209_v12  ;;  %212 = vst [vmem:[%s1619_s29 + $0x68] sm:$0xff] %v211_v13  ;;  %v215_v15 = vld [vmem:[%s1614_s28 + $0xf0] sm:$0xff]  ;;  %v217_v16 = vld [vmem:[%s1614_s28 + $0xf8] sm:$0xff] }
  0x18   : > { %214 = vst [vmem:[%s1619_s29 + $0x70] sm:$0xff] %v213_v14  ;;  %v219_v17 = vld [vmem:[%s1614_s28 + $0x100] sm:$0xff]  ;;  %216 = vst [vmem:[%s1619_s29 + $0x78] sm:$0xff] %v215_v15  ;;  %v223_v19 = vld [vmem:[%s1614_s28 + $0x128] sm:$0xff] }
  0x19   : > { %218 = vst [vmem:[%s1619_s29 + $0x80] sm:$0xff] %v217_v16  ;;  %220 = vst [vmem:[%s1619_s29 + $0x88] sm:$0xff] %v219_v17  ;;  %v221_v18 = vld [vmem:[%s1614_s28 + $0x120] sm:$0xff]  ;;  %v225_v20 = vld [vmem:[%s1614_s28 + $0x130] sm:$0xff] }
  0x1a   : > { %222 = vst [vmem:[%s1619_s29 + $0x90] sm:$0xff] %v221_v18  ;;  %224 = vst [vmem:[%s1619_s29 + $0x98] sm:$0xff] %v223_v19  ;;  %v227_v21 = vld [vmem:[%s1614_s28 + $0x150] sm:$0xff]  ;;  %v229_v22 = vld [vmem:[%s1614_s28 + $0x158] sm:$0xff] }
  0x1b   : > { %226 = vst [vmem:[%s1619_s29 + $0xa0] sm:$0xff] %v225_v20  ;;  %v231_v23 = vld [vmem:[%s1614_s28 + $0x160] sm:$0xff]  ;;  %228 = vst [vmem:[%s1619_s29 + $0xa8] sm:$0xff] %v227_v21  ;;  %v235_v25 = vld [vmem:[%s1614_s28 + $0x188] sm:$0xff] }
  0x1c   : > { %230 = vst [vmem:[%s1619_s29 + $0xb0] sm:$0xff] %v229_v22  ;;  %232 = vst [vmem:[%s1619_s29 + $0xb8] sm:$0xff] %v231_v23  ;;  %v233_v24 = vld [vmem:[%s1614_s28 + $0x180] sm:$0xff]  ;;  %v237_v26 = vld [vmem:[%s1614_s28 + $0x190] sm:$0xff] }
  0x1d   : > { %234 = vst [vmem:[%s1619_s29 + $0xc0] sm:$0xff] %v233_v24  ;;  %236 = vst [vmem:[%s1619_s29 + $0xc8] sm:$0xff] %v235_v25  ;;  %v239_v27 = vld [vmem:[%s1614_s28 + $0x1b0] sm:$0xff]  ;;  %v241_v28 = vld [vmem:[%s1614_s28 + $0x1b8] sm:$0xff] }
  0x1e   : > { %238 = vst [vmem:[%s1619_s29 + $0xd0] sm:$0xff] %v237_v26  ;;  %v243_v29 = vld [vmem:[%s1614_s28 + $0x1c0] sm:$0xff]  ;;  %240 = vst [vmem:[%s1619_s29 + $0xd8] sm:$0xff] %v239_v27  ;;  %v247_v31 = vld [vmem:[%s1614_s28 + $0x1e8] sm:$0xff] }
  0x1f   : > { %242 = vst [vmem:[%s1619_s29 + $0xe0] sm:$0xff] %v241_v28  ;;  %244 = vst [vmem:[%s1619_s29 + $0xe8] sm:$0xff] %v243_v29  ;;  %v245_v30 = vld [vmem:[%s1614_s28 + $0x1e0] sm:$0xff]  ;;  %v249_v32 = vld [vmem:[%s1614_s28 + $0x1f0] sm:$0xff] }
  0x20   : > { %246 = vst [vmem:[%s1619_s29 + $0xf0] sm:$0xff] %v245_v30  ;;  %248 = vst [vmem:[%s1619_s29 + $0xf8] sm:$0xff] %v247_v31  ;;  %v251_v33 = vld [vmem:[%s1614_s28 + $0x210] sm:$0xff]  ;;  %v253_v34 = vld [vmem:[%s1614_s28 + $0x218] sm:$0xff] }
  0x21   : > { %250 = vst [vmem:[%s1619_s29 + $0x100] sm:$0xff] %v249_v32  ;;  %v255_v35 = vld [vmem:[%s1614_s28 + $0x220] sm:$0xff]  ;;  %252 = vst [vmem:[%s1619_s29 + $0x108] sm:$0xff] %v251_v33  ;;  %v259_v37 = vld [vmem:[%s1614_s28 + $0x248] sm:$0xff] }
  0x22   : > { %254 = vst [vmem:[%s1619_s29 + $0x110] sm:$0xff] %v253_v34  ;;  %256 = vst [vmem:[%s1619_s29 + $0x118] sm:$0xff] %v255_v35  ;;  %v257_v36 = vld [vmem:[%s1614_s28 + $0x240] sm:$0xff]  ;;  %v261_v38 = vld [vmem:[%s1614_s28 + $0x250] sm:$0xff] }
  0x23   : > { %258 = vst [vmem:[%s1619_s29 + $0x120] sm:$0xff] %v257_v36  ;;  %260 = vst [vmem:[%s1619_s29 + $0x128] sm:$0xff] %v259_v37  ;;  %v263_v39 = vld [vmem:[%s1614_s28 + $0x270] sm:$0xff]  ;;  %v265_v40 = vld [vmem:[%s1614_s28 + $0x278] sm:$0xff] }
  0x24   : > { %262 = vst [vmem:[%s1619_s29 + $0x130] sm:$0xff] %v261_v38  ;;  %v267_v41 = vld [vmem:[%s1614_s28 + $0x280] sm:$0xff]  ;;  %264 = vst [vmem:[%s1619_s29 + $0x138] sm:$0xff] %v263_v39  ;;  %v271_v43 = vld [vmem:[%s1614_s28 + $0x2a8] sm:$0xff] }
  0x25   : > { %266 = vst [vmem:[%s1619_s29 + $0x140] sm:$0xff] %v265_v40  ;;  %268 = vst [vmem:[%s1619_s29 + $0x148] sm:$0xff] %v267_v41  ;;  %v269_v42 = vld [vmem:[%s1614_s28 + $0x2a0] sm:$0xff]  ;;  %v273_v44 = vld [vmem:[%s1614_s28 + $0x2b0] sm:$0xff] }
  0x26   : > { %270 = vst [vmem:[%s1619_s29 + $0x150] sm:$0xff] %v269_v42  ;;  %272 = vst [vmem:[%s1619_s29 + $0x158] sm:$0xff] %v271_v43  ;;  %v275_v45 = vld [vmem:[%s1614_s28 + $0x2d0] sm:$0xff]  ;;  %v277_v46 = vld [vmem:[%s1614_s28 + $0x2d8] sm:$0xff] }
  0x27   : > { %274 = vst [vmem:[%s1619_s29 + $0x160] sm:$0xff] %v273_v44  ;;  %v279_v47 = vld [vmem:[%s1614_s28 + $0x2e0] sm:$0xff]  ;;  %276 = vst [vmem:[%s1619_s29 + $0x168] sm:$0xff] %v275_v45 }
  0x28   : > { %278 = vst [vmem:[%s1619_s29 + $0x170] sm:$0xff] %v277_v46  ;;  %280 = vst [vmem:[%s1619_s29 + $0x178] sm:$0xff] %v279_v47 }
  0x29 PF: > { %p1240_p5 = scmp.ge.s32.totalorder %s1552_s17, 1  ;;  %p285_p6 = scmp.lt.s32.totalorder %s1552_s17, 3 }
  0x2b   : > { %p286_p7 = pnand %p1240_p5, %p285_p6 }
  0x2c   : > { %p322_p8 = scmp.lt.s32.totalorder (!%p286_p7), %s1235_s18, 1  ;;  %s292_s14 = sand.u32 (!%p286_p7), 1, %s1544_s15  }
  0x2d   : > { %289 = sbr.rel (%p286_p7) target bundleno = 379 (0x17b), region = 55 }
  0x2e   : > { %s1887_s17 = smul.u32 (!%p286_p7), 384, %s292_s14 }
  0x30   : > { %s1902_s20 = scalar_lea.vmem (!%p286_p7), [#allocation2], %s1887_s17 }
  0x32   : > { %v1554_v48 = vmov 0   ;;  %s2104_s18 = smov (!%p322_p8, %s1235_s18), 1  ;;  %v1330_v57 = vld [vmem:[%s2097_s2] sm:$0xff]   ;;  %v1736_v59 = vld [vmem:[%s2097_s2 + $0x30] sm:$0xff]   ;;  %vm495_vm0 = vcmask 130048   ;;  %v360_v62 = vld [vmem:[%s2098_s3 + $0x8] sm:$0xff] }
  0x33   : > { %552 = vmatprep.mubr.bf16.mxu0 %v1554_v48  ;;  %612 = vmatprep.mubr.bf16.mxu1 %v1554_v48  ;;  %s1301_s30 = smul.u32 48, %s2104_s18  ;;  %v359_v60 = vld [vmem:[%s2098_s3] sm:$0xff]  ;;  %v361_v61 = vld [vmem:[%s2098_s3 + $0x10] sm:$0xff]  ;;  %v362_v63 = vld [vmem:[%s2098_s3 + $0x18] sm:$0xff] }
  0x34   : > { %1328 = vset.pattern.permute.xlu0 %v1554_v48  ;;  %1329 = vset.pattern.permute.xlu1 %v1554_v48  ;;  %v363_v0 = vld [vmem:[%s2098_s3 + $0x20] sm:$0xff]  ;;  %v1332_v1 = vld [vmem:[%s2097_s2 + $0x8] sm:$0xff]   ;;  %v1333_v2 = vld [vmem:[%s2097_s2 + $0x38] sm:$0xff]   ;;  %s1302_s15 = smul.u32 384, %s2104_s18 }
  0x35   : > { %s326_s7 = scalar_lea.vmem %s2095_s0, %s1301_s30  ;;  %377 = vperm.xlu0 %1328, %v359_v60   ;;  %387 = vperm.xlu1 %1329, %v361_v61   ;;  %v364_v3 = vld [vmem:[%s2098_s3 + $0x28] sm:$0xff]  ;;  %v365_v4 = vld [vmem:[%s2098_s3 + $0x30] sm:$0xff]  ;;  %v366_v5 = vld [vmem:[%s2098_s3 + $0x38] sm:$0xff] }
  0x36   : > { %v351_v49 = vld [vmem:[%s326_s7 + $0x8] sm:$0xff]  ;;  %v354_v50 = vld [vmem:[%s326_s7 + $0x20] sm:$0xff]  ;;  %v353_v53 = vld [vmem:[%s326_s7 + $0x18] sm:$0xff]  ;;  %s1923_s23 = scalar_lea.vmem %s2099_s4, %s1302_s15 }
  0x37   : > { %v350_v51 = vld [vmem:[%s326_s7] sm:$0xff]  ;;  %v357_v52 = vpack.c.bf16 %v354_v50, %v351_v49  ;;  %v352_v54 = vld [vmem:[%s326_s7 + $0x10] sm:$0xff]  ;;  %v355_v55 = vld [vmem:[%s326_s7 + $0x28] sm:$0xff] }
  0x38   : > { %v356_v56 = vpack.c.bf16 %v353_v53, %v350_v51  ;;  %v358_v58 = vpack.c.bf16 %v355_v55, %v352_v54  ;;  %v367_v6 = vld [vmem:[%s2098_s3 + $0x40] sm:$0xff]  ;;  %v1334_v7 = vld [vmem:[%s2097_s2 + $0x10] sm:$0xff]   ;;  %v368_v8 = vld [vmem:[%s2098_s3 + $0x48] sm:$0xff] }
  0x39   : > { %534 = vmatprep.subr.bf16.mxu0 %v357_v52  ;;  %1297 = vmatprep.subr.bf16.mxu1 %v357_v52  ;;  %v369_v9 = vld [vmem:[%s2098_s3 + $0x50] sm:$0xff]  ;;  %v370_v10 = vld [vmem:[%s2098_s3 + $0x58] sm:$0xff]  ;;  %v371_v11 = vld [vmem:[%s2098_s3 + $0x60] sm:$0xff] }
  0x3a   : > { %535 = vmatpush1.bf16.msra.mxu0 %v356_v56  ;;  %1298 = vmatpush1.bf16.msra.mxu1 %v356_v56  ;;  %v1335_v12 = vld [vmem:[%s2097_s2 + $0x18] sm:$0xff]   ;;  %v372_v13 = vld [vmem:[%s2098_s3 + $0x68] sm:$0xff]  ;;  %v1336_v14 = vld [vmem:[%s2097_s2 + $0x20] sm:$0xff]  }
  0x3b   : > { %1279 = vmatprep.subr.bf16.mxu1 %v358_v58  ;;  %382 = vperm.xlu0 %1328, %v360_v62   ;;  %v373_v15 = vld [vmem:[%s2098_s3 + $0x70] sm:$0xff]  ;;  %v374_v16 = vld [vmem:[%s2098_s3 + $0x78] sm:$0xff]  ;;  %v1337_v17 = vld [vmem:[%s2097_s2 + $0x28] sm:$0xff]  }
  0x3c   : > { %392 = vperm.xlu1 %1329, %v362_v63  }
  0x3d   : > { %1251 = vmatmul.mubr.msk.bf16.vlgmr.msra.gmra.mxu0 %vm495_vm0, %v1330_v57  ;;  %1257 = vmatmul.mubr.msk.bf16.vlgmr.msra.gmra.mxu1 %vm495_vm0, %v1736_v59 }
  0x3e   : > { %1280 = vmatpush3.bf16.msra.mxu1 %v358_v58  ;;  %562 = vmatprep.mubr.bf16.mxu0 %v1554_v48 }
  0x3f   : > { %622 = vmatprep.mubr.bf16.mxu1 %v1554_v48  ;;  %397 = vperm.xlu0 %1328, %v363_v0  }
  0x40   : > { %402 = vperm.xlu1 %1329, %v364_v3  }
  0x43   : > { %407 = vperm.xlu0 %1328, %v365_v4  }
  0x44   : > { %412 = vperm.xlu1 %1329, %v366_v5  }
  0x45   : > { %1252 = vmatmul.mubr.msk.bf16.gmra.mxu0 %vm495_vm0, %v1332_v1  ;;  %1258 = vmatmul.mubr.msk.bf16.gmra.mxu1 %vm495_vm0, %v1333_v2 }
  0x46   : > { %572 = vmatprep.mubr.bf16.mxu0 %v1554_v48  ;;  %1281 = vmatprep.mubr.msk.bf16.mxu1 %vm495_vm0, %v1330_v57 }
  0x47   : > { %417 = vperm.xlu0 %1328, %v367_v6  }
  0x48   : > { %422 = vperm.xlu1 %1329, %v368_v8  }
  0x4b   : > { %427 = vperm.xlu0 %1328, %v369_v9  }
  0x4c   : > { %432 = vperm.xlu1 %1329, %v370_v10  }
  0x4d   : > { %1253 = vmatmul.mubr.msk.bf16.gmra.mxu0 %vm495_vm0, %v1334_v7  ;;  %1282 = vmatmul.mubr.msk.bf16.vlgmr.msra.gmra.mxu1 %vm495_vm0, %v1332_v1 }
  0x4e   : > { %582 = vmatprep.mubr.bf16.mxu0 %v1554_v48  ;;  %1285 = vmatprep.mubr.msk.bf16.mxu1 %vm495_vm0, %v1334_v7 }
  0x4f   : > { %437 = vperm.xlu0 %1328, %v371_v11  }
  0x50   : > { %442 = vperm.xlu1 %1329, %v372_v13  }
  0x53   : > { %447 = vperm.xlu0 %1328, %v373_v15  }
  0x54   : > { %452 = vperm.xlu1 %1329, %v374_v16  }
  0x55   : > { %1254 = vmatmul.mubr.msk.bf16.gmra.mxu0 %vm495_vm0, %v1335_v12  ;;  %1286 = vmatmul.mubr.msk.bf16.gmra.mxu1 %vm495_vm0, %v1335_v12 }
  0x56   : > { %592 = vmatprep.mubr.bf16.mxu0 %v1554_v48  ;;  %1289 = vmatprep.mubr.msk.bf16.mxu1 %vm495_vm0, %v1336_v14 }
  0x5d   : > { %1255 = vmatmul.mubr.msk.bf16.gmra.mxu0 %vm495_vm0, %v1336_v14  ;;  %1290 = vmatmul.mubr.msk.bf16.gmra.mxu1 %vm495_vm0, %v1337_v17 }
  0x5e   : > { %602 = vmatprep.mubr.bf16.mxu0 %v1554_v48  ;;  %1293 = vmatprep.mubr.msk.bf16.mxu1 %vm495_vm0, %v1736_v59 }
  0x65   : > { %1256 = vmatmul.mubr.msk.bf16.gmra.mxu0 %vm495_vm0, %v1337_v17  ;;  %1294 = vmatmul.mubr.msk.bf16.gmra.mxu1 %vm495_vm0, %v1333_v2 }
  0xb0   : > { %v1828_v18 = vpop.permute.xlu0 %377  ;;  %v1830_v19 = vpop.permute.xlu1 %387 }
  0xb6   : > { %v1832_v20 = vpop.permute.xlu0 %382 }
  0xb7   : > { %v1834_v21 = vpop.permute.xlu1 %392 }
  0xba   : > { %v1836_v22 = vpop.permute.xlu0 %397 }
  0xbb   : > { %v1838_v23 = vpop.permute.xlu1 %402 }
  0xbe   : > { %v1840_v24 = vpop.permute.xlu0 %407 }
  0xbf   : > { %v1842_v25 = vpop.permute.xlu1 %412 }
  0xc2   : > { %v1844_v26 = vpop.permute.xlu0 %417 }
  0xc3   : > { %v1846_v27 = vpop.permute.xlu1 %422 }
  0xc6   : > { %v1848_v28 = vpop.permute.xlu0 %427 }
  0xc7   : > { %v1850_v29 = vpop.permute.xlu1 %432 }
  0xca   : > { %v1852_v30 = vpop.permute.xlu0 %437 }
  0xcb   : > { %v1858_v41 = vpop.permute.xlu1 %442 }
  0xce   : > { %v1860_v48 = vpop.permute.xlu0 %447 }
  0xcf   : > { %v1869_v9 = vpop.permute.xlu1 %452 }
  0xfd   : > { %v554_v31 = vpop.f32.mrf.mxu0  ;;  %v614_v32 = vpop.f32.mrf.mxu1 }
  0xfe   : > { %v555_v33 = vadd.f32 %v554_v31, %v1828_v18  ;;  %v615_v34 = vadd.f32 %v614_v32, %v1852_v30 }
  0xff   : > { %v556_v35 = vpop.f32.mrf.mxu0  ;;  %v616_v36 = vpop.f32.mrf.mxu1 }
 0x100   : > { %v778_v37 = vsub.f32 0.0, %v555_v33  ;;  %v814_v38 = vsub.f32 0.0, %v615_v34  ;;  %v557_v39 = vadd.f32 %v556_v35, %v1828_v18  ;;  %v617_v40 = vadd.f32 %v616_v36, %v1852_v30 }
 0x101   : > { %v558_v42 = vpop.f32.mrf.mxu0  ;;  %v618_v43 = vpop.f32.mrf.mxu1 }
 0x102   : > { %v826_v44 = vmul.f32 1.442695, %v778_v37  ;;  %v898_v45 = vmul.f32 1.442695, %v814_v38  ;;  %v779_v46 = vsub.f32 0.0, %v557_v39  ;;  %v815_v47 = vsub.f32 0.0, %v617_v40 }
 0x103   : > { %v559_v49 = vadd.f32 %v558_v42, %v1832_v20  ;;  %v619_v50 = vadd.f32 %v618_v43, %v1858_v41  ;;  %v560_v51 = vpop.f32.mrf.mxu0  ;;  %v620_v52 = vpop.f32.mrf.mxu1 }
 0x104   : > { %1338 = vpow2.f32 %v826_v44  ;;  %v828_v53 = vmul.f32 1.442695, %v779_v46  ;;  %v900_v54 = vmul.f32 1.442695, %v815_v47  ;;  %v561_v55 = vadd.f32 %v560_v51, %v1832_v20 }
 0x105   : > { %1340 = vpow2.f32 %v898_v45  ;;  %v781_v56 = vsub.f32 0.0, %v559_v49  ;;  %v817_v57 = vsub.f32 0.0, %v619_v50  ;;  %v621_v58 = vadd.f32 %v620_v52, %v1858_v41  ;;  %v564_v59 = vpop.f32.mrf.mxu0  ;;  %v624_v60 = vpop.f32.mrf.mxu1 }
 0x106   : > { %1342 = vpow2.f32 %v828_v53  ;;  %v782_v61 = vsub.f32 0.0, %v561_v55  ;;  %v565_v62 = vadd.f32 %v564_v59, %v1830_v19  ;;  %v625_v63 = vadd.f32 %v624_v60, %v1860_v48 }
 0x107   : > { %1344 = vpow2.f32 %v900_v54  ;;  %v832_v0 = vmul.f32 1.442695, %v781_v56  ;;  %v904_v1 = vmul.f32 1.442695, %v817_v57  ;;  %v818_v2 = vsub.f32 0.0, %v621_v58  ;;  %v566_v3 = vpop.f32.mrf.mxu0  ;;  %v626_v4 = vpop.f32.mrf.mxu1 }
 0x108   : > { %v834_v5 = vmul.f32 1.442695, %v782_v61  ;;  %v784_v6 = vsub.f32 0.0, %v565_v62  ;;  %v820_v7 = vsub.f32 0.0, %v625_v63  ;;  %v567_v8 = vadd.f32 %v566_v3, %v1830_v19 }
 0x109   : > { %1346 = vpow2.f32 %v832_v0  ;;  %v906_v10 = vmul.f32 1.442695, %v818_v2  ;;  %v627_v11 = vadd.f32 %v626_v4, %v1860_v48  ;;  %v568_v12 = vpop.f32.mrf.mxu0  ;;  %v628_v13 = vpop.f32.mrf.mxu1 }
 0x10a   : > { %1348 = vpow2.f32 %v904_v1  ;;  %v838_v14 = vmul.f32 1.442695, %v784_v6  ;;  %v910_v15 = vmul.f32 1.442695, %v820_v7  ;;  %v785_v16 = vsub.f32 0.0, %v567_v8 }
 0x10b   : > { %1350 = vpow2.f32 %v834_v5  ;;  %v821_v17 = vsub.f32 0.0, %v627_v11  ;;  %v569_v31 = vadd.f32 %v568_v12, %v1834_v21  ;;  %v629_v32 = vadd.f32 %v628_v13, %v1869_v9  ;;  %v570_v33 = vpop.f32.mrf.mxu0  ;;  %v630_v34 = vpop.f32.mrf.mxu1 }
 0x10c   : > { %1352 = vpow2.f32 %v906_v10  ;;  %v840_v35 = vmul.f32 1.442695, %v785_v16  ;;  %v571_v36 = vadd.f32 %v570_v33, %v1834_v21  ;;  %v631_v37 = vadd.f32 %v630_v34, %v1869_v9 }
 0x10d   : > { %1354 = vpow2.f32 %v838_v14  ;;  %v912_v38 = vmul.f32 1.442695, %v821_v17  ;;  %v787_v39 = vsub.f32 0.0, %v569_v31  ;;  %v823_v40 = vsub.f32 0.0, %v629_v32  ;;  %v574_v42 = vpop.f32.mrf.mxu0  ;;  %v1283_v43 = vpop.f32.mrf.mxu1 }
 0x10e   : > { %1356 = vpow2.f32 %v910_v15  ;;  %v788_v44 = vsub.f32 0.0, %v571_v36  ;;  %v575_v45 = vadd.f32 %v574_v42, %v1836_v22  ;;  %v676_v49 = vadd.f32 %v1283_v43, %v1830_v19 }
 0x10f   : > { %1358 = vpow2.f32 %v840_v35  ;;  %v844_v46 = vmul.f32 1.442695, %v787_v39  ;;  %v916_v47 = vmul.f32 1.442695, %v823_v40  ;;  %v576_v50 = vpop.f32.mrf.mxu0  ;;  %v667_v51 = vpop.f32.mrf.mxu1  ;;  %v824_v53 = vsub.f32 0.0, %v631_v37 }
 0x110   : > { %1360 = vpow2.f32 %v912_v38  ;;  %v846_v52 = vmul.f32 1.442695, %v788_v44  ;;  %v577_v55 = vadd.f32 %v576_v50, %v1836_v22  ;;  %v790_v60 = vsub.f32 0.0, %v575_v45 }
 0x111   : > { %v1339_v54 = vpop.eup %1338  ;;  %1362 = vpow2.f32 %v844_v46  ;;  %v578_v56 = vpop.f32.mrf.mxu0  ;;  %v668_v61 = vadd.f32 %v667_v51, %v1828_v18  ;;  %v786_v63 = vsub.f32 0.0, %v676_v49  ;;  %v918_v3 = vmul.f32 1.442695, %v824_v53 }
 0x112   : > { %v1284_v57 = vpop.f32.mrf.mxu1  ;;  %v1341_v58 = vpop.eup %1340  ;;  %v922_v59 = vadd.f32 1.0, %v1339_v54  ;;  %1364 = vpow2.f32 %v916_v47  ;;  %v579_v4 = vadd.f32 %v578_v56, %v1838_v23  ;;  %v791_v7 = vsub.f32 0.0, %v577_v55 }
 0x113   : > { %v1343_v62 = vpop.eup %1342  ;;  %v958_v19 = vadd.f32 1.0, %v1341_v58  ;;  %1366 = vpow2.f32 %v846_v52  ;;  %v580_v0 = vpop.f32.mrf.mxu0  ;;  %v1882_v18 = vmul.f32 1.442695, %v790_v60  ;;  %v780_v11 = vsub.f32 0.0, %v668_v61 }
 0x114   : > { %v1345_v1 = vpop.eup %1344  ;;  %1368 = vrcp.f32 %v922_v59  ;;  %v923_v2 = vadd.f32 1.0, %v1343_v62  ;;  %v670_v5 = vpop.f32.mrf.mxu1  ;;  %v1884_v14 = vmul.f32 1.442695, %v786_v63  ;;  %v679_v15 = vadd.f32 %v1284_v57, %v1834_v21  ;;  %v730_v62 = vld [vmem:[%s1902_s20] sm:$0xff] }
 0x115   : > { %1370 = vrcp.f32 %v958_v19  ;;  %v959_v6 = vadd.f32 1.0, %v1345_v1  ;;  %v584_v8 = vpop.f32.mrf.mxu0  ;;  %v793_v31 = vsub.f32 0.0, %v579_v4  ;;  %v581_v32 = vadd.f32 %v580_v0, %v1838_v23  ;;  %v766_v1 = vld [vmem:[%s1902_s20 + $0x120] sm:$0xff] }
 0x116   : > { %v1347_v10 = vpop.eup %1346  ;;  %1372 = vrcp.f32 %v923_v2  ;;  %v1287_v33 = vpop.f32.mrf.mxu1  ;;  %v1890_v36 = vmul.f32 1.442695, %v791_v7  ;;  %v671_v37 = vadd.f32 %v670_v5, %v1832_v20  ;;  %v1893_v40 = vmul.f32 1.442695, %v780_v11  ;;  %v731_v7 = vld [vmem:[%s1902_s20 + $0x8] sm:$0xff] }
 0x117   : > { %v1349_v12 = vpop.eup %1348  ;;  %1374 = vrcp.f32 %v959_v6  ;;  %v925_v13 = vadd.f32 1.0, %v1347_v10  ;;  %v586_v38 = vpop.f32.mrf.mxu0  ;;  %v585_v42 = vadd.f32 %v584_v8, %v1840_v24  ;;  %v789_v45 = vsub.f32 0.0, %v679_v15 }
 0x118   : > { %v1351_v16 = vpop.eup %1350  ;;  %v961_v17 = vadd.f32 1.0, %v1349_v12  ;;  %1376 = vpow2.f32 %v918_v3  ;;  %v692_v46 = vadd.f32 %v1287_v33, %v1840_v24  ;;  %v1897_v50 = vmul.f32 1.442695, %v793_v31  ;;  %v683_v51 = vpop.f32.mrf.mxu1 }
 0x119   : > { %v1353_v34 = vpop.eup %1352  ;;  %1378 = vrcp.f32 %v925_v13  ;;  %v926_v35 = vadd.f32 1.0, %v1351_v16  ;;  %v794_v20 = vsub.f32 0.0, %v581_v32  ;;  %v783_v54 = vsub.f32 0.0, %v671_v37  ;;  %v588_v56 = vpop.f32.mrf.mxu0  ;;  %v767_v13 = vld [vmem:[%s1902_s20 + $0x128] sm:$0xff] }
 0x11a   : > { %v1355_v39 = vpop.eup %1354  ;;  %1380 = vrcp.f32 %v961_v17  ;;  %v962_v21 = vadd.f32 1.0, %v1353_v34  ;;  %v587_v55 = vadd.f32 %v586_v38, %v1840_v24  ;;  %v796_v59 = vsub.f32 0.0, %v585_v42  ;;  %v1288_v5 = vpop.f32.mrf.mxu1 }
 0x11b   : > { %v1357_v43 = vpop.eup %1356  ;;  %1382 = vrcp.f32 %v926_v35  ;;  %v928_v44 = vadd.f32 1.0, %v1355_v39  ;;  %v798_v60 = vsub.f32 0.0, %v692_v46  ;;  %v1905_v63 = vmul.f32 1.442695, %v789_v45  ;;  %v590_v34 = vpop.f32.mrf.mxu0  ;;  %v733_v39 = vld [vmem:[%s1902_s20 + $0x18] sm:$0xff] }
 0x11c   : > { %v1359_v47 = vpop.eup %1358  ;;  %1384 = vrcp.f32 %v962_v21  ;;  %v964_v49 = vadd.f32 1.0, %v1357_v43  ;;  %v684_v24 = vadd.f32 %v683_v51, %v1836_v22  ;;  %v1909_v3 = vmul.f32 1.442695, %v794_v20  ;;  %v686_v42 = vpop.f32.mrf.mxu1  ;;  %v769_v46 = vld [vmem:[%s1902_s20 + $0x138] sm:$0xff]  ;;  %v734_v51 = vld [vmem:[%s1902_s20 + $0x20] sm:$0xff] }
 0x11d   : > { %v1361_v52 = vpop.eup %1360  ;;  %1386 = vrcp.f32 %v928_v44  ;;  %v929_v53 = vadd.f32 1.0, %v1359_v47  ;;  %v589_v4 = vadd.f32 %v588_v56, %v1842_v25  ;;  %v1913_v10 = vmul.f32 1.442695, %v783_v54  ;;  %v770_v56 = vld [vmem:[%s1902_s20 + $0x140] sm:$0xff] }
 0x11e   : > { %v1363_v57 = vpop.eup %1362  ;;  %1388 = vrcp.f32 %v964_v49  ;;  %v965_v58 = vadd.f32 1.0, %v1361_v52  ;;  %v797_v11 = vsub.f32 0.0, %v587_v55  ;;  %v1916_v15 = vmul.f32 1.442695, %v796_v59 }
 0x11f   : > { %v1365_v61 = vpop.eup %1364  ;;  %1390 = vrcp.f32 %v929_v53  ;;  %v931_v19 = vadd.f32 1.0, %v1363_v57  ;;  %v1918_v16 = vmul.f32 1.442695, %v798_v60  ;;  %v792_v32 = vsub.f32 0.0, %v684_v24  ;;  %v594_v57 = vpop.f32.mrf.mxu0  ;;  %v736_v60 = vld [vmem:[%s1902_s20 + $0x30] sm:$0xff] }
 0x120   : > { %v1367_v0 = vpop.eup %1366  ;;  %1392 = vrcp.f32 %v965_v58  ;;  %v967_v2 = vadd.f32 1.0, %v1365_v61  ;;  %v695_v33 = vadd.f32 %v1288_v5, %v1842_v25  ;;  %v799_v21 = vsub.f32 0.0, %v589_v4  ;;  %v737_v5 = vld [vmem:[%s1902_s20 + $0x38] sm:$0xff] }
 0x121   : > { %v1369_v6 = vpop.eup %1368  ;;  %1394 = vrcp.f32 %v931_v19  ;;  %v932_v8 = vadd.f32 1.0, %v1367_v0  ;;  %v1930_v47 = vmul.f32 1.442695, %v797_v11  ;;  %v772_v0 = vld [vmem:[%s1902_s20 + $0x150] sm:$0xff] }
 0x122   : > { %v1371_v12 = vpop.eup %1370  ;;  %v1018_v22 = vmul.f32 %v1369_v6, %v730_v62  ;;  %1396 = vrcp.f32 %v967_v2  ;;  %v1941_v61 = vmul.f32 1.442695, %v799_v21 }
 0x123   : > { %v1373_v17 = vpop.eup %1372  ;;  %v1054_v31 = vmul.f32 %v1371_v12, %v766_v1  ;;  %1398 = vrcp.f32 %v932_v8  ;;  %v773_v12 = vld [vmem:[%s1902_s20 + $0x158] sm:$0xff] }
 0x124   : > { %v1375_v35 = vpop.eup %1374  ;;  %v1066_v37 = vadd.f32 %v1018_v22, %v730_v62  ;;  %v1019_v38 = vmul.f32 %v1373_v17, %v731_v7  ;;  %1400 = vpow2.f32 %v1882_v18  ;;  %v591_v18 = vadd.f32 %v590_v34, %v1842_v25  ;;  %v1291_v25 = vpop.f32.mrf.mxu1 }
 0x125   : > { %v1377_v43 = vpop.eup %1376  ;;  %v1102_v44 = vadd.f32 %v1054_v31, %v766_v1  ;;  %v1055_v45 = vmul.f32 %v1375_v35, %v767_v13  ;;  %1402 = vpow2.f32 %v1884_v14  ;;  %v801_v14 = vsub.f32 0.0, %v695_v33  ;;  %v739_v31 = vld [vmem:[%s1902_s20 + $0x48] sm:$0xff] }
 0x126   : > { %v1379_v49 = vpop.eup %1378  ;;  %1114 = vst [vmem:[%s1923_s23] sm:$0xff] %v1066_v37  ;;  %v1067_v20 = vadd.f32 %v1019_v38, %v731_v7  ;;  %v968_v52 = vadd.f32 1.0, %v1377_v43  ;;  %1404 = vpow2.f32 %v1890_v36  ;;  %v854_v36 = vmul.f32 1.442695, %v792_v32  ;;  %v699_v32 = vpop.f32.mrf.mxu1  ;;  %v775_v35 = vld [vmem:[%s1902_s20 + $0x168] sm:$0xff] }
 0x127   : > { %v1381_v53 = vpop.eup %1380  ;;  %1150 = vst [vmem:[%s1923_s23 + $0x120] sm:$0xff] %v1102_v44  ;;  %v1103_v54 = vadd.f32 %v1055_v45, %v767_v13  ;;  %v1021_v55 = vmul.f32 %v1379_v49, %v733_v39  ;;  %1406 = vpow2.f32 %v1893_v40  ;;  %v1947_v40 = vadd.f32 %v686_v42, %v1838_v23 }
 0x128   : > { %v1383_v58 = vpop.eup %1382  ;;  %1115 = vst [vmem:[%s1923_s23 + $0x8] sm:$0xff] %v1067_v20  ;;  %v1057_v59 = vmul.f32 %v1381_v53, %v769_v46  ;;  %1408 = vrcp.f32 %v968_v52  ;;  %v800_v6 = vsub.f32 0.0, %v591_v18  ;;  %v872_v23 = vmul.f32 1.442695, %v801_v14  ;;  %v1292_v52 = vpop.f32.mrf.mxu1 }
 0x129   : > { %v1385_v62 = vpop.eup %1384  ;;  %1151 = vst [vmem:[%s1923_s23 + $0x128] sm:$0xff] %v1103_v54  ;;  %v1069_v19 = vadd.f32 %v1021_v55, %v733_v39  ;;  %v1022_v24 = vmul.f32 %v1383_v58, %v734_v51  ;;  %1410 = vpow2.f32 %v1897_v50  ;;  %v596_v50 = vpop.f32.mrf.mxu0  ;;  %v708_v37 = vadd.f32 %v1291_v25, %v1848_v28 }
 0x12a   : > { %v1387_v1 = vpop.eup %1386  ;;  %v1105_v2 = vadd.f32 %v1057_v59, %v769_v46  ;;  %v1058_v4 = vmul.f32 %v1385_v62, %v770_v56  ;;  %1412 = vpow2.f32 %v1905_v63  ;;  %v1958_v63 = vadd.f32 %v594_v57, %v1844_v26 }
 0x12b   : > { %v1389_v7 = vpop.eup %1388  ;;  %1117 = vst [vmem:[%s1923_s23 + $0x18] sm:$0xff] %v1069_v19  ;;  %v1070_v8 = vadd.f32 %v1022_v24, %v734_v51  ;;  %v1024_v11 = vmul.f32 %v1387_v1, %v736_v60  ;;  %1414 = vpow2.f32 %v1909_v3  ;;  %v870_v42 = vmul.f32 1.442695, %v800_v6  ;;  %v598_v46 = vpop.f32.mrf.mxu0 }
 0x12c   : > { %v1391_v22 = vpop.eup %1390  ;;  %1153 = vst [vmem:[%s1923_s23 + $0x138] sm:$0xff] %v1105_v2  ;;  %v1106_v13 = vadd.f32 %v1058_v4, %v770_v56  ;;  %v1060_v17 = vmul.f32 %v1389_v7, %v772_v0  ;;  %1416 = vpow2.f32 %v1913_v10  ;;  %v740_v10 = vld [vmem:[%s1902_s20 + $0x50] sm:$0xff]  ;;  %v597_v57 = vadd.f32 %v596_v50, %v1844_v26 }
 0x12d   : > { %v1393_v33 = vpop.eup %1392  ;;  %1118 = vst [vmem:[%s1923_s23 + $0x20] sm:$0xff] %v1070_v8  ;;  %v1072_v34 = vadd.f32 %v1024_v11, %v736_v60  ;;  %v1025_v3 = vmul.f32 %v1391_v22, %v737_v5  ;;  %1418 = vpow2.f32 %v1916_v15  ;;  %v795_v15 = vsub.f32 0.0, %v1947_v40  ;;  %v776_v60 = vld [vmem:[%s1902_s20 + $0x170] sm:$0xff]  ;;  %v600_v62 = vpop.f32.mrf.mxu0 }
 0x12e   : > { %v1395_v38 = vpop.eup %1394  ;;  %1154 = vst [vmem:[%s1923_s23 + $0x140] sm:$0xff] %v1106_v13  ;;  %v1108_v39 = vadd.f32 %v1060_v17, %v772_v0  ;;  %v1061_v21 = vmul.f32 %v1393_v33, %v773_v12  ;;  %1420 = vpow2.f32 %v1918_v16  ;;  %v802_v16 = vsub.f32 0.0, %v1958_v63  ;;  %v702_v0 = vpop.f32.mrf.mxu1 }
 0x12f   : > { %v1397_v43 = vpop.eup %1396  ;;  %1120 = vst [vmem:[%s1923_s23 + $0x30] sm:$0xff] %v1072_v34  ;;  %v1073_v44 = vadd.f32 %v1025_v3, %v737_v5  ;;  %v1027_v45 = vmul.f32 %v1395_v38, %v739_v31  ;;  %1422 = vpow2.f32 %v1930_v47  ;;  %v810_v47 = vsub.f32 0.0, %v708_v37 }
 0x130   : > { %v1399_v49 = vpop.eup %1398  ;;  %1156 = vst [vmem:[%s1923_s23 + $0x150] sm:$0xff] %v1108_v39  ;;  %v1109_v20 = vadd.f32 %v1061_v21, %v773_v12  ;;  %v1063_v51 = vmul.f32 %v1397_v43, %v775_v35  ;;  %1424 = vpow2.f32 %v854_v36  ;;  %v700_v25 = vadd.f32 %v699_v32, %v1844_v26  ;;  %v604_v12 = vpop.f32.mrf.mxu0 }
 0x131   : > { %v1401_v18 = vpop.eup %1400  ;;  %1121 = vst [vmem:[%s1923_s23 + $0x38] sm:$0xff] %v1073_v44  ;;  %v1075_v53 = vadd.f32 %v1027_v45, %v739_v31  ;;  %v1028_v54 = vmul.f32 %v1399_v49, %v740_v10  ;;  %1426 = vpow2.f32 %v1941_v61  ;;  %v860_v24 = vmul.f32 1.442695, %v795_v15  ;;  %v1295_v17 = vpop.f32.mrf.mxu1 }
 0x132   : > { %v1403_v55 = vpop.eup %1402  ;;  %1157 = vst [vmem:[%s1923_s23 + $0x158] sm:$0xff] %v1109_v20  ;;  %v1111_v56 = vadd.f32 %v1063_v51, %v775_v35  ;;  %v934_v14 = vadd.f32 1.0, %v1401_v18  ;;  %1428 = vpow2.f32 %v872_v23  ;;  %v1981_v5 = vmul.f32 1.442695, %v802_v16 }
 0x133   : > { %v1405_v58 = vpop.eup %1404  ;;  %1123 = vst [vmem:[%s1923_s23 + $0x48] sm:$0xff] %v1075_v53  ;;  %v1076_v59 = vadd.f32 %v1028_v54, %v740_v10  ;;  %v930_v36 = vadd.f32 1.0, %v1403_v55  ;;  %1430 = vpow2.f32 %v870_v42  ;;  %v803_v6 = vsub.f32 0.0, %v597_v57  ;;  %v606_v42 = vpop.f32.mrf.mxu0  ;;  %v738_v57 = vld [vmem:[%s1902_s20 + $0x40] sm:$0xff] }
 0x134   : > { %v1407_v61 = vpop.eup %1406  ;;  %1159 = vst [vmem:[%s1923_s23 + $0x168] sm:$0xff] %v1111_v56  ;;  %1432 = vrcp.f32 %v934_v14  ;;  %v935_v19 = vadd.f32 1.0, %v1405_v58  ;;  %v1983_v8 = vmul.f32 1.442695, %v810_v47  ;;  %v804_v11 = vsub.f32 0.0, %v700_v25  ;;  %v742_v47 = vld [vmem:[%s1902_s20 + $0x60] sm:$0xff] }
 0x135   : > { %v1409_v40 = vpop.eup %1408  ;;  %1124 = vst [vmem:[%s1923_s23 + $0x50] sm:$0xff] %v1076_v59  ;;  %1434 = vrcp.f32 %v930_v36  ;;  %v924_v1 = vadd.f32 1.0, %v1407_v61  ;;  %v599_v13 = vadd.f32 %v598_v46, %v1846_v27  ;;  %v711_v32 = vadd.f32 %v1292_v52, %v1850_v29  ;;  %v715_v46 = vpop.f32.mrf.mxu1 }
 0x136   : > { %v1411_v2 = vpop.eup %1410  ;;  %v1064_v4 = vmul.f32 %v1409_v40, %v776_v60  ;;  %1436 = vrcp.f32 %v935_v19  ;;  %v601_v33 = vadd.f32 %v600_v62, %v1846_v27  ;;  %v1989_v35 = vmul.f32 1.442695, %v803_v6  ;;  %v608_v36 = vpop.f32.mrf.mxu0  ;;  %v743_v62 = vld [vmem:[%s1902_s20 + $0x68] sm:$0xff]  ;;  %v732_v40 = vld [vmem:[%s1902_s20 + $0x10] sm:$0xff] }
 0x137   : > { %v1413_v7 = vpop.eup %1412  ;;  %1438 = vrcp.f32 %v924_v1  ;;  %v937_v26 = vadd.f32 1.0, %v1411_v2  ;;  %v703_v37 = vadd.f32 %v702_v0, %v1846_v27  ;;  %v1992_v21 = vmul.f32 1.442695, %v804_v11 }
 0x138   : > { %v1415_v23 = vpop.eup %1414  ;;  %v1112_v50 = vadd.f32 %v1064_v4, %v776_v60  ;;  %v933_v22 = vadd.f32 1.0, %v1413_v7  ;;  %1440 = vpow2.f32 %v860_v24  ;;  %v605_v10 = vadd.f32 %v604_v12, %v1848_v28 }
 0x139   : > { %v1417_v31 = vpop.eup %1416  ;;  %1442 = vrcp.f32 %v937_v26  ;;  %v938_v63 = vadd.f32 1.0, %v1415_v23  ;;  %v805_v45 = vsub.f32 0.0, %v599_v13  ;;  %v724_v15 = vadd.f32 %v1295_v17, %v1860_v48  ;;  %v1296_v26 = vpop.f32.mrf.mxu1 }
 0x13a   : > { %v1419_v34 = vpop.eup %1418  ;;  %1160 = vst [vmem:[%s1923_s23 + $0x170] sm:$0xff] %v1112_v50  ;;  %1444 = vrcp.f32 %v933_v22  ;;  %v927_v3 = vadd.f32 1.0, %v1417_v31  ;;  %v813_v20 = vsub.f32 0.0, %v711_v32  ;;  %v806_v51 = vsub.f32 0.0, %v601_v33  ;;  %v745_v50 = vld [vmem:[%s1902_s20 + $0x78] sm:$0xff]  ;;  %v610_v13 = vpop.f32.mrf.mxu0 }
 0x13b   : > { %v1421_v38 = vpop.eup %1420  ;;  %1446 = vrcp.f32 %v938_v63  ;;  %v940_v39 = vadd.f32 1.0, %v1419_v34  ;;  %v807_v18 = vsub.f32 0.0, %v703_v37  ;;  %v1997_v53 = vadd.f32 %v606_v42, %v1848_v28  ;;  %v741_v32 = vld [vmem:[%s1902_s20 + $0x58] sm:$0xff]  ;;  %v746_v37 = vld [vmem:[%s1902_s20 + $0x80] sm:$0xff] }
 0x13c   : > { %v1423_v43 = vpop.eup %1422  ;;  %1448 = vrcp.f32 %v927_v3  ;;  %v942_v44 = vadd.f32 1.0, %v1421_v38  ;;  %v808_v48 = vsub.f32 0.0, %v605_v10  ;;  %v716_v56 = vadd.f32 %v715_v46, %v1852_v30 }
 0x13d   : > { %v1425_v49 = vpop.eup %1424  ;;  %1450 = vrcp.f32 %v940_v39  ;;  %v941_v27 = vadd.f32 1.0, %v1423_v43  ;;  %v880_v59 = vmul.f32 1.442695, %v805_v45  ;;  %v822_v60 = vsub.f32 0.0, %v724_v15  ;;  %v748_v15 = vld [vmem:[%s1902_s20 + $0x90] sm:$0xff] }
 0x13e   : > { %v1427_v16 = vpop.eup %1426  ;;  %1452 = vrcp.f32 %v942_v44  ;;  %v936_v52 = vadd.f32 1.0, %v1425_v49  ;;  %v896_v61 = vmul.f32 1.442695, %v813_v20  ;;  %v2003_v19 = vmul.f32 1.442695, %v806_v51  ;;  %v750_v20 = vld [vmem:[%s1902_s20 + $0xa0] sm:$0xff] }
 0x13f   : > { %v1429_v54 = vpop.eup %1428  ;;  %1454 = vrcp.f32 %v941_v27  ;;  %v943_v55 = vadd.f32 1.0, %v1427_v16  ;;  %v2006_v30 = vmul.f32 1.442695, %v807_v18  ;;  %v809_v1 = vsub.f32 0.0, %v1997_v53  ;;  %v749_v18 = vld [vmem:[%s1902_s20 + $0x98] sm:$0xff] }
 0x140   : > { %v1431_v14 = vpop.eup %1430  ;;  %1456 = vrcp.f32 %v936_v52  ;;  %v945_v58 = vadd.f32 1.0, %v1429_v54  ;;  %v2009_v6 = vmul.f32 1.442695, %v808_v48  ;;  %v816_v7 = vsub.f32 0.0, %v716_v56  ;;  %v744_v48 = vld [vmem:[%s1902_s20 + $0x70] sm:$0xff] }
 0x141   : > { %v1433_v25 = vpop.eup %1432  ;;  %1458 = vrcp.f32 %v943_v55  ;;  %v944_v28 = vadd.f32 1.0, %v1431_v14  ;;  %v2013_v22 = vmul.f32 1.442695, %v822_v60  ;;  %v609_v33 = vadd.f32 %v608_v36, %v1850_v29 }
 0x142   : > { %v1435_v24 = vpop.eup %1434  ;;  %v1030_v0 = vmul.f32 %v1433_v25, %v742_v47  ;;  %1460 = vrcp.f32 %v945_v58  ;;  %v727_v38 = vadd.f32 %v1296_v26, %v1869_v9  ;;  %v611_v43 = vadd.f32 %v610_v13, %v1850_v29 }
 0x143   : > { %v1437_v2 = vpop.eup %1436  ;;  %v1026_v4 = vmul.f32 %v1435_v24, %v738_v57  ;;  %1462 = vrcp.f32 %v944_v28  ;;  %v902_v46 = vmul.f32 1.442695, %v816_v7  ;;  %v811_v51 = vsub.f32 0.0, %v609_v33  ;;  %v753_v28 = vld [vmem:[%s1902_s20 + $0xb8] sm:$0xff] }
 0x144   : > { %v1439_v11 = vpop.eup %1438  ;;  %v1078_v12 = vadd.f32 %v1030_v0, %v742_v47  ;;  %v1031_v23 = vmul.f32 %v1437_v2, %v743_v62  ;;  %1464 = vpow2.f32 %v1981_v5  ;;  %v825_v53 = vsub.f32 0.0, %v727_v38 }
 0x145   : > { %v1441_v17 = vpop.eup %1440  ;;  %v1074_v31 = vadd.f32 %v1026_v4, %v738_v57  ;;  %v1020_v63 = vmul.f32 %v1439_v11, %v732_v40  ;;  %1466 = vpow2.f32 %v1983_v8  ;;  %v735_v8 = vld [vmem:[%s1902_s20 + $0x28] sm:$0xff]  ;;  %v812_v56 = vsub.f32 0.0, %v611_v43 }
 0x146   : > { %v1443_v34 = vpop.eup %1442  ;;  %1126 = vst [vmem:[%s1923_s23 + $0x60] sm:$0xff] %v1078_v12  ;;  %v1079_v3 = vadd.f32 %v1031_v23, %v743_v62  ;;  %v939_v5 = vadd.f32 1.0, %v1441_v17  ;;  %1468 = vpow2.f32 %v1989_v35  ;;  %v888_v35 = vmul.f32 1.442695, %v809_v1 }
 0x147   : > { %v1445_v39 = vpop.eup %1444  ;;  %1122 = vst [vmem:[%s1923_s23 + $0x40] sm:$0xff] %v1074_v31  ;;  %v1068_v10 = vadd.f32 %v1020_v63, %v732_v40  ;;  %v1033_v42 = vmul.f32 %v1443_v34, %v745_v50  ;;  %1470 = vpow2.f32 %v1992_v21  ;;  %v718_v21 = vpop.f32.mrf.mxu1  ;;  %v752_v40 = vld [vmem:[%s1902_s20 + $0xb0] sm:$0xff]  ;;  %v894_v4 = vmul.f32 1.442695, %v812_v56 }
 0x148   : > { %v1447_v44 = vpop.eup %1446  ;;  %1127 = vst [vmem:[%s1923_s23 + $0x68] sm:$0xff] %v1079_v3  ;;  %v1029_v45 = vmul.f32 %v1445_v39, %v741_v32  ;;  %1472 = vrcp.f32 %v939_v5  ;;  %v719_v60 = vadd.f32 %v718_v21, %v1858_v41 }
 0x149   : > { %v1449_v9 = vpop.eup %1448  ;;  %1116 = vst [vmem:[%s1923_s23 + $0x10] sm:$0xff] %v1068_v10  ;;  %v1081_v49 = vadd.f32 %v1033_v42, %v745_v50  ;;  %v1034_v27 = vmul.f32 %v1447_v44, %v746_v37  ;;  %1474 = vpow2.f32 %v880_v59  ;;  %v751_v59 = vld [vmem:[%s1902_s20 + $0xa8] sm:$0xff] }
 0x14a   : > { %v1451_v29 = vpop.eup %1450  ;;  %v1077_v16 = vadd.f32 %v1029_v45, %v741_v32  ;;  %v1023_v52 = vmul.f32 %v1449_v9, %v735_v8  ;;  %1476 = vpow2.f32 %v896_v61  ;;  %v892_v61 = vmul.f32 1.442695, %v811_v51  ;;  %v747_v32 = vld [vmem:[%s1902_s20 + $0x88] sm:$0xff] }
 0x14b   : > { %v1453_v54 = vpop.eup %1452  ;;  %1129 = vst [vmem:[%s1923_s23 + $0x78] sm:$0xff] %v1081_v49  ;;  %v1082_v47 = vadd.f32 %v1034_v27, %v746_v37  ;;  %v1036_v55 = vmul.f32 %v1451_v29, %v748_v15  ;;  %1478 = vpow2.f32 %v2003_v19  ;;  %v819_v11 = vsub.f32 0.0, %v719_v60  ;;  %v756_v60 = vld [vmem:[%s1902_s20 + $0xd0] sm:$0xff] }
 0x14c   : > { %v1455_v14 = vpop.eup %1454  ;;  %1125 = vst [vmem:[%s1923_s23 + $0x58] sm:$0xff] %v1077_v16  ;;  %v1071_v57 = vadd.f32 %v1023_v52, %v735_v8  ;;  %v1038_v58 = vmul.f32 %v1453_v54, %v750_v20  ;;  %1480 = vpow2.f32 %v2006_v30  ;;  %v920_v30 = vmul.f32 1.442695, %v825_v53  ;;  %v754_v53 = vld [vmem:[%s1902_s20 + $0xc0] sm:$0xff] }
 0x14d   : > { %v1457_v36 = vpop.eup %1456  ;;  %1130 = vst [vmem:[%s1923_s23 + $0x80] sm:$0xff] %v1082_v47  ;;  %v1084_v25 = vadd.f32 %v1036_v55, %v748_v15  ;;  %v1037_v62 = vmul.f32 %v1455_v14, %v749_v18  ;;  %1482 = vpow2.f32 %v2009_v6  ;;  %v908_v37 = vmul.f32 1.442695, %v819_v11  ;;  %v762_v55 = vld [vmem:[%s1902_s20 + $0x100] sm:$0xff]  ;;  %v755_v14 = vld [vmem:[%s1902_s20 + $0xc8] sm:$0xff] }
 0x14e   : > { %v1459_v19 = vpop.eup %1458  ;;  %1119 = vst [vmem:[%s1923_s23 + $0x28] sm:$0xff] %v1071_v57  ;;  %v1086_v24 = vadd.f32 %v1038_v58, %v750_v20  ;;  %v1032_v0 = vmul.f32 %v1457_v36, %v744_v48  ;;  %1484 = vpow2.f32 %v2013_v22  ;;  %v759_v11 = vld [vmem:[%s1902_s20 + $0xe8] sm:$0xff] }
 0x14f   : > { %v1461_v41 = vpop.eup %1460  ;;  %1132 = vst [vmem:[%s1923_s23 + $0x90] sm:$0xff] %v1084_v25  ;;  %v1085_v1 = vadd.f32 %v1037_v62, %v749_v18  ;;  %v1039_v2 = vmul.f32 %v1459_v19, %v751_v59  ;;  %1486 = vpow2.f32 %v888_v35  ;;  %v757_v19 = vld [vmem:[%s1902_s20 + $0xd8] sm:$0xff] }
 0x150   : > { %v1463_v7 = vpop.eup %1462  ;;  %1134 = vst [vmem:[%s1923_s23 + $0xa0] sm:$0xff] %v1086_v24  ;;  %v1080_v6 = vadd.f32 %v1032_v0, %v744_v48  ;;  %v1041_v26 = vmul.f32 %v1461_v41, %v753_v28  ;;  %1488 = vpow2.f32 %v902_v46 }
 0x151   : > { %v1465_v12 = vpop.eup %1464  ;;  %1133 = vst [vmem:[%s1923_s23 + $0x98] sm:$0xff] %v1085_v1  ;;  %v1087_v23 = vadd.f32 %v1039_v2, %v751_v59  ;;  %v1040_v50 = vmul.f32 %v1463_v7, %v752_v40  ;;  %1490 = vpow2.f32 %v892_v61  ;;  %v758_v2 = vld [vmem:[%s1902_s20 + $0xe0] sm:$0xff] }
 0x152   : > { %v1467_v22 = vpop.eup %1466  ;;  %1128 = vst [vmem:[%s1923_s23 + $0x70] sm:$0xff] %v1080_v6  ;;  %v1089_v13 = vadd.f32 %v1041_v26, %v753_v28  ;;  %v946_v17 = vadd.f32 1.0, %v1465_v12  ;;  %1492 = vpow2.f32 %v920_v30  ;;  %v765_v30 = vld [vmem:[%s1902_s20 + $0x118] sm:$0xff] }
 0x153   : > { %v1469_v31 = vpop.eup %1468  ;;  %1135 = vst [vmem:[%s1923_s23 + $0xa8] sm:$0xff] %v1087_v23  ;;  %v1088_v63 = vadd.f32 %v1040_v50, %v752_v40  ;;  %v954_v33 = vadd.f32 1.0, %v1467_v22  ;;  %1494 = vpow2.f32 %v894_v4  ;;  %v760_v50 = vld [vmem:[%s1902_s20 + $0xf0] sm:$0xff] }
 0x154   : > { %v1471_v34 = vpop.eup %1470  ;;  %1137 = vst [vmem:[%s1923_s23 + $0xb8] sm:$0xff] %v1089_v13  ;;  %1496 = vrcp.f32 %v946_v17  ;;  %v947_v3 = vadd.f32 1.0, %v1469_v31  ;;  %v774_v31 = vld [vmem:[%s1902_s20 + $0x160] sm:$0xff] }
 0x155   : > { %v1473_v5 = vpop.eup %1472  ;;  %1136 = vst [vmem:[%s1923_s23 + $0xb0] sm:$0xff] %v1088_v63  ;;  %1498 = vrcp.f32 %v954_v33  ;;  %v948_v38 = vadd.f32 1.0, %v1471_v34  ;;  %v761_v34 = vld [vmem:[%s1902_s20 + $0xf8] sm:$0xff] }
 0x156   : > { %v1475_v39 = vpop.eup %1474  ;;  %v1035_v10 = vmul.f32 %v1473_v5, %v747_v32  ;;  %1500 = vrcp.f32 %v947_v3 }
 0x157   : > { %v1477_v42 = vpop.eup %1476  ;;  %1502 = vrcp.f32 %v948_v38  ;;  %v949_v8 = vadd.f32 1.0, %v1475_v39  ;;  %v768_v38 = vld [vmem:[%s1902_s20 + $0x130] sm:$0xff] }
 0x158   : > { %v1479_v43 = vpop.eup %1478  ;;  %v1083_v44 = vadd.f32 %v1035_v10, %v747_v32  ;;  %v957_v45 = vadd.f32 1.0, %v1477_v42  ;;  %1504 = vpow2.f32 %v908_v37 }
 0x159   : > { %v1481_v15 = vpop.eup %1480  ;;  %1506 = vrcp.f32 %v949_v8  ;;  %v950_v35 = vadd.f32 1.0, %v1479_v43  ;;  %v763_v8 = vld [vmem:[%s1902_s20 + $0x108] sm:$0xff] }
 0x15a   : > { %v1483_v46 = vpop.eup %1482  ;;  %1131 = vst [vmem:[%s1923_s23 + $0x88] sm:$0xff] %v1083_v44  ;;  %1508 = vrcp.f32 %v957_v45  ;;  %v951_v9 = vadd.f32 1.0, %v1481_v15  ;;  %v777_v15 = vld [vmem:[%s1902_s20 + $0x178] sm:$0xff] }
 0x15b   : > { %v1485_v49 = vpop.eup %1484  ;;  %1510 = vrcp.f32 %v950_v35  ;;  %v952_v27 = vadd.f32 1.0, %v1483_v46 }
 0x15c   : > { %v1487_v20 = vpop.eup %1486  ;;  %1512 = vrcp.f32 %v951_v9  ;;  %v966_v51 = vadd.f32 1.0, %v1485_v49  ;;  %v764_v49 = vld [vmem:[%s1902_s20 + $0x110] sm:$0xff] }
 0x15d   : > { %v1489_v21 = vpop.eup %1488  ;;  %1514 = vrcp.f32 %v952_v27  ;;  %v953_v29 = vadd.f32 1.0, %v1487_v20 }
 0x15e   : > { %v1491_v16 = vpop.eup %1490  ;;  %1516 = vrcp.f32 %v966_v51  ;;  %v960_v52 = vadd.f32 1.0, %v1489_v21 }
 0x15f   : > { %v1493_v18 = vpop.eup %1492  ;;  %1518 = vrcp.f32 %v953_v29  ;;  %v955_v54 = vadd.f32 1.0, %v1491_v16 }
 0x160   : > { %v1495_v47 = vpop.eup %1494  ;;  %1520 = vrcp.f32 %v960_v52  ;;  %v969_v48 = vadd.f32 1.0, %v1493_v18 }
 0x161   : > { %v1497_v56 = vpop.eup %1496  ;;  %1522 = vrcp.f32 %v955_v54  ;;  %v956_v57 = vadd.f32 1.0, %v1495_v47  ;;  %v771_v47 = vld [vmem:[%s1902_s20 + $0x148] sm:$0xff] }
 0x162   : > { %v1499_v58 = vpop.eup %1498  ;;  %v1042_v59 = vmul.f32 %v1497_v56, %v754_v53  ;;  %1524 = vrcp.f32 %v969_v48 }
 0x163   : > { %v1501_v36 = vpop.eup %1500  ;;  %v1050_v25 = vmul.f32 %v1499_v58, %v762_v55  ;;  %1526 = vrcp.f32 %v956_v57 }
 0x164   : > { %v1503_v62 = vpop.eup %1502  ;;  %v1090_v28 = vadd.f32 %v1042_v59, %v754_v53  ;;  %v1043_v61 = vmul.f32 %v1501_v36, %v755_v14 }
 0x165   : > { %v1505_v24 = vpop.eup %1504  ;;  %v1098_v0 = vadd.f32 %v1050_v25, %v762_v55  ;;  %v1044_v40 = vmul.f32 %v1503_v62, %v756_v60 }
 0x166   : > { %v1507_v41 = vpop.eup %1506  ;;  %1138 = vst [vmem:[%s1923_s23 + $0xc0] sm:$0xff] %v1090_v28  ;;  %v1091_v1 = vadd.f32 %v1043_v61, %v755_v14  ;;  %v963_v4 = vadd.f32 1.0, %v1505_v24 }
 0x167   : > { %v1509_v7 = vpop.eup %1508  ;;  %1146 = vst [vmem:[%s1923_s23 + $0x100] sm:$0xff] %v1098_v0  ;;  %v1092_v6 = vadd.f32 %v1044_v40, %v756_v60  ;;  %v1045_v26 = vmul.f32 %v1507_v41, %v757_v19 }
 0x168   : > { %v1511_v12 = vpop.eup %1510  ;;  %1139 = vst [vmem:[%s1923_s23 + $0xc8] sm:$0xff] %v1091_v1  ;;  %v1053_v23 = vmul.f32 %v1509_v7, %v765_v30  ;;  %1528 = vrcp.f32 %v963_v4 }
 0x169   : > { %v1513_v22 = vpop.eup %1512  ;;  %1140 = vst [vmem:[%s1923_s23 + $0xd0] sm:$0xff] %v1092_v6  ;;  %v1093_v13 = vadd.f32 %v1045_v26, %v757_v19  ;;  %v1046_v17 = vmul.f32 %v1511_v12, %v758_v2 }
 0x16a   : > { %v1515_v63 = vpop.eup %1514  ;;  %v1101_v32 = vadd.f32 %v1053_v23, %v765_v30  ;;  %v1047_v33 = vmul.f32 %v1513_v22, %v759_v11 }
 0x16b   : > { %v1517_v3 = vpop.eup %1516  ;;  %1141 = vst [vmem:[%s1923_s23 + $0xd8] sm:$0xff] %v1093_v13  ;;  %v1094_v37 = vadd.f32 %v1046_v17, %v758_v2  ;;  %v1048_v5 = vmul.f32 %v1515_v63, %v760_v50 }
 0x16c   : > { %v1519_v39 = vpop.eup %1518  ;;  %1149 = vst [vmem:[%s1923_s23 + $0x118] sm:$0xff] %v1101_v32  ;;  %v1095_v10 = vadd.f32 %v1047_v33, %v759_v11  ;;  %v1062_v42 = vmul.f32 %v1517_v3, %v774_v31 }
 0x16d   : > { %v1521_v43 = vpop.eup %1520  ;;  %1142 = vst [vmem:[%s1923_s23 + $0xe0] sm:$0xff] %v1094_v37  ;;  %v1096_v44 = vadd.f32 %v1048_v5, %v760_v50  ;;  %v1049_v45 = vmul.f32 %v1519_v39, %v761_v34 }
 0x16e   : > { %v1523_v35 = vpop.eup %1522  ;;  %1143 = vst [vmem:[%s1923_s23 + $0xe8] sm:$0xff] %v1095_v10  ;;  %v1110_v46 = vadd.f32 %v1062_v42, %v774_v31  ;;  %v1056_v9 = vmul.f32 %v1521_v43, %v768_v38 }
 0x16f   : > { %v1525_v27 = vpop.eup %1524  ;;  %1144 = vst [vmem:[%s1923_s23 + $0xf0] sm:$0xff] %v1096_v44  ;;  %v1097_v20 = vadd.f32 %v1049_v45, %v761_v34  ;;  %v1051_v51 = vmul.f32 %v1523_v35, %v763_v8 }
 0x170   : > { %v1527_v21 = vpop.eup %1526  ;;  %1158 = vst [vmem:[%s1923_s23 + $0x160] sm:$0xff] %v1110_v46  ;;  %v1104_v29 = vadd.f32 %v1056_v9, %v768_v38  ;;  %v1065_v16 = vmul.f32 %v1525_v27, %v777_v15 }
 0x171   : > { %1145 = vst [vmem:[%s1923_s23 + $0xf8] sm:$0xff] %v1097_v20  ;;  %v1099_v52 = vadd.f32 %v1051_v51, %v763_v8  ;;  %v1052_v18 = vmul.f32 %v1527_v21, %v764_v49 }
 0x172   : > { %1152 = vst [vmem:[%s1923_s23 + $0x130] sm:$0xff] %v1104_v29  ;;  %v1113_v53 = vadd.f32 %v1065_v16, %v777_v15 }
 0x173   : > { %1147 = vst [vmem:[%s1923_s23 + $0x108] sm:$0xff] %v1099_v52  ;;  %v1100_v54 = vadd.f32 %v1052_v18, %v764_v49 }
 0x174   : > { %1161 = vst [vmem:[%s1923_s23 + $0x178] sm:$0xff] %v1113_v53 }
 0x175   : > { %v1529_v55 = vpop.eup %1528  ;;  %1148 = vst [vmem:[%s1923_s23 + $0x110] sm:$0xff] %v1100_v54 }
 0x176   : > { %v1059_v48 = vmul.f32 %v1529_v55, %v771_v47 }
 0x178   : > { %v1107_v56 = vadd.f32 %v1059_v48, %v771_v47 }
 0x17a   : > { %1155 = vst [vmem:[%s1923_s23 + $0x148] sm:$0xff] %v1107_v56 }
 0x17b PF: > { %p11_p9 = scmp.ge.s32.totalorder %s1597_s19, 4   ;;  %s2100_s15 = smov %s1548_s16 }
 0x17c   : > { %s2101_s16 = smov %s1606_s22  ;;  %s2102_s17 = smov %s1597_s19 }
 0x17d   :  { %13 = sbr.rel (!%p11_p9) target bundleno = 2 (0x2), region = 97 }

// kernel: trans_att_forward.2
= control target key start
LH: loop header
LB: loop body
LE: loop exit
PB: predicated region body
PF: predicated region fallthrough
CT: control target
= control target key end

     0   :  { %v11081_v0 = vmov 0   ;;  %s8912_s6 = smov 1   ;;  %s8913_s10 = smov 2   ;;  %vm487_vm0 = vcmask 130048   ;;  %vm8924_vm1 = vmmov 0   ;;  %vm914_vm2 = vcmask 1043456   ;;  %s11080_s0 = inlined_call_operand.smem [shape: u32[32], index: -1, kind: input, shape index: {}] }
   0x1   :  { %s8954_s5 = sld [smem:[%s11080_s0]]   ;;  %327 = vmatprep.mubr.bf16.mxu0 %v11081_v0  ;;  %370 = vmatprep.mubr.bf16.mxu1 %v11081_v0  ;;  %s8914_s14 = smov 4   ;;  %vm910_vm3 = vcmask 64512   ;;  %vm4820_vm5 = vcmask 1044480   ;;  %vm4816_vm6 = vcmask 72704   ;;  %vm6975_vm7 = vcmask 1045504  }
   0x2   :  { %8244 = vset.pattern.permute.xlu0 %v11081_v0  ;;  %8245 = vset.pattern.permute.xlu1 %v11081_v0  ;;  %s9007_s9 = sld [smem:[%s11080_s0 + %s8912_s6]]   ;;  %s8915_s18 = smov 8   ;;  %vm6976_vm8 = vcmask 1046528   ;;  %vm6968_vm9 = vcmask 498688  }
   0x3   :  { %s9031_s13 = sld [smem:[%s11080_s0 + %s8913_s10]]   ;;  %s8916_s22 = smov 9  }
   0x4   :  { %s9046_s17 = sld [smem:[%s11080_s0 + %s8914_s14]]   ;;  %s8917_s26 = smov 10  }
   0x5   :  { %s9066_s21 = sld [smem:[%s11080_s0 + %s8915_s18]]   ;;  %s8918_s30 = smov 12  }
   0x6   :  { %s9076_s25 = sld [smem:[%s11080_s0 + %s8916_s22]]   ;;  %s8919_s4 = smov 14  }
   0x7   :  { %v218_v1 = vld [vmem:[%s8954_s5 + $0x2a8] sm:$0xff]  ;;  %v224_v2 = vld [vmem:[%s8954_s5 + $0x2d8] sm:$0xff]  ;;  %v217_v3 = vld [vmem:[%s8954_s5 + $0x2a0] sm:$0xff]  ;;  %s9086_s29 = sld [smem:[%s11080_s0 + %s8917_s26]]   ;;  %s8922_s16 = smov 3  }
   0x8   :  { %v272_v4 = vpack.c.bf16 %v224_v2, %v218_v1  ;;  %v223_v5 = vld [vmem:[%s8954_s5 + $0x2d0] sm:$0xff]  ;;  %v220_v6 = vld [vmem:[%s8954_s5 + $0x2b8] sm:$0xff]  ;;  %v226_v7 = vld [vmem:[%s8954_s5 + $0x2e8] sm:$0xff]  ;;  %s7312_s3 = sld [smem:[%s11080_s0 + %s8918_s30]]   ;;  %s8926_s24 = smov 6  }
   0x9   :  { %v271_v8 = vpack.c.bf16 %v223_v5, %v217_v3  ;;  %v274_v9 = vpack.c.bf16 %v226_v7, %v220_v6  ;;  %v219_v10 = vld [vmem:[%s8954_s5 + $0x2b0] sm:$0xff]  ;;  %v225_v11 = vld [vmem:[%s8954_s5 + $0x2e0] sm:$0xff]  ;;  %v206_v12 = vld [vmem:[%s8954_s5 + $0x248] sm:$0xff]  ;;  %s9104_s8 = sld [smem:[%s11080_s0 + %s8919_s4]]   ;;  %s8927_s28 = smov 7  }
   0xa   :  { %295 = vmatprep.subr.bf16.mxu0 %v272_v4  ;;  %v273_v13 = vpack.c.bf16 %v225_v11, %v219_v10  ;;  %v212_v14 = vld [vmem:[%s8954_s5 + $0x278] sm:$0xff]  ;;  %v205_v15 = vld [vmem:[%s8954_s5 + $0x240] sm:$0xff]  ;;  %v211_v16 = vld [vmem:[%s8954_s5 + $0x270] sm:$0xff]  ;;  %s9123_s20 = sld [smem:[%s11080_s0 + %s8922_s16]]   ;;  %s8928_s2 = smov 11  }
   0xb   :  { %296 = vmatpush1.bf16.msra.mxu0 %v271_v8  ;;  %338 = vmatprep.subr.bf16.mxu1 %v274_v9  ;;  %v266_v17 = vpack.c.bf16 %v212_v14, %v206_v12  ;;  %v265_v18 = vpack.c.bf16 %v211_v16, %v205_v15  ;;  %v208_v19 = vld [vmem:[%s8954_s5 + $0x258] sm:$0xff]  ;;  %v214_v20 = vld [vmem:[%s8954_s5 + $0x288] sm:$0xff]  ;;  %v207_v21 = vld [vmem:[%s8954_s5 + $0x250] sm:$0xff]  ;;  %s9301_s27 = sld [smem:[%s11080_s0 + %s8926_s24]]   ;;  %s8929_s7 = smov 13  }
   0xc   :  { %339 = vmatpush1.bf16.msra.mxu1 %v273_v13  ;;  %v268_v22 = vpack.c.bf16 %v214_v20, %v208_v19  ;;  %v213_v23 = vld [vmem:[%s8954_s5 + $0x280] sm:$0xff]  ;;  %v194_v24 = vld [vmem:[%s8954_s5 + $0x1e8] sm:$0xff]  ;;  %v200_v25 = vld [vmem:[%s8954_s5 + $0x218] sm:$0xff]  ;;  %s9381_s1 = sld [smem:[%s11080_s0 + %s8927_s28]]   ;;  %s8930_s11 = smov 17  }
   0xd   :  { %297 = vmatprep.subr.bf16.mxu0 %v266_v17  ;;  %v267_v26 = vpack.c.bf16 %v213_v23, %v207_v21  ;;  %v260_v27 = vpack.c.bf16 %v200_v25, %v194_v24  ;;  %v193_v28 = vld [vmem:[%s8954_s5 + $0x1e0] sm:$0xff]  ;;  %v199_v29 = vld [vmem:[%s8954_s5 + $0x210] sm:$0xff]  ;;  %v196_v30 = vld [vmem:[%s8954_s5 + $0x1f8] sm:$0xff]  ;;  %s7311_s6 = sld [smem:[%s11080_s0 + %s8928_s2]]   ;;  %s8931_s15 = smov 19  }
   0xe   :  { %340 = vmatprep.subr.bf16.mxu1 %v268_v22  ;;  %v202_v31 = vld [vmem:[%s8954_s5 + $0x228] sm:$0xff]  ;;  %v195_v32 = vld [vmem:[%s8954_s5 + $0x1f0] sm:$0xff]  ;;  %v201_v33 = vld [vmem:[%s8954_s5 + $0x220] sm:$0xff]  ;;  %v259_v34 = vpack.c.bf16 %v199_v29, %v193_v28  ;;  %s9563_s10 = sld [smem:[%s11080_s0 + %s8929_s7]]   ;;  %s8932_s19 = smov 18  }
   0xf   :  { %298 = vmatpush1.bf16.msra.mxu0 %v265_v18  ;;  %v262_v35 = vpack.c.bf16 %v202_v31, %v196_v30  ;;  %v182_v36 = vld [vmem:[%s8954_s5 + $0x188] sm:$0xff]  ;;  %v188_v37 = vld [vmem:[%s8954_s5 + $0x1b8] sm:$0xff]  ;;  %v181_v38 = vld [vmem:[%s8954_s5 + $0x180] sm:$0xff]  ;;  %v261_v39 = vpack.c.bf16 %v201_v33, %v195_v32  ;;  %s9635_s14 = sld [smem:[%s11080_s0 + %s8930_s11]]   ;;  %s8933_s22 = smov 20  }
  0x10   :  { %341 = vmatpush1.bf16.msra.mxu1 %v267_v26  ;;  %299 = vmatprep.subr.bf16.mxu0 %v260_v27  ;;  %v254_v40 = vpack.c.bf16 %v188_v37, %v182_v36  ;;  %v187_v41 = vld [vmem:[%s8954_s5 + $0x1b0] sm:$0xff]  ;;  %v184_v42 = vld [vmem:[%s8954_s5 + $0x198] sm:$0xff]  ;;  %v190_v43 = vld [vmem:[%s8954_s5 + $0x1c8] sm:$0xff]  ;;  %s10049_s18 = sld [smem:[%s11080_s0 + %s8931_s15]]   ;;  %s8935_s26 = smov 21  }
  0x11   :  { %342 = vmatprep.subr.bf16.mxu1 %v262_v35  ;;  %v256_v44 = vpack.c.bf16 %v190_v43, %v184_v42  ;;  %v183_v45 = vld [vmem:[%s8954_s5 + $0x190] sm:$0xff]  ;;  %v189_v46 = vld [vmem:[%s8954_s5 + $0x1c0] sm:$0xff]  ;;  %v170_v47 = vld [vmem:[%s8954_s5 + $0x128] sm:$0xff]  ;;  %v253_v49 = vpack.c.bf16 %v187_v41, %v181_v38  ;;  %s8936_s30 = smov 22   ;;  %s8937_s4 = smov 25  }
  0x12   :  { %v176_v48 = vld [vmem:[%s8954_s5 + $0x158] sm:$0xff]  ;;  %v178_v51 = vld [vmem:[%s8954_s5 + $0x168] sm:$0xff]  ;;  %v255_v52 = vpack.c.bf16 %v189_v46, %v183_v45  ;;  %v169_v54 = vld [vmem:[%s8954_s5 + $0x120] sm:$0xff]  ;;  %s8940_s16 = smov 24   ;;  %s8942_s24 = smov 28  }
  0x13   :  { %300 = vmatpush1.bf16.msra.mxu0 %v259_v34  ;;  %v172_v50 = vld [vmem:[%s8954_s5 + $0x138] sm:$0xff]  ;;  %v248_v53 = vpack.c.bf16 %v176_v48, %v170_v47  ;;  %v175_v55 = vld [vmem:[%s8954_s5 + $0x150] sm:$0xff]  ;;  %v177_v58 = vld [vmem:[%s8954_s5 + $0x160] sm:$0xff]  ;;  %s8943_s28 = smov 29   ;;  %s8944_s2 = smov 30  }
  0x14   :  { %343 = vmatpush1.bf16.msra.mxu1 %v261_v39  ;;  %301 = vmatprep.subr.bf16.mxu0 %v254_v40  ;;  %v171_v56 = vld [vmem:[%s8954_s5 + $0x130] sm:$0xff]  ;;  %v250_v57 = vpack.c.bf16 %v178_v51, %v172_v50  ;;  %v158_v59 = vld [vmem:[%s8954_s5 + $0xc8] sm:$0xff]  ;;  %v164_v60 = vld [vmem:[%s8954_s5 + $0xf8] sm:$0xff]  ;;  %v247_v63 = vpack.c.bf16 %v175_v55, %v169_v54  ;;  %s8945_s7 = smov 31  }
  0x15   :  { %344 = vmatprep.subr.bf16.mxu1 %v256_v44  ;;  %v160_v61 = vld [vmem:[%s8954_s5 + $0xd8] sm:$0xff]  ;;  %v166_v62 = vld [vmem:[%s8954_s5 + $0x108] sm:$0xff]  ;;  %v249_v1 = vpack.c.bf16 %v177_v58, %v171_v56  ;;  %v242_v2 = vpack.c.bf16 %v164_v60, %v158_v59  ;;  %v157_v3 = vld [vmem:[%s8954_s5 + $0xc0] sm:$0xff] }
  0x16   :  { %v163_v4 = vld [vmem:[%s8954_s5 + $0xf0] sm:$0xff]  ;;  %v244_v6 = vpack.c.bf16 %v166_v62, %v160_v61  ;;  %v165_v7 = vld [vmem:[%s8954_s5 + $0x100] sm:$0xff]  ;;  %v146_v8 = vld [vmem:[%s8954_s5 + $0x68] sm:$0xff] }
  0x17   :  { %302 = vmatpush1.bf16.msra.mxu0 %v253_v49  ;;  %v159_v5 = vld [vmem:[%s8954_s5 + $0xd0] sm:$0xff]  ;;  %v152_v9 = vld [vmem:[%s8954_s5 + $0x98] sm:$0xff]  ;;  %v154_v11 = vld [vmem:[%s8954_s5 + $0xa8] sm:$0xff]  ;;  %v241_v12 = vpack.c.bf16 %v163_v4, %v157_v3 }
  0x18   :  { %345 = vmatpush1.bf16.msra.mxu1 %v255_v52  ;;  %303 = vmatprep.subr.bf16.mxu0 %v248_v53  ;;  %v148_v10 = vld [vmem:[%s8954_s5 + $0x78] sm:$0xff]  ;;  %v145_v13 = vld [vmem:[%s8954_s5 + $0x60] sm:$0xff]  ;;  %v151_v14 = vld [vmem:[%s8954_s5 + $0x90] sm:$0xff]  ;;  %v243_v15 = vpack.c.bf16 %v165_v7, %v159_v5  ;;  %v236_v16 = vpack.c.bf16 %v152_v9, %v146_v8 }
  0x19   :  { %346 = vmatprep.subr.bf16.mxu1 %v250_v57  ;;  %v147_v17 = vld [vmem:[%s8954_s5 + $0x70] sm:$0xff]  ;;  %v238_v18 = vpack.c.bf16 %v154_v11, %v148_v10  ;;  %v153_v19 = vld [vmem:[%s8954_s5 + $0xa0] sm:$0xff]  ;;  %v134_v20 = vld [vmem:[%s8954_s5 + $0x8] sm:$0xff]  ;;  %v235_v24 = vpack.c.bf16 %v151_v14, %v145_v13 }
  0x1a   :  { %v140_v21 = vld [vmem:[%s8954_s5 + $0x38] sm:$0xff]  ;;  %v142_v23 = vld [vmem:[%s8954_s5 + $0x48] sm:$0xff]  ;;  %v237_v25 = vpack.c.bf16 %v153_v19, %v147_v17  ;;  %v133_v27 = vld [vmem:[%s8954_s5] sm:$0xff] }
  0x1b   :  { %304 = vmatpush1.bf16.msra.mxu0 %v247_v63  ;;  %v136_v22 = vld [vmem:[%s8954_s5 + $0x18] sm:$0xff]  ;;  %v230_v26 = vpack.c.bf16 %v140_v21, %v134_v20  ;;  %v139_v28 = vld [vmem:[%s8954_s5 + $0x30] sm:$0xff]  ;;  %v141_v31 = vld [vmem:[%s8954_s5 + $0x40] sm:$0xff] }
  0x1c   :  { %347 = vmatpush1.bf16.msra.mxu1 %v249_v1  ;;  %305 = vmatprep.subr.bf16.mxu0 %v242_v2  ;;  %v135_v29 = vld [vmem:[%s8954_s5 + $0x10] sm:$0xff]  ;;  %v232_v30 = vpack.c.bf16 %v142_v23, %v136_v22  ;;  %v222_v32 = vld [vmem:[%s8954_s5 + $0x2c8] sm:$0xff]  ;;  %v228_v33 = vld [vmem:[%s8954_s5 + $0x2f8] sm:$0xff]  ;;  %v229_v34 = vpack.c.bf16 %v139_v28, %v133_v27 }
  0x1d   :  { %348 = vmatprep.subr.bf16.mxu1 %v244_v6  ;;  %v231_v35 = vpack.c.bf16 %v141_v31, %v135_v29  ;;  %v276_v36 = vpack.c.bf16 %v228_v33, %v222_v32  ;;  %v221_v37 = vld [vmem:[%s8954_s5 + $0x2c0] sm:$0xff]  ;;  %v227_v38 = vld [vmem:[%s8954_s5 + $0x2f0] sm:$0xff]  ;;  %v210_v39 = vld [vmem:[%s8954_s5 + $0x268] sm:$0xff] }
  0x1e   :  { %v216_v40 = vld [vmem:[%s8954_s5 + $0x298] sm:$0xff]  ;;  %v9041_v41 = vld [vmem:[%s9007_s9] sm:$0xff]   ;;  %v275_v42 = vpack.c.bf16 %v227_v38, %v221_v37  ;;  %v215_v45 = vld [vmem:[%s8954_s5 + $0x290] sm:$0xff]  ;;  %s8920_s9 = smov 15  }
  0x1f   :  { %306 = vmatpush1.bf16.msra.mxu0 %v241_v12  ;;  %v270_v43 = vpack.c.bf16 %v216_v40, %v210_v39  ;;  %v209_v44 = vld [vmem:[%s8954_s5 + $0x260] sm:$0xff]  ;;  %v198_v47 = vld [vmem:[%s8954_s5 + $0x208] sm:$0xff]  ;;  %v204_v48 = vld [vmem:[%s8954_s5 + $0x238] sm:$0xff]  ;;  %s9111_s12 = sld [smem:[%s11080_s0 + %s8920_s9]]   ;;  %s8938_s9 = smov 27  }
  0x20   :  { %349 = vmatpush1.bf16.msra.mxu1 %v243_v15  ;;  %307 = vmatprep.subr.bf16.mxu0 %v236_v16  ;;  %v277_v46 = vld [vmem:[%s9031_s13] sm:$0xff]  ;;  %v278_v49 = vld [vmem:[%s9031_s13 + $0x8] sm:$0xff]  ;;  %v269_v50 = vpack.c.bf16 %v215_v45, %v209_v44  ;;  %v264_v51 = vpack.c.bf16 %v204_v48, %v198_v47  ;;  %v203_v53 = vld [vmem:[%s8954_s5 + $0x230] sm:$0xff]  ;;  %s8921_s13 = smov 16  }
  0x21   :  { %350 = vmatprep.subr.bf16.mxu1 %v238_v18  ;;  %281 = vperm.xlu0 %8244, %v277_v46   ;;  %v197_v52 = vld [vmem:[%s8954_s5 + $0x200] sm:$0xff]  ;;  %v186_v54 = vld [vmem:[%s8954_s5 + $0x1a8] sm:$0xff]  ;;  %v192_v55 = vld [vmem:[%s8954_s5 + $0x1d8] sm:$0xff] }
  0x22   :  { %v438_v56 = vld [vmem:[%s9046_s17 + $0x10] sm:$0xff]  ;;  %v263_v57 = vpack.c.bf16 %v203_v53, %v197_v52  ;;  %v258_v58 = vpack.c.bf16 %v192_v55, %v186_v54  ;;  %v185_v59 = vld [vmem:[%s8954_s5 + $0x1a0] sm:$0xff]  ;;  %v174_v61 = vld [vmem:[%s8954_s5 + $0x148] sm:$0xff] }
  0x23   :  { %308 = vmatpush1.bf16.msra.mxu0 %v235_v24  ;;  %v191_v60 = vld [vmem:[%s8954_s5 + $0x1d0] sm:$0xff]  ;;  %v180_v62 = vld [vmem:[%s8954_s5 + $0x178] sm:$0xff]  ;;  %v440_v63 = vld [vmem:[%s9046_s17 + $0x20] sm:$0xff] }
  0x24   :  { %351 = vmatpush1.bf16.msra.mxu1 %v237_v25  ;;  %309 = vmatprep.subr.bf16.mxu0 %v230_v26  ;;  %v257_v1 = vpack.c.bf16 %v191_v60, %v185_v59  ;;  %v252_v2 = vpack.c.bf16 %v180_v62, %v174_v61  ;;  %v173_v3 = vld [vmem:[%s8954_s5 + $0x140] sm:$0xff]  ;;  %v179_v4 = vld [vmem:[%s8954_s5 + $0x170] sm:$0xff]  ;;  %v162_v5 = vld [vmem:[%s8954_s5 + $0xe8] sm:$0xff] }
  0x25   :  { %352 = vmatprep.subr.bf16.mxu1 %v232_v30  ;;  %286 = vperm.xlu0 %8244, %v278_v49   ;;  %v168_v6 = vld [vmem:[%s8954_s5 + $0x118] sm:$0xff]  ;;  %v1705_v7 = vld [vmem:[%s9066_s21] sm:$0xff]  ;;  %v251_v8 = vpack.c.bf16 %v179_v4, %v173_v3  ;;  %v167_v11 = vld [vmem:[%s8954_s5 + $0x110] sm:$0xff] }
  0x26   :  { %v246_v9 = vpack.c.bf16 %v168_v6, %v162_v5  ;;  %v161_v10 = vld [vmem:[%s8954_s5 + $0xe0] sm:$0xff]  ;;  %v150_v12 = vld [vmem:[%s8954_s5 + $0x88] sm:$0xff]  ;;  %v156_v13 = vld [vmem:[%s8954_s5 + $0xb8] sm:$0xff] }
  0x27   :  { %310 = vmatpush1.bf16.msra.mxu0 %v229_v34  ;;  %v1874_v14 = vld [vmem:[%s9076_s25] sm:$0xff]  ;;  %v245_v15 = vpack.c.bf16 %v167_v11, %v161_v10  ;;  %v240_v16 = vpack.c.bf16 %v156_v13, %v150_v12  ;;  %v155_v18 = vld [vmem:[%s8954_s5 + $0xb0] sm:$0xff]  ;;  %v138_v19 = vld [vmem:[%s8954_s5 + $0x28] sm:$0xff]  ;;  %v11090_v13 = vmov 0.0  }
  0x28   :  { %353 = vmatpush1.bf16.msra.mxu1 %v231_v35  ;;  %381 = vmatprep.subr.bf16.mxu0 %v276_v36  ;;  %v149_v17 = vld [vmem:[%s8954_s5 + $0x80] sm:$0xff]  ;;  %v144_v20 = vld [vmem:[%s8954_s5 + $0x58] sm:$0xff]  ;;  %v143_v25 = vld [vmem:[%s8954_s5 + $0x50] sm:$0xff] }
  0x29   :  { %454 = vperm.xlu0 %8244, %v438_v56   ;;  %v1898_v21 = vld [vmem:[%s9086_s29] sm:$0xff]  ;;  %v239_v22 = vpack.c.bf16 %v155_v18, %v149_v17  ;;  %v234_v23 = vpack.c.bf16 %v144_v20, %v138_v19  ;;  %v2243_v28 = vld [vmem:[%s9104_s8 + $0x8] sm:$0xff]  ;;  %v439_v33 = vld [vmem:[%s9046_s17 + $0x18] sm:$0xff] }
  0x2a   :  { %328 = vmatmul.mubr.bf16.vlgmr.msra.gmra.mxu0 %v9041_v41  ;;  %v137_v24 = vld [vmem:[%s8954_s5 + $0x20] sm:$0xff]  ;;  %s7316_s5 = sld [smem:[%s11080_s0 + %s8921_s13]]   ;;  %v2411_v29 = vld [vmem:[%s9111_s12 + $0x8] sm:$0xff]  ;;  %s8939_s13 = smov 23  }
  0x2b   :  { %382 = vmatpush1.bf16.msra.mxu0 %v275_v42  ;;  %371 = vmatmul.mubr.bf16.vlgmr.msra.gmra.mxu1 %v9041_v41  ;;  %v1929_v26 = vld [vmem:[%s7312_s3] sm:$0xff]  ;;  %v233_v27 = vpack.c.bf16 %v143_v25, %v137_v24  ;;  %v437_v32 = vld [vmem:[%s9046_s17 + $0x8] sm:$0xff]  ;;  %s7322_s3 = sld [smem:[%s11080_s0 + %s8936_s30]]  }
  0x2c   :  { %383 = vmatprep.subr.bf16.mxu0 %v270_v43  ;;  %413 = vmatprep.mubr.bf16.mxu0 %v11081_v0  ;;  %v436_v31 = vld [vmem:[%s9046_s17] sm:$0xff]  ;;  %v441_v34 = vld [vmem:[%s9046_s17 + $0x28] sm:$0xff]  ;;  %s8925_s17 = smov 5  }
  0x2d   :  { %529 = vmatprep.mubr.bf16.mxu1 %v11081_v0  ;;  %464 = vperm.xlu0 %8244, %v440_v63   ;;  %v1706_v35 = vld [vmem:[%s9066_s21 + $0x8] sm:$0xff]  ;;  %v2242_v38 = vld [vmem:[%s9104_s8] sm:$0xff]  ;;  %s7305_s23 = sld [smem:[%s11080_s0 + %s8925_s17]]   ;;  %s8941_s17 = smov 26  }
  0x2e   :  { %444 = vperm.xlu1 %8245, %v436_v31   ;;  %v1875_v36 = vld [vmem:[%s9076_s25 + $0x8] sm:$0xff]  ;;  %v2410_v39 = vld [vmem:[%s9111_s12] sm:$0xff]  ;;  %s10149_s21 = sld [smem:[%s11080_s0 + %s8932_s19]]  }
  0x2f   :  { %384 = vmatpush1.bf16.msra.mxu0 %v269_v50  ;;  %v1899_v37 = vld [vmem:[%s9086_s29 + $0x8] sm:$0xff]  ;;  %v8247_v62 = vld [vmem:[%s9123_s20] sm:$0xff]   ;;  %s7320_s25 = sld [smem:[%s11080_s0 + %s8933_s22]]  }
  0x30   :  { %385 = vmatprep.subr.bf16.mxu0 %v264_v51  ;;  %v2435_v30 = vld [vmem:[%s7316_s5 + $0x8] sm:$0xff]  ;;  %v2434_v40 = vld [vmem:[%s7316_s5] sm:$0xff]  ;;  %s10547_s29 = sld [smem:[%s11080_s0 + %s8935_s26]]  }
  0x31   :  { %1709 = vperm.xlu0 %8244, %v1705_v7   ;;  %s10731_s8 = sld [smem:[%s11080_s0 + %s8937_s4]]  }
  0x32   :  { %449 = vperm.xlu1 %8245, %v437_v32   ;;  %s10849_s12 = sld [smem:[%s11080_s0 + %s8938_s9]]  }
  0x33   :  { %386 = vmatpush1.bf16.msra.mxu0 %v263_v57  ;;  %s7323_s5 = sld [smem:[%s11080_s0 + %s8939_s13]]  }
  0x34   :  { %387 = vmatprep.subr.bf16.mxu0 %v258_v58 }
  0x35   :  { %1878 = vperm.xlu0 %8244, %v1874_v14  }
  0x36   :  { %459 = vperm.xlu1 %8245, %v439_v33  }
  0x37   :  { %388 = vmatpush1.bf16.msra.mxu0 %v257_v1  ;;  %v8248_v1 = vld [vmem:[%s9123_s20 + $0x8] sm:$0xff]  }
  0x38   :  { %389 = vmatprep.subr.bf16.mxu0 %v252_v2  ;;  %v8249_v2 = vld [vmem:[%s9123_s20 + $0x10] sm:$0xff]   ;;  %s7324_s20 = sld [smem:[%s11080_s0 + %s8940_s16]]  }
  0x39   :  { %1902 = vperm.xlu0 %8244, %v1898_v21  }
  0x3a   :  { %469 = vperm.xlu1 %8245, %v441_v34  }
  0x3b   :  { %390 = vmatpush1.bf16.msra.mxu0 %v251_v8 }
  0x3c   :  { %391 = vmatprep.subr.bf16.mxu0 %v246_v9 }
  0x3d   :  { %1932 = vperm.xlu0 %8244, %v1929_v26  }
  0x3e   :  { %1714 = vperm.xlu1 %8245, %v1706_v35  }
  0x3f   :  { %392 = vmatpush1.bf16.msra.mxu0 %v245_v15 }
  0x40   :  { %393 = vmatprep.subr.bf16.mxu0 %v240_v16 }
  0x41   :  { %2251 = vperm.xlu0 %8244, %v2243_v28  }
  0x42   :  { %1883 = vperm.xlu1 %8245, %v1875_v36  }
  0x43   :  { %394 = vmatpush1.bf16.msra.mxu0 %v239_v22 }
  0x44   :  { %395 = vmatprep.subr.bf16.mxu0 %v234_v23 }
  0x45   :  { %2419 = vperm.xlu0 %8244, %v2411_v29  }
  0x46   :  { %1907 = vperm.xlu1 %8245, %v1899_v37  }
  0x47   :  { %396 = vmatpush1.bf16.msra.mxu0 %v233_v27 }
  0x49   :  { %2443 = vperm.xlu0 %8244, %v2435_v30  }
  0x4a   :  { %414 = vmatmul.mubr.bf16.vlgmr.msra.gmra.mxu0 %v9041_v41  ;;  %2246 = vperm.xlu1 %8245, %v2242_v38  }
  0x4b   :  { %655 = vmatprep.mubr.bf16.mxu0 %v11081_v0 }
  0x4e   :  { %2414 = vperm.xlu1 %8245, %v2410_v39  }
  0x52   :  { %2438 = vperm.xlu1 %8245, %v2434_v40  }
  0x9c   :  { %v282_v41 = vpop.permute.xlu0 %281 }
  0xa0   :  { %v287_v47 = vpop.permute.xlu0 %286 }
  0xa4   :  { %v9195_v22 = vpop.permute.xlu0 %454 }
  0xa9   :  { %v445_v14 = vpop.permute.xlu1 %444 }
  0xad   :  { %v9193_v18 = vpop.permute.xlu1 %449 }
  0xb1   :  { %v9197_v23 = vpop.permute.xlu1 %459 }
  0xea   :  { %v329_v42 = vpop.f32.mrf.mxu0 }
  0xeb   :  { %v372_v43 = vpop.f32.mrf.mxu1  ;;  %v9142_v55 = vadd.f32 %v329_v42, %v282_v41 }
  0xec   :  { %v331_v44 = vpop.f32.mrf.mxu0  ;;  %v9148_v58 = vadd.f32 %v372_v43, %v282_v41 }
  0xed   :  { %v374_v45 = vpop.f32.mrf.mxu1  ;;  %v9138_v52 = vadd.f32 %v331_v44, %v282_v41  ;;  %v9228_v44 = vld [vmem:[%s7305_s23] sm:$0xf]  ;;  %s7326_s23 = sld [smem:[%s11080_s0 + %s8941_s17]]  }
  0xee   :  { %v333_v46 = vpop.f32.mrf.mxu0  ;;  %v9136_v50 = vadd.f32 %v374_v45, %v282_v41 }
  0xef   :  { %v376_v48 = vpop.f32.mrf.mxu1  ;;  %v9134_v49 = vadd.f32 %v333_v46, %v287_v47 }
  0xf0   :  { %v335_v51 = vpop.f32.mrf.mxu0  ;;  %v9152_v60 = vadd.f32 %v376_v48, %v287_v47 }
  0xf1   :  { %v9140_v53 = vadd.f32 %v335_v51, %v287_v47  ;;  %v378_v54 = vpop.f32.mrf.mxu1  ;;  %v430_v59 = vpack.c.bf16 %v9134_v49, %v9142_v55 }
  0xf2   :  { %v9144_v56 = vadd.f32 %v378_v54, %v287_v47  ;;  %v432_v63 = vpack.c.bf16 %v9152_v60, %v9148_v58 }
  0xf3   :  { %v431_v57 = vpack.c.bf16 %v9140_v53, %v9138_v52 }
  0xf4   :  { %v433_v61 = vpack.c.bf16 %v9144_v56, %v9136_v50 }
  0xf5   :  { %511 = vmatprep.subr.bf16.mxu1 %v431_v57 }
  0xf6   :  { %512 = vmatpush1.bf16.msra.mxu1 %v430_v59 }
  0xf7   :  { %574 = vmatprep.subr.bf16.mxu1 %v433_v61 }
  0xf9   :  { %7336 = vmatmul.mubr.msk.bf16.vlgmr.msra.gmra.mxu1 %vm487_vm0, %v8247_v62 }
  0xfa   :  { %575 = vmatpush1.bf16.msra.mxu1 %v432_v63  ;;  %539 = vmatprep.mubr.bf16.mxu1 %v11081_v0 }
 0x101   :  { %7337 = vmatmul.mubr.msk.bf16.gmra.mxu1 %vm487_vm0, %v8248_v1 }
 0x102   :  { %549 = vmatprep.mubr.bf16.mxu1 %v11081_v0 }
 0x109   :  { %7338 = vmatmul.mubr.msk.bf16.gmra.mxu1 %vm487_vm0, %v8249_v2 }
 0x10a   :  { %v415_v3 = vpop.f32.mrf.mxu0  ;;  %592 = vmatprep.mubr.bf16.mxu1 %v11081_v0 }
 0x10b   :  { %v9174_v10 = vadd.f32 %v415_v3, %v282_v41 }
 0x10c   :  { %v417_v4 = vpop.f32.mrf.mxu0 }
 0x10d   :  { %v9169_v8 = vadd.f32 %v417_v4, %v282_v41 }
 0x10e   :  { %v419_v5 = vpop.f32.mrf.mxu0 }
 0x10f   :  { %v9167_v6 = vadd.f32 %v419_v5, %v287_v47 }
 0x110   :  { %v421_v7 = vpop.f32.mrf.mxu0 }
 0x111   :  { %v9171_v9 = vadd.f32 %v421_v7, %v287_v47  ;;  %7339 = vmatmul.mubr.msk.bf16.vlgmr.msra.gmra.mxu1 %vm487_vm0, %v8247_v62  ;;  %v434_v12 = vpack.c.bf16 %v9167_v6, %v9174_v10 }
 0x112   :  { %602 = vmatprep.mubr.bf16.mxu1 %v11081_v0 }
 0x113   :  { %v435_v11 = vpack.c.bf16 %v9171_v9, %v9169_v8 }
 0x115   :  { %637 = vmatprep.subr.bf16.mxu0 %v435_v11 }
 0x116   :  { %638 = vmatpush1.bf16.msra.mxu0 %v434_v12 }
 0x117   :  { %8017 = vmatprep.subr.bf16.mxu0 %v11090_v13 }
 0x119   :  { %7340 = vmatmul.mubr.msk.bf16.gmra.mxu1 %vm487_vm0, %v8248_v1  ;;  %7342 = vmatmul.mubr.msk.bf16.vlgmr.msra.gmra.mxu0 %vm487_vm0, %v8247_v62 }
 0x11a   :  { %612 = vmatprep.mubr.bf16.mxu1 %v11081_v0  ;;  %665 = vmatprep.mubr.bf16.mxu0 %v11081_v0 }
 0x121   :  { %7341 = vmatmul.mubr.msk.bf16.gmra.mxu1 %vm487_vm0, %v8249_v2  ;;  %7343 = vmatmul.mubr.msk.bf16.gmra.mxu0 %vm487_vm0, %v8248_v1 }
 0x122   :  { %675 = vmatprep.mubr.bf16.mxu0 %v11081_v0  ;;  %733 = vmatprep.mubr.bf16.mxu1 %v11081_v0 }
 0x129   :  { %7344 = vmatmul.mubr.msk.bf16.gmra.mxu0 %vm487_vm0, %v8249_v2 }
 0x12a   :  { %8019 = vmatprep.mubr.msk.bf16.mxu0 %vm8924_vm1, %v11090_v13 }
 0x1b9   :  { %v531_v15 = vpop.f32.mrf.mxu1 }
 0x1ba   :  { %v9201_v27 = vadd.f32 %v531_v15, %v445_v14 }
 0x1bb   :  { %v533_v16 = vpop.f32.mrf.mxu1 }
 0x1bc   :  { %v9210_v31 = vadd.f32 %v533_v16, %v445_v14 }
 0x1bd   :  { %v535_v17 = vpop.f32.mrf.mxu1 }
 0x1be   :  { %v9204_v28 = vadd.f32 %v535_v17, %v9193_v18 }
 0x1bf   :  { %v537_v19 = vpop.f32.mrf.mxu1 }
 0x1c0   :  { %v9213_v32 = vadd.f32 %v537_v19, %v9193_v18 }
 0x1c1   :  { %v541_v20 = vpop.f32.mrf.mxu1 }
 0x1c2   :  { %v542_v29 = vadd.f32 %v541_v20, %v9195_v22 }
 0x1c3   :  { %v543_v21 = vpop.f32.mrf.mxu1 }
 0x1c4   :  { %v544_v25 = vadd.f32 %v543_v21, %v9195_v22  ;;  %v689_v38 = vmul.f32 %v542_v29, %v9201_v27 }
 0x1c5   :  { %v545_v24 = vpop.f32.mrf.mxu1 }
 0x1c6   :  { %v546_v26 = vadd.f32 %v545_v24, %v9197_v23  ;;  %v690_v36 = vmul.f32 %v544_v25, %v9210_v31 }
 0x1c7   :  { %v547_v30 = vpop.f32.mrf.mxu1 }
 0x1c8   :  { %v548_v33 = vadd.f32 %v547_v30, %v9197_v23  ;;  %v692_v34 = vmul.f32 %v546_v26, %v9204_v28 }
 0x1c9   :  { %v9217_v35 = vpop.f32.mrf.mxu1 }
 0x1ca   :  { %v693_v37 = vmul.f32 %v548_v33, %v9213_v32  ;;  %v695_v41 = vpack.c.bf16 %v692_v34, %v689_v38 }
 0x1cb   :  { %v9222_v39 = vpop.f32.mrf.mxu1 }
 0x1cc   :  { %v696_v40 = vpack.c.bf16 %v693_v37, %v690_v36 }
 0x1cd   :  { %v9224_v42 = vpop.f32.mrf.mxu1 }
 0x1ce   :  { %715 = vmatprep.subr.bf16.mxu1 %v696_v40 }
 0x1cf   :  { %v9226_v43 = vpop.f32.mrf.mxu1  ;;  %716 = vmatpush1.bf16.msra.mxu1 %v695_v41 }
 0x1d1   :  { %v594_v45 = vpop.f32.mrf.mxu1 }
 0x1d2   :  { %7345 = vmatmul.mubr.msk.bf16.vlgmr.msra.gmra.mxu1 %vm487_vm0, %v9228_v44  ;;  %v595_v11 = vadd.f32 %v594_v45, %v445_v14 }
 0x1d3   :  { %v596_v46 = vpop.f32.mrf.mxu1  ;;  %823 = vmatprep.mubr.bf16.mxu1 %v11081_v0 }
 0x1d4   :  { %v597_v47 = vadd.f32 %v596_v46, %v445_v14 }
 0x1d5   :  { %v598_v48 = vpop.f32.mrf.mxu1 }
 0x1d6   :  { %v9233_v51 = vmul.f32 %v597_v47, %v542_v29  ;;  %v599_v17 = vadd.f32 %v598_v48, %v9193_v18 }
 0x1d7   :  { %v600_v54 = vpop.f32.mrf.mxu1 }
 0x1d8   :  { %v601_v57 = vadd.f32 %v600_v54, %v9193_v18 }
 0x1d9   :  { %v604_v59 = vpop.f32.mrf.mxu1  ;;  %v657_v61 = vpop.f32.mrf.mxu0 }
 0x1da   :  { %v9236_v62 = vmul.f32 %v601_v57, %v546_v26  ;;  %v658_v63 = vadd.f32 %v657_v61, %v445_v14  ;;  %v605_v1 = vadd.f32 %v604_v59, %v9195_v22 }
 0x1db   :  { %v606_v2 = vpop.f32.mrf.mxu1  ;;  %v659_v3 = vpop.f32.mrf.mxu0 }
 0x1dc   :  { %v9241_v5 = vmul.f32 %v658_v63, %v544_v25  ;;  %v607_v7 = vadd.f32 %v606_v2, %v9195_v22  ;;  %v660_v12 = vadd.f32 %v659_v3, %v445_v14  ;;  %v691_v24 = vmul.f32 %v605_v1, %v595_v11 }
 0x1dd   :  { %v608_v15 = vpop.f32.mrf.mxu1  ;;  %v661_v16 = vpop.f32.mrf.mxu0 }
 0x1de   :  { %v9245_v19 = vmul.f32 %v607_v7, %v597_v47  ;;  %v609_v20 = vadd.f32 %v608_v15, %v9197_v23  ;;  %v662_v21 = vadd.f32 %v661_v16, %v9193_v18  ;;  %v9249_v26 = vmul.f32 %v660_v12, %v605_v1 }
 0x1df   :  { %v610_v29 = vpop.f32.mrf.mxu1  ;;  %v663_v25 = vpop.f32.mrf.mxu0  ;;  %v782_v16 = vmul.f32 %v607_v7, %v9201_v27 }
 0x1e0   :  { %v694_v30 = vmul.f32 %v609_v20, %v599_v17  ;;  %v9251_v34 = vmul.f32 %v662_v21, %v548_v33  ;;  %v611_v14 = vadd.f32 %v610_v29, %v9197_v23  ;;  %v664_v36 = vadd.f32 %v663_v25, %v9193_v18 }
 0x1e1   :  { %v667_v37 = vpop.f32.mrf.mxu0 }
 0x1e2   :  { %v697_v38 = vpack.c.bf16 %v694_v30, %v691_v24  ;;  %v9255_v40 = vmul.f32 %v611_v14, %v601_v57  ;;  %v9257_v41 = vmul.f32 %v664_v36, %v609_v20  ;;  %v668_v45 = vadd.f32 %v667_v37, %v9195_v22 }
 0x1e3   :  { %v669_v46 = vpop.f32.mrf.mxu0  ;;  %v785_v61 = vmul.f32 %v611_v14, %v9204_v28 }
 0x1e4   :  { %8018 = vmatpush3.bf16.msra.mxu0 %v697_v38  ;;  %v9266_v18 = vmul.f32 %v668_v45, %v658_v63  ;;  %v670_v54 = vadd.f32 %v669_v46, %v9195_v22  ;;  %v783_v3 = vmul.f32 %v668_v45, %v9210_v31 }
 0x1e5   :  { %v671_v57 = vpop.f32.mrf.mxu0  ;;  %8023 = vmatprep.subr.bf16.mxu0 %v11090_v13  ;;  %v788_v29 = vpack.c.bf16 %v785_v61, %v782_v16 }
 0x1e6   :  { %v672_v59 = vadd.f32 %v671_v57, %v9197_v23  ;;  %v9272_v1 = vmul.f32 %v670_v54, %v660_v12  ;;  %v784_v28 = vmul.f32 %v670_v54, %v595_v11 }
 0x1e7   :  { %v673_v2 = vpop.f32.mrf.mxu0  ;;  %8020 = vmatmul.mubr.msk.bf16.vlgmr.msra.gmra.mxu0 %vm487_vm0, %v9228_v44 }
 0x1e8   :  { %v786_v63 = vmul.f32 %v672_v59, %v9213_v32  ;;  %v9278_v15 = vmul.f32 %v672_v59, %v662_v21  ;;  %v674_v22 = vadd.f32 %v673_v2, %v9197_v23  ;;  %8025 = vmatprep.mubr.msk.bf16.mxu0 %vm8924_vm1, %v11090_v13  ;;  %v9303_v23 = vpop.f32.mrf.mxu1 }
 0x1ea   :  { %v787_v12 = vmul.f32 %v674_v22, %v599_v17  ;;  %v9284_v20 = vmul.f32 %v674_v22, %v664_v36  ;;  %v789_v24 = vpack.c.bf16 %v786_v63, %v783_v3  ;;  %v9305_v27 = vpop.f32.mrf.mxu1  ;;  %v9311_v36 = vpop.f32.mrf.mxu0 }
 0x1ec   :  { %v790_v25 = vpack.c.bf16 %v787_v12, %v784_v28  ;;  %805 = vmatprep.subr.bf16.mxu1 %v789_v24  ;;  %v9307_v7 = vpop.f32.mrf.mxu1  ;;  %v9313_v37 = vpop.f32.mrf.mxu0 }
 0x1ed   :  { %806 = vmatpush1.bf16.msra.mxu1 %v788_v29 }
 0x1ee   :  { %8024 = vmatpush3.bf16.msra.mxu0 %v790_v25  ;;  %v9309_v11 = vpop.f32.mrf.mxu1  ;;  %v9315_v38 = vpop.f32.mrf.mxu0 }
 0x1ef   :  { %8029 = vmatprep.subr.bf16.mxu0 %v11090_v13 }
 0x1f0   :  { %7347 = vmatmul.mubr.msk.bf16.vlgmr.msra.gmra.mxu1 %vm487_vm0, %v9228_v44  ;;  %v9317_v45 = vpop.f32.mrf.mxu0 }
 0x1f1   :  { %8026 = vmatmul.mubr.msk.bf16.vlgmr.msra.gmra.mxu0 %vm487_vm0, %v9228_v44  ;;  %956 = vmatprep.mubr.bf16.mxu1 %v11081_v0 }
 0x1f2   :  { %8031 = vmatprep.mubr.msk.bf16.mxu0 %vm8924_vm1, %v11090_v13 }
 0x292   :  { %v735_v17 = vpop.f32.mrf.mxu1 }
 0x294   :  { %v737_v21 = vpop.f32.mrf.mxu1 }
 0x296   :  { %v739_v30 = vpop.f32.mrf.mxu1 }
 0x298   :  { %v740_v14 = vpop.f32.mrf.mxu1 }
 0x2a7   :  { %v776_v46 = vpop.f32.mrf.mxu0 }
 0x2a9   :  { %v8021_v54 = vpop.f32.mrf.mxu0 }
 0x2ab   :  { %v779_v57 = vpop.f32.mrf.mxu0 }
 0x2ad   :  { %v8022_v59 = vpop.f32.mrf.mxu0 }
 0x2b0   :  { %v825_v61 = vpop.f32.mrf.mxu1 }
 0x2b1   :  { %v872_v2 = vmax.f32 %v735_v17, %v825_v61  ;;  %v866_v3 = vpop.f32.mrf.mxu0 }
 0x2b2   :  { %v874_v63 = vmax.f32 %v776_v46, %v866_v3  ;;  %v827_v22 = vpop.f32.mrf.mxu1 }
 0x2b3   :  { %v875_v16 = vsub.f32 %v735_v17, %v872_v2  ;;  %v884_v28 = vsub.f32 %v825_v61, %v872_v2  ;;  %v873_v12 = vmax.f32 %v737_v21, %v827_v22  ;;  %v8027_v24 = vpop.f32.mrf.mxu0 }
 0x2b4   :  { %v877_v29 = vsub.f32 %v776_v46, %v874_v63  ;;  %v886_v25 = vsub.f32 %v866_v3, %v874_v63  ;;  %v829_v30 = vpop.f32.mrf.mxu1 }
 0x2b5   :  { %v878_v14 = vmul.f32 1.442695, %v875_v16  ;;  %v887_v33 = vmul.f32 1.442695, %v884_v28  ;;  %v876_v32 = vsub.f32 %v737_v21, %v873_v12  ;;  %v885_v31 = vsub.f32 %v827_v22, %v873_v12  ;;  %v869_v4 = vpop.f32.mrf.mxu0 }
 0x2b6   :  { %v882_v54 = vmul.f32 1.442695, %v877_v29  ;;  %v891_v57 = vmul.f32 1.442695, %v886_v25  ;;  %v830_v59 = vpop.f32.mrf.mxu1 }
 0x2b7   :  { %8809 = vpow2.f32 %v878_v14  ;;  %v880_v48 = vmul.f32 1.442695, %v876_v32  ;;  %v8028_v47 = vpop.f32.mrf.mxu0  ;;  %v889_v0 = vmul.f32 1.442695, %v885_v31  ;;  %v9321_v14 = vld [vmem:[%s9301_s27] sm:$0xff]   ;;  %s7328_s27 = sld [smem:[%s11080_s0 + %s8942_s24]]  }
 0x2b8   :  { %8811 = vpow2.f32 %v887_v33 }
 0x2b9   :  { %8813 = vpow2.f32 %v882_v54 }
 0x2ba   :  { %8815 = vpow2.f32 %v891_v57 }
 0x2bb   :  { %8817 = vpow2.f32 %v880_v48 }
 0x2bc   :  { %8819 = vpow2.f32 %v889_v0 }
 0x2c4   :  { %v8810_v17 = vpop.eup %8809 }
 0x2c5   :  { %v8812_v46 = vpop.eup %8811 }
 0x2c6   :  { %v8814_v61 = vpop.eup %8813  ;;  %v893_v2 = vadd.f32 %v8812_v46, %v8810_v17 }
 0x2c7   :  { %v8816_v3 = vpop.eup %8815 }
 0x2c8   :  { %v8818_v21 = vpop.eup %8817  ;;  %8821 = vrcp.f32 %v893_v2  ;;  %v895_v4 = vadd.f32 %v8816_v3, %v8814_v61  ;;  %v11133_v2 = vmov 0  }
 0x2c9   :  { %v8820_v63 = vpop.eup %8819 }
 0x2ca   :  { %8823 = vrcp.f32 %v895_v4  ;;  %v894_v22 = vadd.f32 %v8820_v63, %v8818_v21  ;;  %v11136_v4 = vpack.c.bf16 %v9236_v62, %v9233_v51  ;;  %v11139_v51 = vpack.c.bf16 %v9255_v40, %v9245_v19  ;;  %v9383_v62 = vpop.permute.xlu0 %464  ;;  %v9389_v40 = vpop.permute.xlu1 %469 }
 0x2cb   :  { %v9387_v19 = vadd.f32 %v9303_v23, %v9383_v62  ;;  %v9401_v23 = vadd.f32 %v9313_v37, %v9383_v62 }
 0x2cc   :  { %8825 = vrcp.f32 %v894_v22 }
 0x2d5   :  { %v8822_v47 = vpop.eup %8821 }
 0x2d6   :  { %v899_v33 = vmul.f32 %v8822_v47, %v8810_v17  ;;  %v1014_v0 = vmul.f32 %v8822_v47, %v8812_v46 }
 0x2d7   :  { %v8824_v31 = vpop.eup %8823 }
 0x2d8   :  { %v901_v32 = vmul.f32 %v8824_v31, %v8814_v61  ;;  %v1016_v16 = vmul.f32 %v8824_v31, %v8816_v3  ;;  %v902_v24 = vpack.c.bf16 %v899_v33, %v899_v33  ;;  %v1017_v17 = vpack.c.bf16 %v1014_v0, %v1014_v0 }
 0x2d9   :  { %v8826_v48 = vpop.eup %8825  ;;  %v11134_v3 = vpack.c.bf16 %v9251_v34, %v9241_v5  ;;  %v11137_v5 = vpack.c.bf16 %v9278_v15, %v9266_v18 }
 0x2da   :  { %v900_v28 = vmul.f32 %v8826_v48, %v8818_v21  ;;  %v904_v12 = vpack.c.bf16 %v901_v32, %v901_v32  ;;  %v1015_v29 = vmul.f32 %v8826_v48, %v8820_v63  ;;  %v1019_v54 = vpack.c.bf16 %v1016_v16, %v1016_v16 }
 0x2db   :  { %v916_v57 = vsel %vm914_vm2, %v902_v24, 0  ;;  %v1021_v61 = vsel %vm914_vm2, %v1017_v17, 0  ;;  %v11135_v21 = vpack.c.bf16 %v9257_v41, %v9249_v26  ;;  %v11138_v26 = vpack.c.bf16 %v9284_v20, %v9272_v1 }
 0x2dc   :  { %v903_v25 = vpack.c.bf16 %v900_v28, %v900_v28  ;;  %v922_v30 = vsel %vm914_vm2, %v904_v12, 0  ;;  %v1018_v59 = vpack.c.bf16 %v1015_v29, %v1015_v29  ;;  %v1027_v46 = vsel %vm914_vm2, %v1019_v54, 0 }
 0x2dd   :  { %8030 = vmatpush3.bf16.msra.mxu0 %v922_v30  ;;  %v9394_v1 = vadd.f32 %v9307_v7, %v9389_v40  ;;  %v9407_v32 = vadd.f32 %v9217_v35, %v9383_v62  ;;  %v9411_v7 = vadd.f32 %v9305_v27, %v9383_v62  ;;  %v9416_v28 = vadd.f32 %v9317_v45, %v9389_v40 }
 0x2de   :  { %7350 = vmatprep.subr.msk.bf16.mxu1 %vm914_vm2, %v903_v25  ;;  %8035 = vmatprep.subr.bf16.mxu0 %v11090_v13  ;;  %v9426_v27 = vadd.f32 %v9224_v42, %v9389_v40  ;;  %v9430_v25 = vadd.f32 %v9309_v11, %v9389_v40 }
 0x2df   :  { %939 = vmatpush1.bf16.msra.mxu1 %v916_v57 }
 0x2e0   :  { %7353 = vmatprep.subr.msk.bf16.mxu1 %vm914_vm2, %v1018_v59  ;;  %8032 = vmatmul.mubr.msk.bf16.vlgmr.msra.gmra.mxu0 %vm910_vm3, %v9321_v14 }
 0x2e1   :  { %8036 = vmatpush3.bf16.msra.mxu0 %v1027_v46  ;;  %8037 = vmatprep.mubr.msk.bf16.mxu0 %vm8924_vm1, %v11090_v13 }
 0x2e2   :  { %7351 = vmatmul.mubr.msk.bf16.vlgmr.msra.gmra.mxu1 %vm910_vm3, %v9321_v14  ;;  %8041 = vmatprep.subr.bf16.mxu0 %v11090_v13 }
 0x2e3   :  { %1044 = vmatpush1.bf16.msra.mxu1 %v1021_v61  ;;  %1061 = vmatprep.mubr.bf16.mxu1 %v11133_v2 }
 0x2e4   :  { %1148 = vmatprep.subr.bf16.mxu1 %v11134_v3 }
 0x2e8   :  { %8038 = vmatmul.mubr.msk.bf16.vlgmr.msra.gmra.mxu0 %vm910_vm3, %v9321_v14 }
 0x2e9   :  { %8042 = vmatpush3.bf16.msra.mxu0 %v11135_v21  ;;  %8043 = vmatprep.mubr.msk.bf16.mxu0 %vm8924_vm1, %v11090_v13 }
 0x2ea   :  { %7354 = vmatmul.mubr.msk.bf16.vlgmr.msra.gmra.mxu1 %vm910_vm3, %v9321_v14  ;;  %8047 = vmatprep.subr.bf16.mxu0 %v11090_v13 }
 0x2eb   :  { %1149 = vmatpush1.bf16.msra.mxu1 %v11136_v4  ;;  %1166 = vmatprep.mubr.bf16.mxu1 %v11133_v2 }
 0x2ec   :  { %1238 = vmatprep.subr.bf16.mxu1 %v11137_v5 }
 0x2f0   :  { %8044 = vmatmul.mubr.msk.bf16.vlgmr.msra.gmra.mxu0 %vm487_vm0, %v9228_v44 }
 0x2f1   :  { %8048 = vmatpush3.bf16.msra.mxu0 %v11138_v26  ;;  %8049 = vmatprep.mubr.msk.bf16.mxu0 %vm8924_vm1, %v11090_v13 }
 0x2f2   :  { %7356 = vmatmul.mubr.msk.bf16.vlgmr.msra.gmra.mxu1 %vm487_vm0, %v9228_v44  ;;  %8053 = vmatprep.subr.bf16.mxu0 %v11090_v13 }
 0x2f3   :  { %1239 = vmatpush1.bf16.msra.mxu1 %v11139_v51  ;;  %1256 = vmatprep.mubr.bf16.mxu1 %v11133_v2 }
 0x2f8   :  { %8050 = vmatmul.mubr.msk.bf16.vlgmr.msra.gmra.mxu0 %vm487_vm0, %v9228_v44 }
 0x2f9   :  { %8055 = vmatprep.mubr.msk.bf16.mxu0 %vm8924_vm1, %v11090_v13 }
 0x2fa   :  { %7358 = vmatmul.mubr.msk.bf16.vlgmr.msra.gmra.mxu1 %vm487_vm0, %v9228_v44 }
 0x2fb   :  { %1379 = vmatprep.mubr.bf16.mxu1 %v11133_v2 }
 0x3a0   :  { %v1001_v34 = vpop.f32.mrf.mxu0 }
 0x3a1   :  { %v1010_v41 = vmul.f32 %v1001_v34, %v9387_v19 }
 0x3a2   :  { %v958_v44 = vpop.f32.mrf.mxu1  ;;  %v8033_v18 = vpop.f32.mrf.mxu0 }
 0x3a3   :  { %v1008_v37 = vmul.f32 %v958_v44, %v9407_v32 }
 0x3a4   :  { %v9396_v15 = vpop.f32.mrf.mxu1  ;;  %v1004_v20 = vpop.f32.mrf.mxu0 }
 0x3a5   :  { %v1013_v63 = vmul.f32 %v1004_v20, %v9394_v1 }
 0x3a6   :  { %v962_v22 = vpop.f32.mrf.mxu1  ;;  %v8034_v47 = vpop.f32.mrf.mxu0 }
 0x3a7   :  { %v1011_v59 = vmul.f32 %v962_v22, %v9426_v27 }
 0x3a8   :  { %v9403_v33 = vpop.f32.mrf.mxu1  ;;  %v1106_v31 = vpop.f32.mrf.mxu0 }
 0x3a9   :  { %v1115_v16 = vmul.f32 %v1106_v31, %v9401_v23 }
 0x3aa   :  { %v1063_v48 = vpop.f32.mrf.mxu1  ;;  %v8039_v0 = vpop.f32.mrf.mxu0 }
 0x3ab   :  { %v9419_v12 = vadd.f32 %v1115_v16, %v1010_v41  ;;  %v1113_v24 = vmul.f32 %v1063_v48, %v9411_v7 }
 0x3ac   :  { %v9422_v35 = vpop.f32.mrf.mxu1  ;;  %v1109_v29 = vpop.f32.mrf.mxu0 }
 0x3ad   :  { %v9432_v30 = vadd.f32 %v1113_v24, %v1008_v37  ;;  %v1118_v45 = vmul.f32 %v1109_v29, %v9416_v28 }
 0x3ae   :  { %v1067_v54 = vpop.f32.mrf.mxu1  ;;  %v8040_v57 = vpop.f32.mrf.mxu0 }
 0x3af   :  { %v9436_v17 = vadd.f32 %v1118_v45, %v1013_v63  ;;  %v1116_v46 = vmul.f32 %v1067_v54, %v9430_v25 }
 0x3b0   :  { %v9439_v61 = vpop.f32.mrf.mxu1  ;;  %v1209_v42 = vpop.f32.mrf.mxu0 }
 0x3b1   :  { %v1552_v3 = vpack.c.bf16 %v9436_v17, %v9419_v12  ;;  %v9443_v11 = vadd.f32 %v1116_v46, %v1011_v59 }
 0x3b2   :  { %v1168_v21 = vpop.f32.mrf.mxu1  ;;  %v8045_v4 = vpop.f32.mrf.mxu0 }
 0x3b3   :  { %v1550_v5 = vpack.c.bf16 %v9443_v11, %v9432_v30 }
 0x3b4   :  { %v1170_v26 = vpop.f32.mrf.mxu1  ;;  %v1212_v51 = vpop.f32.mrf.mxu0 }
 0x3b6   :  { %v1172_v34 = vpop.f32.mrf.mxu1  ;;  %v8046_v41 = vpop.f32.mrf.mxu0 }
 0x3b8   :  { %v1173_v44 = vpop.f32.mrf.mxu1  ;;  %v1299_v18 = vpop.f32.mrf.mxu0 }
 0x3b9   :  { %v1307_v20 = vmax.f32 %v1209_v42, %v1299_v18 }
 0x3ba   :  { %v1258_v63 = vpop.f32.mrf.mxu1  ;;  %v8051_v22 = vpop.f32.mrf.mxu0 }
 0x3bb   :  { %v1310_v47 = vsub.f32 %v1209_v42, %v1307_v20  ;;  %v1319_v31 = vsub.f32 %v1299_v18, %v1307_v20  ;;  %v1305_v16 = vmax.f32 %v1168_v21, %v1258_v63 }
 0x3bc   :  { %v1260_v48 = vpop.f32.mrf.mxu1  ;;  %v1302_v0 = vpop.f32.mrf.mxu0 }
 0x3bd   :  { %v1315_v37 = vmul.f32 1.442695, %v1310_v47  ;;  %v1324_v24 = vmul.f32 1.442695, %v1319_v31  ;;  %v1308_v29 = vsub.f32 %v1168_v21, %v1305_v16  ;;  %v1317_v45 = vsub.f32 %v1258_v63, %v1305_v16 }
 0x3be   :  { %v1306_v54 = vmax.f32 %v1170_v26, %v1260_v48  ;;  %v1262_v57 = vpop.f32.mrf.mxu1  ;;  %v8052_v59 = vpop.f32.mrf.mxu0 }
 0x3bf   :  { %8827 = vpow2.f32 %v1315_v37  ;;  %v1311_v46 = vmul.f32 1.442695, %v1308_v29  ;;  %v1320_v4 = vmul.f32 1.442695, %v1317_v45  ;;  %v9449_v29 = vadd.f32 %v9315_v38, %v9389_v40 }
 0x3c0   :  { %8829 = vpow2.f32 %v1324_v24  ;;  %v1309_v51 = vsub.f32 %v1170_v26, %v1306_v54  ;;  %v1318_v34 = vsub.f32 %v1260_v48, %v1306_v54  ;;  %v1263_v41 = vpop.f32.mrf.mxu1  ;;  %v9453_v57 = vadd.f32 %v9226_v43, %v9389_v40 }
 0x3c1   :  { %8831 = vpow2.f32 %v1311_v46  ;;  %v9457_v46 = vadd.f32 %v9311_v36, %v9383_v62  ;;  %v554_v43 = vadd.f32 %v9222_v39, %v9383_v62 }
 0x3c2   :  { %8833 = vpow2.f32 %v1320_v4  ;;  %v1313_v42 = vmul.f32 1.442695, %v1309_v51  ;;  %v1322_v44 = vmul.f32 1.442695, %v1318_v34  ;;  %v1117_v4 = vmul.f32 %v9439_v61, %v9449_v29 }
 0x3c3   :  { %v1012_v36 = vmul.f32 %v9403_v33, %v9453_v57  ;;  %v1114_v40 = vmul.f32 %v9422_v35, %v9457_v46 }
 0x3c4   :  { %8835 = vpow2.f32 %v1313_v42 }
 0x3c5   :  { %8837 = vpow2.f32 %v1322_v44 }
 0x3cc   :  { %v8828_v18 = vpop.eup %8827 }
 0x3cd   :  { %v8830_v20 = vpop.eup %8829 }
 0x3ce   :  { %v8832_v21 = vpop.eup %8831  ;;  %v1328_v63 = vadd.f32 %v8830_v20, %v8828_v18 }
 0x3cf   :  { %v8834_v22 = vpop.eup %8833 }
 0x3d0   :  { %8839 = vrcp.f32 %v1328_v63  ;;  %v1326_v47 = vadd.f32 %v8834_v22, %v8832_v21 }
 0x3d1   :  { %v8836_v31 = vpop.eup %8835 }
 0x3d2   :  { %v8838_v16 = vpop.eup %8837  ;;  %8841 = vrcp.f32 %v1326_v47 }
 0x3d3   :  { %v1327_v0 = vadd.f32 %v8838_v16, %v8836_v31 }
 0x3d5   :  { %8843 = vrcp.f32 %v1327_v0 }
 0x3dd   :  { %v8840_v26 = vpop.eup %8839 }
 0x3de   :  { %v1334_v48 = vmul.f32 %v8840_v26, %v8828_v18  ;;  %v1439_v37 = vmul.f32 %v8840_v26, %v8830_v20  ;;  %v1009_v18 = vmul.f32 %v9396_v15, %v554_v43 }
 0x3df   :  { %v8842_v24 = vpop.eup %8841 }
 0x3e0   :  { %v1337_v45 = vpack.c.bf16 %v1334_v48, %v1334_v48  ;;  %v1332_v54 = vmul.f32 %v8842_v24, %v8832_v21  ;;  %v1442_v34 = vpack.c.bf16 %v1439_v37, %v1439_v37  ;;  %v1437_v44 = vmul.f32 %v8842_v24, %v8834_v22  ;;  %v8251_v22 = vld [vmem:[%s9381_s1] sm:$0xff]   ;;  %s7329_s1 = sld [smem:[%s11080_s0 + %s8943_s28]]  }
 0x3e1   :  { %v1123_v21 = vadd.f32 %v1117_v4, %v1012_v36  ;;  %v1120_v33 = vadd.f32 %v1114_v40, %v1009_v18 }
 0x3e2   :  { %v8844_v59 = vpop.eup %8843  ;;  %v1345_v51 = vsel %vm914_vm2, %v1337_v45, 0  ;;  %v1335_v41 = vpack.c.bf16 %v1332_v54, %v1332_v54  ;;  %v1450_v20 = vsel %vm914_vm2, %v1442_v34, 0  ;;  %v1440_v63 = vpack.c.bf16 %v1437_v44, %v1437_v44 }
 0x3e3   :  { %8054 = vmatpush3.bf16.msra.mxu0 %v1345_v51  ;;  %v1333_v38 = vmul.f32 %v8844_v59, %v8836_v31  ;;  %v1438_v42 = vmul.f32 %v8844_v59, %v8838_v16  ;;  %v1551_v35 = vpack.c.bf16 %v1123_v21, %v1120_v33 }
 0x3e4   :  { %8059 = vmatprep.subr.bf16.mxu0 %v11090_v13  ;;  %v1339_v39 = vsel %vm914_vm2, %v1335_v41, 0  ;;  %v1444_v15 = vsel %vm914_vm2, %v1440_v63, 0 }
 0x3e5   :  { %v1336_v61 = vpack.c.bf16 %v1333_v38, %v1333_v38  ;;  %v1441_v62 = vpack.c.bf16 %v1438_v42, %v1438_v42 }
 0x3e6   :  { %8056 = vmatmul.mubr.msk.bf16.vlgmr.msra.gmra.mxu0 %vm910_vm3, %v9321_v14 }
 0x3e7   :  { %7360 = vmatprep.subr.msk.bf16.mxu1 %vm914_vm2, %v1336_v61  ;;  %8060 = vmatpush3.bf16.msra.mxu0 %v1450_v20 }
 0x3e8   :  { %1362 = vmatpush1.bf16.msra.mxu1 %v1339_v39  ;;  %8061 = vmatprep.mubr.msk.bf16.mxu0 %vm8924_vm1, %v11090_v13 }
 0x3e9   :  { %7363 = vmatprep.subr.msk.bf16.mxu1 %vm914_vm2, %v1441_v62 }
 0x3eb   :  { %7361 = vmatmul.mubr.msk.bf16.vlgmr.msra.gmra.mxu1 %vm910_vm3, %v9321_v14 }
 0x3ec   :  { %1467 = vmatpush1.bf16.msra.mxu1 %v1444_v15  ;;  %1484 = vmatprep.mubr.bf16.mxu1 %v11133_v2 }
 0x3ed   :  { %1578 = vmatprep.subr.bf16.mxu1 %v1551_v35 }
 0x3ee   :  { %8062 = vmatmul.mubr.msk.bf16.vlgmr.msra.gmra.mxu0 %vm910_vm3, %v9321_v14 }
 0x3ef   :  { %1639 = vmatprep.mubr.bf16.mxu0 %v11133_v2 }
 0x3f3   :  { %7364 = vmatmul.mubr.msk.bf16.vlgmr.msra.gmra.mxu1 %vm910_vm3, %v9321_v14 }
 0x3f4   :  { %1579 = vmatpush1.bf16.msra.mxu1 %v1550_v5  ;;  %1596 = vmatprep.mubr.bf16.mxu1 %v11133_v2 }
 0x3fb   :  { %7367 = vmatmul.mubr.msk.bf16.vlgmr.msra.gmra.mxu1 %vm487_vm0, %v8251_v22 }
 0x3fc   :  { %1682 = vmatprep.mubr.bf16.mxu1 %v11133_v2 }
 0x4a6   :  { %v1424_v47 = vpop.f32.mrf.mxu0 }
 0x4a7   :  { %v1433_v14 = vmul.f32 %v1424_v47, %v9387_v19 }
 0x4a8   :  { %v8057_v31 = vpop.f32.mrf.mxu0 }
 0x4aa   :  { %v1427_v16 = vpop.f32.mrf.mxu0 }
 0x4ab   :  { %v1381_v0 = vpop.f32.mrf.mxu1  ;;  %v1436_v59 = vmul.f32 %v1427_v16, %v9394_v1 }
 0x4ac   :  { %v8058_v26 = vpop.f32.mrf.mxu0  ;;  %v1431_v19 = vmul.f32 %v1381_v0, %v9407_v32 }
 0x4ad   :  { %v1383_v48 = vpop.f32.mrf.mxu1 }
 0x4ae   :  { %v1529_v37 = vpop.f32.mrf.mxu0  ;;  %v1432_v18 = vmul.f32 %v1383_v48, %v554_v43  ;;  %v9513_v43 = vpop.permute.xlu1 %1714 }
 0x4af   :  { %v1385_v24 = vpop.f32.mrf.mxu1  ;;  %v1538_v30 = vmul.f32 %v1529_v37, %v9401_v23 }
 0x4b0   :  { %v8063_v11 = vpop.f32.mrf.mxu0  ;;  %v1434_v23 = vmul.f32 %v1385_v24, %v9426_v27 }
 0x4b1   :  { %v1544_v5 = vadd.f32 %v1538_v30, %v1433_v14  ;;  %v1387_v45 = vpop.f32.mrf.mxu1 }
 0x4b2   :  { %v1532_v54 = vpop.f32.mrf.mxu0 }
 0x4b3   :  { %v1486_v4 = vpop.f32.mrf.mxu1  ;;  %v1541_v51 = vmul.f32 %v1532_v54, %v9416_v28  ;;  %v1435_v28 = vmul.f32 %v1387_v45, %v9453_v57 }
 0x4b4   :  { %v8064_v34 = vpop.f32.mrf.mxu0  ;;  %v1536_v42 = vmul.f32 %v1486_v4, %v9411_v7 }
 0x4b5   :  { %v1547_v38 = vadd.f32 %v1541_v51, %v1436_v59  ;;  %v1488_v41 = vpop.f32.mrf.mxu1 }
 0x4b6   :  { %v1537_v40 = vmul.f32 %v1488_v41, %v9457_v46  ;;  %v1542_v20 = vadd.f32 %v1536_v42, %v1431_v19 }
 0x4b7   :  { %v1490_v44 = vpop.f32.mrf.mxu1  ;;  %v1555_v36 = vpack.c.bf16 %v1547_v38, %v1544_v5 }
 0x4b8   :  { %v1539_v61 = vmul.f32 %v1490_v44, %v9430_v25  ;;  %v1543_v62 = vadd.f32 %v1537_v40, %v1432_v18  ;;  %v9509_v25 = vpop.permute.xlu0 %1709 }
 0x4b9   :  { %v1492_v1 = vpop.f32.mrf.mxu1  ;;  %1664 = vmatprep.subr.bf16.mxu1 %v1555_v36 }
 0x4ba   :  { %v1545_v21 = vadd.f32 %v1539_v61, %v1434_v23  ;;  %v1540_v39 = vmul.f32 %v1492_v1, %v9449_v29 }
 0x4bb   :  { %v1598_v7 = vpop.f32.mrf.mxu1 }
 0x4bc   :  { %v1546_v63 = vadd.f32 %v1540_v39, %v1435_v28  ;;  %v1553_v33 = vpack.c.bf16 %v1545_v21, %v1542_v20  ;;  %v1693_v27 = vadd.f32 %v1598_v7, %v9142_v55 }
 0x4bd   :  { %v1600_v32 = vpop.f32.mrf.mxu1 }
 0x4be   :  { %v1554_v15 = vpack.c.bf16 %v1546_v63, %v1543_v62  ;;  %1621 = vmatprep.subr.bf16.mxu0 %v1553_v33  ;;  %v1694_v57 = vadd.f32 %v1600_v32, %v9138_v52  ;;  %v1717_v47 = vadd.f32 %v9509_v25, %v1693_v27  ;;  %v9524_v27 = vpop.permute.xlu0 %1878 }
 0x4bf   :  { %v1602_v46 = vpop.f32.mrf.mxu1  ;;  %1622 = vmatpush1.bf16.msra.mxu0 %v1552_v3 }
 0x4c0   :  { %v1699_v29 = vadd.f32 %v1602_v46, %v9134_v49  ;;  %1665 = vmatpush1.bf16.msra.mxu1 %v1554_v15  ;;  %v1718_v52 = vadd.f32 %v9509_v25, %v1694_v57  ;;  %v9526_v46 = vpop.permute.xlu1 %1883 }
 0x4c1   :  { %v1604_v35 = vpop.f32.mrf.mxu1 }
 0x4c2   :  { %v1723_v55 = vadd.f32 %v9513_v43, %v1699_v29  ;;  %v1700_v31 = vadd.f32 %v1604_v35, %v9140_v53  ;;  %7368 = vmatmul.mubr.msk.bf16.vlgmr.msra.gmra.mxu0 %vm487_vm0, %v8251_v22 }
 0x4c3   :  { %7369 = vmatmul.mubr.msk.bf16.vlgmr.msra.gmra.mxu1 %vm487_vm0, %v8251_v22  ;;  %1970 = vmatprep.mubr.bf16.mxu0 %v11133_v2 }
 0x4c4   :  { %v1729_v12 = vadd.f32 %v1723_v55, %v1717_v47  ;;  %v1724_v49 = vadd.f32 %v9513_v43, %v1700_v31  ;;  %2011 = vmatprep.mubr.bf16.mxu1 %v11133_v2 }
 0x4c6   :  { %v1730_v17 = vrot.slane %v1729_v12, 4  ;;  %v1736_v3 = vadd.f32 %v1724_v49, %v1718_v52 }
 0x4c8   :  { %v1731_v16 = vadd.f32 %v1730_v17, %v1729_v12  ;;  %v1737_v0 = vrot.slane %v1736_v3, 4  ;;  %v9535_v17 = vpop.permute.xlu1 %1907 }
 0x4ca   :  { %v1732_v26 = vrot.slane %v1731_v16, 2  ;;  %v1738_v48 = vadd.f32 %v1737_v0, %v1736_v3 }
 0x4cc   :  { %v1733_v53 = vadd.f32 %v1732_v26, %v1731_v16  ;;  %v1739_v37 = vrot.slane %v1738_v48, 2 }
 0x4ce   :  { %v1734_v14 = vrot.slane %v1733_v53, 1  ;;  %v1740_v24 = vadd.f32 %v1739_v37, %v1738_v48 }
 0x4d0   :  { %v1735_v22 = vadd.f32 %v1734_v14, %v1733_v53  ;;  %v1741_v30 = vrot.slane %v1740_v24, 1 }
 0x4d2   :  { %v1772_v11 = vmul.f32 0.0625, %v1735_v22  ;;  %v1742_v5 = vadd.f32 %v1741_v30, %v1740_v24  ;;  %v9555_v24 = vld [vmem:[%s7311_s6] sm:$0xf]  ;;  %s7330_s6 = sld [smem:[%s11080_s0 + %s8944_s2]]  }
 0x4d4   :  { %v1778_v45 = vsub.f32 %v1717_v47, %v1772_v11  ;;  %v1784_v54 = vsub.f32 %v1723_v55, %v1772_v11  ;;  %v1773_v59 = vmul.f32 0.0625, %v1742_v5 }
 0x4d6   :  { %v1790_v4 = vmul.f32 %v1778_v45, %v1778_v45  ;;  %v1796_v51 = vmul.f32 %v1784_v54, %v1784_v54  ;;  %v1779_v34 = vsub.f32 %v1718_v52, %v1773_v59  ;;  %v1785_v38 = vsub.f32 %v1724_v49, %v1773_v59  ;;  %v9533_v49 = vpop.permute.xlu0 %1902 }
 0x4d8   :  { %v1802_v41 = vadd.f32 %v1796_v51, %v1790_v4  ;;  %v1791_v42 = vmul.f32 %v1779_v34, %v1779_v34  ;;  %v1797_v44 = vmul.f32 %v1785_v38, %v1785_v38 }
 0x4da   :  { %v1803_v36 = vrot.slane %v1802_v41, 4  ;;  %v1809_v19 = vadd.f32 %v1797_v44, %v1791_v42 }
 0x4dc   :  { %v1804_v23 = vadd.f32 %v1803_v36, %v1802_v41  ;;  %v1810_v40 = vrot.slane %v1809_v19, 4 }
 0x4de   :  { %v1805_v61 = vrot.slane %v1804_v23, 2  ;;  %v1811_v18 = vadd.f32 %v1810_v40, %v1809_v19 }
 0x4e0   :  { %v1806_v1 = vadd.f32 %v1805_v61, %v1804_v23  ;;  %v1812_v28 = vrot.slane %v1811_v18, 2 }
 0x4e2   :  { %v1807_v20 = vrot.slane %v1806_v1, 1  ;;  %v1813_v21 = vadd.f32 %v1812_v28, %v1811_v18 }
 0x4e4   :  { %v1808_v39 = vadd.f32 %v1807_v20, %v1806_v1  ;;  %v1814_v7 = vrot.slane %v1813_v21, 1 }
 0x4e6   :  { %v1844_v62 = vmul.f32 0.0625, %v1808_v39  ;;  %v1815_v63 = vadd.f32 %v1814_v7, %v1813_v21 }
 0x4e8   :  { %v1850_v33 = vadd.f32 1e-05, %v1844_v62  ;;  %v1845_v32 = vmul.f32 0.0625, %v1815_v63 }
 0x4ea   :  { %8845 = vrsqrt.f32 %v1850_v33  ;;  %v1851_v15 = vadd.f32 1e-05, %v1845_v32 }
 0x4ec   :  { %8847 = vrsqrt.f32 %v1851_v15 }
 0x4f7   :  { %v8846_v57 = vpop.eup %8845 }
 0x4f8   :  { %v1862_v29 = vmul.f32 %v8846_v57, %v1778_v45  ;;  %v1868_v35 = vmul.f32 %v8846_v57, %v1784_v54 }
 0x4f9   :  { %v8848_v47 = vpop.eup %8847 }
 0x4fa   :  { %v1892_v55 = vmul.f32 %v9526_v46, %v1868_v35  ;;  %v1869_v31 = vmul.f32 %v8848_v47, %v1785_v38  ;;  %v1863_v52 = vmul.f32 %v8848_v47, %v1779_v34  ;;  %v1886_v12 = vmul.f32 %v9524_v27, %v1862_v29 }
 0x4fc   :  { %v1887_v3 = vmul.f32 %v9524_v27, %v1863_v52  ;;  %v1893_v16 = vmul.f32 %v9526_v46, %v1869_v31  ;;  %v9540_v0 = vadd.f32 %v9533_v49, %v1886_v12  ;;  %v9543_v26 = vadd.f32 %v9535_v17, %v1892_v55 }
 0x4fe   :  { %v9546_v48 = vadd.f32 %v9533_v49, %v1887_v3  ;;  %v9549_v53 = vadd.f32 %v9535_v17, %v1893_v16  ;;  %v1923_v14 = vpack.c.bf16 %v9543_v26, %v9540_v0 }
 0x500   :  { %v1924_v37 = vpack.c.bf16 %v9549_v53, %v9546_v48 }
 0x502   :  { %1952 = vmatprep.subr.bf16.mxu0 %v1924_v37 }
 0x503   :  { %1953 = vmatpush1.bf16.msra.mxu0 %v1923_v14 }
 0x506   :  { %7370 = vmatmul.mubr.msk.bf16.vlgmr.msra.gmra.mxu0 %vm487_vm0, %v9555_v24 }
 0x507   :  { %2052 = vmatprep.mubr.bf16.mxu0 %v11133_v2 }
 0x582   :  { %v1641_v22 = vpop.f32.mrf.mxu0 }
 0x583   :  { %v1684_v30 = vpop.f32.mrf.mxu1  ;;  %v1695_v5 = vadd.f32 %v1641_v22, %v9148_v58 }
 0x584   :  { %v1643_v11 = vpop.f32.mrf.mxu0  ;;  %v1697_v54 = vadd.f32 %v1684_v30, %v9174_v10 }
 0x585   :  { %v1686_v45 = vpop.f32.mrf.mxu1  ;;  %v1696_v4 = vadd.f32 %v1643_v11, %v9136_v50  ;;  %v1719_v44 = vadd.f32 %v9509_v25, %v1695_v5 }
 0x586   :  { %v1645_v59 = vpop.f32.mrf.mxu0  ;;  %v1698_v38 = vadd.f32 %v1686_v45, %v9169_v8  ;;  %v1721_v10 = vadd.f32 %v9509_v25, %v1697_v54 }
 0x587   :  { %v1701_v51 = vadd.f32 %v1645_v59, %v9152_v60  ;;  %v1688_v34 = vpop.f32.mrf.mxu1  ;;  %v1720_v60 = vadd.f32 %v9509_v25, %v1696_v4 }
 0x588   :  { %v1703_v41 = vadd.f32 %v1688_v34, %v9167_v6  ;;  %v1647_v42 = vpop.f32.mrf.mxu0  ;;  %v1722_v6 = vadd.f32 %v9509_v25, %v1698_v38 }
 0x589   :  { %v1725_v36 = vadd.f32 %v9513_v43, %v1701_v51  ;;  %v1702_v58 = vadd.f32 %v1647_v42, %v9144_v56  ;;  %v1690_v19 = vpop.f32.mrf.mxu1 }
 0x58a   :  { %v1727_v23 = vadd.f32 %v9513_v43, %v1703_v41  ;;  %v1704_v50 = vadd.f32 %v1690_v19, %v9171_v9 }
 0x58b   :  { %v1743_v40 = vadd.f32 %v1725_v36, %v1719_v44  ;;  %v1726_v8 = vadd.f32 %v9513_v43, %v1702_v58 }
 0x58c   :  { %v1757_v61 = vadd.f32 %v1727_v23, %v1721_v10  ;;  %v1728_v18 = vadd.f32 %v9513_v43, %v1704_v50 }
 0x58d   :  { %v1744_v1 = vrot.slane %v1743_v40, 4  ;;  %v1750_v28 = vadd.f32 %v1726_v8, %v1720_v60 }
 0x58e   :  { %v1758_v56 = vrot.slane %v1757_v61, 4  ;;  %v1764_v20 = vadd.f32 %v1728_v18, %v1722_v6 }
 0x58f   :  { %v1745_v21 = vadd.f32 %v1744_v1, %v1743_v40  ;;  %v1751_v39 = vrot.slane %v1750_v28, 4 }
 0x590   :  { %v1759_v7 = vadd.f32 %v1758_v56, %v1757_v61  ;;  %v1765_v62 = vrot.slane %v1764_v20, 4 }
 0x591   :  { %v1746_v63 = vrot.slane %v1745_v21, 2  ;;  %v1752_v9 = vadd.f32 %v1751_v39, %v1750_v28 }
 0x592   :  { %v1760_v33 = vrot.slane %v1759_v7, 2  ;;  %v1766_v32 = vadd.f32 %v1765_v62, %v1764_v20 }
 0x593   :  { %v1747_v15 = vadd.f32 %v1746_v63, %v1745_v21  ;;  %v1753_v57 = vrot.slane %v1752_v9, 2 }
 0x594   :  { %v1761_v29 = vadd.f32 %v1760_v33, %v1759_v7  ;;  %v1767_v35 = vrot.slane %v1766_v32, 2 }
 0x595   :  { %v1748_v25 = vrot.slane %v1747_v15, 1  ;;  %v1754_v47 = vadd.f32 %v1753_v57, %v1752_v9 }
 0x596   :  { %v1762_v55 = vrot.slane %v1761_v29, 1  ;;  %v1768_v43 = vadd.f32 %v1767_v35, %v1766_v32 }
 0x597   :  { %v1749_v31 = vadd.f32 %v1748_v25, %v1747_v15  ;;  %v1755_v52 = vrot.slane %v1754_v47, 1 }
 0x598   :  { %v1763_v12 = vadd.f32 %v1762_v55, %v1761_v29  ;;  %v1769_v3 = vrot.slane %v1768_v43, 1 }
 0x599   :  { %v1774_v16 = vmul.f32 0.0625, %v1749_v31  ;;  %v1756_v37 = vadd.f32 %v1755_v52, %v1754_v47 }
 0x59a   :  { %v1776_v14 = vmul.f32 0.0625, %v1763_v12  ;;  %v1770_v22 = vadd.f32 %v1769_v3, %v1768_v43 }
 0x59b   :  { %v1780_v30 = vsub.f32 %v1719_v44, %v1774_v16  ;;  %v1786_v11 = vsub.f32 %v1725_v36, %v1774_v16  ;;  %v1775_v5 = vmul.f32 0.0625, %v1756_v37 }
 0x59c   :  { %v1782_v45 = vsub.f32 %v1721_v10, %v1776_v14  ;;  %v1788_v54 = vsub.f32 %v1727_v23, %v1776_v14  ;;  %v1777_v59 = vmul.f32 0.0625, %v1770_v22 }
 0x59d   :  { %v1792_v4 = vmul.f32 %v1780_v30, %v1780_v30  ;;  %v1798_v51 = vmul.f32 %v1786_v11, %v1786_v11  ;;  %v1781_v34 = vsub.f32 %v1720_v60, %v1775_v5  ;;  %v1787_v38 = vsub.f32 %v1726_v8, %v1775_v5 }
 0x59e   :  { %v1794_v41 = vmul.f32 %v1782_v45, %v1782_v45  ;;  %v1800_v42 = vmul.f32 %v1788_v54, %v1788_v54  ;;  %v1783_v58 = vsub.f32 %v1722_v6, %v1777_v59  ;;  %v1789_v19 = vsub.f32 %v1728_v18, %v1777_v59 }
 0x59f   :  { %v1816_v50 = vadd.f32 %v1798_v51, %v1792_v4  ;;  %v1793_v40 = vmul.f32 %v1781_v34, %v1781_v34  ;;  %v1799_v61 = vmul.f32 %v1787_v38, %v1787_v38 }
 0x5a0   :  { %v1830_v1 = vadd.f32 %v1800_v42, %v1794_v41  ;;  %v1795_v28 = vmul.f32 %v1783_v58, %v1783_v58  ;;  %v1801_v56 = vmul.f32 %v1789_v19, %v1789_v19 }
 0x5a1   :  { %v1817_v44 = vrot.slane %v1816_v50, 4  ;;  %v1823_v36 = vadd.f32 %v1799_v61, %v1793_v40 }
 0x5a2   :  { %v1831_v20 = vrot.slane %v1830_v1, 4  ;;  %v1837_v10 = vadd.f32 %v1801_v56, %v1795_v28 }
 0x5a3   :  { %v1818_v23 = vadd.f32 %v1817_v44, %v1816_v50  ;;  %v1824_v21 = vrot.slane %v1823_v36, 4 }
 0x5a4   :  { %v1832_v39 = vadd.f32 %v1831_v20, %v1830_v1  ;;  %v1838_v7 = vrot.slane %v1837_v10, 4 }
 0x5a5   :  { %v1819_v60 = vrot.slane %v1818_v23, 2  ;;  %v1825_v8 = vadd.f32 %v1824_v21, %v1823_v36 }
 0x5a6   :  { %v1833_v62 = vrot.slane %v1832_v39, 2  ;;  %v1839_v63 = vadd.f32 %v1838_v7, %v1837_v10  ;;  %v1933_v7 = vpop.permute.xlu0 %1932 }
 0x5a7   :  { %v1820_v6 = vadd.f32 %v1819_v60, %v1818_v23  ;;  %v1826_v18 = vrot.slane %v1825_v8, 2 }
 0x5a8   :  { %v1834_v9 = vadd.f32 %v1833_v62, %v1832_v39  ;;  %v1840_v33 = vrot.slane %v1839_v63, 2 }
 0x5a9   :  { %v1821_v32 = vrot.slane %v1820_v6, 1  ;;  %v1827_v15 = vadd.f32 %v1826_v18, %v1825_v8 }
 0x5aa   :  { %v1835_v57 = vrot.slane %v1834_v9, 1  ;;  %v1841_v29 = vadd.f32 %v1840_v33, %v1839_v63 }
 0x5ab   :  { %v1822_v35 = vadd.f32 %v1821_v32, %v1820_v6  ;;  %v1828_v25 = vrot.slane %v1827_v15, 1 }
 0x5ac   :  { %v1836_v47 = vadd.f32 %v1835_v57, %v1834_v9  ;;  %v1842_v55 = vrot.slane %v1841_v29, 1 }
 0x5ad   :  { %v1846_v43 = vmul.f32 0.0625, %v1822_v35  ;;  %v1829_v31 = vadd.f32 %v1828_v25, %v1827_v15  ;;  %v8252_v25 = vld [vmem:[%s9563_s10] sm:$0xff]   ;;  %s11048_s10 = sld [smem:[%s11080_s0 + %s8945_s7]]  }
 0x5ae   :  { %v1848_v52 = vmul.f32 0.0625, %v1836_v47  ;;  %v1843_v12 = vadd.f32 %v1842_v55, %v1841_v29 }
 0x5af   :  { %v1852_v3 = vadd.f32 1e-05, %v1846_v43  ;;  %v1847_v16 = vmul.f32 0.0625, %v1829_v31 }
 0x5b0   :  { %v1854_v37 = vadd.f32 1e-05, %v1848_v52  ;;  %v1849_v14 = vmul.f32 0.0625, %v1843_v12 }
 0x5b1   :  { %8849 = vrsqrt.f32 %v1852_v3  ;;  %v1853_v22 = vadd.f32 1e-05, %v1847_v16 }
 0x5b2   :  { %8851 = vrsqrt.f32 %v1854_v37  ;;  %v1855_v5 = vadd.f32 1e-05, %v1849_v14 }
 0x5b3   :  { %8853 = vrsqrt.f32 %v1853_v22 }
 0x5b4   :  { %8855 = vrsqrt.f32 %v1855_v5 }
 0x5be   :  { %v8850_v59 = vpop.eup %8849 }
 0x5bf   :  { %v8852_v4 = vpop.eup %8851  ;;  %v1864_v51 = vmul.f32 %v8850_v59, %v1780_v30  ;;  %v1870_v41 = vmul.f32 %v8850_v59, %v1786_v11 }
 0x5c0   :  { %v8854_v42 = vpop.eup %8853  ;;  %v1866_v50 = vmul.f32 %v8852_v4, %v1782_v45  ;;  %v1872_v40 = vmul.f32 %v8852_v4, %v1788_v54 }
 0x5c1   :  { %v8856_v61 = vpop.eup %8855  ;;  %v1894_v1 = vmul.f32 %v9526_v46, %v1870_v41  ;;  %v1871_v28 = vmul.f32 %v8854_v42, %v1787_v38  ;;  %v1865_v56 = vmul.f32 %v8854_v42, %v1781_v34  ;;  %v1888_v44 = vmul.f32 %v9524_v27, %v1864_v51 }
 0x5c2   :  { %v1896_v36 = vmul.f32 %v9526_v46, %v1872_v40  ;;  %v1873_v20 = vmul.f32 %v8856_v61, %v1789_v19  ;;  %v1867_v10 = vmul.f32 %v8856_v61, %v1783_v58  ;;  %v1890_v23 = vmul.f32 %v9524_v27, %v1866_v50  ;;  %v8255_v50 = vld [vmem:[%s9635_s14 + $0x1fc] ss:$36 sps:$4 sm:$0xff]  }
 0x5c3   :  { %v1889_v21 = vmul.f32 %v9524_v27, %v1865_v56  ;;  %v1895_v30 = vmul.f32 %v9526_v46, %v1871_v28  ;;  %v9588_v11 = vadd.f32 %v9533_v49, %v1888_v44  ;;  %v9591_v45 = vadd.f32 %v9535_v17, %v1894_v1 }
 0x5c4   :  { %v1891_v54 = vmul.f32 %v9524_v27, %v1867_v10  ;;  %v1897_v34 = vmul.f32 %v9526_v46, %v1873_v20  ;;  %v9602_v19 = vadd.f32 %v9533_v49, %v1890_v23  ;;  %v9605_v39 = vadd.f32 %v9535_v17, %v1896_v36  ;;  %v8253_v36 = vld [vmem:[%s9635_s14 + $0x1f8] ss:$36 sps:$4 sm:$0xff]  }
 0x5c5   :  { %v9596_v38 = vadd.f32 %v9533_v49, %v1889_v21  ;;  %v9599_v58 = vadd.f32 %v9535_v17, %v1895_v30  ;;  %v1925_v6 = vpack.c.bf16 %v9591_v45, %v9588_v11  ;;  %v8258_v10 = vld [vmem:[%s9635_s14 + $0x1b4] ss:$36 sps:$4 sm:$0xff]   ;;  %v9645_v21 = vpop.permute.xlu0 %2251 }
 0x5c6   :  { %v1972_v60 = vpop.f32.mrf.mxu0  ;;  %v9608_v8 = vadd.f32 %v9533_v49, %v1891_v54  ;;  %v9611_v27 = vadd.f32 %v9535_v17, %v1897_v34  ;;  %v1927_v49 = vpack.c.bf16 %v9605_v39, %v9602_v19  ;;  %v9650_v34 = vpop.permute.xlu1 %2246 }
 0x5c7   :  { %v1973_v46 = vadd.f32 %v1972_v60, %v1933_v7  ;;  %v1926_v62 = vpack.c.bf16 %v9599_v58, %v9596_v38 }
 0x5c8   :  { %v1974_v63 = vpop.f32.mrf.mxu0  ;;  %v1928_v18 = vpack.c.bf16 %v9611_v27, %v9608_v8 }
 0x5c9   :  { %v2061_v9 = vmax.f32 %v1973_v46, 0.0  ;;  %v1975_v33 = vadd.f32 %v1974_v63, %v1933_v7  ;;  %1993 = vmatprep.subr.bf16.mxu1 %v1926_v62 }
 0x5ca   :  { %1994 = vmatpush1.bf16.msra.mxu1 %v1925_v6  ;;  %2034 = vmatprep.subr.bf16.mxu0 %v1928_v18  ;;  %v1976_v17 = vpop.f32.mrf.mxu0  ;;  %v8259_v18 = vld [vmem:[%s9635_s14 + $0x168] ss:$36 sps:$4 sm:$0xff]  }
 0x5cb   :  { %v2069_v32 = vpack.c.bf16 %v2061_v9, %v2061_v9  ;;  %v2062_v15 = vmax.f32 %v1975_v33, 0.0  ;;  %2035 = vmatpush1.bf16.msra.mxu0 %v1927_v49  ;;  %v8264_v49 = vld [vmem:[%s9635_s14 + $0x124] ss:$36 sps:$4 sm:$0xff]  }
 0x5cc   :  { %v1977_v57 = vpop.f32.mrf.mxu0 }
 0x5cd   :  { %v2070_v29 = vpack.c.bf16 %v2062_v15, %v2062_v15  ;;  %7371 = vmatmul.mubr.msk.bf16.vlgmr.msra.gmra.mxu1 %vm487_vm0, %v9555_v24  ;;  %v2084_v35 = vsel %vm914_vm2, %v2069_v32, 0  ;;  %v8262_v32 = vld [vmem:[%s9635_s14 + $0x120] ss:$36 sps:$4 sm:$0xff]  }
 0x5ce   :  { %7372 = vmatmul.mubr.msk.bf16.vlgmr.msra.gmra.mxu0 %vm487_vm0, %v9555_v24  ;;  %2133 = vmatprep.mubr.bf16.mxu1 %v11133_v2 }
 0x5cf   :  { %7374 = vmatprep.subr.msk.bf16.mxu1 %vm914_vm2, %v2070_v29  ;;  %2176 = vmatprep.mubr.bf16.mxu0 %v11133_v2  ;;  %v8267_v29 = vld [vmem:[%s9635_s14 + $0xdc] ss:$36 sps:$4 sm:$0xff]  }
 0x5d0   :  { %2116 = vmatpush1.bf16.msra.mxu1 %v2084_v35 }
 0x5d5   :  { %7375 = vmatmul.mubr.msk.bf16.vlgmr.msra.gmra.mxu1 %vm910_vm3, %v8252_v25 }
 0x5d6   :  { %2219 = vmatprep.mubr.bf16.mxu1 %v11133_v2 }
 0x68d   :  { %v2013_v24 = vpop.f32.mrf.mxu1 }
 0x68e   :  { %v2014_v47 = vadd.f32 %v2013_v24, %v1933_v7  ;;  %v2054_v55 = vpop.f32.mrf.mxu0  ;;  %v8265_v24 = vld [vmem:[%s9635_s14 + $0xd8] ss:$36 sps:$4 sm:$0xff]  }
 0x68f   :  { %v2055_v43 = vadd.f32 %v2054_v55, %v1933_v7  ;;  %v2015_v31 = vpop.f32.mrf.mxu1 }
 0x690   :  { %v2063_v52 = vmax.f32 %v2014_v47, 0.0  ;;  %v2016_v12 = vadd.f32 %v2015_v31, %v1933_v7  ;;  %v2056_v3 = vpop.f32.mrf.mxu0 }
 0x691   :  { %v2065_v16 = vmax.f32 %v2055_v43, 0.0  ;;  %v2057_v37 = vadd.f32 %v2056_v3, %v1933_v7  ;;  %v2017_v14 = vpop.f32.mrf.mxu1  ;;  %v8270_v43 = vld [vmem:[%s9635_s14 + $0x94] ss:$36 sps:$4 sm:$0xff]  }
 0x692   :  { %v2071_v22 = vpack.c.bf16 %v2063_v52, %v2063_v52  ;;  %v2064_v5 = vmax.f32 %v2016_v12, 0.0  ;;  %v2058_v59 = vpop.f32.mrf.mxu0  ;;  %v8268_v12 = vld [vmem:[%s9635_s14 + $0x90] ss:$36 sps:$4 sm:$0xff]  }
 0x693   :  { %v2073_v4 = vpack.c.bf16 %v2065_v16, %v2065_v16  ;;  %v2066_v51 = vmax.f32 %v2057_v37, 0.0  ;;  %v2018_v41 = vpop.f32.mrf.mxu1  ;;  %v8273_v37 = vld [vmem:[%s9635_s14 + $0x4c] ss:$36 sps:$4 sm:$0xff]  }
 0x694   :  { %v2072_v42 = vpack.c.bf16 %v2064_v5, %v2064_v5  ;;  %v2059_v40 = vpop.f32.mrf.mxu0  ;;  %v2090_v28 = vsel %vm914_vm2, %v2071_v22, 0  ;;  %v8271_v59 = vld [vmem:[%s9635_s14 + $0x48] ss:$36 sps:$4 sm:$0xff]  }
 0x695   :  { %v2074_v61 = vpack.c.bf16 %v2066_v51, %v2066_v51  ;;  %v2135_v1 = vpop.f32.mrf.mxu1  ;;  %v2096_v44 = vsel %vm914_vm2, %v2073_v4, 0 }
 0x696   :  { %7376 = vmatprep.subr.msk.bf16.mxu0 %vm914_vm2, %v2072_v42  ;;  %v2230_v20 = vadd.f32 %v2135_v1, %v9540_v0  ;;  %v8256_v0 = vld [vmem:[%s9635_s14 + $0x1b0] ss:$36 sps:$4 sm:$0xff]  }
 0x697   :  { %v2137_v56 = vpop.f32.mrf.mxu1  ;;  %2159 = vmatpush1.bf16.msra.mxu0 %v2090_v28  ;;  %7378 = vmatprep.subr.msk.bf16.mxu1 %vm914_vm2, %v2074_v61  ;;  %v8274_v28 = vld [vmem:[%s9635_s14] ss:$36 sps:$4 sm:$0xff]  }
 0x698   :  { %2202 = vmatpush1.bf16.msra.mxu1 %v2096_v44  ;;  %3882 = vmatprep.subr.bf16.mxu0 %v8255_v50  ;;  %v2231_v30 = vadd.f32 %v2137_v56, %v9546_v48  ;;  %v2254_v60 = vadd.f32 %v9650_v34, %v2230_v20  ;;  %v8276_v50 = vld [vmem:[%s9635_s14 + $0x4] ss:$36 sps:$4 sm:$0xff]  }
 0x699   :  { %v2139_v23 = vpop.f32.mrf.mxu1 }
 0x69a   :  { %v2236_v54 = vadd.f32 %v2139_v23, %v9543_v26  ;;  %7377 = vmatmul.mubr.msk.bf16.vlgmr.msra.gmra.mxu0 %vm910_vm3, %v8252_v25  ;;  %v8261_v26 = vld [vmem:[%s9635_s14 + $0x16c] ss:$36 sps:$4 sm:$0xff]   ;;  %v2255_v48 = vadd.f32 %v9650_v34, %v2231_v30  ;;  %v8277_v23 = vld [vmem:[%s9635_s14 + $0x438] ss:$36 sps:$4 sm:$0xff]  }
 0x69b   :  { %v2141_v7 = vpop.f32.mrf.mxu1  ;;  %7379 = vmatmul.mubr.msk.bf16.vlgmr.msra.gmra.mxu1 %vm910_vm3, %v8252_v25  ;;  %3883 = vmatpush1.bf16.msra.mxu0 %v8253_v36  ;;  %v8279_v36 = vld [vmem:[%s9635_s14 + $0x43c] ss:$36 sps:$4 sm:$0xff]  }
 0x69c   :  { %v2260_v46 = vadd.f32 %v9645_v21, %v2236_v54  ;;  %v2237_v62 = vadd.f32 %v2141_v7, %v9549_v53  ;;  %3884 = vmatprep.subr.bf16.mxu0 %v8258_v10  ;;  %3967 = vmatprep.mubr.bf16.mxu1 %v11133_v2  ;;  %v8282_v7 = vld [vmem:[%s9635_s14 + $0x3f4] ss:$36 sps:$4 sm:$0xff]  }
 0x69e   :  { %v2266_v63 = vadd.f32 %v2260_v46, %v2254_v60  ;;  %v2261_v6 = vadd.f32 %v9645_v21, %v2237_v62 }
 0x69f   :  { %3885 = vmatpush1.bf16.msra.mxu0 %v8256_v0 }
 0x6a0   :  { %v2267_v9 = vrot.slane %v2266_v63, 4  ;;  %v2273_v33 = vadd.f32 %v2261_v6, %v2255_v48  ;;  %3886 = vmatprep.subr.bf16.mxu0 %v8261_v26 }
 0x6a2   :  { %v2268_v53 = vadd.f32 %v2267_v9, %v2266_v63  ;;  %v2274_v17 = vrot.slane %v2273_v33, 4 }
 0x6a3   :  { %3887 = vmatpush1.bf16.msra.mxu0 %v8259_v18  ;;  %v8283_v18 = vld [vmem:[%s9635_s14 + $0x3a8] ss:$36 sps:$4 sm:$0xff]  }
 0x6a4   :  { %v2269_v15 = vrot.slane %v2268_v53, 2  ;;  %v2275_v57 = vadd.f32 %v2274_v17, %v2273_v33  ;;  %3888 = vmatprep.subr.bf16.mxu0 %v8264_v49  ;;  %v8288_v49 = vld [vmem:[%s9635_s14 + $0x364] ss:$36 sps:$4 sm:$0xff]  }
 0x6a6   :  { %v2270_v35 = vadd.f32 %v2269_v15, %v2268_v53  ;;  %v2276_v25 = vrot.slane %v2275_v57, 2 }
 0x6a7   :  { %3889 = vmatpush1.bf16.msra.mxu0 %v8262_v32  ;;  %v8286_v32 = vld [vmem:[%s9635_s14 + $0x360] ss:$36 sps:$4 sm:$0xff]  }
 0x6a8   :  { %v2271_v47 = vrot.slane %v2270_v35, 1  ;;  %v2277_v55 = vadd.f32 %v2276_v25, %v2275_v57  ;;  %3890 = vmatprep.subr.bf16.mxu0 %v8267_v29  ;;  %v8291_v57 = vld [vmem:[%s9635_s14 + $0x31c] ss:$36 sps:$4 sm:$0xff]   ;;  %v8292_v25 = vld [vmem:[%s9635_s14 + $0x2d0] ss:$36 sps:$4 sm:$0xff]  }
 0x6a9   :  { %v8289_v29 = vld [vmem:[%s9635_s14 + $0x318] ss:$36 sps:$4 sm:$0xff]  }
 0x6aa   :  { %v2272_v31 = vadd.f32 %v2271_v47, %v2270_v35  ;;  %v2278_v52 = vrot.slane %v2277_v55, 1  ;;  %v8294_v35 = vld [vmem:[%s9635_s14 + $0x2d4] ss:$36 sps:$4 sm:$0xff]   ;;  %v8295_v47 = vld [vmem:[%s9635_s14 + $0x288] ss:$36 sps:$4 sm:$0xff]  }
 0x6ab   :  { %3891 = vmatpush1.bf16.msra.mxu0 %v8265_v24  ;;  %v8297_v24 = vld [vmem:[%s9635_s14 + $0x28c] ss:$36 sps:$4 sm:$0xff]  }
 0x6ac   :  { %v2308_v3 = vmul.f32 0.0625, %v2272_v31  ;;  %v2279_v16 = vadd.f32 %v2278_v52, %v2277_v55  ;;  %3892 = vmatprep.subr.bf16.mxu0 %v8270_v43  ;;  %v9702_v55 = vpop.permute.xlu0 %2419  ;;  %v9704_v43 = vpop.permute.xlu1 %2414  ;;  %v8300_v31 = vld [vmem:[%s9635_s14 + $0x244] ss:$36 sps:$4 sm:$0xff]  }
 0x6ae   :  { %v9669_v14 = vsub.f32 %v2254_v60, %v2308_v3  ;;  %v9671_v22 = vsub.f32 %v2260_v46, %v2308_v3  ;;  %v2309_v5 = vmul.f32 0.0625, %v2279_v16  ;;  %v8280_v46 = vld [vmem:[%s9635_s14 + $0x3f0] ss:$36 sps:$4 sm:$0xff]  }
 0x6af   :  { %3893 = vmatpush1.bf16.msra.mxu0 %v8268_v12 }
 0x6b0   :  { %v2326_v4 = vmul.f32 %v9669_v14, %v9669_v14  ;;  %v2332_v51 = vmul.f32 %v9671_v22, %v9671_v22  ;;  %v9678_v41 = vsub.f32 %v2255_v48, %v2309_v5  ;;  %v9680_v42 = vsub.f32 %v2261_v6, %v2309_v5  ;;  %3894 = vmatprep.subr.bf16.mxu0 %v8273_v37  ;;  %v8285_v48 = vld [vmem:[%s9635_s14 + $0x3ac] ss:$36 sps:$4 sm:$0xff]   ;;  %v8298_v37 = vld [vmem:[%s9635_s14 + $0x240] ss:$36 sps:$4 sm:$0xff]  }
 0x6b2   :  { %v2338_v40 = vadd.f32 %v2332_v51, %v2326_v4  ;;  %v2327_v61 = vmul.f32 %v9678_v41, %v9678_v41  ;;  %v2333_v1 = vmul.f32 %v9680_v42, %v9680_v42 }
 0x6b3   :  { %3895 = vmatpush1.bf16.msra.mxu0 %v8271_v59 }
 0x6b4   :  { %v2339_v56 = vrot.slane %v2338_v40, 4  ;;  %v2345_v44 = vadd.f32 %v2333_v1, %v2327_v61  ;;  %3896 = vmatprep.subr.bf16.mxu0 %v8276_v50  ;;  %v9714_v50 = vpop.permute.xlu0 %2443 }
 0x6b6   :  { %v2340_v20 = vadd.f32 %v2339_v56, %v2338_v40  ;;  %v2346_v10 = vrot.slane %v2345_v44, 4  ;;  %v9716_v40 = vpop.permute.xlu1 %2438 }
 0x6b7   :  { %3897 = vmatpush1.bf16.msra.mxu0 %v8274_v28 }
 0x6b8   :  { %v2341_v30 = vrot.slane %v2340_v20, 2  ;;  %v2347_v54 = vadd.f32 %v2346_v10, %v2345_v44  ;;  %3898 = vmatprep.subr.bf16.mxu0 %v8279_v36  ;;  %v8303_v44 = vld [vmem:[%s9635_s14 + $0x67c] ss:$36 sps:$4 sm:$0xff]   ;;  %v8304_v10 = vld [vmem:[%s9635_s14 + $0x630] ss:$36 sps:$4 sm:$0xff]  }
 0x6b9   :  { %v8301_v36 = vld [vmem:[%s9635_s14 + $0x678] ss:$36 sps:$4 sm:$0xff]   ;;  %3935 = vmatprep.subr.bf16.mxu1 %v8303_v44 }
 0x6ba   :  { %v2342_v0 = vadd.f32 %v2341_v30, %v2340_v20  ;;  %v2348_v60 = vrot.slane %v2347_v54, 2  ;;  %3936 = vmatpush1.bf16.msra.mxu1 %v8301_v36  ;;  %v8306_v20 = vld [vmem:[%s9635_s14 + $0x634] ss:$36 sps:$4 sm:$0xff]   ;;  %v8312_v30 = vld [vmem:[%s9635_s14 + $0x684] ss:$36 sps:$4 sm:$0xff]  }
 0x6bb   :  { %3899 = vmatpush2.bf16.msra.mxu0 %v8277_v23  ;;  %3937 = vmatprep.subr.bf16.mxu1 %v8306_v20  ;;  %v8309_v23 = vld [vmem:[%s9635_s14 + $0x5ec] ss:$36 sps:$4 sm:$0xff]  }
 0x6bc   :  { %v2343_v62 = vrot.slane %v2342_v0, 1  ;;  %v2349_v26 = vadd.f32 %v2348_v60, %v2347_v54  ;;  %3900 = vmatprep.subr.bf16.mxu0 %v8282_v7  ;;  %v8307_v54 = vld [vmem:[%s9635_s14 + $0x5e8] ss:$36 sps:$4 sm:$0xff]   ;;  %v8310_v7 = vld [vmem:[%s9635_s14 + $0x680] ss:$36 sps:$4 sm:$0xff]  }
 0x6bd   :  { %v8318_v60 = vld [vmem:[%s9635_s14 + $0x63c] ss:$36 sps:$4 sm:$0xff]  }
 0x6be   :  { %v2344_v63 = vadd.f32 %v2343_v62, %v2342_v0  ;;  %v2350_v6 = vrot.slane %v2349_v26, 1  ;;  %3938 = vmatpush1.bf16.msra.mxu1 %v8304_v10  ;;  %v8315_v0 = vld [vmem:[%s9635_s14 + $0x5a4] ss:$36 sps:$4 sm:$0xff]   ;;  %v8316_v62 = vld [vmem:[%s9635_s14 + $0x638] ss:$36 sps:$4 sm:$0xff]  }
 0x6bf   :  { %3901 = vmatpush2.bf16.msra.mxu0 %v8280_v46  ;;  %3939 = vmatprep.subr.bf16.mxu1 %v8309_v23  ;;  %v8313_v46 = vld [vmem:[%s9635_s14 + $0x5a0] ss:$36 sps:$4 sm:$0xff]  }
 0x6c0   :  { %v2380_v9 = vmul.f32 0.0625, %v2344_v63  ;;  %v2351_v33 = vadd.f32 %v2350_v6, %v2349_v26  ;;  %3902 = vmatprep.subr.bf16.mxu0 %v8285_v48  ;;  %v8321_v26 = vld [vmem:[%s9635_s14 + $0x55c] ss:$36 sps:$4 sm:$0xff]   ;;  %v8324_v48 = vld [vmem:[%s9635_s14 + $0x5f4] ss:$36 sps:$4 sm:$0xff]  }
 0x6c1   :  { %v8319_v63 = vld [vmem:[%s9635_s14 + $0x558] ss:$36 sps:$4 sm:$0xff]   ;;  %v8322_v6 = vld [vmem:[%s9635_s14 + $0x5f0] ss:$36 sps:$4 sm:$0xff]  }
 0x6c2   :  { %v2386_v53 = vadd.f32 1e-05, %v2380_v9  ;;  %v2381_v17 = vmul.f32 0.0625, %v2351_v33  ;;  %3940 = vmatpush1.bf16.msra.mxu1 %v8307_v54  ;;  %v8330_v9 = vld [vmem:[%s9635_s14 + $0x5ac] ss:$36 sps:$4 sm:$0xff]  }
 0x6c3   :  { %3903 = vmatpush2.bf16.msra.mxu0 %v8283_v18  ;;  %3941 = vmatprep.subr.bf16.mxu1 %v8315_v0  ;;  %v8327_v18 = vld [vmem:[%s9635_s14 + $0x514] ss:$36 sps:$4 sm:$0xff]  }
 0x6c4   :  { %8857 = vrsqrt.f32 %v2386_v53  ;;  %v2387_v15 = vadd.f32 1e-05, %v2381_v17  ;;  %3904 = vmatprep.subr.bf16.mxu0 %v8288_v49  ;;  %v8325_v33 = vld [vmem:[%s9635_s14 + $0x510] ss:$36 sps:$4 sm:$0xff]   ;;  %v8328_v49 = vld [vmem:[%s9635_s14 + $0x5a8] ss:$36 sps:$4 sm:$0xff]  }
 0x6c5   :  { %v8333_v53 = vld [vmem:[%s9635_s14 + $0x4cc] ss:$36 sps:$4 sm:$0xff]   ;;  %v8336_v17 = vld [vmem:[%s9635_s14 + $0x564] ss:$36 sps:$4 sm:$0xff]  }
 0x6c6   :  { %8859 = vrsqrt.f32 %v2387_v15  ;;  %3942 = vmatpush1.bf16.msra.mxu1 %v8313_v46  ;;  %v8334_v15 = vld [vmem:[%s9635_s14 + $0x560] ss:$36 sps:$4 sm:$0xff]  }
 0x6c7   :  { %3905 = vmatpush2.bf16.msra.mxu0 %v8286_v32  ;;  %3943 = vmatprep.subr.bf16.mxu1 %v8321_v26  ;;  %v8331_v32 = vld [vmem:[%s9635_s14 + $0x4c8] ss:$36 sps:$4 sm:$0xff]  }
 0x6c8   :  { %3906 = vmatprep.subr.bf16.mxu0 %v8291_v57  ;;  %v8339_v57 = vld [vmem:[%s9635_s14 + $0x484] ss:$36 sps:$4 sm:$0xff]  }
 0x6ca   :  { %3944 = vmatpush1.bf16.msra.mxu1 %v8319_v63 }
 0x6cb   :  { %3907 = vmatpush2.bf16.msra.mxu0 %v8289_v29  ;;  %3945 = vmatprep.subr.bf16.mxu1 %v8327_v18  ;;  %v8342_v29 = vld [vmem:[%s9635_s14 + $0x51c] ss:$36 sps:$4 sm:$0xff]  }
 0x6cc   :  { %3908 = vmatprep.subr.bf16.mxu0 %v8294_v35  ;;  %v8337_v35 = vld [vmem:[%s9635_s14 + $0x480] ss:$36 sps:$4 sm:$0xff]  }
 0x6ce   :  { %3946 = vmatpush1.bf16.msra.mxu1 %v8325_v33 }
 0x6cf   :  { %3909 = vmatpush2.bf16.msra.mxu0 %v8292_v25  ;;  %3947 = vmatprep.subr.bf16.mxu1 %v8333_v53  ;;  %v8340_v25 = vld [vmem:[%s9635_s14 + $0x518] ss:$36 sps:$4 sm:$0xff]  }
 0x6d0   :  { %3910 = vmatprep.subr.bf16.mxu0 %v8297_v24  ;;  %v8345_v24 = vld [vmem:[%s9635_s14 + $0x204] ss:$36 sps:$4 sm:$0xff]  }
 0x6d1   :  { %v8858_v52 = vpop.eup %8857 }
 0x6d2   :  { %v2398_v12 = vmul.f32 %v8858_v52, %v9669_v14  ;;  %v2404_v3 = vmul.f32 %v8858_v52, %v9671_v22  ;;  %3948 = vmatpush1.bf16.msra.mxu1 %v8331_v32  ;;  %v8354_v52 = vld [vmem:[%s9635_s14 + $0x48c] ss:$36 sps:$4 sm:$0xff]  }
 0x6d3   :  { %v8860_v16 = vpop.eup %8859  ;;  %3911 = vmatpush2.bf16.msra.mxu0 %v8295_v47  ;;  %3949 = vmatprep.subr.bf16.mxu1 %v8339_v57  ;;  %v8348_v47 = vld [vmem:[%s9635_s14 + $0x4d4] ss:$36 sps:$4 sm:$0xff]  }
 0x6d4   :  { %v2422_v5 = vmul.f32 %v9704_v43, %v2398_v12  ;;  %v2428_v59 = vmul.f32 %v9702_v55, %v2404_v3  ;;  %v2399_v4 = vmul.f32 %v8860_v16, %v9678_v41  ;;  %v2405_v51 = vmul.f32 %v8860_v16, %v9680_v42  ;;  %3912 = vmatprep.subr.bf16.mxu0 %v8300_v31  ;;  %v8346_v31 = vld [vmem:[%s9635_s14 + $0x4d0] ss:$36 sps:$4 sm:$0xff]   ;;  %v8352_v12 = vld [vmem:[%s9635_s14 + $0x488] ss:$36 sps:$4 sm:$0xff]  }
 0x6d5   :  { %v8360_v3 = vld [vmem:[%s9635_s14 + $0x20c] ss:$36 sps:$4 sm:$0xff]  }
 0x6d6   :  { %v2423_v14 = vmul.f32 %v9704_v43, %v2399_v4  ;;  %v2429_v22 = vmul.f32 %v9702_v55, %v2405_v51  ;;  %v9721_v61 = vadd.f32 %v9714_v50, %v2428_v59  ;;  %v9724_v41 = vadd.f32 %v9716_v40, %v2422_v5  ;;  %3950 = vmatpush1.bf16.msra.mxu1 %v8337_v35 }
 0x6d7   :  { %3913 = vmatpush2.bf16.msra.mxu0 %v8298_v37  ;;  %3988 = vmatprep.subr.bf16.mxu1 %v8345_v24 }
 0x6d8   :  { %11140 = vst [vmem:[#allocation2_spill] sm:$0xff] %v9721_v61  ;;  %11141 = vst [vmem:[#allocation3_spill] sm:$0xff] %v9724_v41  ;;  %v9727_v42 = vadd.f32 %v9714_v50, %v2429_v22  ;;  %v9730_v1 = vadd.f32 %v9716_v40, %v2423_v14  ;;  %v9738_v56 = vpack.c.bf16 %v9721_v61, %v9724_v41  ;;  %4041 = vmatprep.subr.bf16.mxu0 %v8312_v30 }
 0x6da   :  { %11142 = vst [vmem:[#allocation4_spill] sm:$0xff] %v9727_v42  ;;  %11143 = vst [vmem:[#allocation5_spill] sm:$0xff] %v9730_v1  ;;  %v9734_v28 = vpack.c.bf16 %v9727_v42, %v9730_v1 }
 0x6dc   :  { %3914 = vmatprep.mubr.bf16.mxu0 %v9734_v28 }
 0x6dd   :  { %3915 = vmatmul.mubr.bf16.vlgmr.msra.gmra.mxu0 %v9738_v56 }
 0x6de   :  { %4042 = vmatpush1.bf16.msra.mxu0 %v8310_v7 }
 0x6df   :  { %4043 = vmatprep.subr.bf16.mxu0 %v8318_v60 }
 0x6e2   :  { %4044 = vmatpush1.bf16.msra.mxu0 %v8316_v62 }
 0x6e3   :  { %4045 = vmatprep.subr.bf16.mxu0 %v8324_v48 }
 0x6e6   :  { %4046 = vmatpush1.bf16.msra.mxu0 %v8322_v6 }
 0x6e7   :  { %4047 = vmatprep.subr.bf16.mxu0 %v8330_v9 }
 0x6ea   :  { %4048 = vmatpush1.bf16.msra.mxu0 %v8328_v49 }
 0x6eb   :  { %4049 = vmatprep.subr.bf16.mxu0 %v8336_v17 }
 0x6ee   :  { %4050 = vmatpush1.bf16.msra.mxu0 %v8334_v15 }
 0x6ef   :  { %4051 = vmatprep.subr.bf16.mxu0 %v8342_v29 }
 0x6f2   :  { %4052 = vmatpush1.bf16.msra.mxu0 %v8340_v25 }
 0x6f3   :  { %4053 = vmatprep.subr.bf16.mxu0 %v8348_v47 }
 0x6f6   :  { %4054 = vmatpush1.bf16.msra.mxu0 %v8346_v31 }
 0x6f7   :  { %4055 = vmatprep.subr.bf16.mxu0 %v8354_v52 }
 0x6fa   :  { %4056 = vmatpush1.bf16.msra.mxu0 %v8352_v12 }
 0x6fb   :  { %4094 = vmatprep.subr.bf16.mxu0 %v8360_v3 }
 0x75a   :  { %v2178_v16 = vpop.f32.mrf.mxu0 }
 0x75b   :  { %v2221_v37 = vpop.f32.mrf.mxu1  ;;  %v2232_v59 = vadd.f32 %v2178_v16, %v9588_v11 }
 0x75c   :  { %v2180_v5 = vpop.f32.mrf.mxu0  ;;  %v2234_v51 = vadd.f32 %v2221_v37, %v9602_v19 }
 0x75d   :  { %v2223_v4 = vpop.f32.mrf.mxu1  ;;  %v2233_v22 = vadd.f32 %v2180_v5, %v9596_v38  ;;  %v2256_v30 = vadd.f32 %v9650_v34, %v2232_v59 }
 0x75e   :  { %v2182_v14 = vpop.f32.mrf.mxu0  ;;  %v2235_v20 = vadd.f32 %v2223_v4, %v9608_v8  ;;  %v2258_v19 = vadd.f32 %v9650_v34, %v2234_v51 }
 0x75f   :  { %v2238_v44 = vadd.f32 %v2182_v14, %v9591_v45  ;;  %v2225_v36 = vpop.f32.mrf.mxu1  ;;  %v2257_v45 = vadd.f32 %v9650_v34, %v2233_v22 }
 0x760   :  { %v2240_v10 = vadd.f32 %v2225_v36, %v9605_v39  ;;  %v2184_v23 = vpop.f32.mrf.mxu0  ;;  %v2259_v39 = vadd.f32 %v9650_v34, %v2235_v20 }
 0x761   :  { %v2262_v54 = vadd.f32 %v9645_v21, %v2238_v44  ;;  %v2239_v11 = vadd.f32 %v2184_v23, %v9599_v58  ;;  %v2227_v7 = vpop.f32.mrf.mxu1 }
 0x762   :  { %v2264_v0 = vadd.f32 %v9645_v21, %v2240_v10  ;;  %v2241_v38 = vadd.f32 %v2227_v7, %v9611_v27 }
 0x763   :  { %v2280_v60 = vadd.f32 %v2262_v54, %v2256_v30  ;;  %v2263_v8 = vadd.f32 %v9645_v21, %v2239_v11 }
 0x764   :  { %v2294_v46 = vadd.f32 %v2264_v0, %v2258_v19  ;;  %v2265_v62 = vadd.f32 %v9645_v21, %v2241_v38 }
 0x765   :  { %v2281_v26 = vrot.slane %v2280_v60, 4  ;;  %v2287_v48 = vadd.f32 %v2263_v8, %v2257_v45 }
 0x766   :  { %v2295_v58 = vrot.slane %v2294_v46, 4  ;;  %v2301_v63 = vadd.f32 %v2265_v62, %v2259_v39 }
 0x767   :  { %v2282_v6 = vadd.f32 %v2281_v26, %v2280_v60  ;;  %v2288_v18 = vrot.slane %v2287_v48, 4 }
 0x768   :  { %v2296_v9 = vadd.f32 %v2295_v58, %v2294_v46  ;;  %v2302_v33 = vrot.slane %v2301_v63, 4 }
 0x769   :  { %v2283_v49 = vrot.slane %v2282_v6, 2  ;;  %v2289_v27 = vadd.f32 %v2288_v18, %v2287_v48 }
 0x76a   :  { %v2297_v53 = vrot.slane %v2296_v9, 2  ;;  %v2303_v17 = vadd.f32 %v2302_v33, %v2301_v63 }
 0x76b   :  { %v2284_v32 = vadd.f32 %v2283_v49, %v2282_v6  ;;  %v2290_v15 = vrot.slane %v2289_v27, 2 }
 0x76c   :  { %v2298_v57 = vadd.f32 %v2297_v53, %v2296_v9  ;;  %v2304_v29 = vrot.slane %v2303_v17, 2 }
 0x76d   :  { %v2285_v34 = vrot.slane %v2284_v32, 1  ;;  %v2291_v35 = vadd.f32 %v2290_v15, %v2289_v27 }
 0x76e   :  { %v2299_v25 = vrot.slane %v2298_v57, 1  ;;  %v2305_v21 = vadd.f32 %v2304_v29, %v2303_v17 }
 0x76f   :  { %v2286_v24 = vadd.f32 %v2285_v34, %v2284_v32  ;;  %v2292_v47 = vrot.slane %v2291_v35, 1 }
 0x770   :  { %v2300_v31 = vadd.f32 %v2299_v25, %v2298_v57  ;;  %v2306_v52 = vrot.slane %v2305_v21, 1 }
 0x771   :  { %v2310_v12 = vmul.f32 0.0625, %v2286_v24  ;;  %v2293_v3 = vadd.f32 %v2292_v47, %v2291_v35 }
 0x772   :  { %v2312_v16 = vmul.f32 0.0625, %v2300_v31  ;;  %v2307_v37 = vadd.f32 %v2306_v52, %v2305_v21 }
 0x773   :  { %v9792_v5 = vsub.f32 %v2256_v30, %v2310_v12  ;;  %v9794_v59 = vsub.f32 %v2262_v54, %v2310_v12  ;;  %v2311_v4 = vmul.f32 0.0625, %v2293_v3 }
 0x774   :  { %v9796_v51 = vsub.f32 %v2258_v19, %v2312_v16  ;;  %v9798_v14 = vsub.f32 %v2264_v0, %v2312_v16  ;;  %v2313_v22 = vmul.f32 0.0625, %v2307_v37 }
 0x775   :  { %v2328_v44 = vmul.f32 %v9792_v5, %v9792_v5  ;;  %v2334_v36 = vmul.f32 %v9794_v59, %v9794_v59  ;;  %v9804_v20 = vsub.f32 %v2257_v45, %v2311_v4  ;;  %v9806_v10 = vsub.f32 %v2263_v8, %v2311_v4 }
 0x776   :  { %v2330_v23 = vmul.f32 %v9796_v51, %v9796_v51  ;;  %v2336_v30 = vmul.f32 %v9798_v14, %v9798_v14  ;;  %v9812_v54 = vsub.f32 %v2259_v39, %v2313_v22  ;;  %v9814_v11 = vsub.f32 %v2265_v62, %v2313_v22 }
 0x777   :  { %v2352_v7 = vadd.f32 %v2334_v36, %v2328_v44  ;;  %v2329_v19 = vmul.f32 %v9804_v20, %v9804_v20  ;;  %v2335_v0 = vmul.f32 %v9806_v10, %v9806_v10  ;;  %v2458_v4 = vlaneseq }
 0x778   :  { %v2366_v38 = vadd.f32 %v2336_v30, %v2330_v23  ;;  %v2331_v45 = vmul.f32 %v9812_v54, %v9812_v54  ;;  %v2337_v60 = vmul.f32 %v9814_v11, %v9814_v11 }
 0x779   :  { %v2353_v8 = vrot.slane %v2352_v7, 4  ;;  %v2359_v46 = vadd.f32 %v2335_v0, %v2329_v19  ;;  %v2459_v36 = vand.u32 127, %v2458_v4 }
 0x77a   :  { %v2367_v39 = vrot.slane %v2366_v38, 4  ;;  %v2373_v26 = vadd.f32 %v2337_v60, %v2331_v45 }
 0x77b   :  { %v2354_v62 = vadd.f32 %v2353_v8, %v2352_v7  ;;  %v2360_v48 = vrot.slane %v2359_v46, 4  ;;  %v2461_v23 = vadd.s32 256, %v2459_v36  ;;  %v8373_v36 = vld [vmem:[%s9635_s14 + $0x98] ss:$36 sps:$4 sm:$0xff]  }
 0x77c   :  { %v2368_v58 = vadd.f32 %v2367_v39, %v2366_v38  ;;  %v2374_v63 = vrot.slane %v2373_v26, 4 }
 0x77d   :  { %v2355_v6 = vrot.slane %v2354_v62, 2  ;;  %v2361_v18 = vadd.f32 %v2360_v48, %v2359_v46  ;;  %vm2464_vm4 = vcmp.lt.s32.totalorder %v2461_v23, 378  ;;  %v8376_v23 = vld [vmem:[%s9635_s14 + $0x130] ss:$36 sps:$4 sm:$0xff]  }
 0x77e   :  { %v2369_v9 = vrot.slane %v2368_v58, 2  ;;  %v2375_v33 = vadd.f32 %v2374_v63, %v2373_v26  ;;  %v9828_v45 = vsel %vm2464_vm4, 1.0, %v11090_v13 }
 0x77f   :  { %v2356_v49 = vadd.f32 %v2355_v6, %v2354_v62  ;;  %v2362_v27 = vrot.slane %v2361_v18, 2  ;;  %11144 = vst [vmem:[#allocation6_spill] sm:$0xff] %v9828_v45 }
 0x780   :  { %v2370_v53 = vadd.f32 %v2369_v9, %v2368_v58  ;;  %v2376_v17 = vrot.slane %v2375_v33, 2 }
 0x781   :  { %v2357_v32 = vrot.slane %v2356_v49, 1  ;;  %v2363_v15 = vadd.f32 %v2362_v27, %v2361_v18 }
 0x782   :  { %v2371_v57 = vrot.slane %v2370_v53, 1  ;;  %v2377_v29 = vadd.f32 %v2376_v17, %v2375_v33 }
 0x783   :  { %v2358_v34 = vadd.f32 %v2357_v32, %v2356_v49  ;;  %v2364_v35 = vrot.slane %v2363_v15, 1 }
 0x784   :  { %v2372_v25 = vadd.f32 %v2371_v57, %v2370_v53  ;;  %v2378_v21 = vrot.slane %v2377_v29, 1  ;;  %v8351_v57 = vld [vmem:[%s9635_s14 + $0x1bc] ss:$36 sps:$4 sm:$0xff]  }
 0x785   :  { %v2382_v24 = vmul.f32 0.0625, %v2358_v34  ;;  %v2365_v47 = vadd.f32 %v2364_v35, %v2363_v15  ;;  %v8355_v35 = vld [vmem:[%s9635_s14 + $0x170] ss:$36 sps:$4 sm:$0xff]  }
 0x786   :  { %v2384_v31 = vmul.f32 0.0625, %v2372_v25  ;;  %v2379_v52 = vadd.f32 %v2378_v21, %v2377_v29  ;;  %v8357_v29 = vld [vmem:[%s9635_s14 + $0x174] ss:$36 sps:$4 sm:$0xff]   ;;  %v8358_v25 = vld [vmem:[%s9635_s14 + $0x208] ss:$36 sps:$4 sm:$0xff]  }
 0x787   :  { %v2388_v12 = vadd.f32 1e-05, %v2382_v24  ;;  %v2383_v3 = vmul.f32 0.0625, %v2365_v47  ;;  %v8363_v24 = vld [vmem:[%s9635_s14 + $0x12c] ss:$36 sps:$4 sm:$0xff]  }
 0x788   :  { %v2390_v16 = vadd.f32 1e-05, %v2384_v31  ;;  %v2385_v37 = vmul.f32 0.0625, %v2379_v52  ;;  %v8366_v47 = vld [vmem:[%s9635_s14 + $0x1c4] ss:$36 sps:$4 sm:$0xff]  }
 0x789   :  { %8861 = vrsqrt.f32 %v2388_v12  ;;  %v2389_v22 = vadd.f32 1e-05, %v2383_v3  ;;  %v8361_v31 = vld [vmem:[%s9635_s14 + $0x128] ss:$36 sps:$4 sm:$0xff]   ;;  %v8364_v52 = vld [vmem:[%s9635_s14 + $0x1c0] ss:$36 sps:$4 sm:$0xff]  }
 0x78a   :  { %8863 = vrsqrt.f32 %v2390_v16  ;;  %v2391_v44 = vadd.f32 1e-05, %v2385_v37  ;;  %v8369_v12 = vld [vmem:[%s9635_s14 + $0xe4] ss:$36 sps:$4 sm:$0xff]   ;;  %v8372_v3 = vld [vmem:[%s9635_s14 + $0x17c] ss:$36 sps:$4 sm:$0xff]  }
 0x78b   :  { %8865 = vrsqrt.f32 %v2389_v22  ;;  %v8367_v16 = vld [vmem:[%s9635_s14 + $0xe0] ss:$36 sps:$4 sm:$0xff]   ;;  %v8370_v37 = vld [vmem:[%s9635_s14 + $0x178] ss:$36 sps:$4 sm:$0xff]  }
 0x78c   :  { %8867 = vrsqrt.f32 %v2391_v44  ;;  %v8375_v22 = vld [vmem:[%s9635_s14 + $0x9c] ss:$36 sps:$4 sm:$0xff]   ;;  %v8378_v44 = vld [vmem:[%s9635_s14 + $0x134] ss:$36 sps:$4 sm:$0xff]  }
 0x796   :  { %v8862_v30 = vpop.eup %8861 }
 0x797   :  { %v8864_v7 = vpop.eup %8863  ;;  %v2400_v19 = vmul.f32 %v8862_v30, %v9792_v5  ;;  %v2406_v0 = vmul.f32 %v8862_v30, %v9794_v59  ;;  %v8381_v30 = vld [vmem:[%s9635_s14 + $0x54] ss:$36 sps:$4 sm:$0xff]  }
 0x798   :  { %v8866_v38 = vpop.eup %8865  ;;  %v2402_v60 = vmul.f32 %v8864_v7, %v9796_v51  ;;  %v2408_v8 = vmul.f32 %v8864_v7, %v9798_v14  ;;  %v8384_v7 = vld [vmem:[%s9635_s14 + $0xec] ss:$36 sps:$4 sm:$0xff]  }
 0x799   :  { %v8868_v46 = vpop.eup %8867  ;;  %v2424_v39 = vmul.f32 %v9704_v43, %v2400_v19  ;;  %v2430_v26 = vmul.f32 %v9702_v55, %v2406_v0  ;;  %v2401_v62 = vmul.f32 %v8866_v38, %v9804_v20  ;;  %v2407_v48 = vmul.f32 %v8866_v38, %v9806_v10  ;;  %v8379_v19 = vld [vmem:[%s9635_s14 + $0x50] ss:$36 sps:$4 sm:$0xff]   ;;  %v8382_v0 = vld [vmem:[%s9635_s14 + $0xe8] ss:$36 sps:$4 sm:$0xff]  }
 0x79a   :  { %v2426_v5 = vmul.f32 %v9704_v43, %v2402_v60  ;;  %v2432_v59 = vmul.f32 %v9702_v55, %v2408_v8  ;;  %v2403_v58 = vmul.f32 %v8868_v46, %v9812_v54  ;;  %v2409_v51 = vmul.f32 %v8868_v46, %v9814_v11  ;;  %v8387_v38 = vld [vmem:[%s9635_s14 + $0xc] ss:$36 sps:$4 sm:$0xff]   ;;  %v8390_v60 = vld [vmem:[%s9635_s14 + $0xa4] ss:$36 sps:$4 sm:$0xff]  }
 0x79b   :  { %v2448_v14 = vadd.f32 %v9716_v40, %v2424_v39  ;;  %v2454_v63 = vadd.f32 %v9714_v50, %v2430_v26  ;;  %v2425_v6 = vmul.f32 %v9704_v43, %v2401_v62  ;;  %v2431_v20 = vmul.f32 %v9702_v55, %v2407_v48  ;;  %v8385_v8 = vld [vmem:[%s9635_s14 + $0x8] ss:$36 sps:$4 sm:$0xff]   ;;  %v8388_v46 = vld [vmem:[%s9635_s14 + $0xa0] ss:$36 sps:$4 sm:$0xff]   ;;  %v8394_v48 = vld [vmem:[%s9635_s14 + $0x58] ss:$36 sps:$4 sm:$0xff]  }
 0x79c   :  { %v9845_v10 = vadd.f32 %v9714_v50, %v2432_v59  ;;  %v2427_v18 = vmul.f32 %v9704_v43, %v2403_v58  ;;  %v2433_v9 = vmul.f32 %v9702_v55, %v2409_v51  ;;  %v9850_v54 = vadd.f32 %v9716_v40, %v2426_v5  ;;  %v8343_v43 = vld [vmem:[%s9635_s14 + $0x200] ss:$36 sps:$4 sm:$0xff]   ;;  %v8402_v59 = vld [vmem:[%s9635_s14 + $0x14] ss:$36 sps:$4 sm:$0xff]  }
 0x79d   :  { %v9853_v11 = vmul.f32 %v9828_v45, %v2454_v63  ;;  %v9856_v33 = vadd.f32 %v9714_v50, %v2431_v20  ;;  %v9859_v49 = vadd.f32 %v9716_v40, %v2425_v6  ;;  %v9862_v27 = vmul.f32 %v9828_v45, %v2448_v14  ;;  %v8393_v39 = vld [vmem:[%s9635_s14 + $0x444] ss:$36 sps:$4 sm:$0xff]   ;;  %v8396_v26 = vld [vmem:[%s9635_s14 + $0x5c] ss:$36 sps:$4 sm:$0xff]   ;;  %v8400_v51 = vld [vmem:[%s9635_s14 + $0x10] ss:$36 sps:$4 sm:$0xff]  }
 0x79e   :  { %11145 = vst [vmem:[#allocation7_spill] sm:$0xff] %v9845_v10  ;;  %11146 = vst [vmem:[#allocation8_spill] sm:$0xff] %v9850_v54  ;;  %v9866_v55 = vpack.c.bf16 %v9845_v10, %v9850_v54  ;;  %v2451_v53 = vadd.f32 %v9716_v40, %v2427_v18  ;;  %v2457_v17 = vadd.f32 %v9714_v50, %v2433_v9  ;;  %v8349_v50 = vld [vmem:[%s9635_s14 + $0x1b8] ss:$36 sps:$4 sm:$0xff]   ;;  %v8391_v62 = vld [vmem:[%s9635_s14 + $0x440] ss:$36 sps:$4 sm:$0xff]  }
 0x79f   :  { %11147 = vst [vmem:[#allocation9_spill] sm:$0xff] %v9853_v11  ;;  %11148 = vst [vmem:[#allocation10_spill] sm:$0xff] %v9856_v33  ;;  %v9873_v32 = vpack.c.bf16 %v9856_v33, %v9859_v49  ;;  %v9877_v15 = vpack.c.bf16 %v9853_v11, %v9862_v27  ;;  %v8399_v5 = vld [vmem:[%s9635_s14 + $0x3fc] ss:$36 sps:$4 sm:$0xff]   ;;  %v8405_v14 = vld [vmem:[%s9635_s14 + $0x3b4] ss:$36 sps:$4 sm:$0xff]  }
 0x7a0   :  { %11149 = vst [vmem:[#allocation11_spill] sm:$0xff] %v9859_v49  ;;  %11150 = vst [vmem:[#allocation12_spill] sm:$0xff] %v9862_v27  ;;  %3924 = vmatprep.mubr.bf16.mxu0 %v9866_v55  ;;  %v9886_v40 = vmul.f32 %v9828_v45, %v2457_v17  ;;  %v9891_v34 = vmul.f32 %v9828_v45, %v2451_v53  ;;  %v8397_v58 = vld [vmem:[%s9635_s14 + $0x3f8] ss:$36 sps:$4 sm:$0xff]   ;;  %v8408_v63 = vld [vmem:[%s9635_s14 + $0x44c] ss:$36 sps:$4 sm:$0xff]  }
 0x7a1   :  { %3925 = vmatmul.mubr.bf16.gmra.mxu0 %v9873_v32  ;;  %3968 = vmatmul.mubr.bf16.vlgmr.msra.gmra.mxu1 %v9877_v15  ;;  %v8403_v6 = vld [vmem:[%s9635_s14 + $0x3b0] ss:$36 sps:$4 sm:$0xff]   ;;  %v8406_v20 = vld [vmem:[%s9635_s14 + $0x448] ss:$36 sps:$4 sm:$0xff]   ;;  %v8412_v53 = vld [vmem:[%s9635_s14 + $0x400] ss:$36 sps:$4 sm:$0xff]  }
 0x7a2   :  { %3989 = vmatpush1.bf16.msra.mxu1 %v8343_v43  ;;  %3977 = vmatprep.mubr.bf16.mxu1 %v11133_v2  ;;  %11151 = vst [vmem:[#allocation13_spill] sm:$0xff] %v9886_v40  ;;  %11152 = vst [vmem:[#allocation14_spill] sm:$0xff] %v9891_v34  ;;  %v9897_v21 = vpack.c.bf16 %v9886_v40, %v9891_v34  ;;  %v8411_v18 = vld [vmem:[%s9635_s14 + $0x36c] ss:$36 sps:$4 sm:$0xff]   ;;  %v8414_v9 = vld [vmem:[%s9635_s14 + $0x404] ss:$36 sps:$4 sm:$0xff]  }
 0x7a3   :  { %3990 = vmatprep.subr.bf16.mxu1 %v8351_v57  ;;  %4073 = vmatprep.mubr.bf16.mxu0 %v11133_v2  ;;  %v8409_v43 = vld [vmem:[%s9635_s14 + $0x368] ss:$36 sps:$4 sm:$0xff]   ;;  %v8420_v57 = vld [vmem:[%s9635_s14 + $0x3bc] ss:$36 sps:$4 sm:$0xff]  }
 0x7a4   :  { %v8417_v17 = vld [vmem:[%s9635_s14 + $0x324] ss:$36 sps:$4 sm:$0xff]  }
 0x7a6   :  { %3991 = vmatpush1.bf16.msra.mxu1 %v8349_v50  ;;  %v8415_v50 = vld [vmem:[%s9635_s14 + $0x320] ss:$36 sps:$4 sm:$0xff]  }
 0x7a7   :  { %3992 = vmatprep.subr.bf16.mxu1 %v8357_v29  ;;  %v8418_v29 = vld [vmem:[%s9635_s14 + $0x3b8] ss:$36 sps:$4 sm:$0xff]  }
 0x7a9   :  { %3978 = vmatmul.mubr.bf16.gmra.mxu1 %v9897_v21  ;;  %4074 = vmatmul.mubr.bf16.vlgmr.msra.gmra.mxu0 %v9877_v15 }
 0x7aa   :  { %3993 = vmatpush1.bf16.msra.mxu1 %v8355_v35  ;;  %4095 = vmatpush1.bf16.msra.mxu0 %v8358_v25  ;;  %v8423_v35 = vld [vmem:[%s9635_s14 + $0x2dc] ss:$36 sps:$4 sm:$0xff]   ;;  %v8426_v25 = vld [vmem:[%s9635_s14 + $0x374] ss:$36 sps:$4 sm:$0xff]  }
 0x7ab   :  { %4020 = vmatprep.mubr.bf16.mxu1 %v9734_v28  ;;  %3994 = vmatprep.subr.bf16.mxu1 %v8363_v24  ;;  %v8421_v24 = vld [vmem:[%s9635_s14 + $0x2d8] ss:$36 sps:$4 sm:$0xff]  }
 0x7ac   :  { %4096 = vmatprep.subr.bf16.mxu0 %v8366_v47  ;;  %4083 = vmatprep.mubr.bf16.mxu0 %v11133_v2  ;;  %v8424_v47 = vld [vmem:[%s9635_s14 + $0x370] ss:$36 sps:$4 sm:$0xff]  }
 0x7ae   :  { %3995 = vmatpush1.bf16.msra.mxu1 %v8361_v31  ;;  %4097 = vmatpush1.bf16.msra.mxu0 %v8364_v52  ;;  %v8429_v31 = vld [vmem:[%s9635_s14 + $0x294] ss:$36 sps:$4 sm:$0xff]   ;;  %v8432_v52 = vld [vmem:[%s9635_s14 + $0x32c] ss:$36 sps:$4 sm:$0xff]  }
 0x7af   :  { %3996 = vmatprep.subr.bf16.mxu1 %v8369_v12  ;;  %4098 = vmatprep.subr.bf16.mxu0 %v8372_v3  ;;  %v8427_v12 = vld [vmem:[%s9635_s14 + $0x290] ss:$36 sps:$4 sm:$0xff]   ;;  %v8430_v3 = vld [vmem:[%s9635_s14 + $0x328] ss:$36 sps:$4 sm:$0xff]  }
 0x7b1   :  { %4084 = vmatmul.mubr.bf16.gmra.mxu0 %v9897_v21 }
 0x7b2   :  { %3997 = vmatpush1.bf16.msra.mxu1 %v8367_v16  ;;  %4099 = vmatpush1.bf16.msra.mxu0 %v8370_v37  ;;  %v8435_v16 = vld [vmem:[%s9635_s14 + $0x24c] ss:$36 sps:$4 sm:$0xff]   ;;  %v8438_v37 = vld [vmem:[%s9635_s14 + $0x2e4] ss:$36 sps:$4 sm:$0xff]  }
 0x7b3   :  { %4126 = vmatprep.mubr.bf16.mxu0 %v9734_v28  ;;  %3998 = vmatprep.subr.bf16.mxu1 %v8375_v22  ;;  %v8433_v22 = vld [vmem:[%s9635_s14 + $0x248] ss:$36 sps:$4 sm:$0xff]  }
 0x7b4   :  { %4100 = vmatprep.subr.bf16.mxu0 %v8378_v44  ;;  %v8436_v44 = vld [vmem:[%s9635_s14 + $0x2e0] ss:$36 sps:$4 sm:$0xff]  }
 0x7b6   :  { %3999 = vmatpush1.bf16.msra.mxu1 %v8373_v36  ;;  %4101 = vmatpush1.bf16.msra.mxu0 %v8376_v23  ;;  %v8441_v36 = vld [vmem:[%s9635_s14 + $0x29c] ss:$36 sps:$4 sm:$0xff]   ;;  %v8444_v23 = vld [vmem:[%s9635_s14 + $0x68c] ss:$36 sps:$4 sm:$0xff]  }
 0x7b7   :  { %4000 = vmatprep.subr.bf16.mxu1 %v8381_v30  ;;  %4102 = vmatprep.subr.bf16.mxu0 %v8384_v7  ;;  %v8439_v30 = vld [vmem:[%s9635_s14 + $0x298] ss:$36 sps:$4 sm:$0xff]   ;;  %v8442_v7 = vld [vmem:[%s9635_s14 + $0x688] ss:$36 sps:$4 sm:$0xff]  }
 0x7ba   :  { %4001 = vmatpush1.bf16.msra.mxu1 %v8379_v19  ;;  %4103 = vmatpush1.bf16.msra.mxu0 %v8382_v0  ;;  %v8447_v19 = vld [vmem:[%s9635_s14 + $0x254] ss:$36 sps:$4 sm:$0xff]   ;;  %v8450_v0 = vld [vmem:[%s9635_s14 + $0x644] ss:$36 sps:$4 sm:$0xff]  }
 0x7bb   :  { %4002 = vmatprep.subr.bf16.mxu1 %v8387_v38  ;;  %4104 = vmatprep.subr.bf16.mxu0 %v8390_v60  ;;  %v8445_v38 = vld [vmem:[%s9635_s14 + $0x250] ss:$36 sps:$4 sm:$0xff]   ;;  %v8448_v60 = vld [vmem:[%s9635_s14 + $0x640] ss:$36 sps:$4 sm:$0xff]  }
 0x7be   :  { %4003 = vmatpush1.bf16.msra.mxu1 %v8385_v8  ;;  %4105 = vmatpush1.bf16.msra.mxu0 %v8388_v46  ;;  %v8456_v8 = vld [vmem:[%s9635_s14 + $0x694] ss:$36 sps:$4 sm:$0xff]   ;;  %v8453_v46 = vld [vmem:[%s9635_s14 + $0x5fc] ss:$36 sps:$4 sm:$0xff]  }
 0x7bf   :  { %4004 = vmatprep.subr.bf16.mxu1 %v8393_v39  ;;  %4106 = vmatprep.subr.bf16.mxu0 %v8396_v26  ;;  %v8454_v39 = vld [vmem:[%s9635_s14 + $0x690] ss:$36 sps:$4 sm:$0xff]   ;;  %v8451_v26 = vld [vmem:[%s9635_s14 + $0x5f8] ss:$36 sps:$4 sm:$0xff]  }
 0x7c2   :  { %4005 = vmatpush2.bf16.msra.mxu1 %v8391_v62  ;;  %4107 = vmatpush1.bf16.msra.mxu0 %v8394_v48  ;;  %v8462_v62 = vld [vmem:[%s9635_s14 + $0x64c] ss:$36 sps:$4 sm:$0xff]   ;;  %v8459_v48 = vld [vmem:[%s9635_s14 + $0x5b4] ss:$36 sps:$4 sm:$0xff]  }
 0x7c3   :  { %4006 = vmatprep.subr.bf16.mxu1 %v8399_v5  ;;  %4108 = vmatprep.subr.bf16.mxu0 %v8402_v59  ;;  %v8460_v5 = vld [vmem:[%s9635_s14 + $0x648] ss:$36 sps:$4 sm:$0xff]   ;;  %v8457_v59 = vld [vmem:[%s9635_s14 + $0x5b0] ss:$36 sps:$4 sm:$0xff]  }
 0x7c6   :  { %4007 = vmatpush2.bf16.msra.mxu1 %v8397_v58  ;;  %4109 = vmatpush1.bf16.msra.mxu0 %v8400_v51  ;;  %v8468_v58 = vld [vmem:[%s9635_s14 + $0x604] ss:$36 sps:$4 sm:$0xff]   ;;  %v8465_v51 = vld [vmem:[%s9635_s14 + $0x56c] ss:$36 sps:$4 sm:$0xff]  }
 0x7c7   :  { %4008 = vmatprep.subr.bf16.mxu1 %v8405_v14  ;;  %4110 = vmatprep.subr.bf16.mxu0 %v8408_v63  ;;  %v8466_v14 = vld [vmem:[%s9635_s14 + $0x600] ss:$36 sps:$4 sm:$0xff]   ;;  %v8463_v63 = vld [vmem:[%s9635_s14 + $0x568] ss:$36 sps:$4 sm:$0xff]  }
 0x7ca   :  { %4009 = vmatpush2.bf16.msra.mxu1 %v8403_v6  ;;  %4111 = vmatpush2.bf16.msra.mxu0 %v8406_v20  ;;  %v8474_v6 = vld [vmem:[%s9635_s14 + $0x5bc] ss:$36 sps:$4 sm:$0xff]   ;;  %v8471_v20 = vld [vmem:[%s9635_s14 + $0x524] ss:$36 sps:$4 sm:$0xff]  }
 0x7cb   :  { %4010 = vmatprep.subr.bf16.mxu1 %v8411_v18  ;;  %4112 = vmatprep.subr.bf16.mxu0 %v8414_v9  ;;  %v8472_v18 = vld [vmem:[%s9635_s14 + $0x5b8] ss:$36 sps:$4 sm:$0xff]   ;;  %v8469_v9 = vld [vmem:[%s9635_s14 + $0x520] ss:$36 sps:$4 sm:$0xff]  }
 0x7ce   :  { %4011 = vmatpush2.bf16.msra.mxu1 %v8409_v43  ;;  %4113 = vmatpush2.bf16.msra.mxu0 %v8412_v53  ;;  %v8480_v43 = vld [vmem:[%s9635_s14 + $0x574] ss:$36 sps:$4 sm:$0xff]   ;;  %v8477_v53 = vld [vmem:[%s9635_s14 + $0x4dc] ss:$36 sps:$4 sm:$0xff]  }
 0x7cf   :  { %4012 = vmatprep.subr.bf16.mxu1 %v8417_v17  ;;  %4114 = vmatprep.subr.bf16.mxu0 %v8420_v57  ;;  %v8478_v17 = vld [vmem:[%s9635_s14 + $0x570] ss:$36 sps:$4 sm:$0xff]   ;;  %v8475_v57 = vld [vmem:[%s9635_s14 + $0x4d8] ss:$36 sps:$4 sm:$0xff]  }
 0x7d2   :  { %4013 = vmatpush2.bf16.msra.mxu1 %v8415_v50  ;;  %4115 = vmatpush2.bf16.msra.mxu0 %v8418_v29  ;;  %v8486_v50 = vld [vmem:[%s9635_s14 + $0x52c] ss:$36 sps:$4 sm:$0xff]   ;;  %v8483_v29 = vld [vmem:[%s9635_s14 + $0x494] ss:$36 sps:$4 sm:$0xff]  }
 0x7d3   :  { %4014 = vmatprep.subr.bf16.mxu1 %v8423_v35  ;;  %4116 = vmatprep.subr.bf16.mxu0 %v8426_v25  ;;  %v8484_v35 = vld [vmem:[%s9635_s14 + $0x528] ss:$36 sps:$4 sm:$0xff]   ;;  %v8481_v25 = vld [vmem:[%s9635_s14 + $0x490] ss:$36 sps:$4 sm:$0xff]  }
 0x7d6   :  { %4015 = vmatpush2.bf16.msra.mxu1 %v8421_v24  ;;  %4117 = vmatpush2.bf16.msra.mxu0 %v8424_v47  ;;  %v8492_v24 = vld [vmem:[%s9635_s14 + $0x4e4] ss:$36 sps:$4 sm:$0xff]   ;;  %v8489_v47 = vld [vmem:[%s9635_s14 + $0x214] ss:$36 sps:$4 sm:$0xff]  }
 0x7d7   :  { %4016 = vmatprep.subr.bf16.mxu1 %v8429_v31  ;;  %4118 = vmatprep.subr.bf16.mxu0 %v8432_v52  ;;  %v8490_v31 = vld [vmem:[%s9635_s14 + $0x4e0] ss:$36 sps:$4 sm:$0xff]   ;;  %v8487_v52 = vld [vmem:[%s9635_s14 + $0x210] ss:$36 sps:$4 sm:$0xff]  }
 0x7da   :  { %4017 = vmatpush2.bf16.msra.mxu1 %v8427_v12  ;;  %4119 = vmatpush2.bf16.msra.mxu0 %v8430_v3  ;;  %v8498_v12 = vld [vmem:[%s9635_s14 + $0x49c] ss:$36 sps:$4 sm:$0xff]   ;;  %v8495_v3 = vld [vmem:[%s9635_s14 + $0x1cc] ss:$36 sps:$4 sm:$0xff]  }
 0x7db   :  { %4018 = vmatprep.subr.bf16.mxu1 %v8435_v16  ;;  %4120 = vmatprep.subr.bf16.mxu0 %v8438_v37  ;;  %v8496_v16 = vld [vmem:[%s9635_s14 + $0x498] ss:$36 sps:$4 sm:$0xff]   ;;  %v8493_v37 = vld [vmem:[%s9635_s14 + $0x1c8] ss:$36 sps:$4 sm:$0xff]  }
 0x7de   :  { %4019 = vmatpush2.bf16.msra.mxu1 %v8433_v22  ;;  %4121 = vmatpush2.bf16.msra.mxu0 %v8436_v44  ;;  %v8502_v22 = vld [vmem:[%s9635_s14 + $0x458] ss:$36 sps:$4 sm:$0xff]   ;;  %v8501_v44 = vld [vmem:[%s9635_s14 + $0x184] ss:$36 sps:$4 sm:$0xff]  }
 0x7df   :  { %4122 = vmatprep.subr.bf16.mxu0 %v8441_v36  ;;  %4147 = vmatprep.subr.bf16.mxu1 %v8444_v23  ;;  %v8503_v36 = vld [vmem:[%s9635_s14 + $0x218] ss:$36 sps:$4 sm:$0xff]   ;;  %v8499_v23 = vld [vmem:[%s9635_s14 + $0x180] ss:$36 sps:$4 sm:$0xff]  }
 0x7e1   :  { %4021 = vmatmul.mubr.bf16.vlgmr.msra.gmra.mxu1 %v9738_v56 }
 0x7e2   :  { %4030 = vmatprep.mubr.bf16.mxu1 %v9866_v55  ;;  %4123 = vmatpush2.bf16.msra.mxu0 %v8439_v30  ;;  %v8506_v30 = vld [vmem:[%s9635_s14 + $0x13c] ss:$36 sps:$4 sm:$0xff]  }
 0x7e3   :  { %4148 = vmatpush1.bf16.msra.mxu1 %v8442_v7  ;;  %4124 = vmatprep.subr.bf16.mxu0 %v8447_v19  ;;  %v8507_v7 = vld [vmem:[%s9635_s14 + $0x410] ss:$36 sps:$4 sm:$0xff]  }
 0x7e4   :  { %4149 = vmatprep.subr.bf16.mxu1 %v8450_v0  ;;  %v8508_v19 = vld [vmem:[%s9635_s14 + $0x1d0] ss:$36 sps:$4 sm:$0xff]   ;;  %v8504_v0 = vld [vmem:[%s9635_s14 + $0x138] ss:$36 sps:$4 sm:$0xff]  }
 0x7e6   :  { %4125 = vmatpush2.bf16.msra.mxu0 %v8445_v38  ;;  %v8512_v38 = vld [vmem:[%s9635_s14 + $0x3c8] ss:$36 sps:$4 sm:$0xff]  }
 0x7e7   :  { %4150 = vmatpush1.bf16.msra.mxu1 %v8448_v60  ;;  %4253 = vmatprep.subr.bf16.mxu0 %v8456_v8  ;;  %v8511_v60 = vld [vmem:[%s9635_s14 + $0xf4] ss:$36 sps:$4 sm:$0xff]   ;;  %v8513_v8 = vld [vmem:[%s9635_s14 + $0x188] ss:$36 sps:$4 sm:$0xff]  }
 0x7e8   :  { %4151 = vmatprep.subr.bf16.mxu1 %v8453_v46  ;;  %v8509_v46 = vld [vmem:[%s9635_s14 + $0xf0] ss:$36 sps:$4 sm:$0xff]  }
 0x7e9   :  { %4031 = vmatmul.mubr.bf16.gmra.mxu1 %v9873_v32  ;;  %4127 = vmatmul.mubr.bf16.vlgmr.msra.gmra.mxu0 %v9738_v56 }
 0x7ea   :  { %4136 = vmatprep.mubr.bf16.mxu0 %v9866_v55  ;;  %4254 = vmatpush1.bf16.msra.mxu0 %v8454_v39  ;;  %v8517_v39 = vld [vmem:[%s9635_s14 + $0x380] ss:$36 sps:$4 sm:$0xff]  }
 0x7eb   :  { %4152 = vmatpush1.bf16.msra.mxu1 %v8451_v26  ;;  %4255 = vmatprep.subr.bf16.mxu0 %v8462_v62  ;;  %v8516_v26 = vld [vmem:[%s9635_s14 + $0xac] ss:$36 sps:$4 sm:$0xff]   ;;  %v8518_v62 = vld [vmem:[%s9635_s14 + $0x140] ss:$36 sps:$4 sm:$0xff]  }
 0x7ec   :  { %4153 = vmatprep.subr.bf16.mxu1 %v8459_v48  ;;  %4179 = vmatprep.mubr.bf16.mxu1 %v11133_v2  ;;  %v8514_v48 = vld [vmem:[%s9635_s14 + $0xa8] ss:$36 sps:$4 sm:$0xff]  }
 0x7ee   :  { %4256 = vmatpush1.bf16.msra.mxu0 %v8460_v5  ;;  %v8522_v5 = vld [vmem:[%s9635_s14 + $0x338] ss:$36 sps:$4 sm:$0xff]  }
 0x7ef   :  { %4154 = vmatpush1.bf16.msra.mxu1 %v8457_v59  ;;  %4257 = vmatprep.subr.bf16.mxu0 %v8468_v58  ;;  %v8521_v59 = vld [vmem:[%s9635_s14 + $0x64] ss:$36 sps:$4 sm:$0xff]   ;;  %v8523_v58 = vld [vmem:[%s9635_s14 + $0xf8] ss:$36 sps:$4 sm:$0xff]  }
 0x7f0   :  { %4155 = vmatprep.subr.bf16.mxu1 %v8465_v51  ;;  %v8519_v51 = vld [vmem:[%s9635_s14 + $0x60] ss:$36 sps:$4 sm:$0xff]  }
 0x7f1   :  { %4137 = vmatmul.mubr.bf16.gmra.mxu0 %v9873_v32 }
 0x7f2   :  { %4258 = vmatpush1.bf16.msra.mxu0 %v8466_v14  ;;  %4285 = vmatprep.mubr.bf16.mxu0 %v11133_v2  ;;  %v8527_v14 = vld [vmem:[%s9635_s14 + $0x2f0] ss:$36 sps:$4 sm:$0xff]  }
 0x7f3   :  { %4156 = vmatpush1.bf16.msra.mxu1 %v8463_v63  ;;  %4259 = vmatprep.subr.bf16.mxu0 %v8474_v6  ;;  %v8528_v63 = vld [vmem:[%s9635_s14 + $0xb0] ss:$36 sps:$4 sm:$0xff]   ;;  %v8524_v6 = vld [vmem:[%s9635_s14 + $0x18] ss:$36 sps:$4 sm:$0xff]  }
 0x7f4   :  { %4157 = vmatprep.subr.bf16.mxu1 %v8471_v20  ;;  %v8532_v20 = vld [vmem:[%s9635_s14 + $0x2a8] ss:$36 sps:$4 sm:$0xff]  }
 0x7f6   :  { %4260 = vmatpush1.bf16.msra.mxu0 %v8472_v18  ;;  %v8531_v18 = vld [vmem:[%s9635_s14 + $0x454] ss:$36 sps:$4 sm:$0xff]  }
 0x7f7   :  { %4158 = vmatpush1.bf16.msra.mxu1 %v8469_v9  ;;  %4261 = vmatprep.subr.bf16.mxu0 %v8480_v43  ;;  %v8533_v9 = vld [vmem:[%s9635_s14 + $0x68] ss:$36 sps:$4 sm:$0xff]   ;;  %v8529_v43 = vld [vmem:[%s9635_s14 + $0x450] ss:$36 sps:$4 sm:$0xff]  }
 0x7f8   :  { %4159 = vmatprep.subr.bf16.mxu1 %v8477_v53  ;;  %v8537_v53 = vld [vmem:[%s9635_s14 + $0x260] ss:$36 sps:$4 sm:$0xff]  }
 0x7fa   :  { %4262 = vmatpush1.bf16.msra.mxu0 %v8478_v17  ;;  %v8536_v17 = vld [vmem:[%s9635_s14 + $0x40c] ss:$36 sps:$4 sm:$0xff]  }
 0x7fb   :  { %4160 = vmatpush1.bf16.msra.mxu1 %v8475_v57  ;;  %4263 = vmatprep.subr.bf16.mxu0 %v8486_v50  ;;  %v8538_v57 = vld [vmem:[%s9635_s14 + $0x20] ss:$36 sps:$4 sm:$0xff]   ;;  %v8534_v50 = vld [vmem:[%s9635_s14 + $0x408] ss:$36 sps:$4 sm:$0xff]  }
 0x7fc   :  { %4161 = vmatprep.subr.bf16.mxu1 %v8483_v29  ;;  %v8541_v29 = vld [vmem:[%s9635_s14 + $0x3c4] ss:$36 sps:$4 sm:$0xff]  }
 0x7fe   :  { %4264 = vmatpush1.bf16.msra.mxu0 %v8484_v35  ;;  %v8539_v35 = vld [vmem:[%s9635_s14 + $0x3c0] ss:$36 sps:$4 sm:$0xff]  }
 0x7ff   :  { %4162 = vmatpush1.bf16.msra.mxu1 %v8481_v25  ;;  %4265 = vmatprep.subr.bf16.mxu0 %v8492_v24  ;;  %v8544_v25 = vld [vmem:[%s9635_s14 + $0x37c] ss:$36 sps:$4 sm:$0xff]  }
 0x800   :  { %4200 = vmatprep.subr.bf16.mxu1 %v8489_v47  ;;  %v8542_v24 = vld [vmem:[%s9635_s14 + $0x378] ss:$36 sps:$4 sm:$0xff]  }
 0x801   :  { %v8547_v47 = vld [vmem:[%s9635_s14 + $0x334] ss:$36 sps:$4 sm:$0xff]  }
 0x802   :  { %4180 = vmatmul.mubr.bf16.vlgmr.msra.gmra.mxu1 %v9877_v15  ;;  %4266 = vmatpush1.bf16.msra.mxu0 %v8490_v31  ;;  %v10058_v31 = vld [vmem:[%s10049_s18 + $0x78] sm:$0xff]  }
 0x803   :  { %4201 = vmatpush1.bf16.msra.mxu1 %v8487_v52  ;;  %4267 = vmatprep.subr.bf16.mxu0 %v8498_v12  ;;  %11153 = vst [vmem:[#allocation15_spill] sm:$0xff] %v10058_v31  ;;  %v10061_v52 = vld [vmem:[%s10049_s18 + $0x38] sm:$0xff]   ;;  %v8545_v12 = vld [vmem:[%s9635_s14 + $0x330] ss:$36 sps:$4 sm:$0xff]  }
 0x804   :  { %4202 = vmatprep.subr.bf16.mxu1 %v8495_v3  ;;  %4189 = vmatprep.mubr.bf16.mxu1 %v11133_v2  ;;  %v8550_v3 = vld [vmem:[%s9635_s14 + $0x2ec] ss:$36 sps:$4 sm:$0xff]  }
 0x806   :  { %4268 = vmatpush1.bf16.msra.mxu0 %v8496_v16  ;;  %v10068_v16 = vld [vmem:[%s10049_s18 + $0x70] sm:$0xff]  }
 0x807   :  { %4203 = vmatpush1.bf16.msra.mxu1 %v8493_v37  ;;  %7809 = vmatprep.subr.bf16.mxu0 %v8502_v22  ;;  %v10071_v37 = vld [vmem:[%s10049_s18 + $0x30] sm:$0xff]   ;;  %v8548_v22 = vld [vmem:[%s9635_s14 + $0x2e8] ss:$36 sps:$4 sm:$0xff]  }
 0x808   :  { %4204 = vmatprep.subr.bf16.mxu1 %v8501_v44  ;;  %v8553_v44 = vld [vmem:[%s9635_s14 + $0x2a4] ss:$36 sps:$4 sm:$0xff]  }
 0x809   :  { %4286 = vmatmul.mubr.bf16.vlgmr.msra.gmra.mxu0 %v9877_v15 }
 0x80a   :  { %4190 = vmatmul.mubr.bf16.gmra.mxu1 %v9897_v21  ;;  %7810 = vmatpush3.bf16.msra.mxu0 %v8503_v36  ;;  %v10079_v36 = vld [vmem:[%s10049_s18 + $0x68] sm:$0xff]  }
 0x80b   :  { %4205 = vmatpush1.bf16.msra.mxu1 %v8499_v23  ;;  %4232 = vmatprep.mubr.bf16.mxu1 %v9734_v28  ;;  %v10082_v23 = vld [vmem:[%s10049_s18 + $0x28] sm:$0xff]  }
 0x80c   :  { %4206 = vmatprep.subr.bf16.mxu1 %v8506_v30  ;;  %7811 = vmatprep.subr.bf16.mxu0 %v8507_v7  ;;  %v8551_v30 = vld [vmem:[%s9635_s14 + $0x2a0] ss:$36 sps:$4 sm:$0xff]  }
 0x80d   :  { %4295 = vmatprep.mubr.bf16.mxu0 %v11133_v2  ;;  %v10088_v7 = vld [vmem:[%s10049_s18 + $0x60] sm:$0xff]  }
 0x80e   :  { %7812 = vmatpush3.bf16.msra.mxu0 %v8508_v19  ;;  %v8556_v19 = vld [vmem:[%s9635_s14 + $0x25c] ss:$36 sps:$4 sm:$0xff]  }
 0x80f   :  { %4207 = vmatpush1.bf16.msra.mxu1 %v8504_v0  ;;  %7813 = vmatprep.subr.bf16.mxu0 %v8512_v38  ;;  %v10092_v0 = vld [vmem:[%s10049_s18 + $0x20] sm:$0xff]   ;;  %v10095_v38 = vld [vmem:[%s10049_s18 + $0x58] sm:$0xff]  }
 0x810   :  { %4208 = vmatprep.subr.bf16.mxu1 %v8511_v60  ;;  %v8554_v60 = vld [vmem:[%s9635_s14 + $0x258] ss:$36 sps:$4 sm:$0xff]  }
 0x811   :  { %4296 = vmatmul.mubr.bf16.gmra.mxu0 %v9897_v21 }
 0x812   :  { %7814 = vmatpush3.bf16.msra.mxu0 %v8513_v8  ;;  %4338 = vmatprep.mubr.bf16.mxu0 %v9734_v28  ;;  %v8526_v28 = vld [vmem:[%s9635_s14 + $0x1c] ss:$36 sps:$4 sm:$0xff]  }
 0x813   :  { %4209 = vmatpush1.bf16.msra.mxu1 %v8509_v46  ;;  %7815 = vmatprep.subr.bf16.mxu0 %v8517_v39  ;;  %v10100_v8 = vld [vmem:[%s10049_s18 + $0x18] sm:$0xff]   ;;  %v10105_v39 = vld [vmem:[%s10049_s18 + $0x50] sm:$0xff]  }
 0x814   :  { %4210 = vmatprep.subr.bf16.mxu1 %v8516_v26  ;;  %v8557_v46 = vld [vmem:[%s9635_s14 + $0x698] ss:$36 sps:$4 sm:$0xff]   ;;  %v8558_v26 = vld [vmem:[%s9635_s14 + $0x650] ss:$36 sps:$4 sm:$0xff]  }
 0x816   :  { %7816 = vmatpush3.bf16.msra.mxu0 %v8518_v62  ;;  %v10112_v62 = vld [vmem:[%s10049_s18 + $0x10] sm:$0xff]  }
 0x817   :  { %4211 = vmatpush1.bf16.msra.mxu1 %v8514_v48  ;;  %7817 = vmatprep.subr.bf16.mxu0 %v8522_v5  ;;  %v10118_v48 = vld [vmem:[%s10049_s18 + $0x48] sm:$0xff]  }
 0x818   :  { %4212 = vmatprep.subr.bf16.mxu1 %v8521_v59  ;;  %v8559_v5 = vld [vmem:[%s9635_s14 + $0x608] ss:$36 sps:$4 sm:$0xff]  }
 0x819   :  { %v10122_v59 = vld [vmem:[%s10049_s18 + $0x8] sm:$0xff]  }
 0x81a   :  { %7818 = vmatpush3.bf16.msra.mxu0 %v8523_v58  ;;  %v10127_v58 = vld [vmem:[%s10049_s18 + $0x40] sm:$0xff]  }
 0x81b   :  { %4213 = vmatpush1.bf16.msra.mxu1 %v8519_v51  ;;  %7819 = vmatprep.subr.bf16.mxu0 %v8527_v14  ;;  %11154 = vst [vmem:[#allocation16_spill] sm:$0xff] %v10127_v58  ;;  %v8561_v51 = vld [vmem:[%s9635_s14 + $0x578] ss:$36 sps:$4 sm:$0xff]   ;;  %v8562_v14 = vld [vmem:[%s9635_s14 + $0x530] ss:$36 sps:$4 sm:$0xff]  }
 0x81c   :  { %4214 = vmatprep.subr.bf16.mxu1 %v8526_v28  ;;  %v10140_v28 = vpop.f32.mrf.mxu0 }
 0x81e   :  { %7820 = vmatpush3.bf16.msra.mxu0 %v8528_v63  ;;  %v8563_v63 = vld [vmem:[%s9635_s14 + $0x4e8] ss:$36 sps:$4 sm:$0xff]  }
 0x81f   :  { %4215 = vmatpush1.bf16.msra.mxu1 %v8524_v6  ;;  %7821 = vmatprep.subr.bf16.mxu0 %v8532_v20  ;;  %v8564_v6 = vld [vmem:[%s9635_s14 + $0x4a0] ss:$36 sps:$4 sm:$0xff]   ;;  %v10154_v20 = vshrl.u32 %v2458_v4, 7 }
 0x820   :  { %4216 = vmatprep.subr.bf16.mxu1 %v8531_v18 }
 0x821   :  { %v10242_v33 = vsub.s32 2, %v10154_v20 }
 0x822   :  { %7822 = vmatpush3.bf16.msra.mxu0 %v8533_v9  ;;  %v10159_v9 = vld [vmem:[%s10049_s18 + $0xb8] sm:$0xff]  }
 0x823   :  { %4217 = vmatpush2.bf16.msra.mxu1 %v8529_v43  ;;  %7823 = vmatprep.subr.bf16.mxu0 %v8537_v53  ;;  %11161 = vst [vmem:[#allocation23_spill] sm:$0xff] %v10242_v33 }
 0x824   :  { %4218 = vmatprep.subr.bf16.mxu1 %v8536_v17  ;;  %v10165_v17 = vsub.s32 0, %v10154_v20 }
 0x826   :  { %7824 = vmatpush3.bf16.msra.mxu0 %v8538_v57  ;;  %11156 = vst [vmem:[#allocation18_spill] sm:$0xff] %v10165_v17  ;;  %v10169_v57 = vld [vmem:[%s10149_s21] sm:$0xff] }
 0x827   :  { %4219 = vmatpush2.bf16.msra.mxu1 %v8534_v50  ;;  %7847 = vmatprep.subr.bf16.mxu0 %v10058_v31  ;;  %11157 = vst [vmem:[#allocation19_spill] sm:$0xff] %v10169_v57  ;;  %v2744_v27 = vrot.slane %v10169_v57, %v10242_v33 }
 0x828   :  { %4220 = vmatprep.subr.bf16.mxu1 %v8541_v29  ;;  %v10175_v29 = vld [vmem:[%s10049_s18 + $0xb0] sm:$0xff]  }
 0x829   :  { %4339 = vmatmul.mubr.bf16.vlgmr.msra.gmra.mxu0 %v9738_v56 }
 0x82a   :  { %4346 = vmatprep.mubr.bf16.mxu0 %v9866_v55  ;;  %7848 = vmatpush3.bf16.msra.mxu0 %v10061_v52 }
 0x82b   :  { %4221 = vmatpush2.bf16.msra.mxu1 %v8539_v35  ;;  %7849 = vmatprep.subr.bf16.mxu0 %v10068_v16  ;;  %v10180_v35 = vsub.s32 1, %v10154_v20 }
 0x82c   :  { %4222 = vmatprep.subr.bf16.mxu1 %v8544_v25 }
 0x82d   :  { %11158 = vst [vmem:[#allocation20_spill] sm:$0xff] %v10180_v35 }
 0x82e   :  { %7850 = vmatpush3.bf16.msra.mxu0 %v10071_v37 }
 0x82f   :  { %4223 = vmatpush2.bf16.msra.mxu1 %v8542_v24  ;;  %7851 = vmatprep.subr.bf16.mxu0 %v10079_v36 }
 0x830   :  { %4224 = vmatprep.subr.bf16.mxu1 %v8547_v47 }
 0x831   :  { %4347 = vmatmul.mubr.bf16.gmra.mxu0 %v9873_v32 }
 0x832   :  { %7852 = vmatpush3.bf16.msra.mxu0 %v10082_v23 }
 0x833   :  { %4225 = vmatpush2.bf16.msra.mxu1 %v8545_v12  ;;  %7853 = vmatprep.subr.bf16.mxu0 %v10088_v7  ;;  %v10193_v12 = vld [vmem:[%s10049_s18 + $0xa8] sm:$0xff]  }
 0x834   :  { %4226 = vmatprep.subr.bf16.mxu1 %v8550_v3  ;;  %v10197_v3 = vrot.slane %v10169_v57, %v10180_v35 }
 0x836   :  { %7854 = vmatpush3.bf16.msra.mxu0 %v10092_v0 }
 0x837   :  { %4227 = vmatpush2.bf16.msra.mxu1 %v8548_v22  ;;  %7855 = vmatprep.subr.bf16.mxu0 %v10095_v38 }
 0x838   :  { %4228 = vmatprep.subr.bf16.mxu1 %v8553_v44 }
 0x83a   :  { %7856 = vmatpush3.bf16.msra.mxu0 %v10100_v8 }
 0x83b   :  { %4229 = vmatpush2.bf16.msra.mxu1 %v8551_v30  ;;  %7857 = vmatprep.subr.bf16.mxu0 %v10105_v39 }
 0x83c   :  { %4230 = vmatprep.subr.bf16.mxu1 %v8556_v19 }
 0x83e   :  { %7858 = vmatpush3.bf16.msra.mxu0 %v10112_v62 }
 0x83f   :  { %4231 = vmatpush2.bf16.msra.mxu1 %v8554_v60  ;;  %7859 = vmatprep.subr.bf16.mxu0 %v10118_v48 }
 0x840   :  { %8065 = vmatprep.subr.bf16.mxu1 %v8557_v46 }
 0x842   :  { %4233 = vmatmul.mubr.bf16.vlgmr.msra.gmra.mxu1 %v9738_v56  ;;  %7860 = vmatpush3.bf16.msra.mxu0 %v10122_v59  ;;  %v8560_v56 = vld [vmem:[%s9635_s14 + $0x5c0] ss:$36 sps:$4 sm:$0xff]  }
 0x843   :  { %4242 = vmatprep.mubr.bf16.mxu1 %v9866_v55  ;;  %8066 = vmatpush3.bf16.msra.mxu1 %v8557_v46  ;;  %v10131_v55 = vld [vmem:[%s10049_s18] sm:$0xff]  }
 0x844   :  { %8067 = vmatprep.subr.bf16.mxu1 %v8558_v26  ;;  %11155 = vst [vmem:[#allocation17_spill] sm:$0xff] %v10131_v55  ;;  %7861 = vmatprep.subr.bf16.mxu0 %v10127_v58 }
 0x846   :  { %7862 = vmatpush3.bf16.msra.mxu0 %v10131_v55 }
 0x847   :  { %8068 = vmatpush3.bf16.msra.mxu1 %v8558_v26  ;;  %7878 = vmatprep.subr.bf16.mxu0 %v10058_v31  ;;  %v10204_v26 = vld [vmem:[%s10049_s18 + $0xa0] sm:$0xff]  }
 0x848   :  { %8069 = vmatprep.subr.bf16.mxu1 %v8559_v5 }
 0x84a   :  { %4243 = vmatmul.mubr.bf16.gmra.mxu1 %v9873_v32  ;;  %v10143_v32 = vpop.f32.mrf.mxu0 }
 0x84b   :  { %8070 = vmatpush3.bf16.msra.mxu1 %v8559_v5  ;;  %8081 = vmatprep.mubr.bf16.mxu1 %v9877_v15 }
 0x84c   :  { %8071 = vmatprep.subr.bf16.mxu1 %v8560_v56  ;;  %v10151_v15 = vpop.f32.mrf.mxu0 }
 0x84e   :  { %v10156_v18 = vpop.f32.mrf.mxu0 }
 0x84f   :  { %8072 = vmatpush3.bf16.msra.mxu1 %v8560_v56 }
 0x850   :  { %8073 = vmatprep.subr.bf16.mxu1 %v8561_v51 }
 0x853   :  { %8074 = vmatpush3.bf16.msra.mxu1 %v8561_v51 }
 0x854   :  { %8075 = vmatprep.subr.bf16.mxu1 %v8562_v14 }
 0x857   :  { %8076 = vmatpush3.bf16.msra.mxu1 %v8562_v14 }
 0x858   :  { %8077 = vmatprep.subr.bf16.mxu1 %v8563_v63 }
 0x85b   :  { %8078 = vmatpush3.bf16.msra.mxu1 %v8563_v63 }
 0x85c   :  { %8079 = vmatprep.subr.bf16.mxu1 %v8564_v6 }
 0x85f   :  { %8080 = vmatpush3.bf16.msra.mxu1 %v8564_v6 }
 0x860   :  { %8085 = vmatprep.subr.bf16.mxu1 %v11090_v13 }
 0x861   :  { %v3926_v43 = vpop.f32.mrf.mxu0  ;;  %v10162_v53 = vpop.f32.mrf.mxu1 }
 0x862   :  { %8082 = vmatmul.mubr.bf16.vlgmr.msra.gmra.mxu1 %v9897_v21  ;;  %v10187_v21 = vrot.slane %v10169_v57, %v10165_v17 }
 0x863   :  { %v3928_v4 = vpop.f32.mrf.mxu0  ;;  %v10171_v50 = vpop.f32.mrf.mxu1  ;;  %8086 = vmatpush3.bf16.msra.mxu1 %v10159_v9  ;;  %8101 = vmatprep.mubr.msk.bf16.mxu1 %vm8924_vm1, %v11090_v13 }
 0x864   :  { %8087 = vmatprep.subr.bf16.mxu1 %v11090_v13  ;;  %v3927_v22 = vadd.f32 %v3926_v43, %v10187_v21  ;;  %v3929_v30 = vadd.f32 %v3928_v4, %v10197_v3  ;;  %v10213_v43 = vld [vmem:[%s10049_s18 + $0x98] sm:$0xff]  }
 0x865   :  { %v10183_v25 = vpop.f32.mrf.mxu1  ;;  %v3930_v24 = vpop.f32.mrf.mxu0 }
 0x866   :  { %v3931_v5 = vadd.f32 %v3930_v24, %v10187_v21  ;;  %v10220_v24 = vld [vmem:[%s10049_s18 + $0x90] sm:$0xff]  }
 0x867   :  { %v10189_v47 = vpop.f32.mrf.mxu1  ;;  %8088 = vmatpush3.bf16.msra.mxu1 %v10175_v29  ;;  %v3932_v60 = vpop.f32.mrf.mxu0 }
 0x868   :  { %8089 = vmatprep.subr.bf16.mxu1 %v11090_v13  ;;  %v3933_v14 = vadd.f32 %v3932_v60, %v10197_v3 }
 0x869   :  { %v3979_v44 = vpop.f32.mrf.mxu1 }
 0x86a   :  { %v3980_v19 = vadd.f32 %v3979_v44, %v3927_v22  ;;  %v10225_v22 = vld [vmem:[%s10049_s18 + $0x88] sm:$0xff]   ;;  %v10230_v44 = vld [vmem:[%s10049_s18 + $0x80] sm:$0xff]  }
 0x86b   :  { %v3981_v46 = vpop.f32.mrf.mxu1  ;;  %8090 = vmatpush3.bf16.msra.mxu1 %v10193_v12  ;;  %11159 = vst [vmem:[#allocation21_spill] sm:$0xff] %v10225_v22  ;;  %11160 = vst [vmem:[#allocation22_spill] sm:$0xff] %v10230_v44 }
 0x86c   :  { %v10207_v56 = vadd.f32 %v3981_v46, %v3929_v30  ;;  %8091 = vmatprep.subr.bf16.mxu1 %v11090_v13  ;;  %v10235_v30 = vpop.f32.mrf.mxu0 }
 0x86d   :  { %v3983_v51 = vpop.f32.mrf.mxu1 }
 0x86e   :  { %v3984_v63 = vadd.f32 %v3983_v51, %v3931_v5  ;;  %v4077_v60 = vpop.f32.mrf.mxu0  ;;  %v2747_v51 = vsub.s32 3, %v10154_v20 }
 0x86f   :  { %v3985_v6 = vpop.f32.mrf.mxu1  ;;  %8092 = vmatpush3.bf16.msra.mxu1 %v10204_v26 }
 0x870   :  { %v10215_v4 = vadd.f32 %v3985_v6, %v3933_v14  ;;  %8093 = vmatprep.subr.bf16.mxu1 %v11090_v13  ;;  %v10237_v46 = vpop.f32.mrf.mxu0  ;;  %v2748_v6 = vrot.slane %v10169_v57, %v2747_v51 }
 0x872   :  { %v4081_v5 = vpop.f32.mrf.mxu0 }
 0x873   :  { %8094 = vmatpush3.bf16.msra.mxu1 %v10213_v43 }
 0x874   :  { %8095 = vmatprep.subr.bf16.mxu1 %v11090_v13  ;;  %v4085_v14 = vpop.f32.mrf.mxu0 }
 0x876   :  { %v4087_v40 = vpop.f32.mrf.mxu0 }
 0x877   :  { %8096 = vmatpush3.bf16.msra.mxu1 %v10220_v24 }
 0x878   :  { %8097 = vmatprep.subr.bf16.mxu1 %v11090_v13  ;;  %v4089_v49 = vpop.f32.mrf.mxu0 }
 0x87a   :  { %v4091_v35 = vpop.f32.mrf.mxu0 }
 0x87b   :  { %8098 = vmatpush3.bf16.msra.mxu1 %v10225_v22 }
 0x87c   :  { %8099 = vmatprep.subr.bf16.mxu1 %v11090_v13 }
 0x87f   :  { %8100 = vmatpush3.bf16.msra.mxu1 %v10230_v44 }
 0x880   :  { %8105 = vmatprep.subr.bf16.mxu1 %v11090_v13 }
 0x8a1   :  { %v4022_v45 = vpop.f32.mrf.mxu1 }
 0x8a3   :  { %v4024_v34 = vpop.f32.mrf.mxu1 }
 0x8a4   :  { %v4025_v10 = vadd.f32 %v4024_v34, %v2748_v6 }
 0x8a5   :  { %v4026_v11 = vpop.f32.mrf.mxu1 }
 0x8a6   :  { %v10244_v13 = vadd.f32 %v4077_v60, %v4025_v10 }
 0x8a7   :  { %v4028_v54 = vpop.f32.mrf.mxu1 }
 0x8a8   :  { %v10249_v61 = vmul.f32 %v10244_v13, %v3980_v19  ;;  %v4029_v42 = vadd.f32 %v4028_v54, %v2748_v6 }
 0x8a9   :  { %v4032_v51 = vpop.f32.mrf.mxu1  ;;  %v4128_v60 = vpop.f32.mrf.mxu0 }
 0x8aa   :  { %11162 = vst [vmem:[#allocation24_spill] sm:$0xff] %v10249_v61  ;;  %v4082_v17 = vadd.f32 %v4081_v5, %v4029_v42  ;;  %v4033_v41 = vadd.f32 %v4032_v51, %v2744_v27  ;;  %v4027_v61 = vadd.f32 %v4026_v11, %v2744_v27 }
 0x8ab   :  { %v4034_v1 = vpop.f32.mrf.mxu1  ;;  %v4130_v51 = vpop.f32.mrf.mxu0 }
 0x8ac   :  { %v10251_v31 = vmul.f32 %v4082_v17, %v3984_v63  ;;  %v10253_v34 = vadd.f32 %v4085_v14, %v4033_v41  ;;  %v4035_v10 = vadd.f32 %v4034_v1, %v2748_v6  ;;  %v3919_v14 = vadd.f32 %v10143_v32, %v10197_v3 }
 0x8ad   :  { %v4036_v2 = vpop.f32.mrf.mxu1  ;;  %v4132_v1 = vpop.f32.mrf.mxu0 }
 0x8ae   :  { %11163 = vst [vmem:[#allocation25_spill] sm:$0xff] %v10251_v31  ;;  %v10257_v33 = vadd.f32 %v4087_v40, %v4035_v10  ;;  %v4037_v55 = vadd.f32 %v4036_v2, %v2744_v27  ;;  %v2751_v40 = vsub.s32 4, %v10154_v20  ;;  %v2755_v10 = vsub.s32 5, %v10154_v20 }
 0x8af   :  { %v4038_v58 = vpop.f32.mrf.mxu1  ;;  %v4134_v2 = vpop.f32.mrf.mxu0  ;;  %v3972_v32 = vadd.f32 %v10171_v50, %v3919_v14 }
 0x8b0   :  { %v10260_v54 = vmul.f32 %v10257_v33, %v3980_v19  ;;  %v10262_v42 = vadd.f32 %v4089_v49, %v4037_v55  ;;  %v4039_v5 = vadd.f32 %v4038_v58, %v2748_v6  ;;  %v2752_v19 = vrot.slane %v10169_v57, %v2751_v40 }
 0x8b1   :  { %v4138_v49 = vpop.f32.mrf.mxu0  ;;  %v2756_v58 = vrot.slane %v10169_v57, %v2755_v10  ;;  %v3923_v10 = vadd.f32 %v10156_v18, %v10197_v3  ;;  %v10301_v3 = vadd.f32 %v10237_v46, %v4027_v61 }
 0x8b2   :  { %11164 = vst [vmem:[#allocation26_spill] sm:$0xff] %v10260_v54  ;;  %v10264_v22 = vadd.f32 %v4091_v35, %v4039_v5  ;;  %v4129_v55 = vadd.f32 %v4128_v60, %v2752_v19  ;;  %v3921_v54 = vadd.f32 %v10151_v15, %v10187_v21  ;;  %v4133_v60 = vadd.f32 %v4132_v1, %v2752_v19 }
 0x8b3   :  { %v4140_v35 = vpop.f32.mrf.mxu0  ;;  %v4131_v5 = vadd.f32 %v4130_v51, %v2756_v58  ;;  %v3976_v11 = vadd.f32 %v10189_v47, %v3923_v10  ;;  %v4139_v50 = vadd.f32 %v4138_v49, %v2752_v19 }
 0x8b4   :  { %v10267_v41 = vmul.f32 %v10264_v22, %v3984_v63  ;;  %v3917_v63 = vadd.f32 %v10140_v28, %v10187_v21 }
 0x8b5   :  { %v4142_v31 = vpop.f32.mrf.mxu0 }
 0x8b6   :  { %11165 = vst [vmem:[#allocation27_spill] sm:$0xff] %v10267_v41  ;;  %v4023_v41 = vadd.f32 %v4022_v45, %v2744_v27  ;;  %v10287_v51 = vadd.f32 %v10162_v53, %v3917_v63  ;;  %v4135_v27 = vadd.f32 %v4134_v2, %v2756_v58 }
 0x8b8   :  { %v10298_v21 = vadd.f32 %v10235_v30, %v4023_v41 }
 0x8c2   :  { %v4181_v6 = vpop.f32.mrf.mxu1 }
 0x8c3   :  { %v4182_v44 = vadd.f32 %v4181_v6, %v4129_v55  ;;  %v10291_v55 = vadd.f32 %v10183_v25, %v3921_v54  ;;  %v4144_v25 = vpop.f32.mrf.mxu0  ;;  %v4456_v6 = vmul.f32 %v10244_v13, %v10287_v51 }
 0x8c4   :  { %v4183_v40 = vpop.f32.mrf.mxu1 }
 0x8c5   :  { %v10284_v57 = vmul.f32 %v4182_v44, %v10207_v56  ;;  %v4184_v28 = vadd.f32 %v4183_v40, %v4131_v5  ;;  %v4459_v53 = vmul.f32 %v4082_v17, %v10291_v55  ;;  %v4457_v54 = vmul.f32 %v4182_v44, %v3972_v32 }
 0x8c6   :  { %v4185_v45 = vpop.f32.mrf.mxu1  ;;  %v4141_v5 = vadd.f32 %v4140_v35, %v2756_v58 }
 0x8c7   :  { %v10295_v15 = vmul.f32 %v4184_v28, %v10253_v34  ;;  %v4186_v18 = vadd.f32 %v4185_v45, %v4133_v60  ;;  %v4458_v30 = vmul.f32 %v4184_v28, %v10298_v21  ;;  %v4462_v63 = vpack.c.bf16 %v4459_v53, %v4456_v6 }
 0x8c8   :  { %v4187_v1 = vpop.f32.mrf.mxu1  ;;  %v4143_v60 = vadd.f32 %v4142_v31, %v2752_v19 }
 0x8c9   :  { %v4460_v14 = vmul.f32 %v4186_v18, %v3976_v11  ;;  %v10305_v47 = vmul.f32 %v4186_v18, %v10215_v4  ;;  %v4188_v2 = vadd.f32 %v4187_v1, %v4135_v27  ;;  %v10314_v49 = vpop.f32.mrf.mxu0 }
 0x8ca   :  { %v4191_v41 = vpop.f32.mrf.mxu1 }
 0x8cb   :  { %v4461_v61 = vmul.f32 %v4188_v2, %v10301_v3  ;;  %v10312_v46 = vmul.f32 %v4188_v2, %v10262_v42  ;;  %v4192_v17 = vadd.f32 %v4191_v41, %v4139_v50  ;;  %v4463_v44 = vpack.c.bf16 %v4460_v14, %v4457_v54  ;;  %v10323_v1 = vpop.f32.mrf.mxu0 }
 0x8cc   :  { %v4193_v40 = vpop.f32.mrf.mxu1  ;;  %v4145_v50 = vadd.f32 %v4144_v25, %v2756_v58  ;;  %v11166_v25 = vmov 0.0  }
 0x8cd   :  { %v4464_v13 = vpack.c.bf16 %v4461_v61, %v4458_v30  ;;  %v10321_v45 = vmul.f32 %v4192_v17, %v10207_v56  ;;  %4641 = vmatprep.mubr.bf16.mxu0 %v4463_v44  ;;  %v4194_v27 = vadd.f32 %v4193_v40, %v4141_v5  ;;  %v4692_v53 = vmul.f32 %v4192_v17, %v3972_v32  ;;  %v10337_v14 = vpop.f32.mrf.mxu0  ;;  %v11167_v17 = vld [vmem:[#allocation21_spill] sm:$0xff]  ;;  %v11168_v44 = vld [vmem:[#allocation16_spill] sm:$0xff] }
 0x8ce   :  { %v4195_v18 = vpop.f32.mrf.mxu1  ;;  %4642 = vmatmul.mubr.bf16.vlgmr.msra.gmra.mxu0 %v4462_v63  ;;  %v4694_v61 = vmul.f32 %v10264_v22, %v10291_v55  ;;  %v4691_v40 = vmul.f32 %v10257_v33, %v10287_v51 }
 0x8cf   :  { %v4196_v35 = vadd.f32 %v4195_v18, %v4143_v60  ;;  %7879 = vmatpush3.bf16.msra.mxu0 %v10061_v52  ;;  %8102 = vmatmul.mubr.bf16.vlgmr.msra.gmra.mxu1 %v4464_v13  ;;  %v10327_v31 = vmul.f32 %v4194_v27, %v10253_v34  ;;  %v10350_v2 = vpop.f32.mrf.mxu0  ;;  %v4693_v60 = vmul.f32 %v4194_v27, %v10298_v21  ;;  %v11169_v13 = vld [vmem:[#allocation17_spill] sm:$0xff]  ;;  %v2759_v27 = vsub.s32 6, %v10154_v20 }
 0x8d0   :  { %8106 = vmatpush3.bf16.msra.mxu1 %v10159_v9  ;;  %v4197_v19 = vpop.f32.mrf.mxu1  ;;  %7880 = vmatprep.subr.bf16.mxu0 %v10068_v16 }
 0x8d1   :  { %v4695_v56 = vmul.f32 %v4196_v35, %v3976_v11  ;;  %v10332_v54 = vmul.f32 %v4196_v35, %v10215_v4  ;;  %v4198_v58 = vadd.f32 %v4197_v19, %v4145_v50  ;;  %8107 = vmatprep.subr.bf16.mxu1 %v11166_v25  ;;  %8121 = vmatprep.mubr.msk.bf16.mxu1 %vm8924_vm1, %v11166_v25  ;;  %v11170_v35 = vld [vmem:[#allocation22_spill] sm:$0xff]  ;;  %v11171_v19 = vmov 0  }
 0x8d2   :  { %v4697_v50 = vpack.c.bf16 %v4694_v61, %v4691_v40 }
 0x8d3   :  { %v10340_v34 = vmul.f32 %v4198_v58, %v10262_v42  ;;  %7881 = vmatpush3.bf16.msra.mxu0 %v10071_v37  ;;  %v4698_v32 = vpack.c.bf16 %v4695_v56, %v4692_v53  ;;  %v4297_v42 = vpop.f32.mrf.mxu0  ;;  %v4696_v63 = vmul.f32 %v4198_v58, %v10301_v3  ;;  %v2763_v58 = vsub.s32 7, %v10154_v20 }
 0x8d4   :  { %8108 = vmatpush3.bf16.msra.mxu1 %v10175_v29  ;;  %7882 = vmatprep.subr.bf16.mxu0 %v10079_v36 }
 0x8d5   :  { %4732 = vmatprep.mubr.bf16.mxu0 %v4698_v32  ;;  %8109 = vmatprep.subr.bf16.mxu1 %v11166_v25  ;;  %v4299_v6 = vpop.f32.mrf.mxu0  ;;  %v4699_v55 = vpack.c.bf16 %v4696_v63, %v4693_v60  ;;  %v11173_v32 = vld [vmem:[#allocation19_spill] sm:$0xff] }
 0x8d6   :  { %v2760_v61 = vrot.slane %v11173_v32, %v2759_v27  ;;  %v2764_v63 = vrot.slane %v11173_v32, %v2763_v58 }
 0x8d7   :  { %7883 = vmatpush3.bf16.msra.mxu0 %v10082_v23  ;;  %v4301_v30 = vpop.f32.mrf.mxu0 }
 0x8d8   :  { %8110 = vmatpush3.bf16.msra.mxu1 %v10193_v12  ;;  %7884 = vmatprep.subr.bf16.mxu0 %v10088_v7 }
 0x8d9   :  { %8111 = vmatprep.subr.bf16.mxu1 %v11166_v25  ;;  %v4303_v41 = vpop.f32.mrf.mxu0 }
 0x8db   :  { %7885 = vmatpush3.bf16.msra.mxu0 %v10092_v0 }
 0x8dc   :  { %8112 = vmatpush3.bf16.msra.mxu1 %v10204_v26  ;;  %7886 = vmatprep.subr.bf16.mxu0 %v10095_v38 }
 0x8dd   :  { %8113 = vmatprep.subr.bf16.mxu1 %v11166_v25 }
 0x8df   :  { %7887 = vmatpush3.bf16.msra.mxu0 %v10100_v8 }
 0x8e0   :  { %8114 = vmatpush3.bf16.msra.mxu1 %v10213_v43  ;;  %7888 = vmatprep.subr.bf16.mxu0 %v10105_v39 }
 0x8e1   :  { %8115 = vmatprep.subr.bf16.mxu1 %v11166_v25 }
 0x8e3   :  { %7889 = vmatpush3.bf16.msra.mxu0 %v10112_v62 }
 0x8e4   :  { %8116 = vmatpush3.bf16.msra.mxu1 %v10220_v24  ;;  %7890 = vmatprep.subr.bf16.mxu0 %v10118_v48 }
 0x8e5   :  { %8117 = vmatprep.subr.bf16.mxu1 %v11166_v25 }
 0x8e7   :  { %7891 = vmatpush3.bf16.msra.mxu0 %v10122_v59 }
 0x8e8   :  { %8118 = vmatpush3.bf16.msra.mxu1 %v11167_v17  ;;  %7892 = vmatprep.subr.bf16.mxu0 %v11168_v44 }
 0x8e9   :  { %v7825_v5 = vpop.f32.mrf.mxu0  ;;  %8119 = vmatprep.subr.bf16.mxu1 %v11166_v25 }
 0x8eb   :  { %7893 = vmatpush3.bf16.msra.mxu0 %v11169_v13  ;;  %v7826_v18 = vpop.f32.mrf.mxu0 }
 0x8ec   :  { %8120 = vmatpush3.bf16.msra.mxu1 %v11170_v35  ;;  %v7827_v22 = vadd.f32 %v7826_v18, %v7825_v5 }
 0x8ed   :  { %v7828_v53 = vpop.f32.mrf.mxu0  ;;  %8125 = vmatprep.subr.bf16.mxu1 %v11166_v25 }
 0x8ee   :  { %4733 = vmatmul.mubr.bf16.vlgmr.msra.gmra.mxu0 %v4697_v50 }
 0x8ef   :  { %8122 = vmatmul.mubr.bf16.vlgmr.msra.gmra.mxu1 %v4699_v55  ;;  %v7829_v3 = vpop.f32.mrf.mxu0  ;;  %4864 = vmatprep.mubr.bf16.mxu0 %v11171_v19 }
 0x8f0   :  { %v10382_v56 = vadd.f32 %v7829_v3, %v7828_v53  ;;  %8127 = vmatprep.mubr.msk.bf16.mxu1 %vm8924_vm1, %v11166_v25 }
 0x8f1   :  { %v7831_v33 = vpop.f32.mrf.mxu0 }
 0x8f2   :  { %11172 = vst [vmem:[#allocation21_spill] sm:$0xff] %v10382_v56 }
 0x8f3   :  { %v7832_v51 = vpop.f32.mrf.mxu0 }
 0x8f4   :  { %v7833_v21 = vadd.f32 %v7832_v51, %v7831_v33 }
 0x902   :  { %v4234_v5 = vpop.f32.mrf.mxu1 }
 0x903   :  { %v4235_v40 = vadd.f32 %v4234_v5, %v2760_v61 }
 0x904   :  { %v4236_v60 = vpop.f32.mrf.mxu1 }
 0x905   :  { %v4237_v18 = vadd.f32 %v4236_v60, %v2764_v63  ;;  %v10391_v50 = vadd.f32 %v10314_v49, %v4235_v40 }
 0x906   :  { %v4238_v55 = vpop.f32.mrf.mxu1 }
 0x907   :  { %11174 = vst [vmem:[#allocation16_spill] sm:$0xff] %v10391_v50  ;;  %v4239_v53 = vadd.f32 %v4238_v55, %v2760_v61  ;;  %v10394_v3 = vadd.f32 %v10323_v1, %v4237_v18 }
 0x908   :  { %v4240_v33 = vpop.f32.mrf.mxu1 }
 0x909   :  { %11175 = vst [vmem:[#allocation17_spill] sm:$0xff] %v10394_v3  ;;  %v4241_v51 = vadd.f32 %v4240_v33, %v2764_v63  ;;  %v10397_v20 = vadd.f32 %v10337_v14, %v4239_v53  ;;  %v7834_v53 = vpop.f32.mrf.mxu0 }
 0x90a   :  { %v4244_v27 = vpop.f32.mrf.mxu1 }
 0x90b   :  { %11176 = vst [vmem:[#allocation22_spill] sm:$0xff] %v10397_v20  ;;  %v4245_v58 = vadd.f32 %v4244_v27, %v2760_v61  ;;  %v10400_v32 = vadd.f32 %v10350_v2, %v4241_v51  ;;  %v7835_v11 = vpop.f32.mrf.mxu0  ;;  %v10411_v27 = vld [vmem:[%s10149_s21 + $0x8] ss:$0 sm:$0xff] }
 0x90c   :  { %v4246_v5 = vpop.f32.mrf.mxu1  ;;  %v7836_v2 = vadd.f32 %v7835_v11, %v7834_v53  ;;  %v4349_v51 = vadd.f32 %v7833_v21, %v10411_v27  ;;  %v11121_v11 = vmov 65535  }
 0x90d   :  { %11177 = vst [vmem:[#allocation19_spill] sm:$0xff] %v10400_v32  ;;  %v4247_v60 = vadd.f32 %v4246_v5, %v2764_v63  ;;  %v10402_v49 = vadd.f32 %v4297_v42, %v4245_v58  ;;  %v4821_v21 = vsel %vm914_vm2, 4294967295, %v11121_v11 }
 0x90e   :  { %v4248_v40 = vpop.f32.mrf.mxu1 }
 0x90f   :  { %11178 = vst [vmem:[#allocation28_spill] sm:$0xff] %v10402_v49  ;;  %v4249_v55 = vadd.f32 %v4248_v40, %v2760_v61  ;;  %v10404_v4 = vadd.f32 %v4299_v6, %v4247_v60  ;;  %v4341_v61 = vadd.f32 %v7827_v22, %v10411_v27  ;;  %v4822_v60 = vsel %vm4820_vm5, %v4821_v21, 0  ;;  %v8589_v22 = vld [vmem:[%s7320_s25 + $0x4] ss:$12 sps:$4 sm:$0x1f]  }
 0x910   :  { %v4250_v1 = vpop.f32.mrf.mxu1  ;;  %v8591_v40 = vld [vmem:[%s7320_s25] ss:$12 sps:$4 sm:$0x1f]  }
 0x911   :  { %11179 = vst [vmem:[#allocation29_spill] sm:$0xff] %v10404_v4  ;;  %v4251_v18 = vadd.f32 %v4250_v1, %v2764_v63  ;;  %v10406_v33 = vadd.f32 %v4301_v30, %v4249_v55  ;;  %v4352_v30 = vadd.f32 %v7836_v2, %v10411_v27  ;;  %v10427_v55 = vand.u32 %v8589_v22, %v4822_v60  ;;  %v8592_v1 = vld [vmem:[%s7320_s25 + $0x8] ss:$12 sps:$4 sm:$0x1f]  }
 0x912   :  { %v10432_v53 = vand.u32 %v8592_v1, %v4822_v60 }
 0x913   :  { %11180 = vst [vmem:[#allocation30_spill] sm:$0xff] %v10406_v33  ;;  %v10408_v14 = vadd.f32 %v4303_v41, %v4251_v18  ;;  %v10429_v18 = vand.u32 %v8591_v40, %v4822_v60  ;;  %4846 = vmatprep.subr.bf16.mxu0 %v10427_v55 }
 0x914   :  { %8126 = vmatpush3.bf16.msra.mxu1 %v10432_v53 }
 0x915   :  { %11181 = vst [vmem:[#allocation31_spill] sm:$0xff] %v10408_v14  ;;  %4847 = vmatpush1.bf16.msra.mxu0 %v10429_v18  ;;  %8131 = vmatprep.subr.bf16.mxu1 %v11166_v25 }
 0x916   :  { %4942 = vmatprep.subr.bf16.mxu0 %v10427_v55 }
 0x922   :  { %v8083_v5 = vpop.f32.mrf.mxu1 }
 0x923   :  { %v10414_v42 = vadd.f32 %v8083_v5, %v4349_v51 }
 0x924   :  { %v4389_v6 = vpop.f32.mrf.mxu1 }
 0x925   :  { %11182 = vst [vmem:[#allocation32_spill] sm:$0xff] %v10414_v42  ;;  %v10417_v58 = vadd.f32 %v4389_v6, %v4341_v61 }
 0x926   :  { %v8084_v63 = vpop.f32.mrf.mxu1 }
 0x927   :  { %11183 = vst [vmem:[#allocation33_spill] sm:$0xff] %v10417_v58  ;;  %v10420_v41 = vadd.f32 %v8084_v63, %v4352_v30 }
 0x928   :  { %v10438_v2 = vpop.f32.mrf.mxu1 }
 0x929   :  { %11184 = vst [vmem:[#allocation34_spill] sm:$0xff] %v10420_v41  ;;  %11185 = vst [vmem:[#allocation35_spill] sm:$0xff] %v10438_v2 }
 0x98e   :  { %v7863_v30 = vpop.f32.mrf.mxu0 }
 0x98f   :  { %v4684_v51 = vpop.f32.mrf.mxu1 }
 0x990   :  { %v7864_v63 = vpop.f32.mrf.mxu0 }
 0x991   :  { %v8103_v5 = vpop.f32.mrf.mxu1  ;;  %v7865_v40 = vadd.f32 %v7864_v63, %v7863_v30 }
 0x992   :  { %v7866_v21 = vpop.f32.mrf.mxu0 }
 0x993   :  { %v4687_v61 = vpop.f32.mrf.mxu1  ;;  %v4685_v32 = vadd.f32 %v7865_v40, %v4684_v51  ;;  %v8910_v40 = vld [vmem:[%s10049_s18 + $0x38] sm:$0xff]  }
 0x994   :  { %v7867_v22 = vpop.f32.mrf.mxu0 }
 0x995   :  { %v8104_v6 = vpop.f32.mrf.mxu1  ;;  %v7868_v41 = vadd.f32 %v7867_v22, %v7866_v21 }
 0x997   :  { %v4688_v6 = vadd.f32 %v7868_v41, %v4687_v61 }
 0x9ae   :  { %v7894_v60 = vpop.f32.mrf.mxu0 }
 0x9af   :  { %v4775_v1 = vpop.f32.mrf.mxu1 }
 0x9b0   :  { %v7895_v11 = vpop.f32.mrf.mxu0 }
 0x9b1   :  { %v7896_v28 = vadd.f32 %v7895_v11, %v7894_v60  ;;  %v8123_v10 = vpop.f32.mrf.mxu1  ;;  %v11191_v60 = vpack.c.bf16 %v10312_v46, %v10295_v15  ;;  %v11199_v15 = vld [vmem:[#allocation33_spill] sm:$0xff] }
 0x9b2   :  { %v7897_v14 = vpop.f32.mrf.mxu0 }
 0x9b3   :  { %v4776_v33 = vadd.f32 %v7896_v28, %v4775_v1  ;;  %v4778_v20 = vpop.f32.mrf.mxu1  ;;  %v11192_v1 = vpack.c.bf16 %v10332_v54, %v10321_v45  ;;  %v11200_v45 = vld [vmem:[#allocation28_spill] sm:$0xff] }
 0x9b4   :  { %v7898_v4 = vpop.f32.mrf.mxu0  ;;  %v11201_v54 = vld [vmem:[#allocation32_spill] sm:$0xff] }
 0x9b5   :  { %v4782_v3 = vmax.f32 %v4685_v32, %v4776_v33  ;;  %v7899_v5 = vadd.f32 %v7898_v4, %v7897_v14  ;;  %v8124_v2 = vpop.f32.mrf.mxu1 }
 0x9b6   :  { %v11187_v2 = vpack.c.bf16 %v10305_v47, %v10284_v57  ;;  %v11188_v57 = vld [vmem:[#allocation25_spill] sm:$0xff]  ;;  %v11189_v47 = vld [vmem:[#allocation24_spill] sm:$0xff] }
 0x9b7   :  { %v4784_v42 = vsub.f32 %v4685_v32, %v4782_v3  ;;  %v4790_v49 = vsub.f32 %v4776_v33, %v4782_v3  ;;  %v4779_v58 = vadd.f32 %v7899_v5, %v4778_v20  ;;  %v11190_v61 = vpack.c.bf16 %v11188_v57, %v11189_v47 }
 0x9b9   :  { %v4786_v50 = vmul.f32 1.442695, %v4784_v42  ;;  %v4792_v56 = vmul.f32 1.442695, %v4790_v49  ;;  %v4783_v30 = vmax.f32 %v4688_v6, %v4779_v58  ;;  %v11186_v42 = vld [vmem:[#allocation15_spill] sm:$0xff] }
 0x9bb   :  { %8869 = vpow2.f32 %v4786_v50  ;;  %v4785_v63 = vsub.f32 %v4688_v6, %v4783_v30  ;;  %v4791_v11 = vsub.f32 %v4779_v58, %v4783_v30 }
 0x9bc   :  { %8871 = vpow2.f32 %v4792_v56 }
 0x9bd   :  { %v4788_v10 = vmul.f32 1.442695, %v4785_v63  ;;  %v4794_v51 = vmul.f32 1.442695, %v4791_v11  ;;  %v11205_v11 = vld [vmem:[#allocation22_spill] sm:$0xff] }
 0x9bf   :  { %8873 = vpow2.f32 %v4788_v10 }
 0x9c0   :  { %8875 = vpow2.f32 %v4794_v51 }
 0x9c8   :  { %v8870_v28 = vpop.eup %8869 }
 0x9c9   :  { %v8872_v21 = vpop.eup %8871 }
 0x9ca   :  { %v4796_v22 = vadd.f32 %v8872_v21, %v8870_v28 }
 0x9cc   :  { %v8874_v4 = vpop.eup %8873  ;;  %8877 = vrcp.f32 %v4796_v22 }
 0x9cd   :  { %v8876_v14 = vpop.eup %8875 }
 0x9ce   :  { %v4797_v32 = vadd.f32 %v8876_v14, %v8874_v4 }
 0x9d0   :  { %8879 = vrcp.f32 %v4797_v32  ;;  %v11207_v32 = vld [vmem:[#allocation34_spill] sm:$0xff] }
 0x9d9   :  { %v8878_v3 = vpop.eup %8877 }
 0x9da   :  { %v4800_v49 = vmul.f32 %v8878_v3, %v8870_v28  ;;  %v4922_v58 = vmul.f32 %v8878_v3, %v8872_v21 }
 0x9dd   :  { %v8880_v20 = vpop.eup %8879 }
 0x9de   :  { %v4801_v33 = vmul.f32 %v8880_v20, %v8874_v4  ;;  %v4923_v56 = vmul.f32 %v8880_v20, %v8876_v14  ;;  %v11206_v4 = vld [vmem:[#allocation30_spill] sm:$0xff] }
 0x9e0   :  { %v4802_v50 = vpack.c.bf16 %v4801_v33, %v4800_v49  ;;  %v4924_v41 = vpack.c.bf16 %v4923_v56, %v4922_v58  ;;  %v11208_v33 = vld [vmem:[#allocation19_spill] sm:$0xff] }
 0x9e1   :  { %v11209_v58 = vld [vmem:[#allocation31_spill] sm:$0xff] }
 0x9e2   :  { %7625 = vmatmul.mubr.msk.bf16.vlgmr.msra.gmra.mxu0 %vm4816_vm6, %v4802_v50  ;;  %8128 = vmatmul.mubr.msk.bf16.vlgmr.msra.gmra.mxu1 %vm4816_vm6, %v4802_v50 }
 0x9e3   :  { %4943 = vmatpush1.bf16.msra.mxu0 %v10429_v18  ;;  %8132 = vmatpush3.bf16.msra.mxu1 %v10432_v53 }
 0x9e4   :  { %4960 = vmatprep.mubr.bf16.mxu0 %v11171_v19  ;;  %8133 = vmatprep.mubr.msk.bf16.mxu1 %vm8924_vm1, %v11166_v25 }
 0x9e5   :  { %7913 = vmatprep.subr.bf16.mxu0 %v11186_v42  ;;  %8137 = vmatprep.subr.bf16.mxu1 %v11166_v25 }
 0x9ea   :  { %7627 = vmatmul.mubr.msk.bf16.vlgmr.msra.gmra.mxu0 %vm4816_vm6, %v4924_v41  ;;  %8134 = vmatmul.mubr.msk.bf16.vlgmr.msra.gmra.mxu1 %vm4816_vm6, %v4924_v41 }
 0x9eb   :  { %7914 = vmatpush3.bf16.msra.mxu0 %v10061_v52  ;;  %8138 = vmatpush3.bf16.msra.mxu1 %v10159_v9  ;;  %v8909_v52 = vld [vmem:[%s10049_s18 + $0x78] sm:$0xff]  }
 0x9ec   :  { %5065 = vmatprep.mubr.bf16.mxu0 %v11187_v2  ;;  %7915 = vmatprep.subr.bf16.mxu0 %v10068_v16 }
 0x9ed   :  { %8139 = vmatprep.subr.bf16.mxu1 %v11166_v25  ;;  %8153 = vmatprep.mubr.msk.bf16.mxu1 %vm8924_vm1, %v11166_v25 }
 0x9ef   :  { %7916 = vmatpush3.bf16.msra.mxu0 %v10071_v37  ;;  %8140 = vmatpush3.bf16.msra.mxu1 %v10175_v29 }
 0x9f0   :  { %7917 = vmatprep.subr.bf16.mxu0 %v10079_v36  ;;  %8141 = vmatprep.subr.bf16.mxu1 %v11166_v25 }
 0x9f3   :  { %7918 = vmatpush3.bf16.msra.mxu0 %v10082_v23  ;;  %8142 = vmatpush3.bf16.msra.mxu1 %v10193_v12 }
 0x9f4   :  { %7919 = vmatprep.subr.bf16.mxu0 %v10088_v7  ;;  %8143 = vmatprep.subr.bf16.mxu1 %v11166_v25 }
 0x9f7   :  { %7920 = vmatpush3.bf16.msra.mxu0 %v10092_v0  ;;  %8144 = vmatpush3.bf16.msra.mxu1 %v10204_v26 }
 0x9f8   :  { %7921 = vmatprep.subr.bf16.mxu0 %v10095_v38  ;;  %8145 = vmatprep.subr.bf16.mxu1 %v11166_v25 }
 0x9fb   :  { %7922 = vmatpush3.bf16.msra.mxu0 %v10100_v8  ;;  %8146 = vmatpush3.bf16.msra.mxu1 %v10213_v43 }
 0x9fc   :  { %7923 = vmatprep.subr.bf16.mxu0 %v10105_v39  ;;  %8147 = vmatprep.subr.bf16.mxu1 %v11166_v25 }
 0x9ff   :  { %7924 = vmatpush3.bf16.msra.mxu0 %v10112_v62  ;;  %8148 = vmatpush3.bf16.msra.mxu1 %v10220_v24 }
 0xa00   :  { %7925 = vmatprep.subr.bf16.mxu0 %v10118_v48  ;;  %8149 = vmatprep.subr.bf16.mxu1 %v11166_v25 }
 0xa03   :  { %7926 = vmatpush3.bf16.msra.mxu0 %v10122_v59  ;;  %8150 = vmatpush3.bf16.msra.mxu1 %v11167_v17 }
 0xa04   :  { %7927 = vmatprep.subr.bf16.mxu0 %v11168_v44  ;;  %8151 = vmatprep.subr.bf16.mxu1 %v11166_v25 }
 0xa07   :  { %7928 = vmatpush3.bf16.msra.mxu0 %v11169_v13  ;;  %8152 = vmatpush3.bf16.msra.mxu1 %v11170_v35 }
 0xa08   :  { %7944 = vmatprep.subr.bf16.mxu0 %v8909_v52  ;;  %8157 = vmatprep.subr.bf16.mxu1 %v11166_v25 }
 0xa0a   :  { %5066 = vmatmul.mubr.bf16.vlgmr.msra.gmra.mxu0 %v11190_v61  ;;  %8154 = vmatmul.mubr.bf16.vlgmr.msra.gmra.mxu1 %v11191_v60 }
 0xa0b   :  { %7945 = vmatpush3.bf16.msra.mxu0 %v8910_v40  ;;  %5156 = vmatprep.mubr.bf16.mxu0 %v11192_v1 }
 0xa0c   :  { %8158 = vmatpush3.bf16.msra.mxu1 %v10159_v9  ;;  %7946 = vmatprep.subr.bf16.mxu0 %v10068_v16  ;;  %v11193_v16 = vld [vmem:[#allocation27_spill] sm:$0xff]  ;;  %v11197_v9 = vld [vmem:[#allocation21_spill] sm:$0xff] }
 0xa0d   :  { %8159 = vmatprep.subr.bf16.mxu1 %v11166_v25  ;;  %8173 = vmatprep.mubr.msk.bf16.mxu1 %vm8924_vm1, %v11166_v25 }
 0xa0f   :  { %7947 = vmatpush3.bf16.msra.mxu0 %v10071_v37  ;;  %v11194_v37 = vld [vmem:[#allocation26_spill] sm:$0xff] }
 0xa10   :  { %8160 = vmatpush3.bf16.msra.mxu1 %v10175_v29  ;;  %7948 = vmatprep.subr.bf16.mxu0 %v10079_v36  ;;  %v11195_v36 = vpack.c.bf16 %v11193_v16, %v11194_v37  ;;  %v4344_v29 = vadd.f32 %v11197_v9, %v10411_v27  ;;  %v11204_v27 = vld [vmem:[#allocation29_spill] sm:$0xff] }
 0xa11   :  { %8161 = vmatprep.subr.bf16.mxu1 %v11166_v25 }
 0xa13   :  { %7949 = vmatpush3.bf16.msra.mxu0 %v10082_v23  ;;  %v11196_v23 = vpack.c.bf16 %v10340_v34, %v10327_v31 }
 0xa14   :  { %8162 = vmatpush3.bf16.msra.mxu1 %v10193_v12  ;;  %7950 = vmatprep.subr.bf16.mxu0 %v10088_v7 }
 0xa15   :  { %8163 = vmatprep.subr.bf16.mxu1 %v11166_v25 }
 0xa17   :  { %7951 = vmatpush3.bf16.msra.mxu0 %v10092_v0 }
 0xa18   :  { %8164 = vmatpush3.bf16.msra.mxu1 %v10204_v26  ;;  %7952 = vmatprep.subr.bf16.mxu0 %v10095_v38 }
 0xa19   :  { %8165 = vmatprep.subr.bf16.mxu1 %v11166_v25 }
 0xa1b   :  { %7953 = vmatpush3.bf16.msra.mxu0 %v10100_v8 }
 0xa1c   :  { %8166 = vmatpush3.bf16.msra.mxu1 %v10213_v43  ;;  %7954 = vmatprep.subr.bf16.mxu0 %v10105_v39  ;;  %v11198_v43 = vld [vmem:[#allocation16_spill] sm:$0xff] }
 0xa1d   :  { %8167 = vmatprep.subr.bf16.mxu1 %v11166_v25 }
 0xa1f   :  { %7955 = vmatpush3.bf16.msra.mxu0 %v10112_v62 }
 0xa20   :  { %8168 = vmatpush3.bf16.msra.mxu1 %v10220_v24  ;;  %7956 = vmatprep.subr.bf16.mxu0 %v10118_v48 }
 0xa21   :  { %8169 = vmatprep.subr.bf16.mxu1 %v11166_v25 }
 0xa23   :  { %7957 = vmatpush3.bf16.msra.mxu0 %v10122_v59 }
 0xa24   :  { %8170 = vmatpush3.bf16.msra.mxu1 %v11167_v17  ;;  %7958 = vmatprep.subr.bf16.mxu0 %v11168_v44  ;;  %v11202_v17 = vld [vmem:[#allocation35_spill] sm:$0xff] }
 0xa25   :  { %8171 = vmatprep.subr.bf16.mxu1 %v11166_v25  ;;  %v10556_v44 = vadd.f32 %v11202_v17, %v4344_v29 }
 0xa27   :  { %7959 = vmatpush3.bf16.msra.mxu0 %v11169_v13 }
 0xa28   :  { %8172 = vmatpush3.bf16.msra.mxu1 %v11170_v35  ;;  %5244 = vmatprep.subr.bf16.mxu0 %v10427_v55 }
 0xa29   :  { %8177 = vmatprep.subr.bf16.mxu1 %v11166_v25 }
 0xa2a   :  { %5157 = vmatmul.mubr.bf16.vlgmr.msra.gmra.mxu0 %v11195_v36 }
 0xa2b   :  { %8174 = vmatmul.mubr.bf16.vlgmr.msra.gmra.mxu1 %v11196_v23  ;;  %5245 = vmatpush1.bf16.msra.mxu0 %v10429_v18 }
 0xa2c   :  { %8178 = vmatpush3.bf16.msra.mxu1 %v10432_v53  ;;  %5262 = vmatprep.mubr.bf16.mxu0 %v11171_v19 }
 0xa2d   :  { %8179 = vmatprep.mubr.msk.bf16.mxu1 %vm8924_vm1, %v11166_v25  ;;  %5340 = vmatprep.subr.bf16.mxu0 %v10427_v55  ;;  %v11203_v55 = vld [vmem:[#allocation17_spill] sm:$0xff] }
 0xa2e   :  { %8183 = vmatprep.subr.bf16.mxu1 %v11166_v25 }
 0xaa2   :  { %v4866_v7 = vpop.f32.mrf.mxu0  ;;  %v4909_v0 = vpop.f32.mrf.mxu1 }
 0xaa3   :  { %v4916_v24 = vmul.f32 %v4866_v7, %v11198_v43  ;;  %v4918_v46 = vmul.f32 %v4909_v0, %v11199_v15 }
 0xaa4   :  { %v4868_v38 = vpop.f32.mrf.mxu0  ;;  %v8129_v8 = vpop.f32.mrf.mxu1 }
 0xaa5   :  { %v4917_v5 = vmul.f32 %v4868_v38, %v11203_v55 }
 0xaa6   :  { %v4870_v39 = vpop.f32.mrf.mxu0  ;;  %v4912_v62 = vpop.f32.mrf.mxu1 }
 0xaa7   :  { %v4919_v10 = vmul.f32 %v4870_v39, %v11205_v11  ;;  %v4921_v21 = vmul.f32 %v4912_v62, %v10556_v44 }
 0xaa8   :  { %v4872_v48 = vpop.f32.mrf.mxu0  ;;  %v8130_v59 = vpop.f32.mrf.mxu1 }
 0xaa9   :  { %v4920_v50 = vmul.f32 %v4872_v48, %v11208_v33 }
 0xaaa   :  { %v4962_v12 = vpop.f32.mrf.mxu0  ;;  %v5005_v26 = vpop.f32.mrf.mxu1 }
 0xaab   :  { %v5012_v31 = vmul.f32 %v4962_v12, %v11200_v45  ;;  %v5014_v34 = vmul.f32 %v5005_v26, %v11201_v54 }
 0xaac   :  { %v4964_v13 = vpop.f32.mrf.mxu0  ;;  %v8135_v35 = vpop.f32.mrf.mxu1 }
 0xaad   :  { %v5018_v6 = vadd.f32 %v5012_v31, %v4916_v24  ;;  %v5020_v30 = vadd.f32 %v5014_v34, %v4918_v46  ;;  %v5013_v63 = vmul.f32 %v4964_v13, %v11204_v27 }
 0xaae   :  { %v4966_v51 = vpop.f32.mrf.mxu0  ;;  %v5008_v28 = vpop.f32.mrf.mxu1 }
 0xaaf   :  { %v5019_v22 = vadd.f32 %v5013_v63, %v4917_v5  ;;  %v5015_v14 = vmul.f32 %v4966_v51, %v11206_v4  ;;  %v5017_v3 = vmul.f32 %v5008_v28, %v11207_v32 }
 0xab0   :  { %v4968_v20 = vpop.f32.mrf.mxu0  ;;  %v8136_v49 = vpop.f32.mrf.mxu1 }
 0xab1   :  { %v5021_v56 = vadd.f32 %v5015_v14, %v4919_v10  ;;  %v5023_v42 = vadd.f32 %v5017_v3, %v4921_v21  ;;  %v5016_v41 = vmul.f32 %v4968_v20, %v11209_v58 }
 0xab3   :  { %v10566_v2 = vpack.c.bf16 %v5021_v56, %v5018_v6  ;;  %v10568_v52 = vpack.c.bf16 %v5023_v42, %v5020_v30  ;;  %v5022_v57 = vadd.f32 %v5016_v41, %v4920_v50 }
 0xab5   :  { %v10570_v47 = vpack.c.bf16 %v5022_v57, %v5019_v22 }
 0xaca   :  { %v5108_v61 = vpop.f32.mrf.mxu1  ;;  %v7929_v16 = vpop.f32.mrf.mxu0 }
 0xacc   :  { %v8155_v60 = vpop.f32.mrf.mxu1  ;;  %v7930_v37 = vpop.f32.mrf.mxu0 }
 0xacd   :  { %v7931_v0 = vadd.f32 %v7930_v37, %v7929_v16  ;;  %v8598_v60 = vld [vmem:[%s10547_s29 + $0x22c] ss:$12 sps:$4 sm:$0xff]   ;;  %v8593_v16 = vld [vmem:[%s10547_s29 + $0xa8] ss:$12 sps:$4 sm:$0xff]  }
 0xace   :  { %v5111_v40 = vpop.f32.mrf.mxu1  ;;  %v7932_v36 = vpop.f32.mrf.mxu0  ;;  %v8596_v37 = vld [vmem:[%s10547_s29 + $0x228] ss:$12 sps:$4 sm:$0xff]  }
 0xacf   :  { %v5109_v59 = vadd.f32 %v7931_v0, %v5108_v61  ;;  %v8595_v61 = vld [vmem:[%s10547_s29 + $0xac] ss:$12 sps:$4 sm:$0xff]   ;;  %v8610_v0 = vld [vmem:[%s10547_s29 + $0x1fc] ss:$12 sps:$4 sm:$0xff]  }
 0xad0   :  { %v8156_v1 = vpop.f32.mrf.mxu1  ;;  %v7933_v23 = vpop.f32.mrf.mxu0 }
 0xad1   :  { %v7934_v9 = vadd.f32 %v7933_v23, %v7932_v36  ;;  %v8601_v23 = vld [vmem:[%s10547_s29 + $0x94] ss:$12 sps:$4 sm:$0xff]  }
 0xad3   :  { %v5112_v34 = vadd.f32 %v7934_v9, %v5111_v40  ;;  %v8619_v9 = vld [vmem:[%s10547_s29 + $0x4c] ss:$12 sps:$4 sm:$0xff]  }
 0xaea   :  { %v7960_v7 = vpop.f32.mrf.mxu0 }
 0xaeb   :  { %v5199_v38 = vpop.f32.mrf.mxu1 }
 0xaec   :  { %v7961_v8 = vpop.f32.mrf.mxu0 }
 0xaed   :  { %v7962_v39 = vadd.f32 %v7961_v8, %v7960_v7  ;;  %v8175_v62 = vpop.f32.mrf.mxu1  ;;  %v8607_v7 = vld [vmem:[%s10547_s29 + $0x7c] ss:$12 sps:$4 sm:$0xff]   ;;  %v8608_v8 = vld [vmem:[%s10547_s29 + $0x1f8] ss:$12 sps:$4 sm:$0xff]  }
 0xaee   :  { %v7963_v48 = vpop.f32.mrf.mxu0  ;;  %v8616_v62 = vld [vmem:[%s10547_s29 + $0x1e4] ss:$12 sps:$4 sm:$0xff]  }
 0xaef   :  { %v5200_v29 = vadd.f32 %v7962_v39, %v5199_v38  ;;  %v5202_v12 = vpop.f32.mrf.mxu1  ;;  %v8605_v38 = vld [vmem:[%s10547_s29 + $0x78] ss:$12 sps:$4 sm:$0xff]  }
 0xaf0   :  { %v7964_v26 = vpop.f32.mrf.mxu0  ;;  %v8613_v39 = vld [vmem:[%s10547_s29 + $0x64] ss:$12 sps:$4 sm:$0xff]  }
 0xaf1   :  { %v5206_v24 = vmax.f32 %v5109_v59, %v5200_v29  ;;  %v7965_v46 = vadd.f32 %v7964_v26, %v7963_v48  ;;  %v8176_v31 = vpop.f32.mrf.mxu1  ;;  %v8611_v48 = vld [vmem:[%s10547_s29 + $0x60] ss:$12 sps:$4 sm:$0xff]   ;;  %v8620_v26 = vld [vmem:[%s10547_s29 + $0x1c8] ss:$12 sps:$4 sm:$0xff]  }
 0xaf2   :  { %v8623_v31 = vld [vmem:[%s10547_s29 + $0x30] ss:$12 sps:$4 sm:$0xff]  }
 0xaf3   :  { %v5208_v17 = vsub.f32 %v5109_v59, %v5206_v24  ;;  %v5214_v13 = vsub.f32 %v5200_v29, %v5206_v24  ;;  %v5203_v35 = vadd.f32 %v7965_v46, %v5202_v12  ;;  %v8614_v59 = vld [vmem:[%s10547_s29 + $0x1e0] ss:$12 sps:$4 sm:$0xff]   ;;  %v8617_v12 = vld [vmem:[%s10547_s29 + $0x48] ss:$12 sps:$4 sm:$0xff]  }
 0xaf4   :  { %v8622_v29 = vld [vmem:[%s10547_s29 + $0x1cc] ss:$12 sps:$4 sm:$0xff]   ;;  %v8625_v24 = vld [vmem:[%s10547_s29 + $0x34] ss:$12 sps:$4 sm:$0xff]  }
 0xaf5   :  { %v5210_v5 = vmul.f32 1.442695, %v5208_v17  ;;  %v5216_v6 = vmul.f32 1.442695, %v5214_v13  ;;  %v5207_v30 = vmax.f32 %v5112_v34, %v5203_v35  ;;  %v8628_v46 = vld [vmem:[%s10547_s29 + $0x1b4] ss:$12 sps:$4 sm:$0xff]  }
 0xaf6   :  { %v8631_v17 = vld [vmem:[%s10547_s29 + $0x1c] ss:$12 sps:$4 sm:$0xff]  }
 0xaf7   :  { %8881 = vpow2.f32 %v5210_v5  ;;  %v5209_v63 = vsub.f32 %v5112_v34, %v5207_v30  ;;  %v5215_v10 = vsub.f32 %v5203_v35, %v5207_v30  ;;  %v8626_v34 = vld [vmem:[%s10547_s29 + $0x1b0] ss:$12 sps:$4 sm:$0xff]   ;;  %v8629_v35 = vld [vmem:[%s10547_s29 + $0x18] ss:$12 sps:$4 sm:$0xff]  }
 0xaf8   :  { %8883 = vpow2.f32 %v5216_v6  ;;  %v8634_v13 = vld [vmem:[%s10547_s29 + $0x19c] ss:$12 sps:$4 sm:$0xff]   ;;  %v8632_v5 = vld [vmem:[%s10547_s29 + $0x198] ss:$12 sps:$4 sm:$0xff]  }
 0xaf9   :  { %v5212_v51 = vmul.f32 1.442695, %v5209_v63  ;;  %v5218_v28 = vmul.f32 1.442695, %v5215_v10  ;;  %v8637_v6 = vld [vmem:[%s10547_s29 + $0x4] ss:$12 sps:$4 sm:$0xff]  }
 0xafa   :  { %v8640_v30 = vld [vmem:[%s10547_s29 + $0x184] ss:$12 sps:$4 sm:$0xff]   ;;  %v8635_v63 = vld [vmem:[%s10547_s29] ss:$12 sps:$4 sm:$0xff]  }
 0xafb   :  { %8885 = vpow2.f32 %v5212_v51  ;;  %v8638_v10 = vld [vmem:[%s10547_s29 + $0x180] ss:$12 sps:$4 sm:$0xff]  }
 0xafc   :  { %8887 = vpow2.f32 %v5218_v28  ;;  %v8643_v51 = vld [vmem:[%s10547_s29 + $0x16c] ss:$12 sps:$4 sm:$0xff]   ;;  %v8665_v28 = vld [vmem:[%s10547_s29 + $0x170] ss:$12 sps:$4 sm:$0xff]  }
 0xb04   :  { %v8882_v21 = vpop.eup %8881 }
 0xb05   :  { %v8884_v22 = vpop.eup %8883 }
 0xb06   :  { %v5220_v14 = vadd.f32 %v8884_v22, %v8882_v21 }
 0xb08   :  { %v8886_v3 = vpop.eup %8885  ;;  %8889 = vrcp.f32 %v5220_v14  ;;  %v8646_v14 = vld [vmem:[%s10547_s29 + $0x154] ss:$12 sps:$4 sm:$0xff]  }
 0xb09   :  { %v8888_v20 = vpop.eup %8887 }
 0xb0a   :  { %v5221_v49 = vadd.f32 %v8888_v20, %v8886_v3 }
 0xb0c   :  { %8891 = vrcp.f32 %v5221_v49  ;;  %v8649_v49 = vld [vmem:[%s10547_s29 + $0x13c] ss:$12 sps:$4 sm:$0xff]  }
 0xb15   :  { %v8890_v50 = vpop.eup %8889 }
 0xb16   :  { %v5224_v42 = vmul.f32 %v8890_v50, %v8882_v21  ;;  %v5320_v1 = vmul.f32 %v8890_v50, %v8884_v22  ;;  %v8641_v21 = vld [vmem:[%s10547_s29 + $0x168] ss:$12 sps:$4 sm:$0xff]   ;;  %v8666_v22 = vld [vmem:[%s10547_s29 + $0xb0] ss:$12 sps:$4 sm:$0xff]   ;;  %v8647_v50 = vld [vmem:[%s10547_s29 + $0x138] ss:$12 sps:$4 sm:$0xff]  }
 0xb19   :  { %v8892_v56 = vpop.eup %8891 }
 0xb1a   :  { %v5225_v41 = vmul.f32 %v8892_v56, %v8886_v3  ;;  %v5321_v40 = vmul.f32 %v8892_v56, %v8888_v20  ;;  %v8668_v3 = vld [vmem:[%s10547_s29 + $0x158] ss:$12 sps:$4 sm:$0xff]   ;;  %v8644_v20 = vld [vmem:[%s10547_s29 + $0x150] ss:$12 sps:$4 sm:$0xff]  }
 0xb1b   :  { %v8652_v56 = vld [vmem:[%s10547_s29 + $0x124] ss:$12 sps:$4 sm:$0xff]  }
 0xb1c   :  { %v5226_v57 = vpack.c.bf16 %v5225_v41, %v5224_v42  ;;  %v5322_v36 = vpack.c.bf16 %v5321_v40, %v5320_v1  ;;  %v8650_v42 = vld [vmem:[%s10547_s29 + $0x120] ss:$12 sps:$4 sm:$0xff]   ;;  %v8661_v40 = vld [vmem:[%s10547_s29 + $0xdc] ss:$12 sps:$4 sm:$0xff]   ;;  %v8659_v1 = vld [vmem:[%s10547_s29 + $0xd8] ss:$12 sps:$4 sm:$0xff]  }
 0xb1d   :  { %v8655_v41 = vld [vmem:[%s10547_s29 + $0x10c] ss:$12 sps:$4 sm:$0xff]  }
 0xb1e   :  { %7629 = vmatmul.mubr.msk.bf16.vlgmr.msra.gmra.mxu0 %vm4816_vm6, %v5226_v57  ;;  %8180 = vmatmul.mubr.msk.bf16.vlgmr.msra.gmra.mxu1 %vm4816_vm6, %v5226_v57  ;;  %v8653_v57 = vld [vmem:[%s10547_s29 + $0x108] ss:$12 sps:$4 sm:$0xff]  }
 0xb1f   :  { %5341 = vmatpush1.bf16.msra.mxu0 %v10429_v18  ;;  %8184 = vmatpush3.bf16.msra.mxu1 %v10432_v53  ;;  %v8604_v18 = vld [vmem:[%s10547_s29 + $0x214] ss:$12 sps:$4 sm:$0xff]   ;;  %v8602_v53 = vld [vmem:[%s10547_s29 + $0x210] ss:$12 sps:$4 sm:$0xff]  }
 0xb20   :  { %5358 = vmatprep.mubr.bf16.mxu0 %v11171_v19  ;;  %8185 = vmatprep.mubr.msk.bf16.mxu1 %vm8924_vm1, %v11166_v25  ;;  %v8599_v25 = vld [vmem:[%s10547_s29 + $0x90] ss:$12 sps:$4 sm:$0xff]  }
 0xb21   :  { %5908 = vmatprep.subr.bf16.mxu0 %v8595_v61  ;;  %5961 = vmatprep.subr.bf16.mxu1 %v8598_v60  ;;  %v8658_v61 = vld [vmem:[%s10547_s29 + $0xf4] ss:$12 sps:$4 sm:$0xff]   ;;  %v8656_v60 = vld [vmem:[%s10547_s29 + $0xf0] ss:$12 sps:$4 sm:$0xff]  }
 0xb26   :  { %7631 = vmatmul.mubr.msk.bf16.vlgmr.msra.gmra.mxu0 %vm4816_vm6, %v5322_v36  ;;  %8186 = vmatmul.mubr.msk.bf16.vlgmr.msra.gmra.mxu1 %vm4816_vm6, %v5322_v36  ;;  %v8662_v36 = vld [vmem:[%s10547_s29 + $0xc0] ss:$12 sps:$4 sm:$0xff]  }
 0xb27   :  { %5909 = vmatpush1.bf16.msra.mxu0 %v8593_v16  ;;  %5962 = vmatpush1.bf16.msra.mxu1 %v8596_v37  ;;  %v8664_v16 = vld [vmem:[%s10547_s29 + $0xc4] ss:$12 sps:$4 sm:$0xff]  }
 0xb28   :  { %5940 = vmatprep.mubr.bf16.mxu0 %v10570_v47  ;;  %5910 = vmatprep.subr.bf16.mxu0 %v8601_v23  ;;  %v8669_v37 = vld [vmem:[%s10547_s29 + $0x98] ss:$12 sps:$4 sm:$0xff]   ;;  %v8667_v23 = vld [vmem:[%s10547_s29 + $0x230] ss:$12 sps:$4 sm:$0xff]  }
 0xb29   :  { %5963 = vmatprep.subr.bf16.mxu1 %v8604_v18  ;;  %5993 = vmatprep.mubr.bf16.mxu1 %v11171_v19  ;;  %v8671_v18 = vld [vmem:[%s10547_s29 + $0x140] ss:$12 sps:$4 sm:$0xff]  }
 0xb2b   :  { %5911 = vmatpush1.bf16.msra.mxu0 %v8599_v25  ;;  %5964 = vmatpush1.bf16.msra.mxu1 %v8602_v53  ;;  %v8672_v25 = vld [vmem:[%s10547_s29 + $0x80] ss:$12 sps:$4 sm:$0xff]   ;;  %v8670_v53 = vld [vmem:[%s10547_s29 + $0x218] ss:$12 sps:$4 sm:$0xff]  }
 0xb2c   :  { %5912 = vmatprep.subr.bf16.mxu0 %v8607_v7  ;;  %5965 = vmatprep.subr.bf16.mxu1 %v8610_v0  ;;  %v8674_v7 = vld [vmem:[%s10547_s29 + $0x128] ss:$12 sps:$4 sm:$0xff]  }
 0xb2d   :  { %v8675_v0 = vld [vmem:[%s10547_s29 + $0x68] ss:$12 sps:$4 sm:$0xff]  }
 0xb2f   :  { %5913 = vmatpush1.bf16.msra.mxu0 %v8605_v38  ;;  %5966 = vmatpush1.bf16.msra.mxu1 %v8608_v8  ;;  %v8673_v38 = vld [vmem:[%s10547_s29 + $0x200] ss:$12 sps:$4 sm:$0xff]   ;;  %v8677_v8 = vld [vmem:[%s10547_s29 + $0x110] ss:$12 sps:$4 sm:$0xff]  }
 0xb30   :  { %5914 = vmatprep.subr.bf16.mxu0 %v8613_v39  ;;  %5967 = vmatprep.subr.bf16.mxu1 %v8616_v62  ;;  %v8678_v39 = vld [vmem:[%s10547_s29 + $0x50] ss:$12 sps:$4 sm:$0xff]   ;;  %v8676_v62 = vld [vmem:[%s10547_s29 + $0x1e8] ss:$12 sps:$4 sm:$0xff]  }
 0xb33   :  { %5915 = vmatpush1.bf16.msra.mxu0 %v8611_v48  ;;  %5968 = vmatpush1.bf16.msra.mxu1 %v8614_v59  ;;  %v8680_v48 = vld [vmem:[%s10547_s29 + $0xf8] ss:$12 sps:$4 sm:$0xff]  }
 0xb34   :  { %5916 = vmatprep.subr.bf16.mxu0 %v8619_v9  ;;  %5969 = vmatprep.subr.bf16.mxu1 %v8622_v29  ;;  %v8681_v59 = vld [vmem:[%s10547_s29 + $0x38] ss:$12 sps:$4 sm:$0xff]   ;;  %v8679_v9 = vld [vmem:[%s10547_s29 + $0x1d0] ss:$12 sps:$4 sm:$0xff]   ;;  %v8683_v29 = vld [vmem:[%s10547_s29 + $0xe0] ss:$12 sps:$4 sm:$0xff]  }
 0xb37   :  { %5917 = vmatpush1.bf16.msra.mxu0 %v8617_v12  ;;  %5970 = vmatpush1.bf16.msra.mxu1 %v8620_v26  ;;  %v8684_v12 = vld [vmem:[%s10547_s29 + $0x20] ss:$12 sps:$4 sm:$0xff]   ;;  %v8682_v26 = vld [vmem:[%s10547_s29 + $0x1b8] ss:$12 sps:$4 sm:$0xff]  }
 0xb38   :  { %5918 = vmatprep.subr.bf16.mxu0 %v8625_v24  ;;  %5971 = vmatprep.subr.bf16.mxu1 %v8628_v46  ;;  %v8686_v24 = vld [vmem:[%s10547_s29 + $0xc8] ss:$12 sps:$4 sm:$0xff]  }
 0xb39   :  { %v8687_v46 = vld [vmem:[%s10547_s29 + $0x8] ss:$12 sps:$4 sm:$0xff]  }
 0xb3b   :  { %5919 = vmatpush1.bf16.msra.mxu0 %v8623_v31  ;;  %5972 = vmatpush1.bf16.msra.mxu1 %v8626_v34  ;;  %v8685_v31 = vld [vmem:[%s10547_s29 + $0x1a0] ss:$12 sps:$4 sm:$0xff]   ;;  %v8688_v34 = vld [vmem:[%s10547_s29 + $0x188] ss:$12 sps:$4 sm:$0xff]  }
 0xb3c   :  { %5920 = vmatprep.subr.bf16.mxu0 %v8631_v17  ;;  %5973 = vmatprep.subr.bf16.mxu1 %v8634_v13 }
 0xb3f   :  { %5921 = vmatpush1.bf16.msra.mxu0 %v8629_v35  ;;  %5974 = vmatpush1.bf16.msra.mxu1 %v8632_v5 }
 0xb40   :  { %5922 = vmatprep.subr.bf16.mxu0 %v8637_v6  ;;  %5975 = vmatprep.subr.bf16.mxu1 %v8640_v30 }
 0xb43   :  { %5923 = vmatpush1.bf16.msra.mxu0 %v8635_v63  ;;  %5976 = vmatpush1.bf16.msra.mxu1 %v8638_v10 }
 0xb44   :  { %5924 = vmatprep.subr.bf16.mxu0 %v8643_v51  ;;  %7979 = vmatprep.subr.bf16.mxu1 %v8665_v28 }
 0xb46   :  { %5994 = vmatmul.mubr.bf16.vlgmr.msra.gmra.mxu1 %v10568_v52 }
 0xb47   :  { %5925 = vmatpush2.bf16.msra.mxu0 %v8641_v21  ;;  %7980 = vmatpush3.bf16.msra.mxu1 %v8666_v22 }
 0xb48   :  { %5926 = vmatprep.subr.bf16.mxu0 %v8646_v14  ;;  %7981 = vmatprep.subr.bf16.mxu1 %v8668_v3 }
 0xb49   :  { %6003 = vmatprep.mubr.bf16.mxu1 %v11171_v19 }
 0xb4b   :  { %5927 = vmatpush2.bf16.msra.mxu0 %v8644_v20  ;;  %7982 = vmatpush3.bf16.msra.mxu1 %v8669_v37 }
 0xb4c   :  { %5928 = vmatprep.subr.bf16.mxu0 %v8649_v49  ;;  %7983 = vmatprep.subr.bf16.mxu1 %v8671_v18 }
 0xb4f   :  { %5929 = vmatpush2.bf16.msra.mxu0 %v8647_v50  ;;  %7984 = vmatpush3.bf16.msra.mxu1 %v8672_v25 }
 0xb50   :  { %5930 = vmatprep.subr.bf16.mxu0 %v8652_v56  ;;  %7985 = vmatprep.subr.bf16.mxu1 %v8674_v7 }
 0xb53   :  { %5931 = vmatpush2.bf16.msra.mxu0 %v8650_v42  ;;  %7986 = vmatpush3.bf16.msra.mxu1 %v8675_v0 }
 0xb54   :  { %5932 = vmatprep.subr.bf16.mxu0 %v8655_v41  ;;  %7987 = vmatprep.subr.bf16.mxu1 %v8677_v8 }
 0xb57   :  { %5933 = vmatpush2.bf16.msra.mxu0 %v8653_v57  ;;  %7988 = vmatpush3.bf16.msra.mxu1 %v8678_v39 }
 0xb58   :  { %5934 = vmatprep.subr.bf16.mxu0 %v8658_v61  ;;  %7989 = vmatprep.subr.bf16.mxu1 %v8680_v48 }
 0xb5b   :  { %5935 = vmatpush2.bf16.msra.mxu0 %v8656_v60  ;;  %7990 = vmatpush3.bf16.msra.mxu1 %v8681_v59 }
 0xb5c   :  { %5936 = vmatprep.subr.bf16.mxu0 %v8661_v40  ;;  %7991 = vmatprep.subr.bf16.mxu1 %v8683_v29 }
 0xb5f   :  { %5937 = vmatpush2.bf16.msra.mxu0 %v8659_v1  ;;  %7992 = vmatpush3.bf16.msra.mxu1 %v8684_v12  ;;  %v11210_v12 = vld [vmem:[#allocation5_spill] sm:$0xff] }
 0xb60   :  { %5938 = vmatprep.subr.bf16.mxu0 %v8664_v16  ;;  %7993 = vmatprep.subr.bf16.mxu1 %v8686_v24  ;;  %v11211_v24 = vld [vmem:[#allocation20_spill] sm:$0xff] }
 0xb63   :  { %5939 = vmatpush2.bf16.msra.mxu0 %v8662_v36  ;;  %7994 = vmatpush3.bf16.msra.mxu1 %v8687_v46 }
 0xb64   :  { %8189 = vmatprep.subr.bf16.mxu0 %v8667_v23 }
 0xb66   :  { %5941 = vmatmul.mubr.bf16.vlgmr.msra.gmra.mxu0 %v10566_v2 }
 0xb67   :  { %8190 = vmatpush3.bf16.msra.mxu0 %v8667_v23 }
 0xb68   :  { %8191 = vmatprep.subr.bf16.mxu0 %v8670_v53 }
 0xb6b   :  { %8192 = vmatpush3.bf16.msra.mxu0 %v8670_v53 }
 0xb6c   :  { %8193 = vmatprep.subr.bf16.mxu0 %v8673_v38 }
 0xb6f   :  { %8194 = vmatpush3.bf16.msra.mxu0 %v8673_v38 }
 0xb70   :  { %8195 = vmatprep.subr.bf16.mxu0 %v8676_v62 }
 0xb73   :  { %8196 = vmatpush3.bf16.msra.mxu0 %v8676_v62 }
 0xb74   :  { %8197 = vmatprep.subr.bf16.mxu0 %v8679_v9 }
 0xb77   :  { %8198 = vmatpush3.bf16.msra.mxu0 %v8679_v9  ;;  %v6124_v9 = vld [vmem:[%s7322_s3] sm:$0x7] }
 0xb78   :  { %8199 = vmatprep.subr.bf16.mxu0 %v8682_v26  ;;  %v6133_v46 = vrot.slane %v6124_v9, %v11211_v24 }
 0xb7b   :  { %8200 = vmatpush3.bf16.msra.mxu0 %v8682_v26 }
 0xb7c   :  { %8201 = vmatprep.subr.bf16.mxu0 %v8685_v31 }
 0xb7f   :  { %8202 = vmatpush3.bf16.msra.mxu0 %v8685_v31 }
 0xb80   :  { %8203 = vmatprep.subr.bf16.mxu0 %v8688_v34 }
 0xb83   :  { %8204 = vmatpush3.bf16.msra.mxu0 %v8688_v34 }
 0xbde   :  { %v5264_v17 = vpop.f32.mrf.mxu0  ;;  %v5307_v13 = vpop.f32.mrf.mxu1 }
 0xbdf   :  { %v5316_v3 = vmul.f32 %v5307_v13, %v11199_v15 }
 0xbe0   :  { %v5266_v35 = vpop.f32.mrf.mxu0  ;;  %v8181_v5 = vpop.f32.mrf.mxu1 }
 0xbe1   :  { %v5315_v57 = vmul.f32 %v5266_v35, %v11203_v55  ;;  %v11212_v35 = vld [vmem:[#allocation3_spill] sm:$0xff] }
 0xbe2   :  { %v5268_v6 = vpop.f32.mrf.mxu0  ;;  %v5310_v30 = vpop.f32.mrf.mxu1 }
 0xbe3   :  { %v5319_v50 = vmul.f32 %v5310_v30, %v10556_v44  ;;  %v5317_v61 = vmul.f32 %v5268_v6, %v11205_v11  ;;  %v11213_v6 = vld [vmem:[#allocation18_spill] sm:$0xff] }
 0xbe4   :  { %v5270_v63 = vpop.f32.mrf.mxu0  ;;  %v8182_v10 = vpop.f32.mrf.mxu1  ;;  %v6129_v30 = vrot.slane %v6124_v9, %v11213_v6 }
 0xbe5   :  { %v5318_v15 = vmul.f32 %v5270_v63, %v11208_v33 }
 0xbe6   :  { %v5360_v51 = vpop.f32.mrf.mxu0  ;;  %v5403_v28 = vpop.f32.mrf.mxu1 }
 0xbe7   :  { %v5412_v14 = vmul.f32 %v5403_v28, %v11201_v54  ;;  %v5410_v60 = vmul.f32 %v5360_v51, %v11200_v45 }
 0xbe8   :  { %v5362_v21 = vpop.f32.mrf.mxu0  ;;  %v8187_v22 = vpop.f32.mrf.mxu1 }
 0xbe9   :  { %v5411_v56 = vmul.f32 %v5362_v21, %v11204_v27  ;;  %v5418_v1 = vadd.f32 %v5412_v14, %v5316_v3  ;;  %v5314_v27 = vmul.f32 %v5264_v17, %v11198_v43  ;;  %v11214_v22 = vld [vmem:[#allocation4_spill] sm:$0xff] }
 0xbea   :  { %v5364_v20 = vpop.f32.mrf.mxu0  ;;  %v5406_v49 = vpop.f32.mrf.mxu1 }
 0xbeb   :  { %v5413_v42 = vmul.f32 %v5364_v20, %v11206_v4  ;;  %v5415_v41 = vmul.f32 %v5406_v49, %v11207_v32  ;;  %v5417_v4 = vadd.f32 %v5411_v56, %v5315_v57  ;;  %v5416_v23 = vadd.f32 %v5410_v60, %v5314_v27  ;;  %v11215_v49 = vld [vmem:[#allocation23_spill] sm:$0xff] }
 0xbec   :  { %v5366_v40 = vpop.f32.mrf.mxu0  ;;  %v8188_v54 = vpop.f32.mrf.mxu1 }
 0xbed   :  { %v5421_v16 = vadd.f32 %v5415_v41, %v5319_v50  ;;  %v5414_v44 = vmul.f32 %v5366_v40, %v11209_v58  ;;  %v5419_v37 = vadd.f32 %v5413_v42, %v5317_v61  ;;  %v6137_v50 = vrot.slane %v6124_v9, %v11215_v49  ;;  %v11216_v61 = vld [vmem:[#allocation2_spill] sm:$0xff]  ;;  %v11217_v40 = vld [vmem:[#allocation12_spill] sm:$0xff] }
 0xbef   :  { %v5523_v36 = vpack.c.bf16 %v5421_v16, %v5418_v1  ;;  %v5420_v32 = vadd.f32 %v5414_v44, %v5318_v15  ;;  %v5521_v11 = vpack.c.bf16 %v5419_v37, %v5416_v23  ;;  %v11218_v1 = vld [vmem:[#allocation8_spill] sm:$0xff] }
 0xbf1   :  { %6004 = vmatmul.mubr.bf16.gmra.mxu1 %v5523_v36  ;;  %v5522_v55 = vpack.c.bf16 %v5420_v32, %v5417_v4 }
 0xbf2   :  { %6046 = vmatprep.mubr.bf16.mxu1 %v10570_v47 }
 0xbf3   :  { %5950 = vmatprep.mubr.bf16.mxu0 %v5522_v55 }
 0xbf4   :  { %5951 = vmatmul.mubr.bf16.gmra.mxu0 %v5521_v11 }
 0xbf5   :  { %8205 = vmatprep.mubr.bf16.mxu0 %v10568_v52 }
 0xbf9   :  { %6047 = vmatmul.mubr.bf16.vlgmr.msra.gmra.mxu1 %v10566_v2 }
 0xbfa   :  { %6054 = vmatprep.mubr.bf16.mxu1 %v5522_v55  ;;  %v11219_v55 = vld [vmem:[#allocation11_spill] sm:$0xff] }
 0xbfc   :  { %8206 = vmatmul.mubr.bf16.vlgmr.msra.gmra.mxu0 %v5523_v36 }
 0xbfd   :  { %6698 = vmatprep.mubr.bf16.mxu0 %v11171_v19 }
 0xc01   :  { %6055 = vmatmul.mubr.bf16.gmra.mxu1 %v5521_v11 }
 0xc06   :  { %v5995_v43 = vpop.f32.mrf.mxu1 }
 0xc08   :  { %v5997_v33 = vpop.f32.mrf.mxu1 }
 0xc0a   :  { %v5999_v18 = vpop.f32.mrf.mxu1 }
 0xc0c   :  { %v6001_v53 = vpop.f32.mrf.mxu1 }
 0xc26   :  { %v5942_v45 = vpop.f32.mrf.mxu0 }
 0xc27   :  { %v5996_v48 = vadd.f32 %v5995_v43, %v5942_v45 }
 0xc28   :  { %v5944_v58 = vpop.f32.mrf.mxu0 }
 0xc29   :  { %v5998_v8 = vadd.f32 %v5997_v33, %v5944_v58  ;;  %v6112_v5 = vadd.f32 %v5996_v48, %v11212_v35  ;;  %v11220_v58 = vld [vmem:[#allocation9_spill] sm:$0xff] }
 0xc2a   :  { %v5946_v25 = vpop.f32.mrf.mxu0  ;;  %v11224_v35 = vld [vmem:[#allocation13_spill] sm:$0xff] }
 0xc2b   :  { %v6113_v26 = vadd.f32 %v5998_v8, %v11210_v12  ;;  %v6000_v63 = vadd.f32 %v5999_v18, %v5946_v25  ;;  %v10685_v57 = vadd.f32 %v6129_v30, %v6112_v5 }
 0xc2c   :  { %v5948_v52 = vpop.f32.mrf.mxu0 }
 0xc2d   :  { %v6002_v31 = vadd.f32 %v6001_v53, %v5948_v52  ;;  %v10681_v21 = vadd.f32 %v6133_v46, %v6113_v26  ;;  %v6115_v60 = vadd.f32 %v6000_v63, %v11216_v61  ;;  %v11221_v52 = vld [vmem:[#allocation7_spill] sm:$0xff]  ;;  %v8703_v61 = vld [vmem:[%s10731_s8 + $0x34] ss:$8 sps:$4 sm:$0xff]  }
 0xc2f   :  { %v6116_v14 = vadd.f32 %v6002_v31, %v11214_v22  ;;  %v6155_v23 = vadd.f32 %v10681_v21, %v10685_v57  ;;  %v10697_v33 = vadd.f32 %v6129_v30, %v6115_v60  ;;  %v8694_v22 = vld [vmem:[%s10731_s8 + $0x64] ss:$8 sps:$4 sm:$0xff]   ;;  %v8701_v60 = vld [vmem:[%s10731_s8 + $0x30] ss:$8 sps:$4 sm:$0xff]  }
 0xc31   :  { %v10690_v37 = vadd.f32 %v6133_v46, %v6116_v14  ;;  %v8692_v14 = vld [vmem:[%s10731_s8 + $0x60] ss:$8 sps:$4 sm:$0xff]  }
 0xcb1   :  { %v6005_v7 = vpop.f32.mrf.mxu1 }
 0xcb3   :  { %v6007_v2 = vpop.f32.mrf.mxu1 }
 0xcb4   :  { %v5952_v47 = vpop.f32.mrf.mxu0 }
 0xcb5   :  { %v6009_v0 = vpop.f32.mrf.mxu1  ;;  %v6006_v56 = vadd.f32 %v6005_v7, %v5952_v47 }
 0xcb6   :  { %v5954_v38 = vpop.f32.mrf.mxu0 }
 0xcb7   :  { %v6011_v39 = vpop.f32.mrf.mxu1  ;;  %v6008_v51 = vadd.f32 %v6007_v2, %v5954_v38  ;;  %v6118_v11 = vadd.f32 %v6006_v56, %v11219_v55  ;;  %v8713_v56 = vld [vmem:[%s10731_s8 + $0x170] ss:$8 sps:$4 sm:$0xff]  }
 0xcb8   :  { %v5956_v62 = vpop.f32.mrf.mxu0 }
 0xcb9   :  { %v7995_v59 = vpop.f32.mrf.mxu1  ;;  %v6119_v16 = vadd.f32 %v6008_v51, %v11218_v1  ;;  %v6010_v43 = vadd.f32 %v6009_v0, %v5956_v62  ;;  %v6159_v0 = vadd.f32 %v10690_v37, %v10697_v33  ;;  %v11222_v62 = vld [vmem:[#allocation10_spill] sm:$0xff]  ;;  %v8707_v1 = vld [vmem:[%s10731_s8 + $0x10] ss:$8 sps:$4 sm:$0xff]  }
 0xcba   :  { %v5958_v29 = vpop.f32.mrf.mxu0 }
 0xcbb   :  { %v7996_v34 = vpop.f32.mrf.mxu1  ;;  %v6012_v44 = vadd.f32 %v6011_v39, %v5958_v29  ;;  %v10701_v7 = vadd.f32 %v6133_v46, %v6119_v16  ;;  %v10708_v39 = vadd.f32 %v6129_v30, %v6118_v11  ;;  %v6121_v48 = vadd.f32 %v6010_v43, %v11222_v62  ;;  %v8712_v16 = vld [vmem:[%s10731_s8 + $0x4] ss:$8 sps:$4 sm:$0xff]  }
 0xcbc   :  { %v7997_v17 = vadd.f32 %v7996_v34, %v7995_v59  ;;  %v8207_v13 = vpop.f32.mrf.mxu0  ;;  %v11223_v59 = vld [vmem:[#allocation14_spill] sm:$0xff] }
 0xcbd   :  { %v7998_v10 = vpop.f32.mrf.mxu1  ;;  %v6122_v2 = vadd.f32 %v6012_v44, %v11221_v52  ;;  %v8710_v44 = vld [vmem:[%s10731_s8] ss:$8 sps:$4 sm:$0xff]  }
 0xcbe   :  { %v6097_v28 = vpop.f32.mrf.mxu0 }
 0xcbf   :  { %v6098_v3 = vadd.f32 %v7997_v17, %v6097_v28  ;;  %v7999_v20 = vpop.f32.mrf.mxu1  ;;  %v10713_v26 = vadd.f32 %v6133_v46, %v6122_v2  ;;  %v6163_v17 = vadd.f32 %v10701_v7, %v10708_v39  ;;  %v8691_v28 = vld [vmem:[%s10731_s8 + $0x74] ss:$8 sps:$4 sm:$0xff]  }
 0xcc0   :  { %v8000_v42 = vadd.f32 %v7999_v20, %v7998_v10  ;;  %v8208_v41 = vpop.f32.mrf.mxu0  ;;  %6613 = vmatprep.subr.bf16.mxu1 %v8691_v28  ;;  %v8695_v20 = vld [vmem:[%s10731_s8 + $0x50] ss:$8 sps:$4 sm:$0xff]  }
 0xcc1   :  { %v6114_v54 = vadd.f32 %v6098_v3, %v11217_v40  ;;  %v8001_v15 = vpop.f32.mrf.mxu1  ;;  %v8697_v3 = vld [vmem:[%s10731_s8 + $0x54] ss:$8 sps:$4 sm:$0xff]   ;;  %v8706_v40 = vld [vmem:[%s10731_s8 + $0x24] ss:$8 sps:$4 sm:$0xff]  }
 0xcc2   :  { %v6100_v27 = vpop.f32.mrf.mxu0 }
 0xcc3   :  { %v6101_v4 = vadd.f32 %v8000_v42, %v6100_v27  ;;  %v8002_v36 = vpop.f32.mrf.mxu1  ;;  %v10692_v32 = vadd.f32 %v6137_v50, %v6114_v54  ;;  %v8715_v42 = vld [vmem:[%s10731_s8 + $0x174] ss:$8 sps:$4 sm:$0xff]   ;;  %v8704_v54 = vld [vmem:[%s10731_s8 + $0x20] ss:$8 sps:$4 sm:$0xff]  }
 0xcc4   :  { %v8003_v45 = vadd.f32 %v8002_v36, %v8001_v15  ;;  %6666 = vmatprep.subr.bf16.mxu0 %v8715_v42  ;;  %v8709_v15 = vld [vmem:[%s10731_s8 + $0x14] ss:$8 sps:$4 sm:$0xff]   ;;  %v8722_v42 = vld [vmem:[%s10731_s8 + $0xe0] ss:$8 sps:$4 sm:$0xff]  }
 0xcc5   :  { %v6117_v18 = vadd.f32 %v6101_v4, %v11220_v58  ;;  %v8004_v25 = vpop.f32.mrf.mxu1  ;;  %v6156_v53 = vadd.f32 %v6155_v23, %v10692_v32  ;;  %6667 = vmatpush1.bf16.msra.mxu0 %v8713_v56  ;;  %v8718_v27 = vld [vmem:[%s10731_s8 + $0xf4] ss:$8 sps:$4 sm:$0xff]   ;;  %v8716_v4 = vld [vmem:[%s10731_s8 + $0xf0] ss:$8 sps:$4 sm:$0xff]   ;;  %v8724_v56 = vld [vmem:[%s10731_s8 + $0xe4] ss:$8 sps:$4 sm:$0xff]  }
 0xcc6   :  { %v6106_v47 = vadd.f32 %v8207_v13, %v8003_v45  ;;  %v10719_v13 = vadd.f32 %v6129_v30, %v6121_v48  ;;  %v8689_v30 = vld [vmem:[%s10731_s8 + $0x70] ss:$8 sps:$4 sm:$0xff]  }
 0xcc7   :  { %v8005_v38 = vpop.f32.mrf.mxu1  ;;  %6157 = vadd.xlane.f32.xlu1 %v6156_v53  ;;  %v10704_v8 = vadd.f32 %v6137_v50, %v6117_v18  ;;  %6614 = vmatpush1.bf16.msra.mxu1 %v8689_v30  ;;  %v11225_v18 = vld [vmem:[#allocation6_spill] sm:$0xff] }
 0xcc8   :  { %v6120_v9 = vadd.f32 %v6106_v47, %v11223_v59  ;;  %v8006_v29 = vadd.f32 %v8005_v38, %v8004_v25  ;;  %v6167_v51 = vadd.f32 %v10713_v26, %v10719_v13  ;;  %6615 = vmatprep.subr.bf16.mxu1 %v8694_v22 }
 0xcc9   :  { %v6160_v12 = vadd.f32 %v6159_v0, %v10704_v8 }
 0xcca   :  { %v6109_v31 = vadd.f32 %v8208_v41, %v8006_v29  ;;  %v10715_v34 = vadd.f32 %v6137_v50, %v6120_v9  ;;  %v8698_v41 = vld [vmem:[%s10731_s8 + $0x40] ss:$8 sps:$4 sm:$0xff]  }
 0xccb   :  { %6161 = vadd.xlane.f32.xlu0 %v6160_v12  ;;  %6616 = vmatpush1.bf16.msra.mxu1 %v8692_v14 }
 0xccc   :  { %v6123_v5 = vadd.f32 %v6109_v31, %v11224_v35  ;;  %v6164_v63 = vadd.f32 %v6163_v17, %v10715_v34  ;;  %6617 = vmatprep.subr.bf16.mxu1 %v8697_v3 }
 0xcce   :  { %v10723_v10 = vadd.f32 %v6137_v50, %v6123_v5  ;;  %v8700_v50 = vld [vmem:[%s10731_s8 + $0x44] ss:$8 sps:$4 sm:$0xff]  }
 0xccf   :  { %6165 = vadd.xlane.f32.xlu0 %v6164_v63  ;;  %6618 = vmatpush1.bf16.msra.mxu1 %v8695_v20  ;;  %v8721_v20 = vld [vmem:[%s10731_s8 + $0x164] ss:$8 sps:$4 sm:$0xff]  }
 0xcd0   :  { %v6168_v46 = vadd.f32 %v6167_v51, %v10723_v10  ;;  %6619 = vmatprep.subr.bf16.mxu1 %v8700_v50  ;;  %v8719_v50 = vld [vmem:[%s10731_s8 + $0x160] ss:$8 sps:$4 sm:$0xff]   ;;  %6668 = vmatprep.subr.bf16.mxu0 %v8721_v20 }
 0xcd1   :  { %6669 = vmatpush1.bf16.msra.mxu0 %v8719_v50 }
 0xcd2   :  { %6169 = vadd.xlane.f32.xlu1 %v6168_v46 }
 0xcd3   :  { %6620 = vmatpush1.bf16.msra.mxu1 %v8698_v41  ;;  %v8727_v41 = vld [vmem:[%s10731_s8 + $0x154] ss:$8 sps:$4 sm:$0xff]  }
 0xcd4   :  { %6621 = vmatprep.subr.bf16.mxu1 %v8703_v61  ;;  %v8725_v61 = vld [vmem:[%s10731_s8 + $0x150] ss:$8 sps:$4 sm:$0xff]   ;;  %6670 = vmatprep.subr.bf16.mxu0 %v8727_v41 }
 0xcd5   :  { %6671 = vmatpush1.bf16.msra.mxu0 %v8725_v61 }
 0xcd7   :  { %6622 = vmatpush1.bf16.msra.mxu1 %v8701_v60  ;;  %v8730_v60 = vld [vmem:[%s10731_s8 + $0xd4] ss:$8 sps:$4 sm:$0xff]  }
 0xcd8   :  { %6623 = vmatprep.subr.bf16.mxu1 %v8706_v40  ;;  %v8728_v40 = vld [vmem:[%s10731_s8 + $0xd0] ss:$8 sps:$4 sm:$0xff]  }
 0xcdb   :  { %6624 = vmatpush1.bf16.msra.mxu1 %v8704_v54  ;;  %v8733_v54 = vld [vmem:[%s10731_s8 + $0x144] ss:$8 sps:$4 sm:$0xff]  }
 0xcdc   :  { %6625 = vmatprep.subr.bf16.mxu1 %v8709_v15  ;;  %v8731_v15 = vld [vmem:[%s10731_s8 + $0x140] ss:$8 sps:$4 sm:$0xff]   ;;  %6672 = vmatprep.subr.bf16.mxu0 %v8733_v54 }
 0xcdd   :  { %6673 = vmatpush1.bf16.msra.mxu0 %v8731_v15 }
 0xcdf   :  { %6626 = vmatpush1.bf16.msra.mxu1 %v8707_v1  ;;  %v8736_v1 = vld [vmem:[%s10731_s8 + $0xc4] ss:$8 sps:$4 sm:$0xff]  }
 0xce0   :  { %6627 = vmatprep.subr.bf16.mxu1 %v8712_v16  ;;  %v8734_v16 = vld [vmem:[%s10731_s8 + $0xc0] ss:$8 sps:$4 sm:$0xff]  }
 0xce3   :  { %6628 = vmatpush1.bf16.msra.mxu1 %v8710_v44  ;;  %v8739_v44 = vld [vmem:[%s10731_s8 + $0x134] ss:$8 sps:$4 sm:$0xff]  }
 0xce4   :  { %6629 = vmatprep.subr.bf16.mxu1 %v8718_v27  ;;  %v8737_v27 = vld [vmem:[%s10731_s8 + $0x130] ss:$8 sps:$4 sm:$0xff]   ;;  %6674 = vmatprep.subr.bf16.mxu0 %v8739_v44 }
 0xce5   :  { %6675 = vmatpush1.bf16.msra.mxu0 %v8737_v27 }
 0xce7   :  { %6630 = vmatpush2.bf16.msra.mxu1 %v8716_v4  ;;  %v8742_v4 = vld [vmem:[%s10731_s8 + $0xb4] ss:$8 sps:$4 sm:$0xff]  }
 0xce8   :  { %6631 = vmatprep.subr.bf16.mxu1 %v8724_v56 }
 0xceb   :  { %6632 = vmatpush2.bf16.msra.mxu1 %v8722_v42 }
 0xcec   :  { %6633 = vmatprep.subr.bf16.mxu1 %v8730_v60 }
 0xcef   :  { %6634 = vmatpush2.bf16.msra.mxu1 %v8728_v40 }
 0xcf0   :  { %6635 = vmatprep.subr.bf16.mxu1 %v8736_v1 }
 0xcf3   :  { %6636 = vmatpush2.bf16.msra.mxu1 %v8734_v16 }
 0xcf4   :  { %6637 = vmatprep.subr.bf16.mxu1 %v8742_v4 }
 0xd50   :  { %v6158_v36 = vpop.xlane.xlu1 %6157 }
 0xd51   :  { %v6171_v23 = vmul.f32 0.0026455026, %v6158_v36  ;;  %v8740_v36 = vld [vmem:[%s10731_s8 + $0xb0] ss:$8 sps:$4 sm:$0xff]  }
 0xd52   :  { %6638 = vmatpush2.bf16.msra.mxu1 %v8740_v36 }
 0xd53   :  { %v10754_v55 = vsub.f32 %v10685_v57, %v6171_v23  ;;  %v10757_v11 = vsub.f32 %v10681_v21, %v6171_v23  ;;  %v6177_v43 = vsub.f32 %v10692_v32, %v6171_v23  ;;  %v8745_v23 = vld [vmem:[%s10731_s8 + $0x124] ss:$8 sps:$4 sm:$0xff]  }
 0xd54   :  { %v6162_v45 = vpop.xlane.xlu0 %6161  ;;  %6676 = vmatprep.subr.bf16.mxu0 %v8745_v23 }
 0xd55   :  { %v6172_v58 = vmul.f32 0.0026455026, %v6162_v45  ;;  %v10761_v25 = vmul.f32 %v11225_v18, %v6177_v43  ;;  %v6199_v53 = vmul.f32 %v10754_v55, %v10754_v55  ;;  %v6200_v52 = vmul.f32 %v10757_v11, %v10757_v11  ;;  %v8743_v43 = vld [vmem:[%s10731_s8 + $0x120] ss:$8 sps:$4 sm:$0xff]   ;;  %v8748_v45 = vld [vmem:[%s10731_s8 + $0xa4] ss:$8 sps:$4 sm:$0xff]  }
 0xd56   :  { %6639 = vmatprep.subr.bf16.mxu1 %v8748_v45  ;;  %6677 = vmatpush1.bf16.msra.mxu0 %v8743_v43 }
 0xd57   :  { %v10768_v2 = vsub.f32 %v10697_v33, %v6172_v58  ;;  %v10771_v57 = vsub.f32 %v10690_v37, %v6172_v58  ;;  %v6180_v21 = vsub.f32 %v10704_v8, %v6172_v58  ;;  %v6201_v32 = vmul.f32 %v10761_v25, %v10761_v25  ;;  %v8746_v58 = vld [vmem:[%s10731_s8 + $0xa0] ss:$8 sps:$4 sm:$0xff]  }
 0xd58   :  { %v6166_v47 = vpop.xlane.xlu0 %6165  ;;  %v6211_v38 = vadd.f32 %v6200_v52, %v6199_v53  ;;  %v8751_v53 = vld [vmem:[%s10731_s8 + $0x114] ss:$8 sps:$4 sm:$0xff]   ;;  %6640 = vmatpush2.bf16.msra.mxu1 %v8746_v58 }
 0xd59   :  { %v6173_v0 = vmul.f32 0.0026455026, %v6166_v47  ;;  %v10777_v62 = vmul.f32 %v11225_v18, %v6180_v21  ;;  %v6202_v48 = vmul.f32 %v10768_v2, %v10768_v2  ;;  %v6203_v33 = vmul.f32 %v10771_v57, %v10771_v57  ;;  %v8754_v52 = vld [vmem:[%s10731_s8 + $0x94] ss:$8 sps:$4 sm:$0xff]   ;;  %v8749_v21 = vld [vmem:[%s10731_s8 + $0x110] ss:$8 sps:$4 sm:$0xff]   ;;  %6678 = vmatprep.subr.bf16.mxu0 %v8751_v53 }
 0xd5a   :  { %v6212_v59 = vadd.f32 %v6211_v38, %v6201_v32  ;;  %v8752_v32 = vld [vmem:[%s10731_s8 + $0x90] ss:$8 sps:$4 sm:$0xff]   ;;  %v8757_v47 = vld [vmem:[%s10731_s8 + $0x104] ss:$8 sps:$4 sm:$0xff]   ;;  %6641 = vmatprep.subr.bf16.mxu1 %v8754_v52  ;;  %6679 = vmatpush1.bf16.msra.mxu0 %v8749_v21 }
 0xd5b   :  { %v10784_v37 = vsub.f32 %v10708_v39, %v6173_v0  ;;  %v10787_v8 = vsub.f32 %v10701_v7, %v6173_v0  ;;  %v6183_v9 = vsub.f32 %v10715_v34, %v6173_v0  ;;  %v6170_v29 = vpop.xlane.xlu1 %6169  ;;  %v6204_v12 = vmul.f32 %v10777_v62, %v10777_v62  ;;  %v8760_v38 = vld [vmem:[%s10731_s8 + $0x84] ss:$8 sps:$4 sm:$0xff]   ;;  %v8755_v0 = vld [vmem:[%s10731_s8 + $0x100] ss:$8 sps:$4 sm:$0xff]   ;;  %6680 = vmatprep.subr.bf16.mxu0 %v8757_v47 }
 0xd5c   :  { %6213 = vadd.xlane.f32.xlu0 %v6212_v59  ;;  %v6174_v31 = vmul.f32 0.0026455026, %v6170_v29  ;;  %v6215_v17 = vadd.f32 %v6203_v33, %v6202_v48  ;;  %6642 = vmatpush2.bf16.msra.mxu1 %v8752_v32  ;;  %v8758_v48 = vld [vmem:[%s10731_s8 + $0x80] ss:$8 sps:$4 sm:$0xff]   ;;  %v8763_v33 = vld [vmem:[%s10849_s12 + $0xac] ss:$12 sps:$4 sm:$0xff]  }
 0xd5d   :  { %v10793_v35 = vmul.f32 %v11225_v18, %v6183_v9  ;;  %v6205_v5 = vmul.f32 %v10784_v37, %v10784_v37  ;;  %v6206_v39 = vmul.f32 %v10787_v8, %v10787_v8  ;;  %6643 = vmatprep.subr.bf16.mxu1 %v8760_v38  ;;  %v8761_v38 = vld [vmem:[%s10849_s12 + $0xa8] ss:$12 sps:$4 sm:$0xff]  }
 0xd5e   :  { %v10800_v7 = vsub.f32 %v10719_v13, %v6174_v31  ;;  %v10803_v34 = vsub.f32 %v10713_v26, %v6174_v31  ;;  %v6186_v63 = vsub.f32 %v10723_v10, %v6174_v31  ;;  %v6216_v51 = vadd.f32 %v6215_v17, %v6204_v12  ;;  %6681 = vmatpush1.bf16.msra.mxu0 %v8755_v0  ;;  %v8764_v0 = vld [vmem:[%s10849_s12 + $0xb0] ss:$12 sps:$4 sm:$0xff]  }
 0xd5f   :  { %v6207_v46 = vmul.f32 %v10793_v35, %v10793_v35  ;;  %v6219_v30 = vadd.f32 %v6206_v39, %v6205_v5  ;;  %6988 = vmatprep.subr.bf16.mxu0 %v8763_v33 }
 0xd60   :  { %6217 = vadd.xlane.f32.xlu1 %v6216_v51  ;;  %v10809_v28 = vmul.f32 %v11225_v18, %v6186_v63  ;;  %v6208_v13 = vmul.f32 %v10800_v7, %v10800_v7  ;;  %v6209_v26 = vmul.f32 %v10803_v34, %v10803_v34  ;;  %6644 = vmatpush2.bf16.msra.mxu1 %v8758_v48 }
 0xd61   :  { %v6220_v10 = vadd.f32 %v6219_v30, %v6207_v46  ;;  %7041 = vmatprep.subr.bf16.mxu1 %v11171_v19 }
 0xd62   :  { %v6210_v22 = vmul.f32 %v10809_v28, %v10809_v28  ;;  %v6223_v14 = vadd.f32 %v6209_v26, %v6208_v13  ;;  %v6153_v13 = vld [vmem:[%s7323_s5] sm:$0x7] }
 0xd63   :  { %6221 = vadd.xlane.f32.xlu0 %v6220_v10  ;;  %v6255_v10 = vrot.slane %v6153_v13, %v11213_v6  ;;  %v6263_v20 = vrot.slane %v6153_v13, %v11215_v49 }
 0xd64   :  { %v6224_v3 = vadd.f32 %v6223_v14, %v6210_v22  ;;  %v6259_v22 = vrot.slane %v6153_v13, %v11211_v24  ;;  %v6154_v14 = vld [vmem:[%s7324_s20] sm:$0x7]  ;;  %v8769_v13 = vld [vmem:[%s10849_s12 + $0x78] ss:$12 sps:$4 sm:$0xff]  }
 0xd65   :  { %v6283_v61 = vrot.slane %v6154_v14, %v11213_v6  ;;  %v6287_v60 = vrot.slane %v6154_v14, %v11211_v24  ;;  %v6291_v40 = vrot.slane %v6154_v14, %v11215_v49  ;;  %v8773_v14 = vld [vmem:[%s10849_s12 + $0x60] ss:$12 sps:$4 sm:$0xff]  }
 0xd66   :  { %6225 = vadd.xlane.f32.xlu1 %v6224_v3 }
 0xde5   :  { %v6214_v59 = vpop.xlane.xlu0 %6213 }
 0xde6   :  { %v6227_v9 = vmul.f32 0.0026455026, %v6214_v59  ;;  %v8767_v59 = vld [vmem:[%s10849_s12 + $0x94] ss:$12 sps:$4 sm:$0xff]  }
 0xde8   :  { %v6231_v29 = vadd.f32 1e-05, %v6227_v9 }
 0xde9   :  { %v6218_v12 = vpop.xlane.xlu1 %6217 }
 0xdea   :  { %8893 = vrsqrt.f32 %v6231_v29  ;;  %v6228_v31 = vmul.f32 0.0026455026, %v6218_v12 }
 0xdec   :  { %v6232_v17 = vadd.f32 1e-05, %v6228_v31  ;;  %v6222_v5 = vpop.xlane.xlu0 %6221 }
 0xded   :  { %v6229_v39 = vmul.f32 0.0026455026, %v6222_v5 }
 0xdee   :  { %8895 = vrsqrt.f32 %v6232_v17  ;;  %v8765_v17 = vld [vmem:[%s10849_s12 + $0x90] ss:$12 sps:$4 sm:$0xff]  }
 0xdef   :  { %v6233_v63 = vadd.f32 1e-05, %v6229_v39  ;;  %v6226_v51 = vpop.xlane.xlu1 %6225  ;;  %v8768_v39 = vld [vmem:[%s10849_s12 + $0x98] ss:$12 sps:$4 sm:$0xff]  }
 0xdf0   :  { %v6230_v46 = vmul.f32 0.0026455026, %v6226_v51 }
 0xdf1   :  { %8897 = vrsqrt.f32 %v6233_v63  ;;  %v8771_v63 = vld [vmem:[%s10849_s12 + $0x7c] ss:$12 sps:$4 sm:$0xff]  }
 0xdf2   :  { %v6234_v30 = vadd.f32 1e-05, %v6230_v46 }
 0xdf4   :  { %8899 = vrsqrt.f32 %v6234_v30 }
 0xdf7   :  { %v8894_v26 = vpop.eup %8893 }
 0xdf8   :  { %v6240_v3 = vmul.f32 %v8894_v26, %v10757_v11  ;;  %v6241_v50 = vmul.f32 %v8894_v26, %v10761_v25  ;;  %v6239_v56 = vmul.f32 %v8894_v26, %v10754_v55 }
 0xdfa   :  { %v6268_v41 = vmul.f32 %v6259_v22, %v6240_v3  ;;  %v6269_v1 = vmul.f32 %v6263_v20, %v6241_v50  ;;  %v6267_v11 = vmul.f32 %v6255_v10, %v6239_v56  ;;  %v8776_v3 = vld [vmem:[%s10849_s12 + $0x68] ss:$12 sps:$4 sm:$0xff]   ;;  %v8780_v56 = vld [vmem:[%s10849_s12 + $0x50] ss:$12 sps:$4 sm:$0xff]  }
 0xdfb   :  { %v8896_v42 = vpop.eup %8895  ;;  %v8777_v50 = vld [vmem:[%s10849_s12 + $0x48] ss:$12 sps:$4 sm:$0xff]  }
 0xdfc   :  { %v6243_v54 = vmul.f32 %v8896_v42, %v10771_v57  ;;  %v6244_v15 = vmul.f32 %v8896_v42, %v10777_v62  ;;  %v6242_v16 = vmul.f32 %v8896_v42, %v10768_v2  ;;  %v10870_v55 = vadd.f32 %v6287_v60, %v6268_v41  ;;  %v8783_v42 = vld [vmem:[%s10849_s12 + $0x34] ss:$12 sps:$4 sm:$0xff]   ;;  %v8781_v41 = vld [vmem:[%s10849_s12 + $0x30] ss:$12 sps:$4 sm:$0xff]  }
 0xdfd   :  { %v10876_v57 = vadd.f32 %v6291_v40, %v6269_v1  ;;  %v10880_v2 = vadd.f32 %v6283_v61, %v6267_v11  ;;  %v8789_v1 = vld [vmem:[%s10849_s12] ss:$12 sps:$4 sm:$0xff]   ;;  %v8792_v11 = vld [vmem:[%s10849_s12 + $0x8] ss:$12 sps:$4 sm:$0xff]  }
 0xdfe   :  { %v8898_v44 = vpop.eup %8897  ;;  %v6271_v25 = vmul.f32 %v6259_v22, %v6243_v54  ;;  %v6272_v27 = vmul.f32 %v6263_v20, %v6244_v15  ;;  %v6270_v4 = vmul.f32 %v6255_v10, %v6242_v16  ;;  %v8788_v54 = vld [vmem:[%s10849_s12 + $0x20] ss:$12 sps:$4 sm:$0xff]   ;;  %v8791_v15 = vld [vmem:[%s10849_s12 + $0x4] ss:$12 sps:$4 sm:$0xff]  }
 0xdff   :  { %v6246_v36 = vmul.f32 %v8898_v44, %v10787_v8  ;;  %v6247_v23 = vmul.f32 %v8898_v44, %v10793_v35  ;;  %v6245_v21 = vmul.f32 %v8898_v44, %v10784_v37  ;;  %v8795_v16 = vld [vmem:[%s10849_s12 + $0x10c] ss:$12 sps:$4 sm:$0x7f]   ;;  %v11226_v44 = vmov 65535  }
 0xe00   :  { %v10874_v43 = vadd.f32 %v6287_v60, %v6271_v25  ;;  %v10878_v62 = vadd.f32 %v6291_v40, %v6272_v27  ;;  %v10882_v58 = vadd.f32 %v6283_v61, %v6270_v4  ;;  %v6977_v25 = vsel %vm6975_vm7, 4294967295, %v11226_v44  ;;  %v8793_v27 = vld [vmem:[%s10849_s12 + $0x108] ss:$12 sps:$4 sm:$0x7f]  }
 0xe01   :  { %v8900_v45 = vpop.eup %8899  ;;  %v6274_v53 = vmul.f32 %v6259_v22, %v6246_v36  ;;  %v6275_v52 = vmul.f32 %v6263_v20, %v6247_v23  ;;  %v6978_v4 = vsel %vm6976_vm8, %v6977_v25, 0  ;;  %v8796_v23 = vld [vmem:[%s10849_s12 + $0x110] ss:$12 sps:$4 sm:$0x7f]  }
 0xe02   :  { %v6356_v8 = vpack.c.bf16 %v10874_v43, %v10870_v55  ;;  %v6357_v35 = vpack.c.bf16 %v10878_v62, %v10876_v57  ;;  %v6249_v32 = vmul.f32 %v8900_v45, %v10803_v34  ;;  %v6250_v47 = vmul.f32 %v8900_v45, %v10809_v28 }
 0xe03   :  { %v6355_v48 = vpack.c.bf16 %v10882_v58, %v10880_v2  ;;  %v6248_v33 = vmul.f32 %v8900_v45, %v10800_v7  ;;  %v10897_v29 = vadd.f32 %v6287_v60, %v6274_v53  ;;  %v6273_v34 = vmul.f32 %v6255_v10, %v6245_v21  ;;  %v8797_v21 = vld [vmem:[%s10849_s12 + $0xf0] ss:$12 sps:$4 sm:$0xff]  }
 0xe04   :  { %6645 = vmatprep.mubr.bf16.mxu1 %v6356_v8  ;;  %6699 = vmatmul.mubr.bf16.vlgmr.msra.gmra.mxu0 %v6357_v35  ;;  %v6277_v37 = vmul.f32 %v6259_v22, %v6249_v32  ;;  %v6278_v9 = vmul.f32 %v6263_v20, %v6250_v47  ;;  %v10902_v31 = vadd.f32 %v6291_v40, %v6275_v52  ;;  %v8775_v22 = vld [vmem:[%s10849_s12 + $0x64] ss:$12 sps:$4 sm:$0xff]   ;;  %v8779_v20 = vld [vmem:[%s10849_s12 + $0x4c] ss:$12 sps:$4 sm:$0xff]   ;;  %v8799_v52 = vld [vmem:[%s10849_s12 + $0xf4] ss:$12 sps:$4 sm:$0xff]  }
 0xe05   :  { %6646 = vmatmul.mubr.bf16.vlgmr.msra.gmra.mxu1 %v6355_v48  ;;  %6708 = vmatprep.mubr.bf16.mxu0 %v11171_v19  ;;  %v6276_v28 = vmul.f32 %v6255_v10, %v6248_v33  ;;  %v10916_v30 = vadd.f32 %v6283_v61, %v6273_v34  ;;  %v8772_v10 = vld [vmem:[%s10849_s12 + $0x80] ss:$12 sps:$4 sm:$0xff]   ;;  %v6983_v36 = vand.u32 %v8795_v16, %v6978_v4  ;;  %v8800_v8 = vld [vmem:[%s10849_s12 + $0xf8] ss:$12 sps:$4 sm:$0xff]   ;;  %v8803_v35 = vld [vmem:[%s10849_s12 + $0xdc] ss:$12 sps:$4 sm:$0xff]  }
 0xe06   :  { %v10900_v12 = vadd.f32 %v6287_v60, %v6277_v37  ;;  %v10904_v7 = vadd.f32 %v6291_v40, %v6278_v9  ;;  %6989 = vmatpush1.bf16.msra.mxu0 %v8761_v38  ;;  %7042 = vmatpush1.bf16.msra.mxu1 %v8764_v0  ;;  %v8787_v60 = vld [vmem:[%s10849_s12 + $0x1c] ss:$12 sps:$4 sm:$0xff]   ;;  %v8785_v40 = vld [vmem:[%s10849_s12 + $0x18] ss:$12 sps:$4 sm:$0xff]   ;;  %v6980_v45 = vand.u32 %v8793_v27, %v6978_v4  ;;  %v8804_v47 = vld [vmem:[%s10849_s12 + $0xe0] ss:$12 sps:$4 sm:$0xff]  }
 0xe07   :  { %v10907_v5 = vadd.f32 %v6283_v61, %v6276_v28  ;;  %6990 = vmatprep.subr.bf16.mxu0 %v8767_v59  ;;  %7043 = vmatprep.subr.bf16.mxu1 %v11171_v19  ;;  %v8784_v61 = vld [vmem:[%s10849_s12 + $0x38] ss:$12 sps:$4 sm:$0xff]   ;;  %v6986_v53 = vand.u32 %v8796_v23, %v6978_v4  ;;  %v8805_v0 = vld [vmem:[%s10849_s12 + $0xc0] ss:$12 sps:$4 sm:$0xff]   ;;  %v8808_v48 = vld [vmem:[%s10849_s12 + $0xc8] ss:$12 sps:$4 sm:$0xff]  }
 0xe08   :  { %v6359_v51 = vpack.c.bf16 %v10900_v12, %v10897_v29  ;;  %v6360_v46 = vpack.c.bf16 %v10904_v7, %v10902_v31  ;;  %v8801_v32 = vld [vmem:[%s10849_s12 + $0xd8] ss:$12 sps:$4 sm:$0xff]   ;;  %v6361_v33 = vld [vmem:[%s7326_s23] sm:$0x3] }
 0xe09   :  { %v6358_v26 = vpack.c.bf16 %v10907_v5, %v10916_v30  ;;  %v8807_v38 = vld [vmem:[%s10849_s12 + $0xc4] ss:$12 sps:$4 sm:$0xff]   ;;  %v6370_v37 = vrot.slane %v6361_v33, %v11211_v24  ;;  %v6366_v9 = vrot.slane %v6361_v33, %v11213_v6 }
 0xe0a   :  { %6655 = vmatprep.mubr.bf16.mxu1 %v6359_v51  ;;  %6991 = vmatpush1.bf16.msra.mxu0 %v8765_v17 }
 0xe0b   :  { %7044 = vmatpush1.bf16.msra.mxu1 %v8768_v39  ;;  %6992 = vmatprep.subr.bf16.mxu0 %v8771_v63 }
 0xe0c   :  { %6709 = vmatmul.mubr.bf16.gmra.mxu0 %v6360_v46  ;;  %7045 = vmatprep.subr.bf16.mxu1 %v11171_v19 }
 0xe0d   :  { %6656 = vmatmul.mubr.bf16.gmra.mxu1 %v6358_v26 }
 0xe0e   :  { %6993 = vmatpush1.bf16.msra.mxu0 %v8769_v13 }
 0xe0f   :  { %7046 = vmatpush1.bf16.msra.mxu1 %v8772_v10  ;;  %6994 = vmatprep.subr.bf16.mxu0 %v8775_v22 }
 0xe10   :  { %7047 = vmatprep.subr.bf16.mxu1 %v11171_v19 }
 0xe12   :  { %6995 = vmatpush1.bf16.msra.mxu0 %v8773_v14 }
 0xe13   :  { %7048 = vmatpush1.bf16.msra.mxu1 %v8776_v3  ;;  %6996 = vmatprep.subr.bf16.mxu0 %v8779_v20 }
 0xe14   :  { %7049 = vmatprep.subr.bf16.mxu1 %v11171_v19 }
 0xe16   :  { %6997 = vmatpush1.bf16.msra.mxu0 %v8777_v50 }
 0xe17   :  { %7050 = vmatpush1.bf16.msra.mxu1 %v8780_v56  ;;  %6998 = vmatprep.subr.bf16.mxu0 %v8783_v42 }
 0xe18   :  { %7051 = vmatprep.subr.bf16.mxu1 %v11171_v19 }
 0xe1a   :  { %6999 = vmatpush1.bf16.msra.mxu0 %v8781_v41 }
 0xe1b   :  { %7052 = vmatpush1.bf16.msra.mxu1 %v8784_v61  ;;  %7000 = vmatprep.subr.bf16.mxu0 %v8787_v60 }
 0xe1c   :  { %7053 = vmatprep.subr.bf16.mxu1 %v11171_v19 }
 0xe1e   :  { %7001 = vmatpush1.bf16.msra.mxu0 %v8785_v40 }
 0xe1f   :  { %7054 = vmatpush1.bf16.msra.mxu1 %v8788_v54  ;;  %7002 = vmatprep.subr.bf16.mxu0 %v8791_v15 }
 0xe20   :  { %7055 = vmatprep.subr.bf16.mxu1 %v11171_v19 }
 0xe22   :  { %7003 = vmatpush1.bf16.msra.mxu0 %v8789_v1 }
 0xe23   :  { %7056 = vmatpush1.bf16.msra.mxu1 %v8792_v11  ;;  %7012 = vmatprep.subr.bf16.mxu0 %v6983_v36 }
 0xe24   :  { %7065 = vmatprep.subr.bf16.mxu1 %v11171_v19 }
 0xe26   :  { %7013 = vmatpush2.bf16.msra.mxu0 %v6980_v45 }
 0xe27   :  { %7066 = vmatpush2.bf16.msra.mxu1 %v6986_v53  ;;  %7014 = vmatprep.subr.bf16.mxu0 %v8799_v52 }
 0xe28   :  { %7067 = vmatprep.subr.bf16.mxu1 %v11171_v19 }
 0xe2a   :  { %7015 = vmatpush2.bf16.msra.mxu0 %v8797_v21 }
 0xe2b   :  { %7068 = vmatpush2.bf16.msra.mxu1 %v8800_v8  ;;  %7016 = vmatprep.subr.bf16.mxu0 %v8803_v35 }
 0xe2c   :  { %7069 = vmatprep.subr.bf16.mxu1 %v11171_v19 }
 0xe2e   :  { %7017 = vmatpush2.bf16.msra.mxu0 %v8801_v32 }
 0xe2f   :  { %7070 = vmatpush2.bf16.msra.mxu1 %v8804_v47  ;;  %7018 = vmatprep.subr.bf16.mxu0 %v8807_v38 }
 0xe30   :  { %7071 = vmatprep.subr.bf16.mxu1 %v11171_v19 }
 0xe32   :  { %7019 = vmatpush2.bf16.msra.mxu0 %v8805_v0 }
 0xe33   :  { %7072 = vmatpush2.bf16.msra.mxu1 %v8808_v48  ;;  %v7102_v48 = vld [vmem:[%s7328_s27] sm:$0x7] }
 0xec4   :  { %v6700_v59 = vpop.f32.mrf.mxu0 }
 0xec5   :  { %v6647_v34 = vpop.f32.mrf.mxu1 }
 0xec6   :  { %v6702_v28 = vpop.f32.mrf.mxu0  ;;  %v6648_v63 = vadd.f32 %v6647_v34, %v6366_v9  ;;  %v7111_v34 = vrot.slane %v7102_v48, %v11211_v24 }
 0xec7   :  { %v6649_v17 = vpop.f32.mrf.mxu1 }
 0xec8   :  { %v6650_v39 = vadd.f32 %v6649_v17, %v6370_v37  ;;  %v6704_v19 = vpop.f32.mrf.mxu0  ;;  %v6701_v20 = vadd.f32 %v6700_v59, %v6648_v63 }
 0xec9   :  { %v6651_v51 = vpop.f32.mrf.mxu1 }
 0xeca   :  { %v6652_v46 = vadd.f32 %v6651_v51, %v6366_v9  ;;  %v6706_v13 = vpop.f32.mrf.mxu0  ;;  %v6703_v10 = vadd.f32 %v6702_v28, %v6650_v39  ;;  %v6719_v15 = vmax.f32 %v6701_v20, 0.0 }
 0xecb   :  { %v6653_v26 = vpop.f32.mrf.mxu1 }
 0xecc   :  { %v6705_v22 = vadd.f32 %v6704_v19, %v6652_v46  ;;  %v6654_v14 = vadd.f32 %v6653_v26, %v6370_v37  ;;  %v6710_v3 = vpop.f32.mrf.mxu0  ;;  %v6720_v60 = vmax.f32 %v6703_v10, 0.0  ;;  %v7115_v19 = vrot.slane %v7102_v48, %v11215_v49 }
 0xecd   :  { %v6657_v50 = vpop.f32.mrf.mxu1 }
 0xece   :  { %v6707_v56 = vadd.f32 %v6706_v13, %v6654_v14  ;;  %v6712_v42 = vpop.f32.mrf.mxu0  ;;  %v6721_v41 = vmax.f32 %v6705_v22, 0.0  ;;  %v6658_v1 = vadd.f32 %v6657_v50, %v6366_v9 }
 0xecf   :  { %v6659_v61 = vpop.f32.mrf.mxu1 }
 0xed0   :  { %v6722_v40 = vmax.f32 %v6707_v56, 0.0  ;;  %v6660_v54 = vadd.f32 %v6659_v61, %v6370_v37  ;;  %v6714_v11 = vpop.f32.mrf.mxu0  ;;  %v6775_v27 = vpack.c.bf16 %v6721_v41, %v6719_v15  ;;  %v6711_v53 = vadd.f32 %v6710_v3, %v6658_v1 }
 0xed1   :  { %v6661_v16 = vpop.f32.mrf.mxu1 }
 0xed2   :  { %v6776_v44 = vpack.c.bf16 %v6722_v40, %v6720_v60  ;;  %v6662_v25 = vadd.f32 %v6661_v16, %v6366_v9  ;;  %v6713_v36 = vadd.f32 %v6712_v42, %v6660_v54  ;;  %v6716_v52 = vpop.f32.mrf.mxu0  ;;  %v6723_v47 = vmax.f32 %v6711_v53, 0.0 }
 0xed3   :  { %v6663_v4 = vpop.f32.mrf.mxu1  ;;  %v7107_v9 = vrot.slane %v7102_v48, %v11213_v6 }
 0xed4   :  { %v6715_v23 = vadd.f32 %v6714_v11, %v6662_v25  ;;  %v6664_v45 = vadd.f32 %v6663_v4, %v6370_v37  ;;  %7789 = vmatprep.mubr.msk.bf16.mxu0 %vm6968_vm9, %v6776_v44  ;;  %7791 = vmatprep.mubr.msk.bf16.mxu1 %vm6968_vm9, %v6776_v44  ;;  %v6724_v35 = vmax.f32 %v6713_v36, 0.0 }
 0xed5   :  { %7021 = vmatmul.mubr.bf16.vlgmr.msra.gmra.mxu0 %v6775_v27  ;;  %7074 = vmatmul.mubr.bf16.vlgmr.msra.gmra.mxu1 %v6775_v27 }
 0xed6   :  { %v6717_v21 = vadd.f32 %v6716_v52, %v6664_v45  ;;  %v6725_v8 = vmax.f32 %v6715_v23, 0.0 }
 0xed8   :  { %v6726_v32 = vmax.f32 %v6717_v21, 0.0  ;;  %v6777_v0 = vpack.c.bf16 %v6725_v8, %v6723_v47 }
 0xeda   :  { %v6778_v38 = vpack.c.bf16 %v6726_v32, %v6724_v35 }
 0xedc   :  { %7790 = vmatprep.mubr.msk.bf16.mxu0 %vm6968_vm9, %v6778_v38  ;;  %7792 = vmatprep.mubr.msk.bf16.mxu1 %vm6968_vm9, %v6778_v38 }
 0xedd   :  { %7031 = vmatmul.mubr.bf16.gmra.mxu0 %v6777_v0  ;;  %7082 = vmatmul.mubr.bf16.gmra.mxu1 %v6777_v0 }
 0xf95   :  { %v7022_v33 = vpop.f32.mrf.mxu0  ;;  %v7075_v59 = vpop.f32.mrf.mxu1 }
 0xf96   :  { %v7090_v37 = vadd.f32 %v7022_v33, %v10880_v2  ;;  %v7092_v39 = vadd.f32 %v7075_v59, %v10876_v57 }
 0xf97   :  { %v7024_v28 = vpop.f32.mrf.mxu0  ;;  %v7077_v17 = vpop.f32.mrf.mxu1 }
 0xf98   :  { %v7091_v63 = vadd.f32 %v7024_v28, %v10870_v55  ;;  %v7119_v13 = vadd.f32 %v7107_v9, %v7090_v37  ;;  %v7121_v14 = vadd.f32 %v7115_v19, %v7092_v39 }
 0xf99   :  { %v7026_v51 = vpop.f32.mrf.mxu0  ;;  %v7078_v46 = vpop.f32.mrf.mxu1 }
 0xf9a   :  { %v7120_v26 = vadd.f32 %v7111_v34, %v7091_v63  ;;  %v7093_v10 = vadd.f32 %v7026_v51, %v10882_v58  ;;  %v7095_v3 = vadd.f32 %v7078_v46, %v10878_v62 }
 0xf9b   :  { %v7028_v22 = vpop.f32.mrf.mxu0  ;;  %v7080_v2 = vpop.f32.mrf.mxu1 }
 0xf9c   :  { %v7094_v20 = vadd.f32 %v7028_v22, %v10874_v43  ;;  %v7133_v50 = vadd.f32 %v7120_v26, %v7119_v13  ;;  %v7122_v42 = vadd.f32 %v7107_v9, %v7093_v10  ;;  %v7124_v54 = vadd.f32 %v7115_v19, %v7095_v3 }
 0xf9d   :  { %v7032_v56 = vpop.f32.mrf.mxu0  ;;  %v7083_v57 = vpop.f32.mrf.mxu1 }
 0xf9e   :  { %v7123_v41 = vadd.f32 %v7111_v34, %v7094_v20  ;;  %v7096_v55 = vadd.f32 %v7032_v56, %v10916_v30  ;;  %v7134_v61 = vadd.f32 %v7133_v50, %v7121_v14  ;;  %v7098_v58 = vadd.f32 %v7083_v57, %v10902_v31 }
 0xf9f   :  { %v7034_v60 = vpop.f32.mrf.mxu0  ;;  %v7085_v40 = vpop.f32.mrf.mxu1 }
 0xfa0   :  { %v7097_v15 = vadd.f32 %v7034_v60, %v10897_v29  ;;  %7135 = vadd.xlane.f32.xlu0 %v7134_v61  ;;  %v7137_v1 = vadd.f32 %v7123_v41, %v7122_v42  ;;  %v7125_v43 = vadd.f32 %v7107_v9, %v7096_v55  ;;  %v7127_v30 = vadd.f32 %v7115_v19, %v7098_v58 }
 0xfa1   :  { %v7036_v62 = vpop.f32.mrf.mxu0  ;;  %v7086_v11 = vpop.f32.mrf.mxu1 }
 0xfa2   :  { %v7126_v16 = vadd.f32 %v7111_v34, %v7097_v15  ;;  %v7099_v44 = vadd.f32 %v7036_v62, %v10907_v5  ;;  %v7138_v25 = vadd.f32 %v7137_v1, %v7124_v54  ;;  %v7101_v36 = vadd.f32 %v7086_v11, %v10904_v7 }
 0xfa3   :  { %v7038_v27 = vpop.f32.mrf.mxu0  ;;  %v7088_v4 = vpop.f32.mrf.mxu1 }
 0xfa4   :  { %v7100_v23 = vadd.f32 %v7038_v27, %v10900_v12  ;;  %7139 = vadd.xlane.f32.xlu1 %v7138_v25  ;;  %v7141_v31 = vadd.f32 %v7126_v16, %v7125_v43  ;;  %v7128_v45 = vadd.f32 %v7107_v9, %v7099_v44  ;;  %v7130_v52 = vadd.f32 %v7115_v19, %v7101_v36 }
 0xfa6   :  { %v7129_v29 = vadd.f32 %v7111_v34, %v7100_v23  ;;  %v7142_v53 = vadd.f32 %v7141_v31, %v7127_v30 }
 0xfa8   :  { %7143 = vadd.xlane.f32.xlu0 %v7142_v53  ;;  %v7145_v21 = vadd.f32 %v7129_v29, %v7128_v45  ;;  %v7132_v53 = vld [vmem:[%s7330_s6] sm:$0x7] }
 0xfaa   :  { %v7146_v8 = vadd.f32 %v7145_v21, %v7130_v52 }
 0xfac   :  { %7147 = vadd.xlane.f32.xlu1 %v7146_v8 }
0x1029   :  { %v7136_v35 = vpop.xlane.xlu0 %7135 }
0x102a   :  { %v7149_v5 = vmul.f32 0.0026455026, %v7136_v35 }
0x102c   :  { %v10987_v32 = vsub.f32 %v7119_v13, %v7149_v5  ;;  %v10989_v47 = vsub.f32 %v7120_v26, %v7149_v5  ;;  %v7155_v38 = vsub.f32 %v7121_v14, %v7149_v5  ;;  %v7261_v5 = vrot.slane %v7132_v53, %v11213_v6 }
0x102d   :  { %v7140_v7 = vpop.xlane.xlu1 %7139 }
0x102e   :  { %v7150_v0 = vmul.f32 0.0026455026, %v7140_v7  ;;  %v10992_v12 = vmul.f32 %v11225_v18, %v7155_v38  ;;  %v7177_v48 = vmul.f32 %v10987_v32, %v10987_v32  ;;  %v7178_v33 = vmul.f32 %v10989_v47, %v10989_v47 }
0x102f   :  { %v7265_v38 = vrot.slane %v7132_v53, %v11211_v24  ;;  %v7269_v7 = vrot.slane %v7132_v53, %v11215_v49 }
0x1030   :  { %v10998_v59 = vsub.f32 %v7122_v42, %v7150_v0  ;;  %v11000_v37 = vsub.f32 %v7123_v41, %v7150_v0  ;;  %v7158_v9 = vsub.f32 %v7124_v54, %v7150_v0  ;;  %v7179_v34 = vmul.f32 %v10992_v12, %v10992_v12 }
0x1031   :  { %v7144_v28 = vpop.xlane.xlu0 %7143  ;;  %v7189_v17 = vadd.f32 %v7178_v33, %v7177_v48 }
0x1032   :  { %v7151_v39 = vmul.f32 0.0026455026, %v7144_v28  ;;  %v11005_v19 = vmul.f32 %v11225_v18, %v7158_v9  ;;  %v7180_v63 = vmul.f32 %v10998_v59, %v10998_v59  ;;  %v7181_v51 = vmul.f32 %v11000_v37, %v11000_v37 }
0x1033   :  { %v7190_v46 = vadd.f32 %v7189_v17, %v7179_v34 }
0x1034   :  { %v11011_v13 = vsub.f32 %v7125_v43, %v7151_v39  ;;  %v11013_v26 = vsub.f32 %v7126_v16, %v7151_v39  ;;  %v7161_v10 = vsub.f32 %v7127_v30, %v7151_v39  ;;  %v7182_v22 = vmul.f32 %v11005_v19, %v11005_v19 }
0x1035   :  { %7191 = vadd.xlane.f32.xlu0 %v7190_v46  ;;  %v7148_v2 = vpop.xlane.xlu1 %7147  ;;  %v7193_v14 = vadd.f32 %v7181_v51, %v7180_v63 }
0x1036   :  { %v7152_v3 = vmul.f32 0.0026455026, %v7148_v2  ;;  %v11018_v20 = vmul.f32 %v11225_v18, %v7161_v10  ;;  %v7183_v50 = vmul.f32 %v11011_v13, %v11011_v13  ;;  %v7184_v56 = vmul.f32 %v11013_v26, %v11013_v26 }
0x1037   :  { %v7194_v57 = vadd.f32 %v7193_v14, %v7182_v22 }
0x1038   :  { %v11024_v42 = vsub.f32 %v7128_v45, %v7152_v3  ;;  %v11026_v41 = vsub.f32 %v7129_v29, %v7152_v3  ;;  %v7164_v55 = vsub.f32 %v7130_v52, %v7152_v3  ;;  %v7185_v61 = vmul.f32 %v11018_v20, %v11018_v20  ;;  %v7131_v45 = vld [vmem:[%s7329_s1] sm:$0x7] }
0x1039   :  { %7195 = vadd.xlane.f32.xlu1 %v7194_v57  ;;  %v7197_v60 = vadd.f32 %v7184_v56, %v7183_v50  ;;  %v7233_v52 = vrot.slane %v7131_v45, %v11213_v6  ;;  %v7237_v21 = vrot.slane %v7131_v45, %v11211_v24  ;;  %v7241_v8 = vrot.slane %v7131_v45, %v11215_v49 }
0x103a   :  { %v11031_v40 = vmul.f32 %v11225_v18, %v7164_v55  ;;  %v7186_v54 = vmul.f32 %v11024_v42, %v11024_v42  ;;  %v7187_v58 = vmul.f32 %v11026_v41, %v11026_v41 }
0x103b   :  { %v7198_v15 = vadd.f32 %v7197_v60, %v7185_v61 }
0x103c   :  { %v7188_v1 = vmul.f32 %v11031_v40, %v11031_v40  ;;  %v7201_v62 = vadd.f32 %v7187_v58, %v7186_v54 }
0x103d   :  { %7199 = vadd.xlane.f32.xlu0 %v7198_v15 }
0x103e   :  { %v7202_v11 = vadd.f32 %v7201_v62, %v7188_v1 }
0x1040   :  { %7203 = vadd.xlane.f32.xlu1 %v7202_v11 }
0x10be   :  { %v7192_v43 = vpop.xlane.xlu0 %7191 }
0x10bf   :  { %v7205_v16 = vmul.f32 0.0026455026, %v7192_v43 }
0x10c1   :  { %v7209_v44 = vadd.f32 1e-05, %v7205_v16 }
0x10c2   :  { %v7196_v25 = vpop.xlane.xlu1 %7195 }
0x10c3   :  { %8901 = vrsqrt.f32 %v7209_v44  ;;  %v7206_v18 = vmul.f32 0.0026455026, %v7196_v25 }
0x10c5   :  { %v7210_v27 = vadd.f32 1e-05, %v7206_v18 }
0x10c6   :  { %v7200_v4 = vpop.xlane.xlu0 %7199 }
0x10c7   :  { %8903 = vrsqrt.f32 %v7210_v27  ;;  %v7207_v30 = vmul.f32 0.0026455026, %v7200_v4 }
0x10c9   :  { %v7211_v36 = vadd.f32 1e-05, %v7207_v30  ;;  %v7204_v23 = vpop.xlane.xlu1 %7203 }
0x10ca   :  { %v7208_v31 = vmul.f32 0.0026455026, %v7204_v23 }
0x10cb   :  { %8905 = vrsqrt.f32 %v7211_v36 }
0x10cc   :  { %v7212_v29 = vadd.f32 1e-05, %v7208_v31 }
0x10ce   :  { %8907 = vrsqrt.f32 %v7212_v29 }
0x10d0   :  { %v8902_v35 = vpop.eup %8901 }
0x10d1   :  { %v7217_v0 = vmul.f32 %v8902_v35, %v10987_v32  ;;  %v7218_v48 = vmul.f32 %v8902_v35, %v10989_v47  ;;  %v7219_v33 = vmul.f32 %v8902_v35, %v10992_v12 }
0x10d3   :  { %v7245_v9 = vmul.f32 %v7233_v52, %v7217_v0  ;;  %v7246_v34 = vmul.f32 %v7237_v21, %v7218_v48  ;;  %v7247_v28 = vmul.f32 %v7241_v8, %v7219_v33 }
0x10d4   :  { %v8904_v17 = vpop.eup %8903 }
0x10d5   :  { %v7273_v39 = vadd.f32 %v7261_v5, %v7245_v9  ;;  %v7274_v63 = vadd.f32 %v7265_v38, %v7246_v34  ;;  %v7275_v6 = vadd.f32 %v7269_v7, %v7247_v28  ;;  %v7220_v51 = vmul.f32 %v8904_v17, %v10998_v59 }
0x10d6   :  { %v7221_v24 = vmul.f32 %v8904_v17, %v11000_v37  ;;  %v7222_v49 = vmul.f32 %v8904_v17, %v11005_v19 }
0x10d7   :  { %7285 = vst [vmem:[%s11048_s10] sm:$0xff] %v7273_v39  ;;  %7286 = vst [vmem:[%s11048_s10 + $0x8] sm:$0xff] %v7274_v63  ;;  %v7248_v32 = vmul.f32 %v7233_v52, %v7220_v51 }
0x10d8   :  { %7287 = vst [vmem:[%s11048_s10 + $0x10] sm:$0xff] %v7275_v6  ;;  %v8906_v47 = vpop.eup %8905  ;;  %v7249_v12 = vmul.f32 %v7237_v21, %v7221_v24  ;;  %v7250_v46 = vmul.f32 %v7241_v8, %v7222_v49 }
0x10d9   :  { %v7276_v10 = vadd.f32 %v7261_v5, %v7248_v32  ;;  %v7223_v22 = vmul.f32 %v8906_v47, %v11011_v13  ;;  %v7224_v2 = vmul.f32 %v8906_v47, %v11013_v26  ;;  %v7225_v59 = vmul.f32 %v8906_v47, %v11018_v20 }
0x10da   :  { %v7277_v37 = vadd.f32 %v7265_v38, %v7249_v12  ;;  %v7278_v14 = vadd.f32 %v7269_v7, %v7250_v46 }
0x10db   :  { %v8908_v3 = vpop.eup %8907  ;;  %7288 = vst [vmem:[%s11048_s10 + $0x18] sm:$0xff] %v7276_v10  ;;  %v7251_v19 = vmul.f32 %v7233_v52, %v7223_v22  ;;  %v7252_v50 = vmul.f32 %v7237_v21, %v7224_v2  ;;  %v7253_v56 = vmul.f32 %v7241_v8, %v7225_v59 }
0x10dc   :  { %7289 = vst [vmem:[%s11048_s10 + $0x20] sm:$0xff] %v7277_v37  ;;  %7290 = vst [vmem:[%s11048_s10 + $0x28] sm:$0xff] %v7278_v14  ;;  %v7226_v57 = vmul.f32 %v8908_v3, %v11024_v42  ;;  %v7227_v13 = vmul.f32 %v8908_v3, %v11026_v41  ;;  %v7228_v26 = vmul.f32 %v8908_v3, %v11031_v40 }
0x10dd   :  { %v7279_v20 = vadd.f32 %v7261_v5, %v7251_v19  ;;  %v7280_v55 = vadd.f32 %v7265_v38, %v7252_v50  ;;  %v7281_v61 = vadd.f32 %v7269_v7, %v7253_v56 }
0x10de   :  { %v7254_v60 = vmul.f32 %v7233_v52, %v7226_v57  ;;  %v7255_v54 = vmul.f32 %v7237_v21, %v7227_v13  ;;  %v7256_v58 = vmul.f32 %v7241_v8, %v7228_v26 }
0x10df   :  { %7291 = vst [vmem:[%s11048_s10 + $0x30] sm:$0xff] %v7279_v20  ;;  %7292 = vst [vmem:[%s11048_s10 + $0x38] sm:$0xff] %v7280_v55 }
0x10e0   :  { %7293 = vst [vmem:[%s11048_s10 + $0x40] sm:$0xff] %v7281_v61  ;;  %v7282_v15 = vadd.f32 %v7261_v5, %v7254_v60  ;;  %v7283_v1 = vadd.f32 %v7265_v38, %v7255_v54  ;;  %v7284_v62 = vadd.f32 %v7269_v7, %v7256_v58 }
0x10e2   :  { %7294 = vst [vmem:[%s11048_s10 + $0x48] sm:$0xff] %v7282_v15  ;;  %7295 = vst [vmem:[%s11048_s10 + $0x50] sm:$0xff] %v7283_v1 }
0x10e3   :  { %7296 = vst [vmem:[%s11048_s10 + $0x58] sm:$0xff] %v7284_v62 }

</bundles_post_ra>
